<compile_context>
chip_gen: v6e
topology: v6e:2x2x1
jax: 0.10.0
libtpu: 0.0.40
codegen_flags: <defaults>
</compile_context>

<pallas_src>
import math
from functools import partial

import jax
import jax.numpy as jnp
from jax.experimental import pallas as pl
from jax.experimental.pallas import tpu as pltpu


# ----------------------------------------------------------------------------
# Fused Pallas kernel: full discriminator forward in a single invocation
# ----------------------------------------------------------------------------
def _fused_discriminator_kernel(x1_ref, x2_ref, b_ref, *refs,
                                n1, n2, nj, split, slope, final_vpu):
    """refs = (w_hbm_0..w_hbm_{L-1}, o_ref, w_vmem_0..w_vmem_{L-1}, sems)."""
    n_layers = n1 + n2 + nj
    w_hbm = refs[:n_layers]
    o_ref = refs[n_layers]
    w_vmem = refs[n_layers + 1: 2 * n_layers + 1]
    sems = refs[2 * n_layers + 1]

    # Issue every weight DMA up-front, in compute order (x1 branch first so
    # the exposed prologue is only the first ~1 MiB weight; the 4 MiB x2-L0
    # weight then streams behind the entire x1-branch compute).
    copies = []
    for i in range(n_layers):
        cp = pltpu.make_async_copy(w_hbm[i], w_vmem[i], sems.at[i])
        cp.start()
        copies.append(cp)

    def bias(i, width):
        # Biases are coalesced into one (L, max_out) f32 array; row i holds
        # layer i's bias in its first `width` lanes.
        return b_ref[i:i + 1, :width]

    def dense(h, i, leaky):
        copies[i].wait()                      # only this layer's weight
        w = w_vmem[i][...]
        y = jnp.dot(h.astype(w.dtype), w,
                    preferred_element_type=jnp.float32) + bias(i, w.shape[1])
        if leaky:
            y = jnp.where(y >= 0.0, y, slope * y)
        return y

    # --- x1 branch (smallest weights: computed & streamed first) -------------
    h1 = x1_ref[...]
    for i in range(n1):
        h1 = dense(h1, i, leaky=True)

    # --- x2 branch ------------------------------------------------------------
    h2 = x2_ref[...]
    for i in range(n1, n1 + n2):
        h2 = dense(h2, i, leaky=True)

    # --- joint head: concat folded into two partial matmuls -------------------
    j0 = n1 + n2
    copies[j0].wait()
    wj_ref = w_vmem[j0]
    wa = wj_ref[:split, :]                    # rows matching the x1 features
    wb = wj_ref[split:, :]                    # rows matching the x2 features
    h = (jnp.dot(h1.astype(wa.dtype), wa, preferred_element_type=jnp.float32)
         + jnp.dot(h2.astype(wb.dtype), wb, preferred_element_type=jnp.float32)
         + bias(j0, wj_ref.shape[1]))
    if nj > 1:                                # guard: no LeakyReLU on logits
        h = jnp.where(h >= 0.0, h, slope * h)

    # Middle joint layers.
    for i in range(j0 + 1, n_layers - 1):
        h = dense(h, i, leaky=True)

    # Final joint layer (no activation).
    if nj > 1:
        last = n_layers - 1
        copies[last].wait()
        wl = w_vmem[last][...]
        if final_vpu:
            # Weight passed transposed, shape (1, in): VPU multiply + XLU lane
            # reduction instead of an N=1 MXU matmul + masked (8,1) store path.
            hv = h.astype(jnp.bfloat16).astype(jnp.float32)
            h = (jnp.sum(hv * wl.astype(jnp.float32), axis=-1, keepdims=True)
                 + bias(last, 1))
        else:
            h = (jnp.dot(h.astype(wl.dtype), wl,
                         preferred_element_type=jnp.float32)
                 + bias(last, wl.shape[1]))

    o_ref[...] = h.astype(o_ref.dtype)


def fused_discriminator_forward(params, x1, x2, *, slope=0.2):
    """Single fused pallas_call for the whole XXDiscriminatorFTFT forward."""
    layers = params["x1"] + params["x2"] + params["joint"]
    n1, n2, nj = len(params["x1"]), len(params["x2"]), len(params["joint"])
    n_layers = n1 + n2 + nj
    split = params["x1"][-1][0].shape[1]           # x1 branch output width
    out_dim = params["joint"][-1][0].shape[1]
    batch = x1.shape[0]

    # Final 512->1 layer goes through the VPU; pass its weight lane-dense.
    final_vpu = (nj >= 2 and out_dim == 1)
    ws = [w for (w, _) in layers]
    if final_vpu:
        ws[-1] = ws[-1].T                           # (out, in) == (1, 512)

    # Coalesce the 11 tiny bias vectors into one (L, max_out) f32 input
    # (one DMA instead of 11 sub-2KiB descriptor setups).
    max_out = max(w.shape[1] for (w, _) in layers)
    b_packed = jnp.zeros((n_layers, max_out), jnp.float32)
    for i, (_, b) in enumerate(layers):
        b_packed = b_packed.at[i, :b.shape[0]].set(b)

    vmem = pl.BlockSpec(memory_space=pltpu.MemorySpace.VMEM)
    hbm = pl.BlockSpec(memory_space=pl.ANY)         # weights stay in HBM

    kernel = partial(_fused_discriminator_kernel,
                     n1=n1, n2=n2, nj=nj, split=split, slope=slope,
                     final_vpu=final_vpu)

    scratch = [pltpu.VMEM(w.shape, w.dtype) for w in ws]      # per-layer bufs
    scratch.append(pltpu.SemaphoreType.DMA((n_layers,)))      # one sem / copy

    return pl.pallas_call(
        kernel,
        out_shape=jax.ShapeDtypeStruct((batch, out_dim), jnp.float32),
        in_specs=[vmem, vmem, vmem] + [hbm] * n_layers,
        out_specs=vmem,
        scratch_shapes=scratch,
        compiler_params=pltpu.CompilerParams(vmem_limit_bytes=16 << 20),
    )(x1.astype(jnp.bfloat16), x2.astype(jnp.bfloat16), b_packed, *ws)


# ----------------------------------------------------------------------------
# Parameter construction (deterministic, PyTorch-like init + spectral norm)
# ----------------------------------------------------------------------------
def _spectral_normalize(w, n_iters=30):
    """Divide w (shape [in, out]) by its top singular value (power iteration).

    NOTE: the PyTorch module applies one power-iteration step per forward with
    persistent u; here the reparameterisation is applied once at build time.
    """
    v = jnp.ones((w.shape[1],), w.dtype) / math.sqrt(w.shape[1])

    def body(_, v):
        u = w @ v
        u = u / (jnp.linalg.norm(u) + 1e-12)
        v = w.T @ u
        v = v / (jnp.linalg.norm(v) + 1e-12)
        return v

    v = jax.lax.fori_loop(0, n_iters, body, v)
    u = w @ v
    sigma = jnp.linalg.norm(u) + 1e-12
    return w / sigma


def _init_linear(key, fan_in, fan_out, spectral_norm, w_dtype=jnp.bfloat16):
    kw, kb = jax.random.split(key)
    bound = 1.0 / math.sqrt(fan_in)
    w = jax.random.uniform(kw, (fan_in, fan_out), jnp.float32, -bound, bound)
    b = jax.random.uniform(kb, (fan_out,), jnp.float32, -bound, bound)
    if spectral_norm:
        w = _spectral_normalize(w)
    # Weights stored bf16 (halves HBM traffic of this weight-streaming-bound
    # net); bias kept f32.
    return w.astype(w_dtype), b


def build_params(key, channels1=1024, channels2=2048, output_dim=1,
                 spectral_norm=True):
    dims_x1 = [channels1, channels1 // 2, channels1 // 4,
               channels1 // 8, channels1 // 8]
    dims_x2 = [channels2, channels2 // 2, channels2 // 4,
               channels2 // 8, channels2 // 8]
    # NOTE: the PyTorch module hard-codes the joint input as 128 + 256, which
    # matches channels1 // 8 + channels2 // 8 for the default sizes.
    dims_joint = [channels1 // 8 + channels2 // 8, 512, 512, output_dim]

    params = {"x1": [], "x2": [], "joint": []}
    for name, dims in (("x1", dims_x1), ("x2", dims_x2), ("joint", dims_joint)):
        for i in range(len(dims) - 1):
            key, sub = jax.random.split(key)
            params[name].append(
                _init_linear(sub, dims[i], dims[i + 1], spectral_norm))
    return params


# ----------------------------------------------------------------------------
# Pure-JAX reference (same bf16-weight / f32-accumulate math as the kernel)
# ----------------------------------------------------------------------------
def forward_reference(params, x1, x2, slope=0.2):
    def dense(h, w, b, leaky):
        y = jnp.dot(h.astype(w.dtype), w,
                    preferred_element_type=jnp.float32) + b
        return jnp.where(y >= 0.0, y, slope * y) if leaky else y

    h1 = x1
    for w, b in params["x1"]:
        h1 = dense(h1, w, b, True)
    h2 = x2
    for w, b in params["x2"]:
        h2 = dense(h2, w, b, True)
    h = jnp.concatenate([h1, h2], axis=1)
    n = len(params["joint"])
    for i, (w, b) in enumerate(params["joint"]):
        h = dense(h, w, b, i < n - 1)
    return h


# ----------------------------------------------------------------------------
if __name__ == "__main__":
    channels1, channels2, output_dim = 1024, 2048, 1
    batch = 8  # small batch; feature widths are fixed by the module (the joint
               # head hard-codes 128 + 256 = channels1 // 8 + channels2 // 8)

    key = jax.random.PRNGKey(0)
    kp, k1, k2 = jax.random.split(key, 3)

    params = build_params(kp, channels1, channels2, output_dim,
                          spectral_norm=True)
    x1 = jax.random.normal(k1, (batch, channels1), jnp.float32)
    x2 = jax.random.normal(k2, (batch, channels2), jnp.float32)

    out = jax.block_until_ready(fused_discriminator_forward(params, x1, x2))
    assert out.shape == (batch, output_dim), out.shape

    ref = jax.block_until_ready(forward_reference(params, x1, x2))
    assert jnp.allclose(out, ref, rtol=1e-2, atol=1e-2), (
        float(jnp.max(jnp.abs(out - ref))))

    print("KERNEL_OK")
</pallas_src>

<mosaic_0001>
module attributes {stable_mosaic.version = 11 : i64} {
  func.func @_fused_discriminator_kernel(%arg0: memref<8x1024xbf16, #tpu.memory_space<vmem>>, %arg1: memref<8x2048xbf16, #tpu.memory_space<vmem>>, %arg2: memref<11x1024xf32, #tpu.memory_space<vmem>>, %arg3: memref<1024x512xbf16, #tpu.memory_space<any>>, %arg4: memref<512x256xbf16, #tpu.memory_space<any>>, %arg5: memref<256x128xbf16, #tpu.memory_space<any>>, %arg6: memref<128x128xbf16, #tpu.memory_space<any>>, %arg7: memref<2048x1024xbf16, #tpu.memory_space<any>>, %arg8: memref<1024x512xbf16, #tpu.memory_space<any>>, %arg9: memref<512x256xbf16, #tpu.memory_space<any>>, %arg10: memref<256x256xbf16, #tpu.memory_space<any>>, %arg11: memref<384x512xbf16, #tpu.memory_space<any>>, %arg12: memref<512x512xbf16, #tpu.memory_space<any>>, %arg13: memref<1x512xbf16, #tpu.memory_space<any>>, %arg14: memref<8x1xf32, #tpu.memory_space<vmem>>, %arg15: memref<1024x512xbf16, #tpu.memory_space<vmem>>, %arg16: memref<512x256xbf16, #tpu.memory_space<vmem>>, %arg17: memref<256x128xbf16, #tpu.memory_space<vmem>>, %arg18: memref<128x128xbf16, #tpu.memory_space<vmem>>, %arg19: memref<2048x1024xbf16, #tpu.memory_space<vmem>>, %arg20: memref<1024x512xbf16, #tpu.memory_space<vmem>>, %arg21: memref<512x256xbf16, #tpu.memory_space<vmem>>, %arg22: memref<256x256xbf16, #tpu.memory_space<vmem>>, %arg23: memref<384x512xbf16, #tpu.memory_space<vmem>>, %arg24: memref<512x512xbf16, #tpu.memory_space<vmem>>, %arg25: memref<1x512xbf16, #tpu.memory_space<vmem>>, %arg26: memref<11x!tpu.dma_semaphore, #tpu.memory_space<semaphore_mem>>) attributes {dimension_semantics = [], scalar_prefetch = 0 : i64, scratch_operands = 12 : i64, tpu.core_type = #tpu.core_type<tc>} {
    %c0_i32 = arith.constant 0 : i32
    %0 = tpu.memref_slice %arg26[%c0_i32] : memref<11x!tpu.dma_semaphore, #tpu.memory_space<semaphore_mem>> -> memref<1x!tpu.dma_semaphore, #tpu.memory_space<semaphore_mem>>
    %1 = tpu.memref_squeeze %0 : memref<1x!tpu.dma_semaphore, #tpu.memory_space<semaphore_mem>> -> memref<!tpu.dma_semaphore, #tpu.memory_space<semaphore_mem>>
    tpu.enqueue_dma source(%arg3 : memref<1024x512xbf16, #tpu.memory_space<any>>) target(%arg15 : memref<1024x512xbf16, #tpu.memory_space<vmem>>) target_semaphore(%1 : memref<!tpu.dma_semaphore, #tpu.memory_space<semaphore_mem>>)
    %c1_i32 = arith.constant 1 : i32
    %2 = tpu.memref_slice %arg26[%c1_i32] : memref<11x!tpu.dma_semaphore, #tpu.memory_space<semaphore_mem>> -> memref<1x!tpu.dma_semaphore, #tpu.memory_space<semaphore_mem>>
    %3 = tpu.memref_squeeze %2 : memref<1x!tpu.dma_semaphore, #tpu.memory_space<semaphore_mem>> -> memref<!tpu.dma_semaphore, #tpu.memory_space<semaphore_mem>>
    tpu.enqueue_dma source(%arg4 : memref<512x256xbf16, #tpu.memory_space<any>>) target(%arg16 : memref<512x256xbf16, #tpu.memory_space<vmem>>) target_semaphore(%3 : memref<!tpu.dma_semaphore, #tpu.memory_space<semaphore_mem>>)
    %c2_i32 = arith.constant 2 : i32
    %4 = tpu.memref_slice %arg26[%c2_i32] : memref<11x!tpu.dma_semaphore, #tpu.memory_space<semaphore_mem>> -> memref<1x!tpu.dma_semaphore, #tpu.memory_space<semaphore_mem>>
    %5 = tpu.memref_squeeze %4 : memref<1x!tpu.dma_semaphore, #tpu.memory_space<semaphore_mem>> -> memref<!tpu.dma_semaphore, #tpu.memory_space<semaphore_mem>>
    tpu.enqueue_dma source(%arg5 : memref<256x128xbf16, #tpu.memory_space<any>>) target(%arg17 : memref<256x128xbf16, #tpu.memory_space<vmem>>) target_semaphore(%5 : memref<!tpu.dma_semaphore, #tpu.memory_space<semaphore_mem>>)
    %c3_i32 = arith.constant 3 : i32
    %6 = tpu.memref_slice %arg26[%c3_i32] : memref<11x!tpu.dma_semaphore, #tpu.memory_space<semaphore_mem>> -> memref<1x!tpu.dma_semaphore, #tpu.memory_space<semaphore_mem>>
    %7 = tpu.memref_squeeze %6 : memref<1x!tpu.dma_semaphore, #tpu.memory_space<semaphore_mem>> -> memref<!tpu.dma_semaphore, #tpu.memory_space<semaphore_mem>>
    tpu.enqueue_dma source(%arg6 : memref<128x128xbf16, #tpu.memory_space<any>>) target(%arg18 : memref<128x128xbf16, #tpu.memory_space<vmem>>) target_semaphore(%7 : memref<!tpu.dma_semaphore, #tpu.memory_space<semaphore_mem>>)
    %c4_i32 = arith.constant 4 : i32
    %8 = tpu.memref_slice %arg26[%c4_i32] : memref<11x!tpu.dma_semaphore, #tpu.memory_space<semaphore_mem>> -> memref<1x!tpu.dma_semaphore, #tpu.memory_space<semaphore_mem>>
    %9 = tpu.memref_squeeze %8 : memref<1x!tpu.dma_semaphore, #tpu.memory_space<semaphore_mem>> -> memref<!tpu.dma_semaphore, #tpu.memory_space<semaphore_mem>>
    tpu.enqueue_dma source(%arg7 : memref<2048x1024xbf16, #tpu.memory_space<any>>) target(%arg19 : memref<2048x1024xbf16, #tpu.memory_space<vmem>>) target_semaphore(%9 : memref<!tpu.dma_semaphore, #tpu.memory_space<semaphore_mem>>)
    %c5_i32 = arith.constant 5 : i32
    %10 = tpu.memref_slice %arg26[%c5_i32] : memref<11x!tpu.dma_semaphore, #tpu.memory_space<semaphore_mem>> -> memref<1x!tpu.dma_semaphore, #tpu.memory_space<semaphore_mem>>
    %11 = tpu.memref_squeeze %10 : memref<1x!tpu.dma_semaphore, #tpu.memory_space<semaphore_mem>> -> memref<!tpu.dma_semaphore, #tpu.memory_space<semaphore_mem>>
    tpu.enqueue_dma source(%arg8 : memref<1024x512xbf16, #tpu.memory_space<any>>) target(%arg20 : memref<1024x512xbf16, #tpu.memory_space<vmem>>) target_semaphore(%11 : memref<!tpu.dma_semaphore, #tpu.memory_space<semaphore_mem>>)
    %c6_i32 = arith.constant 6 : i32
    %12 = tpu.memref_slice %arg26[%c6_i32] : memref<11x!tpu.dma_semaphore, #tpu.memory_space<semaphore_mem>> -> memref<1x!tpu.dma_semaphore, #tpu.memory_space<semaphore_mem>>
    %13 = tpu.memref_squeeze %12 : memref<1x!tpu.dma_semaphore, #tpu.memory_space<semaphore_mem>> -> memref<!tpu.dma_semaphore, #tpu.memory_space<semaphore_mem>>
    tpu.enqueue_dma source(%arg9 : memref<512x256xbf16, #tpu.memory_space<any>>) target(%arg21 : memref<512x256xbf16, #tpu.memory_space<vmem>>) target_semaphore(%13 : memref<!tpu.dma_semaphore, #tpu.memory_space<semaphore_mem>>)
    %c7_i32 = arith.constant 7 : i32
    %14 = tpu.memref_slice %arg26[%c7_i32] : memref<11x!tpu.dma_semaphore, #tpu.memory_space<semaphore_mem>> -> memref<1x!tpu.dma_semaphore, #tpu.memory_space<semaphore_mem>>
    %15 = tpu.memref_squeeze %14 : memref<1x!tpu.dma_semaphore, #tpu.memory_space<semaphore_mem>> -> memref<!tpu.dma_semaphore, #tpu.memory_space<semaphore_mem>>
    tpu.enqueue_dma source(%arg10 : memref<256x256xbf16, #tpu.memory_space<any>>) target(%arg22 : memref<256x256xbf16, #tpu.memory_space<vmem>>) target_semaphore(%15 : memref<!tpu.dma_semaphore, #tpu.memory_space<semaphore_mem>>)
    %c8_i32 = arith.constant 8 : i32
    %16 = tpu.memref_slice %arg26[%c8_i32] : memref<11x!tpu.dma_semaphore, #tpu.memory_space<semaphore_mem>> -> memref<1x!tpu.dma_semaphore, #tpu.memory_space<semaphore_mem>>
    %17 = tpu.memref_squeeze %16 : memref<1x!tpu.dma_semaphore, #tpu.memory_space<semaphore_mem>> -> memref<!tpu.dma_semaphore, #tpu.memory_space<semaphore_mem>>
    tpu.enqueue_dma source(%arg11 : memref<384x512xbf16, #tpu.memory_space<any>>) target(%arg23 : memref<384x512xbf16, #tpu.memory_space<vmem>>) target_semaphore(%17 : memref<!tpu.dma_semaphore, #tpu.memory_space<semaphore_mem>>)
    %c9_i32 = arith.constant 9 : i32
    %18 = tpu.memref_slice %arg26[%c9_i32] : memref<11x!tpu.dma_semaphore, #tpu.memory_space<semaphore_mem>> -> memref<1x!tpu.dma_semaphore, #tpu.memory_space<semaphore_mem>>
    %19 = tpu.memref_squeeze %18 : memref<1x!tpu.dma_semaphore, #tpu.memory_space<semaphore_mem>> -> memref<!tpu.dma_semaphore, #tpu.memory_space<semaphore_mem>>
    tpu.enqueue_dma source(%arg12 : memref<512x512xbf16, #tpu.memory_space<any>>) target(%arg24 : memref<512x512xbf16, #tpu.memory_space<vmem>>) target_semaphore(%19 : memref<!tpu.dma_semaphore, #tpu.memory_space<semaphore_mem>>)
    %c10_i32 = arith.constant 10 : i32
    %20 = tpu.memref_slice %arg26[%c10_i32] : memref<11x!tpu.dma_semaphore, #tpu.memory_space<semaphore_mem>> -> memref<1x!tpu.dma_semaphore, #tpu.memory_space<semaphore_mem>>
    %21 = tpu.memref_squeeze %20 : memref<1x!tpu.dma_semaphore, #tpu.memory_space<semaphore_mem>> -> memref<!tpu.dma_semaphore, #tpu.memory_space<semaphore_mem>>
    tpu.enqueue_dma source(%arg13 : memref<1x512xbf16, #tpu.memory_space<any>>) target(%arg25 : memref<1x512xbf16, #tpu.memory_space<vmem>>) target_semaphore(%21 : memref<!tpu.dma_semaphore, #tpu.memory_space<semaphore_mem>>)
    %c0 = arith.constant 0 : index
    %c0_0 = arith.constant 0 : index
    %22 = vector.load %arg0[%c0, %c0_0] : memref<8x1024xbf16, #tpu.memory_space<vmem>>, vector<8x1024xbf16>
    %c0_i32_1 = arith.constant 0 : i32
    %23 = tpu.memref_slice %arg26[%c0_i32_1] : memref<11x!tpu.dma_semaphore, #tpu.memory_space<semaphore_mem>> -> memref<1x!tpu.dma_semaphore, #tpu.memory_space<semaphore_mem>>
    %24 = tpu.memref_squeeze %23 : memref<1x!tpu.dma_semaphore, #tpu.memory_space<semaphore_mem>> -> memref<!tpu.dma_semaphore, #tpu.memory_space<semaphore_mem>>
    tpu.wait_dma2 semaphore(%24 : memref<!tpu.dma_semaphore, #tpu.memory_space<semaphore_mem>>) src(%arg3 : memref<1024x512xbf16, #tpu.memory_space<any>>) dst(%arg15 : memref<1024x512xbf16, #tpu.memory_space<vmem>>)
    %c0_2 = arith.constant 0 : index
    %c0_3 = arith.constant 0 : index
    %25 = vector.load %arg15[%c0_2, %c0_3] : memref<1024x512xbf16, #tpu.memory_space<vmem>>, vector<1024x512xbf16>
    %cst = arith.constant dense<0.000000e+00> : vector<8x512xf32>
    %26 = tpu.matmul %22, %25, %cst {dimension_numbers = #tpu.dot_dimension_numbers<[1], [0], [0], [1], [0, 0, 1, 1], [], []>} : vector<8x1024xbf16>, vector<1024x512xbf16>, vector<8x512xf32> -> vector<8x512xf32>
    %c0_4 = arith.constant 0 : index
    %c0_5 = arith.constant 0 : index
    %27 = vector.load %arg2[%c0_4, %c0_5] : memref<11x1024xf32, #tpu.memory_space<vmem>>, vector<1x512xf32>
    %28 = vector.broadcast %27 : vector<1x512xf32> to vector<8x512xf32>
    %29 = arith.addf %26, %28 : vector<8x512xf32>
    %cst_6 = arith.constant 0.000000e+00 : f32
    %30 = vector.broadcast %cst_6 : f32 to vector<8x512xf32>
    %31 = arith.cmpf oge, %29, %30 : vector<8x512xf32>
    %cst_7 = arith.constant 2.000000e-01 : f32
    %32 = vector.broadcast %cst_7 : f32 to vector<8x512xf32>
    %33 = arith.mulf %32, %29 : vector<8x512xf32>
    %34 = arith.select %31, %29, %33 : vector<8x512xi1>, vector<8x512xf32>
    %c1_i32_8 = arith.constant 1 : i32
    %35 = tpu.memref_slice %arg26[%c1_i32_8] : memref<11x!tpu.dma_semaphore, #tpu.memory_space<semaphore_mem>> -> memref<1x!tpu.dma_semaphore, #tpu.memory_space<semaphore_mem>>
    %36 = tpu.memref_squeeze %35 : memref<1x!tpu.dma_semaphore, #tpu.memory_space<semaphore_mem>> -> memref<!tpu.dma_semaphore, #tpu.memory_space<semaphore_mem>>
    tpu.wait_dma2 semaphore(%36 : memref<!tpu.dma_semaphore, #tpu.memory_space<semaphore_mem>>) src(%arg4 : memref<512x256xbf16, #tpu.memory_space<any>>) dst(%arg16 : memref<512x256xbf16, #tpu.memory_space<vmem>>)
    %c0_9 = arith.constant 0 : index
    %c0_10 = arith.constant 0 : index
    %37 = vector.load %arg16[%c0_9, %c0_10] : memref<512x256xbf16, #tpu.memory_space<vmem>>, vector<512x256xbf16>
    %38 = arith.truncf %34 : vector<8x512xf32> to vector<8x512xbf16>
    %cst_11 = arith.constant dense<0.000000e+00> : vector<8x256xf32>
    %39 = tpu.matmul %38, %37, %cst_11 {dimension_numbers = #tpu.dot_dimension_numbers<[1], [0], [0], [1], [0, 0, 1, 1], [], []>} : vector<8x512xbf16>, vector<512x256xbf16>, vector<8x256xf32> -> vector<8x256xf32>
    %c1 = arith.constant 1 : index
    %c0_12 = arith.constant 0 : index
    %40 = vector.load %arg2[%c1, %c0_12] : memref<11x1024xf32, #tpu.memory_space<vmem>>, vector<1x256xf32>
    %41 = vector.broadcast %40 : vector<1x256xf32> to vector<8x256xf32>
    %42 = arith.addf %39, %41 : vector<8x256xf32>
    %cst_13 = arith.constant 0.000000e+00 : f32
    %43 = vector.broadcast %cst_13 : f32 to vector<8x256xf32>
    %44 = arith.cmpf oge, %42, %43 : vector<8x256xf32>
    %cst_14 = arith.constant 2.000000e-01 : f32
    %45 = vector.broadcast %cst_14 : f32 to vector<8x256xf32>
    %46 = arith.mulf %45, %42 : vector<8x256xf32>
    %47 = arith.select %44, %42, %46 : vector<8x256xi1>, vector<8x256xf32>
    %c2_i32_15 = arith.constant 2 : i32
    %48 = tpu.memref_slice %arg26[%c2_i32_15] : memref<11x!tpu.dma_semaphore, #tpu.memory_space<semaphore_mem>> -> memref<1x!tpu.dma_semaphore, #tpu.memory_space<semaphore_mem>>
    %49 = tpu.memref_squeeze %48 : memref<1x!tpu.dma_semaphore, #tpu.memory_space<semaphore_mem>> -> memref<!tpu.dma_semaphore, #tpu.memory_space<semaphore_mem>>
    tpu.wait_dma2 semaphore(%49 : memref<!tpu.dma_semaphore, #tpu.memory_space<semaphore_mem>>) src(%arg5 : memref<256x128xbf16, #tpu.memory_space<any>>) dst(%arg17 : memref<256x128xbf16, #tpu.memory_space<vmem>>)
    %c0_16 = arith.constant 0 : index
    %c0_17 = arith.constant 0 : index
    %50 = vector.load %arg17[%c0_16, %c0_17] : memref<256x128xbf16, #tpu.memory_space<vmem>>, vector<256x128xbf16>
    %51 = arith.truncf %47 : vector<8x256xf32> to vector<8x256xbf16>
    %cst_18 = arith.constant dense<0.000000e+00> : vector<8x128xf32>
    %52 = tpu.matmul %51, %50, %cst_18 {dimension_numbers = #tpu.dot_dimension_numbers<[1], [0], [0], [1], [0, 0, 1, 1], [], []>} : vector<8x256xbf16>, vector<256x128xbf16>, vector<8x128xf32> -> vector<8x128xf32>
    %c2 = arith.constant 2 : index
    %c0_19 = arith.constant 0 : index
    %53 = vector.load %arg2[%c2, %c0_19] : memref<11x1024xf32, #tpu.memory_space<vmem>>, vector<1x128xf32>
    %54 = vector.broadcast %53 : vector<1x128xf32> to vector<8x128xf32>
    %55 = arith.addf %52, %54 : vector<8x128xf32>
    %cst_20 = arith.constant 0.000000e+00 : f32
    %56 = vector.broadcast %cst_20 : f32 to vector<8x128xf32>
    %57 = arith.cmpf oge, %55, %56 : vector<8x128xf32>
    %cst_21 = arith.constant 2.000000e-01 : f32
    %58 = vector.broadcast %cst_21 : f32 to vector<8x128xf32>
    %59 = arith.mulf %58, %55 : vector<8x128xf32>
    %60 = arith.select %57, %55, %59 : vector<8x128xi1>, vector<8x128xf32>
    %c3_i32_22 = arith.constant 3 : i32
    %61 = tpu.memref_slice %arg26[%c3_i32_22] : memref<11x!tpu.dma_semaphore, #tpu.memory_space<semaphore_mem>> -> memref<1x!tpu.dma_semaphore, #tpu.memory_space<semaphore_mem>>
    %62 = tpu.memref_squeeze %61 : memref<1x!tpu.dma_semaphore, #tpu.memory_space<semaphore_mem>> -> memref<!tpu.dma_semaphore, #tpu.memory_space<semaphore_mem>>
    tpu.wait_dma2 semaphore(%62 : memref<!tpu.dma_semaphore, #tpu.memory_space<semaphore_mem>>) src(%arg6 : memref<128x128xbf16, #tpu.memory_space<any>>) dst(%arg18 : memref<128x128xbf16, #tpu.memory_space<vmem>>)
    %c0_23 = arith.constant 0 : index
    %c0_24 = arith.constant 0 : index
    %63 = vector.load %arg18[%c0_23, %c0_24] : memref<128x128xbf16, #tpu.memory_space<vmem>>, vector<128x128xbf16>
    %64 = arith.truncf %60 : vector<8x128xf32> to vector<8x128xbf16>
    %cst_25 = arith.constant dense<0.000000e+00> : vector<8x128xf32>
    %65 = tpu.matmul %64, %63, %cst_25 {dimension_numbers = #tpu.dot_dimension_numbers<[1], [0], [0], [1], [0, 0, 1, 1], [], []>} : vector<8x128xbf16>, vector<128x128xbf16>, vector<8x128xf32> -> vector<8x128xf32>
    %c3 = arith.constant 3 : index
    %c0_26 = arith.constant 0 : index
    %66 = vector.load %arg2[%c3, %c0_26] : memref<11x1024xf32, #tpu.memory_space<vmem>>, vector<1x128xf32>
    %67 = vector.broadcast %66 : vector<1x128xf32> to vector<8x128xf32>
    %68 = arith.addf %65, %67 : vector<8x128xf32>
    %cst_27 = arith.constant 0.000000e+00 : f32
    %69 = vector.broadcast %cst_27 : f32 to vector<8x128xf32>
    %70 = arith.cmpf oge, %68, %69 : vector<8x128xf32>
    %cst_28 = arith.constant 2.000000e-01 : f32
    %71 = vector.broadcast %cst_28 : f32 to vector<8x128xf32>
    %72 = arith.mulf %71, %68 : vector<8x128xf32>
    %73 = arith.select %70, %68, %72 : vector<8x128xi1>, vector<8x128xf32>
    %c0_29 = arith.constant 0 : index
    %c0_30 = arith.constant 0 : index
    %74 = vector.load %arg1[%c0_29, %c0_30] : memref<8x2048xbf16, #tpu.memory_space<vmem>>, vector<8x2048xbf16>
    %c4_i32_31 = arith.constant 4 : i32
    %75 = tpu.memref_slice %arg26[%c4_i32_31] : memref<11x!tpu.dma_semaphore, #tpu.memory_space<semaphore_mem>> -> memref<1x!tpu.dma_semaphore, #tpu.memory_space<semaphore_mem>>
    %76 = tpu.memref_squeeze %75 : memref<1x!tpu.dma_semaphore, #tpu.memory_space<semaphore_mem>> -> memref<!tpu.dma_semaphore, #tpu.memory_space<semaphore_mem>>
    tpu.wait_dma2 semaphore(%76 : memref<!tpu.dma_semaphore, #tpu.memory_space<semaphore_mem>>) src(%arg7 : memref<2048x1024xbf16, #tpu.memory_space<any>>) dst(%arg19 : memref<2048x1024xbf16, #tpu.memory_space<vmem>>)
    %c0_32 = arith.constant 0 : index
    %c0_33 = arith.constant 0 : index
    %77 = vector.load %arg19[%c0_32, %c0_33] : memref<2048x1024xbf16, #tpu.memory_space<vmem>>, vector<2048x1024xbf16>
    %cst_34 = arith.constant dense<0.000000e+00> : vector<8x1024xf32>
    %78 = tpu.matmul %74, %77, %cst_34 {dimension_numbers = #tpu.dot_dimension_numbers<[1], [0], [0], [1], [0, 0, 1, 1], [], []>} : vector<8x2048xbf16>, vector<2048x1024xbf16>, vector<8x1024xf32> -> vector<8x1024xf32>
    %c4 = arith.constant 4 : index
    %c0_35 = arith.constant 0 : index
    %79 = vector.load %arg2[%c4, %c0_35] : memref<11x1024xf32, #tpu.memory_space<vmem>>, vector<1x1024xf32>
    %80 = vector.broadcast %79 : vector<1x1024xf32> to vector<8x1024xf32>
    %81 = arith.addf %78, %80 : vector<8x1024xf32>
    %cst_36 = arith.constant 0.000000e+00 : f32
    %82 = vector.broadcast %cst_36 : f32 to vector<8x1024xf32>
    %83 = arith.cmpf oge, %81, %82 : vector<8x1024xf32>
    %cst_37 = arith.constant 2.000000e-01 : f32
    %84 = vector.broadcast %cst_37 : f32 to vector<8x1024xf32>
    %85 = arith.mulf %84, %81 : vector<8x1024xf32>
    %86 = arith.select %83, %81, %85 : vector<8x1024xi1>, vector<8x1024xf32>
    %c5_i32_38 = arith.constant 5 : i32
    %87 = tpu.memref_slice %arg26[%c5_i32_38] : memref<11x!tpu.dma_semaphore, #tpu.memory_space<semaphore_mem>> -> memref<1x!tpu.dma_semaphore, #tpu.memory_space<semaphore_mem>>
    %88 = tpu.memref_squeeze %87 : memref<1x!tpu.dma_semaphore, #tpu.memory_space<semaphore_mem>> -> memref<!tpu.dma_semaphore, #tpu.memory_space<semaphore_mem>>
    tpu.wait_dma2 semaphore(%88 : memref<!tpu.dma_semaphore, #tpu.memory_space<semaphore_mem>>) src(%arg8 : memref<1024x512xbf16, #tpu.memory_space<any>>) dst(%arg20 : memref<1024x512xbf16, #tpu.memory_space<vmem>>)
    %c0_39 = arith.constant 0 : index
    %c0_40 = arith.constant 0 : index
    %89 = vector.load %arg20[%c0_39, %c0_40] : memref<1024x512xbf16, #tpu.memory_space<vmem>>, vector<1024x512xbf16>
    %90 = arith.truncf %86 : vector<8x1024xf32> to vector<8x1024xbf16>
    %cst_41 = arith.constant dense<0.000000e+00> : vector<8x512xf32>
    %91 = tpu.matmul %90, %89, %cst_41 {dimension_numbers = #tpu.dot_dimension_numbers<[1], [0], [0], [1], [0, 0, 1, 1], [], []>} : vector<8x1024xbf16>, vector<1024x512xbf16>, vector<8x512xf32> -> vector<8x512xf32>
    %c5 = arith.constant 5 : index
    %c0_42 = arith.constant 0 : index
    %92 = vector.load %arg2[%c5, %c0_42] : memref<11x1024xf32, #tpu.memory_space<vmem>>, vector<1x512xf32>
    %93 = vector.broadcast %92 : vector<1x512xf32> to vector<8x512xf32>
    %94 = arith.addf %91, %93 : vector<8x512xf32>
    %cst_43 = arith.constant 0.000000e+00 : f32
    %95 = vector.broadcast %cst_43 : f32 to vector<8x512xf32>
    %96 = arith.cmpf oge, %94, %95 : vector<8x512xf32>
    %cst_44 = arith.constant 2.000000e-01 : f32
    %97 = vector.broadcast %cst_44 : f32 to vector<8x512xf32>
    %98 = arith.mulf %97, %94 : vector<8x512xf32>
    %99 = arith.select %96, %94, %98 : vector<8x512xi1>, vector<8x512xf32>
    %c6_i32_45 = arith.constant 6 : i32
    %100 = tpu.memref_slice %arg26[%c6_i32_45] : memref<11x!tpu.dma_semaphore, #tpu.memory_space<semaphore_mem>> -> memref<1x!tpu.dma_semaphore, #tpu.memory_space<semaphore_mem>>
    %101 = tpu.memref_squeeze %100 : memref<1x!tpu.dma_semaphore, #tpu.memory_space<semaphore_mem>> -> memref<!tpu.dma_semaphore, #tpu.memory_space<semaphore_mem>>
    tpu.wait_dma2 semaphore(%101 : memref<!tpu.dma_semaphore, #tpu.memory_space<semaphore_mem>>) src(%arg9 : memref<512x256xbf16, #tpu.memory_space<any>>) dst(%arg21 : memref<512x256xbf16, #tpu.memory_space<vmem>>)
    %c0_46 = arith.constant 0 : index
    %c0_47 = arith.constant 0 : index
    %102 = vector.load %arg21[%c0_46, %c0_47] : memref<512x256xbf16, #tpu.memory_space<vmem>>, vector<512x256xbf16>
    %103 = arith.truncf %99 : vector<8x512xf32> to vector<8x512xbf16>
    %cst_48 = arith.constant dense<0.000000e+00> : vector<8x256xf32>
    %104 = tpu.matmul %103, %102, %cst_48 {dimension_numbers = #tpu.dot_dimension_numbers<[1], [0], [0], [1], [0, 0, 1, 1], [], []>} : vector<8x512xbf16>, vector<512x256xbf16>, vector<8x256xf32> -> vector<8x256xf32>
    %c6 = arith.constant 6 : index
    %c0_49 = arith.constant 0 : index
    %105 = vector.load %arg2[%c6, %c0_49] : memref<11x1024xf32, #tpu.memory_space<vmem>>, vector<1x256xf32>
    %106 = vector.broadcast %105 : vector<1x256xf32> to vector<8x256xf32>
    %107 = arith.addf %104, %106 : vector<8x256xf32>
    %cst_50 = arith.constant 0.000000e+00 : f32
    %108 = vector.broadcast %cst_50 : f32 to vector<8x256xf32>
    %109 = arith.cmpf oge, %107, %108 : vector<8x256xf32>
    %cst_51 = arith.constant 2.000000e-01 : f32
    %110 = vector.broadcast %cst_51 : f32 to vector<8x256xf32>
    %111 = arith.mulf %110, %107 : vector<8x256xf32>
    %112 = arith.select %109, %107, %111 : vector<8x256xi1>, vector<8x256xf32>
    %c7_i32_52 = arith.constant 7 : i32
    %113 = tpu.memref_slice %arg26[%c7_i32_52] : memref<11x!tpu.dma_semaphore, #tpu.memory_space<semaphore_mem>> -> memref<1x!tpu.dma_semaphore, #tpu.memory_space<semaphore_mem>>
    %114 = tpu.memref_squeeze %113 : memref<1x!tpu.dma_semaphore, #tpu.memory_space<semaphore_mem>> -> memref<!tpu.dma_semaphore, #tpu.memory_space<semaphore_mem>>
    tpu.wait_dma2 semaphore(%114 : memref<!tpu.dma_semaphore, #tpu.memory_space<semaphore_mem>>) src(%arg10 : memref<256x256xbf16, #tpu.memory_space<any>>) dst(%arg22 : memref<256x256xbf16, #tpu.memory_space<vmem>>)
    %c0_53 = arith.constant 0 : index
    %c0_54 = arith.constant 0 : index
    %115 = vector.load %arg22[%c0_53, %c0_54] : memref<256x256xbf16, #tpu.memory_space<vmem>>, vector<256x256xbf16>
    %116 = arith.truncf %112 : vector<8x256xf32> to vector<8x256xbf16>
    %cst_55 = arith.constant dense<0.000000e+00> : vector<8x256xf32>
    %117 = tpu.matmul %116, %115, %cst_55 {dimension_numbers = #tpu.dot_dimension_numbers<[1], [0], [0], [1], [0, 0, 1, 1], [], []>} : vector<8x256xbf16>, vector<256x256xbf16>, vector<8x256xf32> -> vector<8x256xf32>
    %c7 = arith.constant 7 : index
    %c0_56 = arith.constant 0 : index
    %118 = vector.load %arg2[%c7, %c0_56] : memref<11x1024xf32, #tpu.memory_space<vmem>>, vector<1x256xf32>
    %119 = vector.broadcast %118 : vector<1x256xf32> to vector<8x256xf32>
    %120 = arith.addf %117, %119 : vector<8x256xf32>
    %cst_57 = arith.constant 0.000000e+00 : f32
    %121 = vector.broadcast %cst_57 : f32 to vector<8x256xf32>
    %122 = arith.cmpf oge, %120, %121 : vector<8x256xf32>
    %cst_58 = arith.constant 2.000000e-01 : f32
    %123 = vector.broadcast %cst_58 : f32 to vector<8x256xf32>
    %124 = arith.mulf %123, %120 : vector<8x256xf32>
    %125 = arith.select %122, %120, %124 : vector<8x256xi1>, vector<8x256xf32>
    %c8_i32_59 = arith.constant 8 : i32
    %126 = tpu.memref_slice %arg26[%c8_i32_59] : memref<11x!tpu.dma_semaphore, #tpu.memory_space<semaphore_mem>> -> memref<1x!tpu.dma_semaphore, #tpu.memory_space<semaphore_mem>>
    %127 = tpu.memref_squeeze %126 : memref<1x!tpu.dma_semaphore, #tpu.memory_space<semaphore_mem>> -> memref<!tpu.dma_semaphore, #tpu.memory_space<semaphore_mem>>
    tpu.wait_dma2 semaphore(%127 : memref<!tpu.dma_semaphore, #tpu.memory_space<semaphore_mem>>) src(%arg11 : memref<384x512xbf16, #tpu.memory_space<any>>) dst(%arg23 : memref<384x512xbf16, #tpu.memory_space<vmem>>)
    %c0_60 = arith.constant 0 : index
    %c0_61 = arith.constant 0 : index
    %128 = vector.load %arg23[%c0_60, %c0_61] : memref<384x512xbf16, #tpu.memory_space<vmem>>, vector<128x512xbf16>
    %c128 = arith.constant 128 : index
    %c0_62 = arith.constant 0 : index
    %129 = vector.load %arg23[%c128, %c0_62] : memref<384x512xbf16, #tpu.memory_space<vmem>>, vector<256x512xbf16>
    %130 = arith.truncf %73 : vector<8x128xf32> to vector<8x128xbf16>
    %cst_63 = arith.constant dense<0.000000e+00> : vector<8x512xf32>
    %131 = tpu.matmul %130, %128, %cst_63 {dimension_numbers = #tpu.dot_dimension_numbers<[1], [0], [0], [1], [0, 0, 1, 1], [], []>} : vector<8x128xbf16>, vector<128x512xbf16>, vector<8x512xf32> -> vector<8x512xf32>
    %132 = arith.truncf %125 : vector<8x256xf32> to vector<8x256xbf16>
    %cst_64 = arith.constant dense<0.000000e+00> : vector<8x512xf32>
    %133 = tpu.matmul %132, %129, %cst_64 {dimension_numbers = #tpu.dot_dimension_numbers<[1], [0], [0], [1], [0, 0, 1, 1], [], []>} : vector<8x256xbf16>, vector<256x512xbf16>, vector<8x512xf32> -> vector<8x512xf32>
    %134 = arith.addf %131, %133 : vector<8x512xf32>
    %c8 = arith.constant 8 : index
    %c0_65 = arith.constant 0 : index
    %135 = vector.load %arg2[%c8, %c0_65] : memref<11x1024xf32, #tpu.memory_space<vmem>>, vector<1x512xf32>
    %136 = vector.broadcast %135 : vector<1x512xf32> to vector<8x512xf32>
    %137 = arith.addf %134, %136 : vector<8x512xf32>
    %cst_66 = arith.constant 0.000000e+00 : f32
    %138 = vector.broadcast %cst_66 : f32 to vector<8x512xf32>
    %139 = arith.cmpf oge, %137, %138 : vector<8x512xf32>
    %cst_67 = arith.constant 2.000000e-01 : f32
    %140 = vector.broadcast %cst_67 : f32 to vector<8x512xf32>
    %141 = arith.mulf %140, %137 : vector<8x512xf32>
    %142 = arith.select %139, %137, %141 : vector<8x512xi1>, vector<8x512xf32>
    %c9_i32_68 = arith.constant 9 : i32
    %143 = tpu.memref_slice %arg26[%c9_i32_68] : memref<11x!tpu.dma_semaphore, #tpu.memory_space<semaphore_mem>> -> memref<1x!tpu.dma_semaphore, #tpu.memory_space<semaphore_mem>>
    %144 = tpu.memref_squeeze %143 : memref<1x!tpu.dma_semaphore, #tpu.memory_space<semaphore_mem>> -> memref<!tpu.dma_semaphore, #tpu.memory_space<semaphore_mem>>
    tpu.wait_dma2 semaphore(%144 : memref<!tpu.dma_semaphore, #tpu.memory_space<semaphore_mem>>) src(%arg12 : memref<512x512xbf16, #tpu.memory_space<any>>) dst(%arg24 : memref<512x512xbf16, #tpu.memory_space<vmem>>)
    %c0_69 = arith.constant 0 : index
    %c0_70 = arith.constant 0 : index
    %145 = vector.load %arg24[%c0_69, %c0_70] : memref<512x512xbf16, #tpu.memory_space<vmem>>, vector<512x512xbf16>
    %146 = arith.truncf %142 : vector<8x512xf32> to vector<8x512xbf16>
    %cst_71 = arith.constant dense<0.000000e+00> : vector<8x512xf32>
    %147 = tpu.matmul %146, %145, %cst_71 {dimension_numbers = #tpu.dot_dimension_numbers<[1], [0], [0], [1], [0, 0, 1, 1], [], []>} : vector<8x512xbf16>, vector<512x512xbf16>, vector<8x512xf32> -> vector<8x512xf32>
    %c9 = arith.constant 9 : index
    %c0_72 = arith.constant 0 : index
    %148 = vector.load %arg2[%c9, %c0_72] : memref<11x1024xf32, #tpu.memory_space<vmem>>, vector<1x512xf32>
    %149 = vector.broadcast %148 : vector<1x512xf32> to vector<8x512xf32>
    %150 = arith.addf %147, %149 : vector<8x512xf32>
    %cst_73 = arith.constant 0.000000e+00 : f32
    %151 = vector.broadcast %cst_73 : f32 to vector<8x512xf32>
    %152 = arith.cmpf oge, %150, %151 : vector<8x512xf32>
    %cst_74 = arith.constant 2.000000e-01 : f32
    %153 = vector.broadcast %cst_74 : f32 to vector<8x512xf32>
    %154 = arith.mulf %153, %150 : vector<8x512xf32>
    %155 = arith.select %152, %150, %154 : vector<8x512xi1>, vector<8x512xf32>
    %c10_i32_75 = arith.constant 10 : i32
    %156 = tpu.memref_slice %arg26[%c10_i32_75] : memref<11x!tpu.dma_semaphore, #tpu.memory_space<semaphore_mem>> -> memref<1x!tpu.dma_semaphore, #tpu.memory_space<semaphore_mem>>
    %157 = tpu.memref_squeeze %156 : memref<1x!tpu.dma_semaphore, #tpu.memory_space<semaphore_mem>> -> memref<!tpu.dma_semaphore, #tpu.memory_space<semaphore_mem>>
    tpu.wait_dma2 semaphore(%157 : memref<!tpu.dma_semaphore, #tpu.memory_space<semaphore_mem>>) src(%arg13 : memref<1x512xbf16, #tpu.memory_space<any>>) dst(%arg25 : memref<1x512xbf16, #tpu.memory_space<vmem>>)
    %c0_76 = arith.constant 0 : index
    %c0_77 = arith.constant 0 : index
    %158 = vector.load %arg25[%c0_76, %c0_77] : memref<1x512xbf16, #tpu.memory_space<vmem>>, vector<1x512xbf16>
    %159 = arith.truncf %155 : vector<8x512xf32> to vector<8x512xbf16>
    %160 = arith.extf %159 : vector<8x512xbf16> to vector<8x512xf32>
    %161 = arith.extf %158 : vector<1x512xbf16> to vector<1x512xf32>
    %162 = vector.broadcast %161 : vector<1x512xf32> to vector<8x512xf32>
    %163 = arith.mulf %160, %162 : vector<8x512xf32>
    %cst_78 = arith.constant dense<0.000000e+00> : vector<8xf32>
    %164 = vector.multi_reduction <add>, %163, %cst_78 [1] : vector<8x512xf32> to vector<8xf32>
    %165 = vector.shape_cast %164 : vector<8xf32> to vector<8x1xf32>
    %c10 = arith.constant 10 : index
    %c0_79 = arith.constant 0 : index
    %166 = vector.load %arg2[%c10, %c0_79] : memref<11x1024xf32, #tpu.memory_space<vmem>>, vector<1x1xf32>
    %167 = vector.broadcast %166 : vector<1x1xf32> to vector<8x1xf32>
    %168 = arith.addf %165, %167 : vector<8x1xf32>
    %c0_80 = arith.constant 0 : index
    %c0_81 = arith.constant 0 : index
    %169 = vector.load %arg14[%c0_80, %c0_81] : memref<8x1xf32, #tpu.memory_space<vmem>>, vector<8x1xf32>
    tpu.vector_store %arg14[%c0_80, %c0_81], %168 {strides = array<i32>} : memref<8x1xf32, #tpu.memory_space<vmem>>, vector<8x1xf32>,
    return
  }
}

</mosaic_0001>

<bundles_post_ra>
// kernel: tpu_custom_call.1
= control target key start
LH: loop header
LB: loop body
LE: loop exit
PB: predicated region body
PF: predicated region fallthrough
CT: control target
= control target key end

     0   :  { %19 = vsyncpa [#allocation15], 0  ;;  %s19367_s0 = inlined_call_operand.hbm [shape: bf16[8,1024], index: 0, kind: input, shape index: {}]   ;;  %s19368_s1 = inlined_call_operand.hbm [shape: bf16[8,2048], index: 1, kind: input, shape index: {}]   ;;  %s19369_s2 = inlined_call_operand.hbm [shape: f32[11,1024], index: 2, kind: input, shape index: {}]   ;;  %s19370_s3 = inlined_call_operand.hbm [shape: bf16[1024,512], index: 3, kind: input, shape index: {}]   ;;  %s19371_s4 = inlined_call_operand.hbm [shape: bf16[512,256], index: 4, kind: input, shape index: {}]   ;;  %s19372_s5 = inlined_call_operand.hbm [shape: bf16[256,128], index: 5, kind: input, shape index: {}]   ;;  %s19373_s6 = inlined_call_operand.hbm [shape: bf16[128,128], index: 6, kind: input, shape index: {}]   ;;  %s19374_s7 = inlined_call_operand.hbm [shape: bf16[2048,1024], index: 7, kind: input, shape index: {}]   ;;  %s19375_s8 = inlined_call_operand.hbm [shape: bf16[1024,512], index: 8, kind: input, shape index: {}]   ;;  %s19376_s9 = inlined_call_operand.hbm [shape: bf16[512,256], index: 9, kind: input, shape index: {}]   ;;  %s19377_s10 = inlined_call_operand.hbm [shape: bf16[256,256], index: 10, kind: input, shape index: {}]   ;;  %s19378_s11 = inlined_call_operand.hbm [shape: bf16[384,512], index: 11, kind: input, shape index: {}]   ;;  %s19379_s12 = inlined_call_operand.hbm [shape: bf16[512,512], index: 12, kind: input, shape index: {}]   ;;  %s19380_s13 = inlined_call_operand.hbm [shape: bf16[1,512], index: 13, kind: input, shape index: {}]   ;;  %s19381_s14 = inlined_call_operand.vmem [shape: f32[8,1], index: 14, kind: output, shape index: {}]  }
   0x1   :  { %20 = vsyncpa [#allocation17], 0  ;;  %s18790_s29 = smov [#allocation16]   ;;  %s18791_s15 = smov [#allocation14]  }
   0x2   :  { %s37_s30 = sshll.u32 %s18790_s29, 4  ;;  %s27_s16 = sshll.u32 %s18791_s15, 4  ;;  %s38_s30 = int_to_ptr.vmem [resolvable:$true] %s37_s30  ;;  %s28_s16 = int_to_ptr.vmem [resolvable:$true] %s27_s16 }
   0x3   :  { %s18492_s17 = scalar_lea.vmem %s38_s30, 1024  ;;  %p18497_p1 = scmp.lt.s32.totalorder %s38_s30, %s38_s30 }
   0x4   :  { %p18493_p0 = scmp.ne.s32.totalorder %s38_s30, %s18492_s17  ;;  %p18498_p2 = scmp.lt.s32.totalorder %s18492_s17, %s18492_s17 }
   0x6   :  { %p18499_p3 = por %p18498_p2, %p18497_p1 }
   0x8   :  { %p18500_p4 = pnand %p18499_p3, %p18493_p0 }
   0xa   :  { %18503 = shalt.err (!%p18500_p4)
}
   0xb   :  { %40 = dma.hbm_to_vmem [thread:$0]  %s19368_s1, 1024, %s38_s30, [#allocation17]  }
   0xc   :  { %s18512_s20 = scalar_lea.vmem %s28_s16, 512  ;;  %p18517_p6 = scmp.lt.s32.totalorder %s28_s16, %s28_s16 }
   0xd   :  { %p18513_p5 = scmp.ne.s32.totalorder %s28_s16, %s18512_s20  ;;  %p18518_p7 = scmp.lt.s32.totalorder %s18512_s20, %s18512_s20 }
   0xf   :  { %p18519_p8 = por %p18518_p7, %p18517_p6 }
  0x11   :  { %p18520_p9 = pnand %p18519_p8, %p18513_p5 }
  0x13   :  { %18523 = shalt.err (!%p18520_p9)
}
  0x14   :  { %30 = dma.hbm_to_vmem [thread:$0]  %s19367_s0, 512, %s28_s16, [#allocation15]  }
  0x15   :  { %s18792_s23 = smov [#allocation18]  }
  0x16   :  { %s46_s24 = sshll.u32 %s18792_s23, 4  ;;  %s47_s24 = int_to_ptr.vmem [resolvable:$true] %s46_s24 }
  0x17   :  { %s18532_s25 = scalar_lea.vmem %s47_s24, 2048  ;;  %p18537_p11 = scmp.lt.s32.totalorder %s47_s24, %s47_s24 }
  0x18   :  { %p18533_p10 = scmp.ne.s32.totalorder %s47_s24, %s18532_s25  ;;  %p18538_p12 = scmp.lt.s32.totalorder %s18532_s25, %s18532_s25 }
  0x1a   :  { %p18539_p13 = por %p18538_p12, %p18537_p11 }
  0x1c   :  { %p18540_p0 = pnand %p18539_p13, %p18533_p10 }
  0x1e   :  { %18543 = shalt.err (!%p18540_p0)
}
  0x1f   :  { %s18793_s1 = smov 1024   ;;  %s18794_s26 = smov 64  }
  0x20   :  { %52 = dma.hbm_to_vmem [thread:$0]  %s19369_s2, 2048, %s47_s24, [#allocation17], %s18793_s1, %s18793_s1, %s18794_s26  }
  0x21   :  { %18764 = dma.done.wait [#allocation15], 512  }
  0x22   :  { %18765 = vsyncadd [#allocation15], 4294966784 }
  0x23   :  { %18766 = dma.done.wait [#allocation17], 3072  }
  0x24   :  { %18767 = vsyncadd [#allocation17], 4294964224  ;;  %s18795_s0 = smov [#allocation2]   ;;  %s18796_s30 = smov [#allocation3]  }
  0x25   :  { %s70_s29 = sshll.u32 %s18795_s0, 4  ;;  %s82_s15 = sshll.u32 %s18796_s30, 4  ;;  %s71_s29 = int_to_ptr.vmem [resolvable:$true] %s70_s29  ;;  %s83_s15 = int_to_ptr.vmem [resolvable:$true] %s82_s15 }
  0x26   :  { %s18552_s16 = scalar_lea.vmem %s71_s29, 32768  ;;  %p18557_p2 = scmp.lt.s32.totalorder %s71_s29, %s71_s29 }
  0x27   :  { %p18553_p1 = scmp.ne.s32.totalorder %s71_s29, %s18552_s16  ;;  %p18558_p3 = scmp.lt.s32.totalorder %s18552_s16, %s18552_s16 }
  0x29   :  { %p18559_p4 = por %p18558_p3, %p18557_p2 }
  0x2b   :  { %p18560_p5 = pnand %p18559_p4, %p18553_p1 }
  0x2d   :  { %18563 = shalt.err (!%p18560_p5)  }
  0x2e   :  { %73 = dma.hbm_to_vmem [thread:$0]  %s19370_s3, 32768, %s71_s29, [#allocation13] }
  0x2f   :  { %s18572_s2 = scalar_lea.vmem %s83_s15, 8192  ;;  %p18577_p7 = scmp.lt.s32.totalorder %s83_s15, %s83_s15 }
  0x30   :  { %p18573_p6 = scmp.ne.s32.totalorder %s83_s15, %s18572_s2  ;;  %p18578_p8 = scmp.lt.s32.totalorder %s18572_s2, %s18572_s2 }
  0x32   :  { %p18579_p9 = por %p18578_p8, %p18577_p7 }
  0x34   :  { %p18580_p10 = pnand %p18579_p9, %p18573_p6 }
  0x36   :  { %18583 = shalt.err (!%p18580_p10)  }
  0x37   :  { %85 = dma.hbm_to_vmem [thread:$0]  %s19371_s4, 8192, %s83_s15, [#allocation13 + $0x1]  ;;  %v18899_v0 = vld [vmem:[#allocation14] sm:$0xff]  ;;  %v18901_v1 = vld [vmem:[#allocation14 + $0x8] sm:$0xff]  ;;  %v18903_v2 = vld [vmem:[#allocation14 + $0x10] sm:$0xff] }
  0x38   :  { %s18797_s21 = smov [#allocation4]   ;;  %s18798_s23 = smov [#allocation5]   ;;  %v18905_v3 = vld [vmem:[#allocation14 + $0x18] sm:$0xff] }
  0x39   :  { %s94_s22 = sshll.u32 %s18797_s21, 4  ;;  %s106_s24 = sshll.u32 %s18798_s23, 4  ;;  %s95_s22 = int_to_ptr.vmem [resolvable:$true] %s94_s22  ;;  %s107_s24 = int_to_ptr.vmem [resolvable:$true] %s106_s24 }
  0x3a   :  { %s18592_s3 = scalar_lea.vmem %s95_s22, 2048  ;;  %p18597_p12 = scmp.lt.s32.totalorder %s95_s22, %s95_s22 }
  0x3b   :  { %p18593_p11 = scmp.ne.s32.totalorder %s95_s22, %s18592_s3  ;;  %p18598_p13 = scmp.lt.s32.totalorder %s18592_s3, %s18592_s3 }
  0x3d   :  { %p18599_p0 = por %p18598_p13, %p18597_p12 }
  0x3f   :  { %p18600_p1 = pnand %p18599_p0, %p18593_p11 }
  0x41   :  { %18603 = shalt.err (!%p18600_p1)  }
  0x42   :  { %97 = dma.hbm_to_vmem [thread:$0]  %s19372_s5, 2048, %s95_s22, [#allocation13 + $0x2] }
  0x43   :  { %s18612_s1 = scalar_lea.vmem %s107_s24, 1024  ;;  %p18617_p3 = scmp.lt.s32.totalorder %s107_s24, %s107_s24 }
  0x44   :  { %p18613_p2 = scmp.ne.s32.totalorder %s107_s24, %s18612_s1  ;;  %p18618_p4 = scmp.lt.s32.totalorder %s18612_s1, %s18612_s1 }
  0x46   :  { %p18619_p5 = por %p18618_p4, %p18617_p3 }
  0x48   :  { %p18620_p6 = pnand %p18619_p5, %p18613_p2 }
  0x4a   :  { %18623 = shalt.err (!%p18620_p6)  }
  0x4b   :  { %109 = dma.hbm_to_vmem [thread:$0]  %s19373_s6, 1024, %s107_s24, [#allocation13 + $0x3] }
  0x4c   :  { %s18799_s28 = smov [#allocation6]   ;;  %s18800_s29 = smov [#allocation7]  }
  0x4d   :  { %s118_s0 = sshll.u32 %s18799_s28, 4  ;;  %s130_s30 = sshll.u32 %s18800_s29, 4  ;;  %s119_s0 = int_to_ptr.vmem [resolvable:$true] %s118_s0  ;;  %s131_s30 = int_to_ptr.vmem [resolvable:$true] %s130_s30 }
  0x4e   :  { %s18632_s15 = scalar_lea.vmem %s119_s0, 131072  ;;  %p18637_p8 = scmp.lt.s32.totalorder %s119_s0, %s119_s0 }
  0x4f   :  { %p18633_p7 = scmp.ne.s32.totalorder %s119_s0, %s18632_s15  ;;  %p18638_p9 = scmp.lt.s32.totalorder %s18632_s15, %s18632_s15 }
  0x51   :  { %p18639_p10 = por %p18638_p9, %p18637_p8 }
  0x53   :  { %p18640_p11 = pnand %p18639_p10, %p18633_p7 }
  0x55   :  { %18643 = shalt.err (!%p18640_p11)  }
  0x56   :  { %121 = dma.hbm_to_vmem [thread:$0]  %s19374_s7, 131072, %s119_s0, [#allocation13 + $0x4] }
  0x57   :  { %s18652_s17 = scalar_lea.vmem %s131_s30, 32768  ;;  %p18657_p13 = scmp.lt.s32.totalorder %s131_s30, %s131_s30 }
  0x58   :  { %p18653_p12 = scmp.ne.s32.totalorder %s131_s30, %s18652_s17  ;;  %p18658_p0 = scmp.lt.s32.totalorder %s18652_s17, %s18652_s17 }
  0x5a   :  { %p18659_p1 = por %p18658_p0, %p18657_p13 }
  0x5c   :  { %p18660_p2 = pnand %p18659_p1, %p18653_p12 }
  0x5e   :  { %18663 = shalt.err (!%p18660_p2)  }
  0x5f   :  { %133 = dma.hbm_to_vmem [thread:$0]  %s19375_s8, 32768, %s131_s30, [#allocation13 + $0x5] }
  0x60   :  { %s18801_s2 = smov [#allocation8]   ;;  %s18802_s20 = smov [#allocation9]  }
  0x61   :  { %s142_s19 = sshll.u32 %s18801_s2, 4  ;;  %s154_s21 = sshll.u32 %s18802_s20, 4  ;;  %s143_s19 = int_to_ptr.vmem [resolvable:$true] %s142_s19  ;;  %s155_s21 = int_to_ptr.vmem [resolvable:$true] %s154_s21 }
  0x62   :  { %s18672_s22 = scalar_lea.vmem %s143_s19, 8192  ;;  %p18677_p4 = scmp.lt.s32.totalorder %s143_s19, %s143_s19 }
  0x63   :  { %p18673_p3 = scmp.ne.s32.totalorder %s143_s19, %s18672_s22  ;;  %p18678_p5 = scmp.lt.s32.totalorder %s18672_s22, %s18672_s22 }
  0x65   :  { %p18679_p6 = por %p18678_p5, %p18677_p4 }
  0x67   :  { %p18680_p7 = pnand %p18679_p6, %p18673_p3 }
  0x69   :  { %18683 = shalt.err (!%p18680_p7)  }
  0x6a   :  { %145 = dma.hbm_to_vmem [thread:$0]  %s19376_s9, 8192, %s143_s19, [#allocation13 + $0x6] }
  0x6b   :  { %s18692_s24 = scalar_lea.vmem %s155_s21, 4096  ;;  %p18697_p9 = scmp.lt.s32.totalorder %s155_s21, %s155_s21 }
  0x6c   :  { %p18693_p8 = scmp.ne.s32.totalorder %s155_s21, %s18692_s24  ;;  %p18698_p10 = scmp.lt.s32.totalorder %s18692_s24, %s18692_s24 }
  0x6e   :  { %p18699_p11 = por %p18698_p10, %p18697_p9 }
  0x70   :  { %p18700_p12 = pnand %p18699_p11, %p18693_p8 }
  0x72   :  { %18703 = shalt.err (!%p18700_p12)  }
  0x73   :  { %157 = dma.hbm_to_vmem [thread:$0]  %s19377_s10, 4096, %s155_s21, [#allocation13 + $0x7] }
  0x74   :  { %s18803_s4 = smov [#allocation10]   ;;  %s18804_s1 = smov [#allocation11]  }
  0x75   :  { %s166_s25 = sshll.u32 %s18803_s4, 4  ;;  %s178_s26 = sshll.u32 %s18804_s1, 4  ;;  %s167_s25 = int_to_ptr.vmem [resolvable:$true] %s166_s25  ;;  %s179_s26 = int_to_ptr.vmem [resolvable:$true] %s178_s26 }
  0x76   :  { %s18712_s27 = scalar_lea.vmem %s167_s25, 12288  ;;  %p18717_p0 = scmp.lt.s32.totalorder %s167_s25, %s167_s25 }
  0x77   :  { %p18713_p13 = scmp.ne.s32.totalorder %s167_s25, %s18712_s27  ;;  %p18718_p1 = scmp.lt.s32.totalorder %s18712_s27, %s18712_s27 }
  0x79   :  { %p18719_p2 = por %p18718_p1, %p18717_p0 }
  0x7b   :  { %p18720_p3 = pnand %p18719_p2, %p18713_p13 }
  0x7d   :  { %18723 = shalt.err (!%p18720_p3)  }
  0x7e   :  { %169 = dma.hbm_to_vmem [thread:$0]  %s19378_s11, 12288, %s167_s25, [#allocation13 + $0x8] }
  0x7f   :  { %s18732_s0 = scalar_lea.vmem %s179_s26, 16384  ;;  %p18737_p5 = scmp.lt.s32.totalorder %s179_s26, %s179_s26 }
  0x80   :  { %p18733_p4 = scmp.ne.s32.totalorder %s179_s26, %s18732_s0  ;;  %p18738_p6 = scmp.lt.s32.totalorder %s18732_s0, %s18732_s0 }
  0x82   :  { %p18739_p7 = por %p18738_p6, %p18737_p5 }
  0x84   :  { %p18740_p8 = pnand %p18739_p7, %p18733_p4 }
  0x86   :  { %18743 = shalt.err (!%p18740_p8)  }
  0x87   :  { %181 = dma.hbm_to_vmem [thread:$0]  %s19379_s12, 16384, %s179_s26, [#allocation13 + $0x9] }
  0x88   :  { %s18805_s30 = smov [#allocation12]  }
  0x89   :  { %s190_s15 = sshll.u32 %s18805_s30, 4  ;;  %s191_s15 = int_to_ptr.vmem [resolvable:$true] %s190_s15 }
  0x8a   :  { %s18752_s5 = scalar_lea.vmem %s191_s15, 64  ;;  %p18757_p10 = scmp.lt.s32.totalorder %s191_s15, %s191_s15 }
  0x8b   :  { %p18753_p9 = scmp.ne.s32.totalorder %s191_s15, %s18752_s5  ;;  %p18758_p11 = scmp.lt.s32.totalorder %s18752_s5, %s18752_s5 }
  0x8d   :  { %p18759_p12 = por %p18758_p11, %p18757_p10 }
  0x8f   :  { %p18760_p13 = pnand %p18759_p12, %p18753_p9 }
  0x91   :  { %18763 = shalt.err (!%p18760_p13)  }
  0x92   :  { %193 = dma.hbm_to_vmem [thread:$0]  %s19380_s13, 64, %s191_s15, [#allocation13 + $0xa] }
  0x93   :  { %18768 = dma.done.wait [#allocation13], 32768 }
  0x94   :  { %18769 = vsyncadd [#allocation13], 4294934528  ;;  %v18936_v4 = vcombine.high %v18899_v0, %v18899_v0  ;;  %v18940_v5 = vcombine.high %v18901_v1, %v18901_v1  ;;  %v17116_v6 = vld [vmem:[#allocation2 + $0xe4] ss:$16 sps:$4 sm:$0xff]   ;;  %v17120_v8 = vld [vmem:[#allocation2 + $0xe0] ss:$16 sps:$4 sm:$0xff]  }
  0x95   :  { %v17118_v7 = vld [vmem:[#allocation2 + $0x2e4] ss:$16 sps:$4 sm:$0xff]   ;;  %1788 = vmatprep.subr.bf16.mxu0 %v17116_v6  ;;  %v17121_v9 = vld [vmem:[#allocation2 + $0x2e0] ss:$16 sps:$4 sm:$0xff]  }
  0x96   :  { %1820 = vmatprep.mubr.bf16.mxu0 %v18936_v4  ;;  %1861 = vmatprep.mubr.bf16.mxu1 %v18940_v5  ;;  %v17122_v10 = vld [vmem:[#allocation2 + $0xc4] ss:$16 sps:$4 sm:$0xff]   ;;  %v17126_v12 = vld [vmem:[#allocation2 + $0xc0] ss:$16 sps:$4 sm:$0xff]  }
  0x97   :  { %1829 = vmatprep.subr.bf16.mxu1 %v17118_v7  ;;  %1789 = vmatpush1.bf16.msra.mxu0 %v17120_v8  ;;  %v17124_v11 = vld [vmem:[#allocation2 + $0x2c4] ss:$16 sps:$4 sm:$0xff]   ;;  %v17127_v13 = vld [vmem:[#allocation2 + $0x2c0] ss:$16 sps:$4 sm:$0xff]  }
  0x98   :  { %1830 = vmatpush1.bf16.msra.mxu1 %v17121_v9  ;;  %1790 = vmatprep.subr.bf16.mxu0 %v17122_v10  ;;  %v17128_v14 = vld [vmem:[#allocation2 + $0xa4] ss:$16 sps:$4 sm:$0xff]   ;;  %v17132_v16 = vld [vmem:[#allocation2 + $0xa0] ss:$16 sps:$4 sm:$0xff]  }
  0x99   :  { %1831 = vmatprep.subr.bf16.mxu1 %v17124_v11  ;;  %v17130_v15 = vld [vmem:[#allocation2 + $0x2a4] ss:$16 sps:$4 sm:$0xff]   ;;  %v17133_v17 = vld [vmem:[#allocation2 + $0x2a0] ss:$16 sps:$4 sm:$0xff]  }
  0x9a   :  { %v17134_v18 = vld [vmem:[#allocation2 + $0x84] ss:$16 sps:$4 sm:$0xff]   ;;  %v17138_v20 = vld [vmem:[#allocation2 + $0x80] ss:$16 sps:$4 sm:$0xff]  }
  0x9b   :  { %1791 = vmatpush1.bf16.msra.mxu0 %v17126_v12  ;;  %v17136_v19 = vld [vmem:[#allocation2 + $0x284] ss:$16 sps:$4 sm:$0xff]   ;;  %v17139_v21 = vld [vmem:[#allocation2 + $0x280] ss:$16 sps:$4 sm:$0xff]  }
  0x9c   :  { %1832 = vmatpush1.bf16.msra.mxu1 %v17127_v13  ;;  %1792 = vmatprep.subr.bf16.mxu0 %v17128_v14  ;;  %v17140_v22 = vld [vmem:[#allocation2 + $0x64] ss:$16 sps:$4 sm:$0xff]   ;;  %v17144_v24 = vld [vmem:[#allocation2 + $0x60] ss:$16 sps:$4 sm:$0xff]   ;;  %v18946_v14 = vcombine.low %v18899_v0, %v18899_v0  ;;  %v18958_v0 = vcombine.high %v18905_v3, %v18905_v3 }
  0x9d   :  { %1833 = vmatprep.subr.bf16.mxu1 %v17130_v15  ;;  %v17142_v23 = vld [vmem:[#allocation2 + $0x264] ss:$16 sps:$4 sm:$0xff]   ;;  %v17145_v25 = vld [vmem:[#allocation2 + $0x260] ss:$16 sps:$4 sm:$0xff]   ;;  %v18950_v15 = vcombine.low %v18901_v1, %v18901_v1 }
  0x9e   :  { %v17146_v26 = vld [vmem:[#allocation2 + $0x44] ss:$16 sps:$4 sm:$0xff]   ;;  %v17150_v28 = vld [vmem:[#allocation2 + $0x40] ss:$16 sps:$4 sm:$0xff]  }
  0x9f   :  { %1793 = vmatpush1.bf16.msra.mxu0 %v17132_v16  ;;  %v17148_v27 = vld [vmem:[#allocation2 + $0x244] ss:$16 sps:$4 sm:$0xff]   ;;  %v17151_v29 = vld [vmem:[#allocation2 + $0x240] ss:$16 sps:$4 sm:$0xff]  }
  0xa0   :  { %1834 = vmatpush1.bf16.msra.mxu1 %v17133_v17  ;;  %1794 = vmatprep.subr.bf16.mxu0 %v17134_v18  ;;  %v17152_v30 = vld [vmem:[#allocation2 + $0x24] ss:$16 sps:$4 sm:$0xff]   ;;  %v17156_v32 = vld [vmem:[#allocation2 + $0x20] ss:$16 sps:$4 sm:$0xff]  }
  0xa1   :  { %1835 = vmatprep.subr.bf16.mxu1 %v17136_v19  ;;  %v17154_v31 = vld [vmem:[#allocation2 + $0x224] ss:$16 sps:$4 sm:$0xff]   ;;  %v17157_v33 = vld [vmem:[#allocation2 + $0x220] ss:$16 sps:$4 sm:$0xff]  }
  0xa2   :  { %v17158_v34 = vld [vmem:[#allocation2 + $0x4] ss:$16 sps:$4 sm:$0xff]   ;;  %v17162_v36 = vld [vmem:[#allocation2] ss:$16 sps:$4 sm:$0xff]  }
  0xa3   :  { %1795 = vmatpush1.bf16.msra.mxu0 %v17138_v20  ;;  %v17160_v35 = vld [vmem:[#allocation2 + $0x204] ss:$16 sps:$4 sm:$0xff]   ;;  %v17163_v37 = vld [vmem:[#allocation2 + $0x200] ss:$16 sps:$4 sm:$0xff]   ;;  %v18954_v20 = vcombine.high %v18903_v2, %v18903_v2 }
  0xa4   :  { %1836 = vmatpush1.bf16.msra.mxu1 %v17139_v21  ;;  %1796 = vmatprep.subr.bf16.mxu0 %v17140_v22  ;;  %v17164_v38 = vld [vmem:[#allocation2 + $0x1e4] ss:$16 sps:$4 sm:$0xff]   ;;  %v17168_v40 = vld [vmem:[#allocation2 + $0x1e0] ss:$16 sps:$4 sm:$0xff]  }
  0xa5   :  { %1837 = vmatprep.subr.bf16.mxu1 %v17142_v23  ;;  %v17166_v39 = vld [vmem:[#allocation2 + $0x3e4] ss:$16 sps:$4 sm:$0xff]   ;;  %v17169_v41 = vld [vmem:[#allocation2 + $0x3e0] ss:$16 sps:$4 sm:$0xff]  }
  0xa6   :  { %v17170_v42 = vld [vmem:[#allocation2 + $0x1c4] ss:$16 sps:$4 sm:$0xff]   ;;  %v17174_v44 = vld [vmem:[#allocation2 + $0x1c0] ss:$16 sps:$4 sm:$0xff]  }
  0xa7   :  { %1797 = vmatpush1.bf16.msra.mxu0 %v17144_v24  ;;  %v17172_v43 = vld [vmem:[#allocation2 + $0x3c4] ss:$16 sps:$4 sm:$0xff]   ;;  %v17175_v45 = vld [vmem:[#allocation2 + $0x3c0] ss:$16 sps:$4 sm:$0xff]  }
  0xa8   :  { %1838 = vmatpush1.bf16.msra.mxu1 %v17145_v25  ;;  %1798 = vmatprep.subr.bf16.mxu0 %v17146_v26  ;;  %v17176_v46 = vld [vmem:[#allocation2 + $0x1a4] ss:$16 sps:$4 sm:$0xff]   ;;  %v17180_v48 = vld [vmem:[#allocation2 + $0x1a0] ss:$16 sps:$4 sm:$0xff]  }
  0xa9   :  { %1839 = vmatprep.subr.bf16.mxu1 %v17148_v27  ;;  %v17178_v47 = vld [vmem:[#allocation2 + $0x3a4] ss:$16 sps:$4 sm:$0xff]   ;;  %v17181_v49 = vld [vmem:[#allocation2 + $0x3a0] ss:$16 sps:$4 sm:$0xff]  }
  0xaa   :  { %v17182_v50 = vld [vmem:[#allocation2 + $0x184] ss:$16 sps:$4 sm:$0xff]   ;;  %v17186_v52 = vld [vmem:[#allocation2 + $0x180] ss:$16 sps:$4 sm:$0xff]  }
  0xab   :  { %1799 = vmatpush1.bf16.msra.mxu0 %v17150_v28  ;;  %v17184_v51 = vld [vmem:[#allocation2 + $0x384] ss:$16 sps:$4 sm:$0xff]   ;;  %v17187_v53 = vld [vmem:[#allocation2 + $0x380] ss:$16 sps:$4 sm:$0xff]  }
  0xac   :  { %1840 = vmatpush1.bf16.msra.mxu1 %v17151_v29  ;;  %1800 = vmatprep.subr.bf16.mxu0 %v17152_v30  ;;  %v17188_v54 = vld [vmem:[#allocation2 + $0x164] ss:$16 sps:$4 sm:$0xff]   ;;  %v17192_v56 = vld [vmem:[#allocation2 + $0x160] ss:$16 sps:$4 sm:$0xff]  }
  0xad   :  { %1841 = vmatprep.subr.bf16.mxu1 %v17154_v31  ;;  %v17190_v55 = vld [vmem:[#allocation2 + $0x364] ss:$16 sps:$4 sm:$0xff]   ;;  %v17193_v57 = vld [vmem:[#allocation2 + $0x360] ss:$16 sps:$4 sm:$0xff]  }
  0xae   :  { %v17194_v58 = vld [vmem:[#allocation2 + $0x144] ss:$16 sps:$4 sm:$0xff]   ;;  %v17198_v60 = vld [vmem:[#allocation2 + $0x140] ss:$16 sps:$4 sm:$0xff]  }
  0xaf   :  { %1801 = vmatpush1.bf16.msra.mxu0 %v17156_v32  ;;  %v17196_v59 = vld [vmem:[#allocation2 + $0x344] ss:$16 sps:$4 sm:$0xff]   ;;  %v17199_v61 = vld [vmem:[#allocation2 + $0x340] ss:$16 sps:$4 sm:$0xff]  }
  0xb0   :  { %1842 = vmatpush1.bf16.msra.mxu1 %v17157_v33  ;;  %1802 = vmatprep.subr.bf16.mxu0 %v17158_v34  ;;  %v17200_v62 = vld [vmem:[#allocation2 + $0x124] ss:$16 sps:$4 sm:$0xff]   ;;  %v17204_v6 = vld [vmem:[#allocation2 + $0x120] ss:$16 sps:$4 sm:$0xff]  }
  0xb1   :  { %1843 = vmatprep.subr.bf16.mxu1 %v17160_v35  ;;  %v17202_v63 = vld [vmem:[#allocation2 + $0x324] ss:$16 sps:$4 sm:$0xff]   ;;  %v17205_v7 = vld [vmem:[#allocation2 + $0x320] ss:$16 sps:$4 sm:$0xff]  }
  0xb2   :  { %v17206_v8 = vld [vmem:[#allocation2 + $0x104] ss:$16 sps:$4 sm:$0xff]   ;;  %v17210_v10 = vld [vmem:[#allocation2 + $0x100] ss:$16 sps:$4 sm:$0xff]  }
  0xb3   :  { %1803 = vmatpush1.bf16.msra.mxu0 %v17162_v36  ;;  %v17208_v9 = vld [vmem:[#allocation2 + $0x304] ss:$16 sps:$4 sm:$0xff]   ;;  %v17211_v11 = vld [vmem:[#allocation2 + $0x300] ss:$16 sps:$4 sm:$0xff]  }
  0xb4   :  { %1844 = vmatpush1.bf16.msra.mxu1 %v17163_v37  ;;  %1804 = vmatprep.subr.bf16.mxu0 %v17164_v38  ;;  %v17214_v12 = vld [vmem:[#allocation2 + $0x4e4] ss:$16 sps:$4 sm:$0xff]   ;;  %v17212_v16 = vld [vmem:[#allocation2 + $0x4e0] ss:$16 sps:$4 sm:$0xff]  }
  0xb5   :  { %1845 = vmatprep.subr.bf16.mxu1 %v17166_v39  ;;  %v17217_v13 = vld [vmem:[#allocation2 + $0x6e4] ss:$16 sps:$4 sm:$0xff]   ;;  %v17215_v17 = vld [vmem:[#allocation2 + $0x6e0] ss:$16 sps:$4 sm:$0xff]  }
  0xb6   :  { %v17220_v18 = vld [vmem:[#allocation2 + $0x4c4] ss:$16 sps:$4 sm:$0xff]   ;;  %v17218_v1 = vld [vmem:[#allocation2 + $0x4c0] ss:$16 sps:$4 sm:$0xff]  }
  0xb7   :  { %1805 = vmatpush2.bf16.msra.mxu0 %v17168_v40  ;;  %v17223_v19 = vld [vmem:[#allocation2 + $0x6c4] ss:$16 sps:$4 sm:$0xff]   ;;  %v17221_v21 = vld [vmem:[#allocation2 + $0x6c0] ss:$16 sps:$4 sm:$0xff]  }
  0xb8   :  { %1846 = vmatpush2.bf16.msra.mxu1 %v17169_v41  ;;  %1806 = vmatprep.subr.bf16.mxu0 %v17170_v42  ;;  %v17226_v22 = vld [vmem:[#allocation2 + $0x4a4] ss:$16 sps:$4 sm:$0xff]   ;;  %v17224_v24 = vld [vmem:[#allocation2 + $0x4a0] ss:$16 sps:$4 sm:$0xff]  }
  0xb9   :  { %1847 = vmatprep.subr.bf16.mxu1 %v17172_v43  ;;  %v17229_v23 = vld [vmem:[#allocation2 + $0x6a4] ss:$16 sps:$4 sm:$0xff]   ;;  %v17227_v25 = vld [vmem:[#allocation2 + $0x6a0] ss:$16 sps:$4 sm:$0xff]  }
  0xba   :  { %v17232_v26 = vld [vmem:[#allocation2 + $0x484] ss:$16 sps:$4 sm:$0xff]   ;;  %v17230_v28 = vld [vmem:[#allocation2 + $0x480] ss:$16 sps:$4 sm:$0xff]  }
  0xbb   :  { %1807 = vmatpush2.bf16.msra.mxu0 %v17174_v44  ;;  %v17235_v27 = vld [vmem:[#allocation2 + $0x684] ss:$16 sps:$4 sm:$0xff]   ;;  %v17233_v29 = vld [vmem:[#allocation2 + $0x680] ss:$16 sps:$4 sm:$0xff]  }
  0xbc   :  { %1848 = vmatpush2.bf16.msra.mxu1 %v17175_v45  ;;  %1808 = vmatprep.subr.bf16.mxu0 %v17176_v46  ;;  %v17238_v30 = vld [vmem:[#allocation2 + $0x464] ss:$16 sps:$4 sm:$0xff]   ;;  %v17236_v32 = vld [vmem:[#allocation2 + $0x460] ss:$16 sps:$4 sm:$0xff]  }
  0xbd   :  { %1849 = vmatprep.subr.bf16.mxu1 %v17178_v47  ;;  %v17241_v31 = vld [vmem:[#allocation2 + $0x664] ss:$16 sps:$4 sm:$0xff]   ;;  %v17239_v33 = vld [vmem:[#allocation2 + $0x660] ss:$16 sps:$4 sm:$0xff]  }
  0xbe   :  { %v17244_v34 = vld [vmem:[#allocation2 + $0x444] ss:$16 sps:$4 sm:$0xff]   ;;  %v17242_v36 = vld [vmem:[#allocation2 + $0x440] ss:$16 sps:$4 sm:$0xff]  }
  0xbf   :  { %1809 = vmatpush2.bf16.msra.mxu0 %v17180_v48  ;;  %v17247_v35 = vld [vmem:[#allocation2 + $0x644] ss:$16 sps:$4 sm:$0xff]   ;;  %v17245_v37 = vld [vmem:[#allocation2 + $0x640] ss:$16 sps:$4 sm:$0xff]  }
  0xc0   :  { %1850 = vmatpush2.bf16.msra.mxu1 %v17181_v49  ;;  %1810 = vmatprep.subr.bf16.mxu0 %v17182_v50  ;;  %v17250_v38 = vld [vmem:[#allocation2 + $0x424] ss:$16 sps:$4 sm:$0xff]   ;;  %v17248_v40 = vld [vmem:[#allocation2 + $0x420] ss:$16 sps:$4 sm:$0xff]  }
  0xc1   :  { %1851 = vmatprep.subr.bf16.mxu1 %v17184_v51  ;;  %v17253_v39 = vld [vmem:[#allocation2 + $0x624] ss:$16 sps:$4 sm:$0xff]   ;;  %v17251_v41 = vld [vmem:[#allocation2 + $0x620] ss:$16 sps:$4 sm:$0xff]  }
  0xc2   :  { %v17256_v42 = vld [vmem:[#allocation2 + $0x404] ss:$16 sps:$4 sm:$0xff]   ;;  %v17254_v44 = vld [vmem:[#allocation2 + $0x400] ss:$16 sps:$4 sm:$0xff]  }
  0xc3   :  { %1811 = vmatpush2.bf16.msra.mxu0 %v17186_v52  ;;  %v17259_v43 = vld [vmem:[#allocation2 + $0x604] ss:$16 sps:$4 sm:$0xff]   ;;  %v17257_v45 = vld [vmem:[#allocation2 + $0x600] ss:$16 sps:$4 sm:$0xff]  }
  0xc4   :  { %1852 = vmatpush2.bf16.msra.mxu1 %v17187_v53  ;;  %1812 = vmatprep.subr.bf16.mxu0 %v17188_v54  ;;  %v17262_v46 = vld [vmem:[#allocation2 + $0x5e4] ss:$16 sps:$4 sm:$0xff]   ;;  %v17260_v48 = vld [vmem:[#allocation2 + $0x5e0] ss:$16 sps:$4 sm:$0xff]  }
  0xc5   :  { %1853 = vmatprep.subr.bf16.mxu1 %v17190_v55  ;;  %v17265_v47 = vld [vmem:[#allocation2 + $0x7e4] ss:$16 sps:$4 sm:$0xff]   ;;  %v17263_v49 = vld [vmem:[#allocation2 + $0x7e0] ss:$16 sps:$4 sm:$0xff]  }
  0xc6   :  { %v17268_v50 = vld [vmem:[#allocation2 + $0x5c4] ss:$16 sps:$4 sm:$0xff]   ;;  %v17266_v52 = vld [vmem:[#allocation2 + $0x5c0] ss:$16 sps:$4 sm:$0xff]  }
  0xc7   :  { %1813 = vmatpush2.bf16.msra.mxu0 %v17192_v56  ;;  %v17271_v51 = vld [vmem:[#allocation2 + $0x7c4] ss:$16 sps:$4 sm:$0xff]   ;;  %v17269_v53 = vld [vmem:[#allocation2 + $0x7c0] ss:$16 sps:$4 sm:$0xff]  }
  0xc8   :  { %1854 = vmatpush2.bf16.msra.mxu1 %v17193_v57  ;;  %1814 = vmatprep.subr.bf16.mxu0 %v17194_v58  ;;  %v17274_v54 = vld [vmem:[#allocation2 + $0x5a4] ss:$16 sps:$4 sm:$0xff]   ;;  %v17272_v56 = vld [vmem:[#allocation2 + $0x5a0] ss:$16 sps:$4 sm:$0xff]  }
  0xc9   :  { %1855 = vmatprep.subr.bf16.mxu1 %v17196_v59  ;;  %v17277_v55 = vld [vmem:[#allocation2 + $0x7a4] ss:$16 sps:$4 sm:$0xff]   ;;  %v17275_v57 = vld [vmem:[#allocation2 + $0x7a0] ss:$16 sps:$4 sm:$0xff]  }
  0xca   :  { %v17280_v58 = vld [vmem:[#allocation2 + $0x584] ss:$16 sps:$4 sm:$0xff]  }
  0xcb   :  { %1815 = vmatpush2.bf16.msra.mxu0 %v17198_v60  ;;  %v17283_v59 = vld [vmem:[#allocation2 + $0x784] ss:$16 sps:$4 sm:$0xff]   ;;  %v17278_v60 = vld [vmem:[#allocation2 + $0x580] ss:$16 sps:$4 sm:$0xff]  }
  0xcc   :  { %1856 = vmatpush2.bf16.msra.mxu1 %v17199_v61  ;;  %1816 = vmatprep.subr.bf16.mxu0 %v17200_v62  ;;  %v17281_v61 = vld [vmem:[#allocation2 + $0x780] ss:$16 sps:$4 sm:$0xff]   ;;  %v17286_v62 = vld [vmem:[#allocation2 + $0x564] ss:$16 sps:$4 sm:$0xff]  }
  0xcd   :  { %1857 = vmatprep.subr.bf16.mxu1 %v17202_v63  ;;  %v17289_v63 = vld [vmem:[#allocation2 + $0x764] ss:$16 sps:$4 sm:$0xff]  }
  0xcf   :  { %1817 = vmatpush2.bf16.msra.mxu0 %v17204_v6  ;;  %v17284_v6 = vld [vmem:[#allocation2 + $0x560] ss:$16 sps:$4 sm:$0xff]  }
  0xd0   :  { %1858 = vmatpush2.bf16.msra.mxu1 %v17205_v7  ;;  %1818 = vmatprep.subr.bf16.mxu0 %v17206_v8  ;;  %v17287_v7 = vld [vmem:[#allocation2 + $0x760] ss:$16 sps:$4 sm:$0xff]   ;;  %v17292_v8 = vld [vmem:[#allocation2 + $0x544] ss:$16 sps:$4 sm:$0xff]  }
  0xd1   :  { %1859 = vmatprep.subr.bf16.mxu1 %v17208_v9  ;;  %v17295_v9 = vld [vmem:[#allocation2 + $0x744] ss:$16 sps:$4 sm:$0xff]  }
  0xd3   :  { %1819 = vmatpush2.bf16.msra.mxu0 %v17210_v10  ;;  %v17290_v10 = vld [vmem:[#allocation2 + $0x540] ss:$16 sps:$4 sm:$0xff]  }
  0xd4   :  { %1860 = vmatpush2.bf16.msra.mxu1 %v17211_v11  ;;  %1870 = vmatprep.subr.bf16.mxu0 %v17214_v12  ;;  %v17293_v11 = vld [vmem:[#allocation2 + $0x740] ss:$16 sps:$4 sm:$0xff]   ;;  %v17298_v12 = vld [vmem:[#allocation2 + $0x524] ss:$16 sps:$4 sm:$0xff]  }
  0xd5   :  { %1911 = vmatprep.subr.bf16.mxu1 %v17217_v13  ;;  %v17301_v13 = vld [vmem:[#allocation2 + $0x724] ss:$16 sps:$4 sm:$0xff]  }
  0xd6   :  { %1821 = vmatmul.mubr.bf16.vlgmr.msra.gmra.mxu0 %v18946_v14 }
  0xd7   :  { %1862 = vmatmul.mubr.bf16.vlgmr.msra.gmra.mxu1 %v18950_v15  ;;  %1871 = vmatpush1.bf16.msra.mxu0 %v17212_v16  ;;  %v17296_v16 = vld [vmem:[#allocation2 + $0x520] ss:$16 sps:$4 sm:$0xff]  }
  0xd8   :  { %1912 = vmatpush1.bf16.msra.mxu1 %v17215_v17  ;;  %1872 = vmatprep.subr.bf16.mxu0 %v17220_v18  ;;  %v17299_v17 = vld [vmem:[#allocation2 + $0x720] ss:$16 sps:$4 sm:$0xff]   ;;  %v17304_v18 = vld [vmem:[#allocation2 + $0x504] ss:$16 sps:$4 sm:$0xff]  }
  0xd9   :  { %1913 = vmatprep.subr.bf16.mxu1 %v17223_v19  ;;  %1902 = vmatprep.mubr.bf16.mxu0 %v18954_v20  ;;  %v17307_v19 = vld [vmem:[#allocation2 + $0x704] ss:$16 sps:$4 sm:$0xff]  }
  0xda   :  { %1943 = vmatprep.mubr.bf16.mxu1 %v18958_v0 }
  0xdb   :  { %1873 = vmatpush1.bf16.msra.mxu0 %v17218_v1  ;;  %v17302_v1 = vld [vmem:[#allocation2 + $0x500] ss:$16 sps:$4 sm:$0xff]  }
  0xdc   :  { %1914 = vmatpush1.bf16.msra.mxu1 %v17221_v21  ;;  %1874 = vmatprep.subr.bf16.mxu0 %v17226_v22  ;;  %v17305_v21 = vld [vmem:[#allocation2 + $0x700] ss:$16 sps:$4 sm:$0xff]   ;;  %v17310_v22 = vld [vmem:[#allocation2 + $0xec] ss:$16 sps:$4 sm:$0xff]  }
  0xdd   :  { %1915 = vmatprep.subr.bf16.mxu1 %v17229_v23  ;;  %v17313_v23 = vld [vmem:[#allocation2 + $0x2ec] ss:$16 sps:$4 sm:$0xff]  }
  0xdf   :  { %1875 = vmatpush1.bf16.msra.mxu0 %v17224_v24  ;;  %v18966_v24 = vcombine.low %v18903_v2, %v18903_v2  ;;  %v17322_v2 = vld [vmem:[#allocation2 + $0xac] ss:$16 sps:$4 sm:$0xff]  }
  0xe0   :  { %1916 = vmatpush1.bf16.msra.mxu1 %v17227_v25  ;;  %1876 = vmatprep.subr.bf16.mxu0 %v17232_v26  ;;  %v18970_v25 = vcombine.low %v18905_v3, %v18905_v3  ;;  %v17308_v26 = vld [vmem:[#allocation2 + $0xe8] ss:$16 sps:$4 sm:$0xff]   ;;  %v17325_v3 = vld [vmem:[#allocation2 + $0x2ac] ss:$16 sps:$4 sm:$0xff]  }
  0xe1   :  { %1917 = vmatprep.subr.bf16.mxu1 %v17235_v27  ;;  %v17311_v27 = vld [vmem:[#allocation2 + $0x2e8] ss:$16 sps:$4 sm:$0xff]  }
  0xe3   :  { %1877 = vmatpush1.bf16.msra.mxu0 %v17230_v28  ;;  %v17316_v28 = vld [vmem:[#allocation2 + $0xcc] ss:$16 sps:$4 sm:$0xff]  }
  0xe4   :  { %1918 = vmatpush1.bf16.msra.mxu1 %v17233_v29  ;;  %1878 = vmatprep.subr.bf16.mxu0 %v17238_v30  ;;  %v17319_v29 = vld [vmem:[#allocation2 + $0x2cc] ss:$16 sps:$4 sm:$0xff]   ;;  %v17314_v30 = vld [vmem:[#allocation2 + $0xc8] ss:$16 sps:$4 sm:$0xff]  }
  0xe5   :  { %1919 = vmatprep.subr.bf16.mxu1 %v17241_v31  ;;  %v17317_v31 = vld [vmem:[#allocation2 + $0x2c8] ss:$16 sps:$4 sm:$0xff]  }
  0xe7   :  { %1879 = vmatpush1.bf16.msra.mxu0 %v17236_v32  ;;  %v17320_v32 = vld [vmem:[#allocation2 + $0xa8] ss:$16 sps:$4 sm:$0xff]  }
  0xe8   :  { %1920 = vmatpush1.bf16.msra.mxu1 %v17239_v33  ;;  %1880 = vmatprep.subr.bf16.mxu0 %v17244_v34  ;;  %v17323_v33 = vld [vmem:[#allocation2 + $0x2a8] ss:$16 sps:$4 sm:$0xff]   ;;  %v17328_v34 = vld [vmem:[#allocation2 + $0x8c] ss:$16 sps:$4 sm:$0xff]  }
  0xe9   :  { %1921 = vmatprep.subr.bf16.mxu1 %v17247_v35  ;;  %v17331_v35 = vld [vmem:[#allocation2 + $0x28c] ss:$16 sps:$4 sm:$0xff]  }
  0xeb   :  { %1881 = vmatpush1.bf16.msra.mxu0 %v17242_v36  ;;  %v17326_v36 = vld [vmem:[#allocation2 + $0x88] ss:$16 sps:$4 sm:$0xff]  }
  0xec   :  { %1922 = vmatpush1.bf16.msra.mxu1 %v17245_v37  ;;  %1882 = vmatprep.subr.bf16.mxu0 %v17250_v38  ;;  %v17329_v37 = vld [vmem:[#allocation2 + $0x288] ss:$16 sps:$4 sm:$0xff]   ;;  %v17334_v38 = vld [vmem:[#allocation2 + $0x6c] ss:$16 sps:$4 sm:$0xff]  }
  0xed   :  { %1923 = vmatprep.subr.bf16.mxu1 %v17253_v39  ;;  %v17337_v39 = vld [vmem:[#allocation2 + $0x26c] ss:$16 sps:$4 sm:$0xff]  }
  0xef   :  { %1883 = vmatpush1.bf16.msra.mxu0 %v17248_v40  ;;  %v17332_v40 = vld [vmem:[#allocation2 + $0x68] ss:$16 sps:$4 sm:$0xff]  }
  0xf0   :  { %1924 = vmatpush1.bf16.msra.mxu1 %v17251_v41  ;;  %1884 = vmatprep.subr.bf16.mxu0 %v17256_v42  ;;  %v17343_v41 = vld [vmem:[#allocation2 + $0x24c] ss:$16 sps:$4 sm:$0xff]   ;;  %v17338_v42 = vld [vmem:[#allocation2 + $0x48] ss:$16 sps:$4 sm:$0xff]  }
  0xf1   :  { %1925 = vmatprep.subr.bf16.mxu1 %v17259_v43  ;;  %v17341_v43 = vld [vmem:[#allocation2 + $0x248] ss:$16 sps:$4 sm:$0xff]  }
  0xf3   :  { %1885 = vmatpush1.bf16.msra.mxu0 %v17254_v44  ;;  %v17346_v44 = vld [vmem:[#allocation2 + $0x2c] ss:$16 sps:$4 sm:$0xff]  }
  0xf4   :  { %1926 = vmatpush1.bf16.msra.mxu1 %v17257_v45  ;;  %1886 = vmatprep.subr.bf16.mxu0 %v17262_v46  ;;  %v17349_v45 = vld [vmem:[#allocation2 + $0x22c] ss:$16 sps:$4 sm:$0xff]   ;;  %v17344_v46 = vld [vmem:[#allocation2 + $0x28] ss:$16 sps:$4 sm:$0xff]  }
  0xf5   :  { %1927 = vmatprep.subr.bf16.mxu1 %v17265_v47  ;;  %v17347_v47 = vld [vmem:[#allocation2 + $0x228] ss:$16 sps:$4 sm:$0xff]  }
  0xf7   :  { %1887 = vmatpush2.bf16.msra.mxu0 %v17260_v48  ;;  %v17352_v48 = vld [vmem:[#allocation2 + $0xc] ss:$16 sps:$4 sm:$0xff]  }
  0xf8   :  { %1928 = vmatpush2.bf16.msra.mxu1 %v17263_v49  ;;  %1888 = vmatprep.subr.bf16.mxu0 %v17268_v50  ;;  %v17355_v49 = vld [vmem:[#allocation2 + $0x20c] ss:$16 sps:$4 sm:$0xff]   ;;  %v17350_v50 = vld [vmem:[#allocation2 + $0x8] ss:$16 sps:$4 sm:$0xff]  }
  0xf9   :  { %1929 = vmatprep.subr.bf16.mxu1 %v17271_v51  ;;  %v17353_v51 = vld [vmem:[#allocation2 + $0x208] ss:$16 sps:$4 sm:$0xff]  }
  0xfb   :  { %1889 = vmatpush2.bf16.msra.mxu0 %v17266_v52  ;;  %v17358_v52 = vld [vmem:[#allocation2 + $0x1ec] ss:$16 sps:$4 sm:$0xff]  }
  0xfc   :  { %1930 = vmatpush2.bf16.msra.mxu1 %v17269_v53  ;;  %1890 = vmatprep.subr.bf16.mxu0 %v17274_v54  ;;  %v17361_v53 = vld [vmem:[#allocation2 + $0x3ec] ss:$16 sps:$4 sm:$0xff]   ;;  %v17356_v54 = vld [vmem:[#allocation2 + $0x1e8] ss:$16 sps:$4 sm:$0xff]  }
  0xfd   :  { %1931 = vmatprep.subr.bf16.mxu1 %v17277_v55  ;;  %v17359_v55 = vld [vmem:[#allocation2 + $0x3e8] ss:$16 sps:$4 sm:$0xff]  }
  0xff   :  { %1891 = vmatpush2.bf16.msra.mxu0 %v17272_v56  ;;  %v17364_v56 = vld [vmem:[#allocation2 + $0x1cc] ss:$16 sps:$4 sm:$0xff]  }
 0x100   :  { %1932 = vmatpush2.bf16.msra.mxu1 %v17275_v57  ;;  %1892 = vmatprep.subr.bf16.mxu0 %v17280_v58  ;;  %v17367_v57 = vld [vmem:[#allocation2 + $0x3cc] ss:$16 sps:$4 sm:$0xff]   ;;  %v17362_v58 = vld [vmem:[#allocation2 + $0x1c8] ss:$16 sps:$4 sm:$0xff]  }
 0x101   :  { %1933 = vmatprep.subr.bf16.mxu1 %v17283_v59  ;;  %v17365_v59 = vld [vmem:[#allocation2 + $0x3c8] ss:$16 sps:$4 sm:$0xff]  }
 0x103   :  { %1893 = vmatpush2.bf16.msra.mxu0 %v17278_v60  ;;  %v17370_v60 = vld [vmem:[#allocation2 + $0x1ac] ss:$16 sps:$4 sm:$0xff]  }
 0x104   :  { %1934 = vmatpush2.bf16.msra.mxu1 %v17281_v61  ;;  %1894 = vmatprep.subr.bf16.mxu0 %v17286_v62  ;;  %v17373_v61 = vld [vmem:[#allocation2 + $0x3ac] ss:$16 sps:$4 sm:$0xff]   ;;  %v17368_v62 = vld [vmem:[#allocation2 + $0x1a8] ss:$16 sps:$4 sm:$0xff]  }
 0x105   :  { %1935 = vmatprep.subr.bf16.mxu1 %v17289_v63  ;;  %v17371_v63 = vld [vmem:[#allocation2 + $0x3a8] ss:$16 sps:$4 sm:$0xff]  }
 0x107   :  { %1895 = vmatpush2.bf16.msra.mxu0 %v17284_v6  ;;  %v17376_v6 = vld [vmem:[#allocation2 + $0x18c] ss:$16 sps:$4 sm:$0xff]  }
 0x108   :  { %1936 = vmatpush2.bf16.msra.mxu1 %v17287_v7  ;;  %1896 = vmatprep.subr.bf16.mxu0 %v17292_v8  ;;  %v17379_v7 = vld [vmem:[#allocation2 + $0x38c] ss:$16 sps:$4 sm:$0xff]   ;;  %v17374_v8 = vld [vmem:[#allocation2 + $0x188] ss:$16 sps:$4 sm:$0xff]  }
 0x109   :  { %1937 = vmatprep.subr.bf16.mxu1 %v17295_v9  ;;  %v17377_v9 = vld [vmem:[#allocation2 + $0x388] ss:$16 sps:$4 sm:$0xff]  }
 0x10b   :  { %1897 = vmatpush2.bf16.msra.mxu0 %v17290_v10  ;;  %v17382_v10 = vld [vmem:[#allocation2 + $0x16c] ss:$16 sps:$4 sm:$0xff]  }
 0x10c   :  { %1938 = vmatpush2.bf16.msra.mxu1 %v17293_v11  ;;  %1898 = vmatprep.subr.bf16.mxu0 %v17298_v12  ;;  %v17385_v11 = vld [vmem:[#allocation2 + $0x36c] ss:$16 sps:$4 sm:$0xff]   ;;  %v17380_v12 = vld [vmem:[#allocation2 + $0x168] ss:$16 sps:$4 sm:$0xff]  }
 0x10d   :  { %1939 = vmatprep.subr.bf16.mxu1 %v17301_v13  ;;  %v17383_v13 = vld [vmem:[#allocation2 + $0x368] ss:$16 sps:$4 sm:$0xff]  }
 0x10f   :  { %1899 = vmatpush2.bf16.msra.mxu0 %v17296_v16  ;;  %v17388_v16 = vld [vmem:[#allocation2 + $0x14c] ss:$16 sps:$4 sm:$0xff]  }
 0x110   :  { %1940 = vmatpush2.bf16.msra.mxu1 %v17299_v17  ;;  %1900 = vmatprep.subr.bf16.mxu0 %v17304_v18  ;;  %v17391_v17 = vld [vmem:[#allocation2 + $0x34c] ss:$16 sps:$4 sm:$0xff]   ;;  %v17386_v18 = vld [vmem:[#allocation2 + $0x148] ss:$16 sps:$4 sm:$0xff]  }
 0x111   :  { %1941 = vmatprep.subr.bf16.mxu1 %v17307_v19  ;;  %v17389_v19 = vld [vmem:[#allocation2 + $0x348] ss:$16 sps:$4 sm:$0xff]  }
 0x113   :  { %1901 = vmatpush2.bf16.msra.mxu0 %v17302_v1  ;;  %v17394_v1 = vld [vmem:[#allocation2 + $0x12c] ss:$16 sps:$4 sm:$0xff]  }
 0x114   :  { %1942 = vmatpush2.bf16.msra.mxu1 %v17305_v21  ;;  %1952 = vmatprep.subr.bf16.mxu0 %v17310_v22  ;;  %v17397_v21 = vld [vmem:[#allocation2 + $0x32c] ss:$16 sps:$4 sm:$0xff]   ;;  %v17392_v22 = vld [vmem:[#allocation2 + $0x128] ss:$16 sps:$4 sm:$0xff]  }
 0x115   :  { %1993 = vmatprep.subr.bf16.mxu1 %v17313_v23  ;;  %v17395_v23 = vld [vmem:[#allocation2 + $0x328] ss:$16 sps:$4 sm:$0xff]  }
 0x116   :  { %1903 = vmatmul.mubr.bf16.vlgmr.msra.gmra.mxu0 %v18966_v24 }
 0x117   :  { %1944 = vmatmul.mubr.bf16.vlgmr.msra.gmra.mxu1 %v18970_v25  ;;  %1953 = vmatpush1.bf16.msra.mxu0 %v17308_v26  ;;  %v17400_v26 = vld [vmem:[#allocation2 + $0x10c] ss:$16 sps:$4 sm:$0xff]  }
 0x118   :  { %1994 = vmatpush1.bf16.msra.mxu1 %v17311_v27  ;;  %1954 = vmatprep.subr.bf16.mxu0 %v17316_v28  ;;  %v17403_v27 = vld [vmem:[#allocation2 + $0x30c] ss:$16 sps:$4 sm:$0xff]   ;;  %v17398_v28 = vld [vmem:[#allocation2 + $0x108] ss:$16 sps:$4 sm:$0xff]  }
 0x119   :  { %1995 = vmatprep.subr.bf16.mxu1 %v17319_v29  ;;  %1984 = vmatprep.mubr.bf16.mxu0 %v18936_v4  ;;  %v17335_v4 = vld [vmem:[#allocation2 + $0x268] ss:$16 sps:$4 sm:$0xff]  }
 0x11a   :  { %2025 = vmatprep.mubr.bf16.mxu1 %v18940_v5  ;;  %v17340_v5 = vld [vmem:[#allocation2 + $0x4c] ss:$16 sps:$4 sm:$0xff]   ;;  %v17401_v29 = vld [vmem:[#allocation2 + $0x308] ss:$16 sps:$4 sm:$0xff]  }
 0x11b   :  { %1955 = vmatpush1.bf16.msra.mxu0 %v17314_v30  ;;  %v17406_v30 = vld [vmem:[#allocation2 + $0x4ec] ss:$16 sps:$4 sm:$0xff]  }
 0x11c   :  { %1996 = vmatpush1.bf16.msra.mxu1 %v17317_v31  ;;  %1956 = vmatprep.subr.bf16.mxu0 %v17322_v2  ;;  %v17409_v31 = vld [vmem:[#allocation2 + $0x6ec] ss:$16 sps:$4 sm:$0xff]   ;;  %v17404_v2 = vld [vmem:[#allocation2 + $0x4e8] ss:$16 sps:$4 sm:$0xff]  }
 0x11d   :  { %1997 = vmatprep.subr.bf16.mxu1 %v17325_v3  ;;  %v17407_v3 = vld [vmem:[#allocation2 + $0x6e8] ss:$16 sps:$4 sm:$0xff]  }
 0x11f   :  { %1957 = vmatpush1.bf16.msra.mxu0 %v17320_v32  ;;  %v17412_v32 = vld [vmem:[#allocation2 + $0x4cc] ss:$16 sps:$4 sm:$0xff]  }
 0x120   :  { %1998 = vmatpush1.bf16.msra.mxu1 %v17323_v33  ;;  %1958 = vmatprep.subr.bf16.mxu0 %v17328_v34  ;;  %v17415_v33 = vld [vmem:[#allocation2 + $0x6cc] ss:$16 sps:$4 sm:$0xff]   ;;  %v17410_v34 = vld [vmem:[#allocation2 + $0x4c8] ss:$16 sps:$4 sm:$0xff]  }
 0x121   :  { %1999 = vmatprep.subr.bf16.mxu1 %v17331_v35  ;;  %v17413_v35 = vld [vmem:[#allocation2 + $0x6c8] ss:$16 sps:$4 sm:$0xff]  }
 0x123   :  { %1959 = vmatpush1.bf16.msra.mxu0 %v17326_v36  ;;  %v17418_v36 = vld [vmem:[#allocation2 + $0x4ac] ss:$16 sps:$4 sm:$0xff]  }
 0x124   :  { %2000 = vmatpush1.bf16.msra.mxu1 %v17329_v37  ;;  %1960 = vmatprep.subr.bf16.mxu0 %v17334_v38  ;;  %v17421_v37 = vld [vmem:[#allocation2 + $0x6ac] ss:$16 sps:$4 sm:$0xff]   ;;  %v17416_v38 = vld [vmem:[#allocation2 + $0x4a8] ss:$16 sps:$4 sm:$0xff]  }
 0x125   :  { %2001 = vmatprep.subr.bf16.mxu1 %v17337_v39  ;;  %v17419_v39 = vld [vmem:[#allocation2 + $0x6a8] ss:$16 sps:$4 sm:$0xff]  }
 0x127   :  { %1961 = vmatpush1.bf16.msra.mxu0 %v17332_v40  ;;  %v17422_v40 = vld [vmem:[#allocation2 + $0x488] ss:$16 sps:$4 sm:$0xff]  }
 0x128   :  { %2002 = vmatpush1.bf16.msra.mxu1 %v17335_v4  ;;  %1962 = vmatprep.subr.bf16.mxu0 %v17340_v5  ;;  %v17425_v4 = vld [vmem:[#allocation2 + $0x688] ss:$16 sps:$4 sm:$0xff]   ;;  %v17430_v5 = vld [vmem:[#allocation2 + $0x46c] ss:$16 sps:$4 sm:$0xff]  }
 0x129   :  { %2003 = vmatprep.subr.bf16.mxu1 %v17343_v41  ;;  %v17433_v41 = vld [vmem:[#allocation2 + $0x66c] ss:$16 sps:$4 sm:$0xff]  }
 0x12b   :  { %1963 = vmatpush1.bf16.msra.mxu0 %v17338_v42  ;;  %v17436_v42 = vld [vmem:[#allocation2 + $0x44c] ss:$16 sps:$4 sm:$0xff]  }
 0x12c   :  { %2004 = vmatpush1.bf16.msra.mxu1 %v17341_v43  ;;  %1964 = vmatprep.subr.bf16.mxu0 %v17346_v44  ;;  %v17439_v43 = vld [vmem:[#allocation2 + $0x64c] ss:$16 sps:$4 sm:$0xff]   ;;  %v17434_v44 = vld [vmem:[#allocation2 + $0x448] ss:$16 sps:$4 sm:$0xff]  }
 0x12d   :  { %2005 = vmatprep.subr.bf16.mxu1 %v17349_v45  ;;  %v17437_v45 = vld [vmem:[#allocation2 + $0x648] ss:$16 sps:$4 sm:$0xff]  }
 0x12f   :  { %1965 = vmatpush1.bf16.msra.mxu0 %v17344_v46  ;;  %v17442_v46 = vld [vmem:[#allocation2 + $0x42c] ss:$16 sps:$4 sm:$0xff]  }
 0x130   :  { %2006 = vmatpush1.bf16.msra.mxu1 %v17347_v47  ;;  %1966 = vmatprep.subr.bf16.mxu0 %v17352_v48  ;;  %v17445_v47 = vld [vmem:[#allocation2 + $0x62c] ss:$16 sps:$4 sm:$0xff]   ;;  %v17440_v48 = vld [vmem:[#allocation2 + $0x428] ss:$16 sps:$4 sm:$0xff]  }
 0x131   :  { %2007 = vmatprep.subr.bf16.mxu1 %v17355_v49  ;;  %v17443_v49 = vld [vmem:[#allocation2 + $0x628] ss:$16 sps:$4 sm:$0xff]  }
 0x133   :  { %1967 = vmatpush1.bf16.msra.mxu0 %v17350_v50  ;;  %v17448_v50 = vld [vmem:[#allocation2 + $0x40c] ss:$16 sps:$4 sm:$0xff]  }
 0x134   :  { %2008 = vmatpush1.bf16.msra.mxu1 %v17353_v51  ;;  %1968 = vmatprep.subr.bf16.mxu0 %v17358_v52  ;;  %v17451_v51 = vld [vmem:[#allocation2 + $0x60c] ss:$16 sps:$4 sm:$0xff]   ;;  %v17446_v52 = vld [vmem:[#allocation2 + $0x408] ss:$16 sps:$4 sm:$0xff]  }
 0x135   :  { %2009 = vmatprep.subr.bf16.mxu1 %v17361_v53  ;;  %v17449_v53 = vld [vmem:[#allocation2 + $0x608] ss:$16 sps:$4 sm:$0xff]  }
 0x137   :  { %1969 = vmatpush2.bf16.msra.mxu0 %v17356_v54  ;;  %v17454_v54 = vld [vmem:[#allocation2 + $0x5ec] ss:$16 sps:$4 sm:$0xff]  }
 0x138   :  { %2010 = vmatpush2.bf16.msra.mxu1 %v17359_v55  ;;  %1970 = vmatprep.subr.bf16.mxu0 %v17364_v56  ;;  %v17457_v55 = vld [vmem:[#allocation2 + $0x7ec] ss:$16 sps:$4 sm:$0xff]   ;;  %v17452_v56 = vld [vmem:[#allocation2 + $0x5e8] ss:$16 sps:$4 sm:$0xff]  }
 0x139   :  { %2011 = vmatprep.subr.bf16.mxu1 %v17367_v57  ;;  %v17455_v57 = vld [vmem:[#allocation2 + $0x7e8] ss:$16 sps:$4 sm:$0xff]  }
 0x13b   :  { %1971 = vmatpush2.bf16.msra.mxu0 %v17362_v58  ;;  %v17460_v58 = vld [vmem:[#allocation2 + $0x5cc] ss:$16 sps:$4 sm:$0xff]  }
 0x13c   :  { %2012 = vmatpush2.bf16.msra.mxu1 %v17365_v59  ;;  %1972 = vmatprep.subr.bf16.mxu0 %v17370_v60  ;;  %v17463_v59 = vld [vmem:[#allocation2 + $0x7cc] ss:$16 sps:$4 sm:$0xff]   ;;  %v17458_v60 = vld [vmem:[#allocation2 + $0x5c8] ss:$16 sps:$4 sm:$0xff]  }
 0x13d   :  { %2013 = vmatprep.subr.bf16.mxu1 %v17373_v61  ;;  %v17461_v61 = vld [vmem:[#allocation2 + $0x7c8] ss:$16 sps:$4 sm:$0xff]  }
 0x13f   :  { %1973 = vmatpush2.bf16.msra.mxu0 %v17368_v62  ;;  %v17466_v62 = vld [vmem:[#allocation2 + $0x5ac] ss:$16 sps:$4 sm:$0xff]  }
 0x140   :  { %2014 = vmatpush2.bf16.msra.mxu1 %v17371_v63  ;;  %1974 = vmatprep.subr.bf16.mxu0 %v17376_v6  ;;  %v17469_v63 = vld [vmem:[#allocation2 + $0x7ac] ss:$16 sps:$4 sm:$0xff]   ;;  %v17464_v6 = vld [vmem:[#allocation2 + $0x5a8] ss:$16 sps:$4 sm:$0xff]  }
 0x141   :  { %2015 = vmatprep.subr.bf16.mxu1 %v17379_v7  ;;  %v17467_v7 = vld [vmem:[#allocation2 + $0x7a8] ss:$16 sps:$4 sm:$0xff]  }
 0x143   :  { %1975 = vmatpush2.bf16.msra.mxu0 %v17374_v8  ;;  %v17472_v8 = vld [vmem:[#allocation2 + $0x58c] ss:$16 sps:$4 sm:$0xff]  }
 0x144   :  { %2016 = vmatpush2.bf16.msra.mxu1 %v17377_v9  ;;  %1976 = vmatprep.subr.bf16.mxu0 %v17382_v10  ;;  %v17475_v9 = vld [vmem:[#allocation2 + $0x78c] ss:$16 sps:$4 sm:$0xff]   ;;  %v17470_v10 = vld [vmem:[#allocation2 + $0x588] ss:$16 sps:$4 sm:$0xff]  }
 0x145   :  { %2017 = vmatprep.subr.bf16.mxu1 %v17385_v11  ;;  %v17473_v11 = vld [vmem:[#allocation2 + $0x788] ss:$16 sps:$4 sm:$0xff]  }
 0x147   :  { %1977 = vmatpush2.bf16.msra.mxu0 %v17380_v12  ;;  %v17478_v12 = vld [vmem:[#allocation2 + $0x56c] ss:$16 sps:$4 sm:$0xff]  }
 0x148   :  { %2018 = vmatpush2.bf16.msra.mxu1 %v17383_v13  ;;  %1978 = vmatprep.subr.bf16.mxu0 %v17388_v16  ;;  %v17481_v13 = vld [vmem:[#allocation2 + $0x76c] ss:$16 sps:$4 sm:$0xff]   ;;  %v17476_v16 = vld [vmem:[#allocation2 + $0x568] ss:$16 sps:$4 sm:$0xff]  }
 0x149   :  { %2019 = vmatprep.subr.bf16.mxu1 %v17391_v17  ;;  %v17479_v17 = vld [vmem:[#allocation2 + $0x768] ss:$16 sps:$4 sm:$0xff]  }
 0x14b   :  { %1979 = vmatpush2.bf16.msra.mxu0 %v17386_v18  ;;  %v17484_v18 = vld [vmem:[#allocation2 + $0x54c] ss:$16 sps:$4 sm:$0xff]  }
 0x14c   :  { %2020 = vmatpush2.bf16.msra.mxu1 %v17389_v19  ;;  %1980 = vmatprep.subr.bf16.mxu0 %v17394_v1  ;;  %v17487_v19 = vld [vmem:[#allocation2 + $0x74c] ss:$16 sps:$4 sm:$0xff]   ;;  %v17482_v1 = vld [vmem:[#allocation2 + $0x548] ss:$16 sps:$4 sm:$0xff]  }
 0x14d   :  { %2021 = vmatprep.subr.bf16.mxu1 %v17397_v21  ;;  %v17485_v21 = vld [vmem:[#allocation2 + $0x748] ss:$16 sps:$4 sm:$0xff]  }
 0x14f   :  { %1981 = vmatpush2.bf16.msra.mxu0 %v17392_v22  ;;  %v460_v22 = vlaneseq }
 0x150   :  { %2022 = vmatpush2.bf16.msra.mxu1 %v17395_v23  ;;  %1982 = vmatprep.subr.bf16.mxu0 %v17400_v26  ;;  %v17490_v23 = vld [vmem:[#allocation2 + $0x52c] ss:$16 sps:$4 sm:$0xff]  }
 0x151   :  { %2023 = vmatprep.subr.bf16.mxu1 %v17403_v27  ;;  %v17493_v26 = vld [vmem:[#allocation2 + $0x72c] ss:$16 sps:$4 sm:$0xff]   ;;  %v17488_v27 = vld [vmem:[#allocation2 + $0x528] ss:$16 sps:$4 sm:$0xff]  }
 0x153   :  { %1983 = vmatpush2.bf16.msra.mxu0 %v17398_v28  ;;  %v17491_v28 = vld [vmem:[#allocation2 + $0x728] ss:$16 sps:$4 sm:$0xff]  }
 0x154   :  { %2024 = vmatpush2.bf16.msra.mxu1 %v17401_v29  ;;  %2034 = vmatprep.subr.bf16.mxu0 %v17406_v30  ;;  %v18980_v29 = vshrl.u32 %v460_v22, 7  ;;  %v17496_v30 = vld [vmem:[#allocation2 + $0x50c] ss:$16 sps:$4 sm:$0xff]  }
 0x155   :  { %2075 = vmatprep.subr.bf16.mxu1 %v17409_v31  ;;  %v17499_v31 = vld [vmem:[#allocation2 + $0x70c] ss:$16 sps:$4 sm:$0xff]  }
 0x156   :  { %1985 = vmatmul.mubr.bf16.vlgmr.msra.gmra.mxu0 %v18946_v14  ;;  %v17424_v14 = vld [vmem:[#allocation2 + $0x48c] ss:$16 sps:$4 sm:$0xff]  }
 0x157   :  { %2026 = vmatmul.mubr.bf16.vlgmr.msra.gmra.mxu1 %v18950_v15  ;;  %2035 = vmatpush1.bf16.msra.mxu0 %v17404_v2  ;;  %v17427_v15 = vld [vmem:[#allocation2 + $0x68c] ss:$16 sps:$4 sm:$0xff]   ;;  %v17494_v2 = vld [vmem:[#allocation2 + $0x508] ss:$16 sps:$4 sm:$0xff]  }
 0x158   :  { %2076 = vmatpush1.bf16.msra.mxu1 %v17407_v3  ;;  %2036 = vmatprep.subr.bf16.mxu0 %v17412_v32  ;;  %v17497_v3 = vld [vmem:[#allocation2 + $0x708] ss:$16 sps:$4 sm:$0xff]   ;;  %v18983_v32 = vsub.s32 0, %v18980_v29 }
 0x159   :  { %2077 = vmatprep.subr.bf16.mxu1 %v17415_v33  ;;  %2066 = vmatprep.mubr.bf16.mxu0 %v18954_v20  ;;  %v17428_v20 = vld [vmem:[#allocation2 + $0x468] ss:$16 sps:$4 sm:$0xff]   ;;  %v458_v33 = vld [vmem:[#allocation18] ss:$8 sm:$0xf] }
 0x15a   :  { %2107 = vmatprep.mubr.bf16.mxu1 %v18958_v0  ;;  %v17431_v0 = vld [vmem:[#allocation2 + $0x668] ss:$16 sps:$4 sm:$0xff]  }
 0x15b   :  { %2037 = vmatpush1.bf16.msra.mxu0 %v17410_v34  ;;  %v18986_v34 = vsub.s32 1, %v18980_v29 }
 0x15c   :  { %2078 = vmatpush1.bf16.msra.mxu1 %v17413_v35  ;;  %2038 = vmatprep.subr.bf16.mxu0 %v17418_v36  ;;  %v463_v35 = vrot.slane %v458_v33, %v18983_v32 }
 0x15d   :  { %2079 = vmatprep.subr.bf16.mxu1 %v17421_v37  ;;  %v467_v36 = vrot.slane %v458_v33, %v18986_v34 }
 0x15f   :  { %2039 = vmatpush1.bf16.msra.mxu0 %v17416_v38 }
 0x160   :  { %2080 = vmatpush1.bf16.msra.mxu1 %v17419_v39  ;;  %2040 = vmatprep.subr.bf16.mxu0 %v17424_v14 }
 0x161   :  { %2081 = vmatprep.subr.bf16.mxu1 %v17427_v15 }
 0x163   :  { %2041 = vmatpush1.bf16.msra.mxu0 %v17422_v40 }
 0x164   :  { %2082 = vmatpush1.bf16.msra.mxu1 %v17425_v4  ;;  %2042 = vmatprep.subr.bf16.mxu0 %v17430_v5 }
 0x165   :  { %2083 = vmatprep.subr.bf16.mxu1 %v17433_v41 }
 0x167   :  { %2043 = vmatpush1.bf16.msra.mxu0 %v17428_v20 }
 0x168   :  { %2084 = vmatpush1.bf16.msra.mxu1 %v17431_v0  ;;  %2044 = vmatprep.subr.bf16.mxu0 %v17436_v42 }
 0x169   :  { %2085 = vmatprep.subr.bf16.mxu1 %v17439_v43 }
 0x16b   :  { %2045 = vmatpush1.bf16.msra.mxu0 %v17434_v44 }
 0x16c   :  { %2086 = vmatpush1.bf16.msra.mxu1 %v17437_v45  ;;  %2046 = vmatprep.subr.bf16.mxu0 %v17442_v46 }
 0x16d   :  { %2087 = vmatprep.subr.bf16.mxu1 %v17445_v47 }
 0x16f   :  { %2047 = vmatpush1.bf16.msra.mxu0 %v17440_v48 }
 0x170   :  { %2088 = vmatpush1.bf16.msra.mxu1 %v17443_v49  ;;  %2048 = vmatprep.subr.bf16.mxu0 %v17448_v50 }
 0x171   :  { %2089 = vmatprep.subr.bf16.mxu1 %v17451_v51 }
 0x173   :  { %2049 = vmatpush1.bf16.msra.mxu0 %v17446_v52 }
 0x174   :  { %2090 = vmatpush1.bf16.msra.mxu1 %v17449_v53  ;;  %2050 = vmatprep.subr.bf16.mxu0 %v17454_v54 }
 0x175   :  { %2091 = vmatprep.subr.bf16.mxu1 %v17457_v55 }
 0x177   :  { %2051 = vmatpush2.bf16.msra.mxu0 %v17452_v56 }
 0x178   :  { %2092 = vmatpush2.bf16.msra.mxu1 %v17455_v57  ;;  %2052 = vmatprep.subr.bf16.mxu0 %v17460_v58 }
 0x179   :  { %2093 = vmatprep.subr.bf16.mxu1 %v17463_v59 }
 0x17b   :  { %2053 = vmatpush2.bf16.msra.mxu0 %v17458_v60 }
 0x17c   :  { %2094 = vmatpush2.bf16.msra.mxu1 %v17461_v61  ;;  %2054 = vmatprep.subr.bf16.mxu0 %v17466_v62 }
 0x17d   :  { %2095 = vmatprep.subr.bf16.mxu1 %v17469_v63 }
 0x17f   :  { %2055 = vmatpush2.bf16.msra.mxu0 %v17464_v6 }
 0x180   :  { %2096 = vmatpush2.bf16.msra.mxu1 %v17467_v7  ;;  %2056 = vmatprep.subr.bf16.mxu0 %v17472_v8  ;;  %v18995_v7 = vsub.s32 2, %v18980_v29  ;;  %v18998_v8 = vsub.s32 3, %v18980_v29 }
 0x181   :  { %2097 = vmatprep.subr.bf16.mxu1 %v17475_v9 }
 0x182   :  { %v471_v9 = vrot.slane %v458_v33, %v18995_v7 }
 0x183   :  { %2057 = vmatpush2.bf16.msra.mxu0 %v17470_v10  ;;  %v475_v10 = vrot.slane %v458_v33, %v18998_v8 }
 0x184   :  { %2098 = vmatpush2.bf16.msra.mxu1 %v17473_v11  ;;  %2058 = vmatprep.subr.bf16.mxu0 %v17478_v12 }
 0x185   :  { %2099 = vmatprep.subr.bf16.mxu1 %v17481_v13 }
 0x187   :  { %2059 = vmatpush2.bf16.msra.mxu0 %v17476_v16 }
 0x188   :  { %2100 = vmatpush2.bf16.msra.mxu1 %v17479_v17  ;;  %2060 = vmatprep.subr.bf16.mxu0 %v17484_v18 }
 0x189   :  { %2101 = vmatprep.subr.bf16.mxu1 %v17487_v19 }
 0x18b   :  { %2061 = vmatpush2.bf16.msra.mxu0 %v17482_v1 }
 0x18c   :  { %2102 = vmatpush2.bf16.msra.mxu1 %v17485_v21  ;;  %2062 = vmatprep.subr.bf16.mxu0 %v17490_v23 }
 0x18d   :  { %2103 = vmatprep.subr.bf16.mxu1 %v17493_v26 }
 0x18f   :  { %2063 = vmatpush2.bf16.msra.mxu0 %v17488_v27 }
 0x190   :  { %2104 = vmatpush2.bf16.msra.mxu1 %v17491_v28  ;;  %2064 = vmatprep.subr.bf16.mxu0 %v17496_v30 }
 0x191   :  { %2105 = vmatprep.subr.bf16.mxu1 %v17499_v31 }
 0x193   :  { %2065 = vmatpush2.bf16.msra.mxu0 %v17494_v2 }
 0x194   :  { %2106 = vmatpush2.bf16.msra.mxu1 %v17497_v3 }
 0x196   :  { %v1822_v37 = vpop.f32.mrf.mxu0  ;;  %2067 = vmatmul.mubr.bf16.vlgmr.msra.gmra.mxu0 %v18966_v24 }
 0x197   :  { %v1863_v38 = vpop.f32.mrf.mxu1  ;;  %2108 = vmatmul.mubr.bf16.vlgmr.msra.gmra.mxu1 %v18970_v25  ;;  %v1823_v39 = vadd.f32 %v1822_v37, %v463_v35 }
 0x198   :  { %v1824_v14 = vpop.f32.mrf.mxu0 }
 0x199   :  { %v1865_v15 = vpop.f32.mrf.mxu1  ;;  %v1864_v40 = vadd.f32 %v1863_v38, %v1823_v39  ;;  %v1825_v4 = vadd.f32 %v1824_v14, %v467_v36 }
 0x19a   :  { %v1826_v5 = vpop.f32.mrf.mxu0 }
 0x19b   :  { %v1867_v41 = vpop.f32.mrf.mxu1  ;;  %v1866_v20 = vadd.f32 %v1865_v15, %v1825_v4 }
 0x19c   :  { %v1827_v0 = vpop.f32.mrf.mxu0 }
 0x19d   :  { %v1868_v42 = vpop.f32.mrf.mxu1 }
 0x1d6   :  { %v1904_v43 = vpop.f32.mrf.mxu0 }
 0x1d7   :  { %v1945_v44 = vpop.f32.mrf.mxu1  ;;  %v1905_v45 = vadd.f32 %v1904_v43, %v1864_v40 }
 0x1d8   :  { %v1906_v46 = vpop.f32.mrf.mxu0 }
 0x1d9   :  { %v1947_v47 = vpop.f32.mrf.mxu1  ;;  %v1946_v48 = vadd.f32 %v1945_v44, %v1905_v45  ;;  %v1907_v49 = vadd.f32 %v1906_v46, %v1866_v20 }
 0x1da   :  { %v1908_v24 = vpop.f32.mrf.mxu0 }
 0x1db   :  { %v1949_v50 = vpop.f32.mrf.mxu1  ;;  %vm2116_vm0 = vcmp.ge.f32.partialorder %v1946_v48, 0.0  ;;  %v2120_v25 = vmul.f32 0.2, %v1946_v48  ;;  %v1948_v51 = vadd.f32 %v1947_v47, %v1907_v49 }
 0x1dc   :  { %v1909_v52 = vpop.f32.mrf.mxu0 }
 0x1dd   :  { %v1950_v53 = vpop.f32.mrf.mxu1  ;;  %v18992_v54 = vsel %vm2116_vm0, %v1946_v48, %v2120_v25  ;;  %vm2117_vm1 = vcmp.ge.f32.partialorder %v1948_v51, 0.0  ;;  %v2121_v55 = vmul.f32 0.2, %v1948_v51 }
 0x1df   :  { %v2125_v56 = vsel %vm2117_vm1, %v1948_v51, %v2121_v55 }
 0x216   :  { %v1986_v57 = vpop.f32.mrf.mxu0 }
 0x217   :  { %v2027_v58 = vpop.f32.mrf.mxu1  ;;  %v1987_v11 = vadd.f32 %v1986_v57, %v471_v9 }
 0x218   :  { %v1988_v59 = vpop.f32.mrf.mxu0 }
 0x219   :  { %v2029_v60 = vpop.f32.mrf.mxu1  ;;  %v1989_v12 = vadd.f32 %v1988_v59, %v475_v10  ;;  %v2028_v13 = vadd.f32 %v2027_v58, %v1987_v11 }
 0x21a   :  { %v1990_v61 = vpop.f32.mrf.mxu0 }
 0x21b   :  { %v2031_v62 = vpop.f32.mrf.mxu1  ;;  %v2030_v18 = vadd.f32 %v2029_v60, %v1989_v12 }
 0x21c   :  { %v1991_v63 = vpop.f32.mrf.mxu0 }
 0x21d   :  { %v2032_v6 = vpop.f32.mrf.mxu1 }
 0x256   :  { %v2068_v16 = vpop.f32.mrf.mxu0 }
 0x257   :  { %v2109_v17 = vpop.f32.mrf.mxu1  ;;  %v2069_v19 = vadd.f32 %v2068_v16, %v2028_v13 }
 0x258   :  { %v2070_v1 = vpop.f32.mrf.mxu0 }
 0x259   :  { %v2111_v21 = vpop.f32.mrf.mxu1  ;;  %v2110_v22 = vadd.f32 %v2109_v17, %v2069_v19  ;;  %v2071_v23 = vadd.f32 %v2070_v1, %v2030_v18 }
 0x25a   :  { %v2072_v26 = vpop.f32.mrf.mxu0 }
 0x25b   :  { %v2113_v27 = vpop.f32.mrf.mxu1  ;;  %vm2118_vm2 = vcmp.ge.f32.partialorder %v2110_v22, 0.0  ;;  %v2122_v28 = vmul.f32 0.2, %v2110_v22  ;;  %v2112_v30 = vadd.f32 %v2111_v21, %v2071_v23 }
 0x25c   :  { %v2073_v31 = vpop.f32.mrf.mxu0 }
 0x25d   :  { %v2114_v2 = vpop.f32.mrf.mxu1  ;;  %v19002_v3 = vsel %vm2118_vm2, %v2110_v22, %v2122_v28  ;;  %vm2119_vm3 = vcmp.ge.f32.partialorder %v2112_v30, 0.0  ;;  %v2123_v33 = vmul.f32 0.2, %v2112_v30 }
 0x25f   :  { %v2127_v35 = vsel %vm2119_vm3, %v2112_v30, %v2123_v33 }
 0x260   :  { %18770 = dma.done.wait [#allocation13 + $0x1], 8192 }
 0x261   :  { %18771 = vsyncadd [#allocation13 + $0x1], 4294959104  ;;  %v2197_v36 = vpack.c.bf16 %v2125_v56, %v2125_v56  ;;  %v2199_v37 = vpack.c.bf16 %v2127_v35, %v2127_v35  ;;  %v17500_v38 = vld [vmem:[#allocation3 + $0x74] ss:$8 sps:$4 sm:$0xff]   ;;  %v17504_v14 = vld [vmem:[#allocation3 + $0x70] ss:$8 sps:$4 sm:$0xff]  }
 0x262   :  { %v17502_v39 = vld [vmem:[#allocation3 + $0x174] ss:$8 sps:$4 sm:$0xff]   ;;  %2533 = vmatprep.subr.bf16.mxu0 %v17500_v38  ;;  %v17505_v15 = vld [vmem:[#allocation3 + $0x170] ss:$8 sps:$4 sm:$0xff]   ;;  %v17506_v40 = vld [vmem:[#allocation3 + $0x64] ss:$8 sps:$4 sm:$0xff]  }
 0x263   :  { %2565 = vmatprep.mubr.bf16.mxu0 %v2197_v36  ;;  %2606 = vmatprep.mubr.bf16.mxu1 %v2199_v37  ;;  %v17508_v4 = vld [vmem:[#allocation3 + $0x164] ss:$8 sps:$4 sm:$0xff]   ;;  %v17510_v5 = vld [vmem:[#allocation3 + $0x60] ss:$8 sps:$4 sm:$0xff]   ;;  %v17512_v20 = vld [vmem:[#allocation3 + $0x54] ss:$8 sps:$4 sm:$0xff]  }
 0x264   :  { %2574 = vmatprep.subr.bf16.mxu1 %v17502_v39  ;;  %2534 = vmatpush1.bf16.msra.mxu0 %v17504_v14  ;;  %v17511_v41 = vld [vmem:[#allocation3 + $0x160] ss:$8 sps:$4 sm:$0xff]   ;;  %v17514_v0 = vld [vmem:[#allocation3 + $0x154] ss:$8 sps:$4 sm:$0xff]   ;;  %v17516_v42 = vld [vmem:[#allocation3 + $0x50] ss:$8 sps:$4 sm:$0xff]  }
 0x265   :  { %2575 = vmatpush1.bf16.msra.mxu1 %v17505_v15  ;;  %2535 = vmatprep.subr.bf16.mxu0 %v17506_v40  ;;  %v17517_v43 = vld [vmem:[#allocation3 + $0x150] ss:$8 sps:$4 sm:$0xff]   ;;  %v17518_v44 = vld [vmem:[#allocation3 + $0x44] ss:$8 sps:$4 sm:$0xff]   ;;  %v17522_v46 = vld [vmem:[#allocation3 + $0x40] ss:$8 sps:$4 sm:$0xff]  }
 0x266   :  { %2576 = vmatprep.subr.bf16.mxu1 %v17508_v4  ;;  %v17520_v45 = vld [vmem:[#allocation3 + $0x144] ss:$8 sps:$4 sm:$0xff]   ;;  %v17523_v47 = vld [vmem:[#allocation3 + $0x140] ss:$8 sps:$4 sm:$0xff]   ;;  %v17524_v48 = vld [vmem:[#allocation3 + $0x34] ss:$8 sps:$4 sm:$0xff]  }
 0x267   :  { %v17526_v49 = vld [vmem:[#allocation3 + $0x134] ss:$8 sps:$4 sm:$0xff]   ;;  %v17528_v24 = vld [vmem:[#allocation3 + $0x30] ss:$8 sps:$4 sm:$0xff]   ;;  %v17530_v25 = vld [vmem:[#allocation3 + $0x24] ss:$8 sps:$4 sm:$0xff]  }
 0x268   :  { %2536 = vmatpush1.bf16.msra.mxu0 %v17510_v5  ;;  %v17529_v50 = vld [vmem:[#allocation3 + $0x130] ss:$8 sps:$4 sm:$0xff]   ;;  %v17532_v51 = vld [vmem:[#allocation3 + $0x124] ss:$8 sps:$4 sm:$0xff]   ;;  %v17534_v52 = vld [vmem:[#allocation3 + $0x20] ss:$8 sps:$4 sm:$0xff]  }
 0x269   :  { %2577 = vmatpush1.bf16.msra.mxu1 %v17511_v41  ;;  %2537 = vmatprep.subr.bf16.mxu0 %v17512_v20  ;;  %v17535_v53 = vld [vmem:[#allocation3 + $0x120] ss:$8 sps:$4 sm:$0xff]   ;;  %v17536_v55 = vld [vmem:[#allocation3 + $0x14] ss:$8 sps:$4 sm:$0xff]   ;;  %v17540_v57 = vld [vmem:[#allocation3 + $0x10] ss:$8 sps:$4 sm:$0xff]   ;;  %v2196_v41 = vpack.c.bf16 %v18992_v54, %v18992_v54  ;;  %v2198_v20 = vpack.c.bf16 %v19002_v3, %v19002_v3 }
 0x26a   :  { %2578 = vmatprep.subr.bf16.mxu1 %v17514_v0  ;;  %v17538_v56 = vld [vmem:[#allocation3 + $0x114] ss:$8 sps:$4 sm:$0xff]   ;;  %v17541_v58 = vld [vmem:[#allocation3 + $0x110] ss:$8 sps:$4 sm:$0xff]   ;;  %v17542_v59 = vld [vmem:[#allocation3 + $0x4] ss:$8 sps:$4 sm:$0xff]  }
 0x26b   :  { %v17544_v60 = vld [vmem:[#allocation3 + $0x104] ss:$8 sps:$4 sm:$0xff]   ;;  %v17546_v61 = vld [vmem:[#allocation3] ss:$8 sps:$4 sm:$0xff]   ;;  %v17548_v63 = vld [vmem:[#allocation3 + $0xf4] ss:$8 sps:$4 sm:$0xff]  }
 0x26c   :  { %2538 = vmatpush1.bf16.msra.mxu0 %v17516_v42  ;;  %v17547_v62 = vld [vmem:[#allocation3 + $0x100] ss:$8 sps:$4 sm:$0xff]   ;;  %v17550_v6 = vld [vmem:[#allocation3 + $0x1f4] ss:$8 sps:$4 sm:$0xff]   ;;  %v17552_v9 = vld [vmem:[#allocation3 + $0xf0] ss:$8 sps:$4 sm:$0xff]  }
 0x26d   :  { %2579 = vmatpush1.bf16.msra.mxu1 %v17517_v43  ;;  %2539 = vmatprep.subr.bf16.mxu0 %v17518_v44  ;;  %v17553_v10 = vld [vmem:[#allocation3 + $0x1f0] ss:$8 sps:$4 sm:$0xff]   ;;  %v17554_v11 = vld [vmem:[#allocation3 + $0xe4] ss:$8 sps:$4 sm:$0xff]   ;;  %v17558_v13 = vld [vmem:[#allocation3 + $0xe0] ss:$8 sps:$4 sm:$0xff]  }
 0x26e   :  { %2580 = vmatprep.subr.bf16.mxu1 %v17520_v45  ;;  %v17556_v12 = vld [vmem:[#allocation3 + $0x1e4] ss:$8 sps:$4 sm:$0xff]   ;;  %v17559_v16 = vld [vmem:[#allocation3 + $0x1e0] ss:$8 sps:$4 sm:$0xff]   ;;  %v17560_v17 = vld [vmem:[#allocation3 + $0xd4] ss:$8 sps:$4 sm:$0xff]  }
 0x26f   :  { %v17562_v18 = vld [vmem:[#allocation3 + $0x1d4] ss:$8 sps:$4 sm:$0xff]   ;;  %v17564_v19 = vld [vmem:[#allocation3 + $0xd0] ss:$8 sps:$4 sm:$0xff]   ;;  %v17566_v21 = vld [vmem:[#allocation3 + $0xc4] ss:$8 sps:$4 sm:$0xff]  }
 0x270   :  { %2540 = vmatpush1.bf16.msra.mxu0 %v17522_v46  ;;  %v17565_v1 = vld [vmem:[#allocation3 + $0x1d0] ss:$8 sps:$4 sm:$0xff]   ;;  %v17568_v22 = vld [vmem:[#allocation3 + $0x1c4] ss:$8 sps:$4 sm:$0xff]   ;;  %v17570_v23 = vld [vmem:[#allocation3 + $0xc0] ss:$8 sps:$4 sm:$0xff]  }
 0x271   :  { %2581 = vmatpush1.bf16.msra.mxu1 %v17523_v47  ;;  %2541 = vmatprep.subr.bf16.mxu0 %v17524_v48  ;;  %v17571_v26 = vld [vmem:[#allocation3 + $0x1c0] ss:$8 sps:$4 sm:$0xff]   ;;  %v17572_v27 = vld [vmem:[#allocation3 + $0xb4] ss:$8 sps:$4 sm:$0xff]   ;;  %v17576_v30 = vld [vmem:[#allocation3 + $0xb0] ss:$8 sps:$4 sm:$0xff]  }
 0x272   :  { %2582 = vmatprep.subr.bf16.mxu1 %v17526_v49  ;;  %v17574_v28 = vld [vmem:[#allocation3 + $0x1b4] ss:$8 sps:$4 sm:$0xff]   ;;  %v17577_v31 = vld [vmem:[#allocation3 + $0x1b0] ss:$8 sps:$4 sm:$0xff]   ;;  %v17578_v2 = vld [vmem:[#allocation3 + $0xa4] ss:$8 sps:$4 sm:$0xff]  }
 0x273   :  { %v17580_v33 = vld [vmem:[#allocation3 + $0x1a4] ss:$8 sps:$4 sm:$0xff]   ;;  %v17582_v35 = vld [vmem:[#allocation3 + $0xa0] ss:$8 sps:$4 sm:$0xff]   ;;  %v17584_v37 = vld [vmem:[#allocation3 + $0x94] ss:$8 sps:$4 sm:$0xff]  }
 0x274   :  { %2542 = vmatpush1.bf16.msra.mxu0 %v17528_v24  ;;  %v17583_v36 = vld [vmem:[#allocation3 + $0x1a0] ss:$8 sps:$4 sm:$0xff]   ;;  %v17586_v38 = vld [vmem:[#allocation3 + $0x194] ss:$8 sps:$4 sm:$0xff]   ;;  %v17588_v39 = vld [vmem:[#allocation3 + $0x90] ss:$8 sps:$4 sm:$0xff]  }
 0x275   :  { %2583 = vmatpush1.bf16.msra.mxu1 %v17529_v50  ;;  %2543 = vmatprep.subr.bf16.mxu0 %v17530_v25  ;;  %v17589_v14 = vld [vmem:[#allocation3 + $0x190] ss:$8 sps:$4 sm:$0xff]   ;;  %v17590_v15 = vld [vmem:[#allocation3 + $0x84] ss:$8 sps:$4 sm:$0xff]   ;;  %v17594_v4 = vld [vmem:[#allocation3 + $0x80] ss:$8 sps:$4 sm:$0xff]  }
 0x276   :  { %2584 = vmatprep.subr.bf16.mxu1 %v17532_v51  ;;  %v17592_v40 = vld [vmem:[#allocation3 + $0x184] ss:$8 sps:$4 sm:$0xff]   ;;  %v17595_v5 = vld [vmem:[#allocation3 + $0x180] ss:$8 sps:$4 sm:$0xff]  }
 0x277   :  { %v2201_v0 = vld [vmem:[#allocation18 + $0x1] ss:$8 sm:$0x3] }
 0x278   :  { %2544 = vmatpush1.bf16.msra.mxu0 %v17534_v52  ;;  %v2206_v42 = vrot.slane %v2201_v0, %v18983_v32  ;;  %v2210_v43 = vrot.slane %v2201_v0, %v18986_v34 }
 0x279   :  { %2585 = vmatpush1.bf16.msra.mxu1 %v17535_v53  ;;  %2545 = vmatprep.subr.bf16.mxu0 %v17536_v55 }
 0x27a   :  { %2586 = vmatprep.subr.bf16.mxu1 %v17538_v56 }
 0x27c   :  { %2546 = vmatpush1.bf16.msra.mxu0 %v17540_v57 }
 0x27d   :  { %2587 = vmatpush1.bf16.msra.mxu1 %v17541_v58  ;;  %2547 = vmatprep.subr.bf16.mxu0 %v17542_v59 }
 0x27e   :  { %2588 = vmatprep.subr.bf16.mxu1 %v17544_v60 }
 0x280   :  { %2548 = vmatpush1.bf16.msra.mxu0 %v17546_v61 }
 0x281   :  { %2589 = vmatpush1.bf16.msra.mxu1 %v17547_v62  ;;  %2549 = vmatprep.subr.bf16.mxu0 %v17548_v63 }
 0x282   :  { %2590 = vmatprep.subr.bf16.mxu1 %v17550_v6 }
 0x284   :  { %2550 = vmatpush2.bf16.msra.mxu0 %v17552_v9 }
 0x285   :  { %2591 = vmatpush2.bf16.msra.mxu1 %v17553_v10  ;;  %2551 = vmatprep.subr.bf16.mxu0 %v17554_v11 }
 0x286   :  { %2592 = vmatprep.subr.bf16.mxu1 %v17556_v12 }
 0x288   :  { %2552 = vmatpush2.bf16.msra.mxu0 %v17558_v13 }
 0x289   :  { %2593 = vmatpush2.bf16.msra.mxu1 %v17559_v16  ;;  %2553 = vmatprep.subr.bf16.mxu0 %v17560_v17 }
 0x28a   :  { %2594 = vmatprep.subr.bf16.mxu1 %v17562_v18 }
 0x28c   :  { %2554 = vmatpush2.bf16.msra.mxu0 %v17564_v19 }
 0x28d   :  { %2595 = vmatpush2.bf16.msra.mxu1 %v17565_v1  ;;  %2555 = vmatprep.subr.bf16.mxu0 %v17566_v21 }
 0x28e   :  { %2596 = vmatprep.subr.bf16.mxu1 %v17568_v22 }
 0x290   :  { %2556 = vmatpush2.bf16.msra.mxu0 %v17570_v23 }
 0x291   :  { %2597 = vmatpush2.bf16.msra.mxu1 %v17571_v26  ;;  %2557 = vmatprep.subr.bf16.mxu0 %v17572_v27 }
 0x292   :  { %2598 = vmatprep.subr.bf16.mxu1 %v17574_v28 }
 0x294   :  { %2558 = vmatpush2.bf16.msra.mxu0 %v17576_v30 }
 0x295   :  { %2599 = vmatpush2.bf16.msra.mxu1 %v17577_v31  ;;  %2559 = vmatprep.subr.bf16.mxu0 %v17578_v2 }
 0x296   :  { %2600 = vmatprep.subr.bf16.mxu1 %v17580_v33 }
 0x298   :  { %2560 = vmatpush2.bf16.msra.mxu0 %v17582_v35 }
 0x299   :  { %2601 = vmatpush2.bf16.msra.mxu1 %v17583_v36  ;;  %2561 = vmatprep.subr.bf16.mxu0 %v17584_v37 }
 0x29a   :  { %2602 = vmatprep.subr.bf16.mxu1 %v17586_v38 }
 0x29c   :  { %2562 = vmatpush2.bf16.msra.mxu0 %v17588_v39 }
 0x29d   :  { %2603 = vmatpush2.bf16.msra.mxu1 %v17589_v14  ;;  %2563 = vmatprep.subr.bf16.mxu0 %v17590_v15 }
 0x29e   :  { %2604 = vmatprep.subr.bf16.mxu1 %v17592_v40 }
 0x2a0   :  { %2564 = vmatpush2.bf16.msra.mxu0 %v17594_v4 }
 0x2a1   :  { %2605 = vmatpush2.bf16.msra.mxu1 %v17595_v5 }
 0x2a3   :  { %2566 = vmatmul.mubr.bf16.vlgmr.msra.gmra.mxu0 %v2196_v41 }
 0x2a4   :  { %2607 = vmatmul.mubr.bf16.vlgmr.msra.gmra.mxu1 %v2198_v20 }
 0x363   :  { %v2567_v44 = vpop.f32.mrf.mxu0 }
 0x364   :  { %v2608_v45 = vpop.f32.mrf.mxu1  ;;  %v2568_v46 = vadd.f32 %v2567_v44, %v2206_v42 }
 0x365   :  { %v2569_v47 = vpop.f32.mrf.mxu0 }
 0x366   :  { %v2610_v48 = vpop.f32.mrf.mxu1  ;;  %v2609_v49 = vadd.f32 %v2608_v45, %v2568_v46  ;;  %v2570_v24 = vadd.f32 %v2569_v47, %v2210_v43 }
 0x367   :  { %v2571_v54 = vpop.f32.mrf.mxu0 }
 0x368   :  { %v2612_v50 = vpop.f32.mrf.mxu1  ;;  %vm2615_vm4 = vcmp.ge.f32.partialorder %v2609_v49, 0.0  ;;  %v2617_v3 = vmul.f32 0.2, %v2609_v49  ;;  %v2611_v25 = vadd.f32 %v2610_v48, %v2570_v24 }
 0x369   :  { %v2572_v51 = vpop.f32.mrf.mxu0 }
 0x36a   :  { %v2613_v52 = vpop.f32.mrf.mxu1  ;;  %v2619_v53 = vsel %vm2615_vm4, %v2609_v49, %v2617_v3  ;;  %vm2616_vm5 = vcmp.ge.f32.partialorder %v2611_v25, 0.0  ;;  %v2618_v55 = vmul.f32 0.2, %v2611_v25 }
 0x36c   :  { %v2620_v56 = vsel %vm2616_vm5, %v2611_v25, %v2618_v55 }
 0x36d   :  { %18772 = dma.done.wait [#allocation13 + $0x2], 2048 }
 0x36e   :  { %18773 = vsyncadd [#allocation13 + $0x2], 4294965248  ;;  %v2658_v57 = vpack.c.bf16 %v2620_v56, %v2620_v56  ;;  %v17596_v58 = vld [vmem:[#allocation4 + $0x78] sm:$0xff]   ;;  %v17598_v60 = vld [vmem:[#allocation4 + $0x70] sm:$0xff]   ;;  %v2657_v1 = vpack.c.bf16 %v2619_v53, %v2619_v53 }
 0x36f   :  { %v17597_v59 = vld [vmem:[#allocation4 + $0x38] sm:$0xff]   ;;  %17046 = vmatprep.subr.bf16.mxu0 %v17596_v58  ;;  %v17599_v61 = vld [vmem:[#allocation4 + $0x30] sm:$0xff]   ;;  %v17600_v62 = vld [vmem:[#allocation4 + $0x68] sm:$0xff]  }
 0x370   :  { %2788 = vmatprep.mubr.bf16.mxu0 %v2658_v57  ;;  %17047 = vmatpush3.bf16.msra.mxu0 %v17597_v59  ;;  %v17601_v63 = vld [vmem:[#allocation4 + $0x28] sm:$0xff]   ;;  %v17602_v6 = vld [vmem:[#allocation4 + $0x60] sm:$0xff]   ;;  %v17604_v10 = vld [vmem:[#allocation4 + $0x58] sm:$0xff]  }
 0x371   :  { %17048 = vmatprep.subr.bf16.mxu0 %v17598_v60  ;;  %v17603_v9 = vld [vmem:[#allocation4 + $0x20] sm:$0xff]   ;;  %v17605_v11 = vld [vmem:[#allocation4 + $0x18] sm:$0xff]   ;;  %v17606_v12 = vld [vmem:[#allocation4 + $0x50] sm:$0xff]  }
 0x372   :  { %v17607_v13 = vld [vmem:[#allocation4 + $0x10] sm:$0xff]   ;;  %v17608_v16 = vld [vmem:[#allocation4 + $0x48] sm:$0xff]   ;;  %v17610_v18 = vld [vmem:[#allocation4 + $0x40] sm:$0xff]  }
 0x373   :  { %v17609_v17 = vld [vmem:[#allocation4 + $0x8] sm:$0xff]   ;;  %v17611_v19 = vld [vmem:[#allocation4] sm:$0xff]  }
 0x374   :  { %17049 = vmatpush3.bf16.msra.mxu0 %v17599_v61  ;;  %v2659_v22 = vld [vmem:[#allocation18 + $0x2] ss:$0 sm:$0xff] }
 0x375   :  { %17050 = vmatprep.subr.bf16.mxu0 %v17600_v62 }
 0x378   :  { %17051 = vmatpush3.bf16.msra.mxu0 %v17601_v63 }
 0x379   :  { %17052 = vmatprep.subr.bf16.mxu0 %v17602_v6 }
 0x37c   :  { %17053 = vmatpush3.bf16.msra.mxu0 %v17603_v9 }
 0x37d   :  { %17054 = vmatprep.subr.bf16.mxu0 %v17604_v10 }
 0x380   :  { %17055 = vmatpush3.bf16.msra.mxu0 %v17605_v11 }
 0x381   :  { %17056 = vmatprep.subr.bf16.mxu0 %v17606_v12 }
 0x384   :  { %17057 = vmatpush3.bf16.msra.mxu0 %v17607_v13 }
 0x385   :  { %17058 = vmatprep.subr.bf16.mxu0 %v17608_v16 }
 0x388   :  { %17059 = vmatpush3.bf16.msra.mxu0 %v17609_v17 }
 0x389   :  { %17060 = vmatprep.subr.bf16.mxu0 %v17610_v18 }
 0x38c   :  { %17061 = vmatpush3.bf16.msra.mxu0 %v17611_v19 }
 0x38f   :  { %2789 = vmatmul.mubr.bf16.vlgmr.msra.gmra.mxu0 %v2657_v1 }
 0x44f   :  { %v17062_v21 = vpop.f32.mrf.mxu0 }
 0x451   :  { %v17063_v23 = vpop.f32.mrf.mxu0 }
 0x452   :  { %v17064_v26 = vadd.f32 %v17063_v23, %v17062_v21 }
 0x453   :  { %v17065_v27 = vpop.f32.mrf.mxu0 }
 0x454   :  { %v2791_v28 = vadd.f32 %v17064_v26, %v2659_v22 }
 0x455   :  { %v17066_v30 = vpop.f32.mrf.mxu0 }
 0x456   :  { %vm2796_vm6 = vcmp.ge.f32.partialorder %v2791_v28, 0.0  ;;  %v2797_v31 = vmul.f32 0.2, %v2791_v28 }
 0x458   :  { %v2798_v2 = vsel %vm2796_vm6, %v2791_v28, %v2797_v31 }
 0x459   :  { %18774 = dma.done.wait [#allocation13 + $0x3], 1024 }
 0x45a   :  { %18775 = vsyncadd [#allocation13 + $0x3], 4294966272  ;;  %v18806_v33 = vmov 0.0   ;;  %vm18807_vm7 = vmmov 0   ;;  %v19010_v35 = vld [vmem:[#allocation16] sm:$0xff]  ;;  %v19012_v36 = vld [vmem:[#allocation16 + $0x8] sm:$0xff]  ;;  %v2819_v45 = vpack.c.bf16 %v2798_v2, %v2798_v2 }
 0x45b   :  { %17077 = vmatprep.subr.bf16.mxu1 %v18806_v33  ;;  %17093 = vmatprep.mubr.msk.bf16.mxu1 %vm18807_vm7, %v18806_v33  ;;  %v19014_v37 = vld [vmem:[#allocation16 + $0x10] sm:$0xff]  ;;  %v19016_v38 = vld [vmem:[#allocation16 + $0x18] sm:$0xff]  ;;  %v19018_v39 = vld [vmem:[#allocation16 + $0x20] sm:$0xff] }
 0x45c   :  { %v19020_v14 = vld [vmem:[#allocation16 + $0x28] sm:$0xff]  ;;  %v19022_v15 = vld [vmem:[#allocation16 + $0x30] sm:$0xff]  ;;  %v19024_v40 = vld [vmem:[#allocation16 + $0x38] sm:$0xff] }
 0x45d   :  { %v17612_v4 = vld [vmem:[#allocation5 + $0x38] sm:$0xff]   ;;  %v17613_v5 = vld [vmem:[#allocation5 + $0x30] sm:$0xff]   ;;  %v17614_v41 = vld [vmem:[#allocation5 + $0x28] sm:$0xff]  }
 0x45e   :  { %17078 = vmatpush3.bf16.msra.mxu1 %v17612_v4  ;;  %v17615_v20 = vld [vmem:[#allocation5 + $0x20] sm:$0xff]   ;;  %v17616_v0 = vld [vmem:[#allocation5 + $0x18] sm:$0xff]   ;;  %v17617_v42 = vld [vmem:[#allocation5 + $0x10] sm:$0xff]  }
 0x45f   :  { %17079 = vmatprep.subr.bf16.mxu1 %v18806_v33  ;;  %v17618_v43 = vld [vmem:[#allocation5 + $0x8] sm:$0xff]   ;;  %v17619_v44 = vld [vmem:[#allocation5] sm:$0xff]  }
 0x460   :  { %v2820_v46 = vld [vmem:[#allocation18 + $0x3] ss:$0 sm:$0xff] }
 0x462   :  { %17080 = vmatpush3.bf16.msra.mxu1 %v17613_v5 }
 0x463   :  { %17081 = vmatprep.subr.bf16.mxu1 %v18806_v33 }
 0x466   :  { %17082 = vmatpush3.bf16.msra.mxu1 %v17614_v41 }
 0x467   :  { %17083 = vmatprep.subr.bf16.mxu1 %v18806_v33 }
 0x46a   :  { %17084 = vmatpush3.bf16.msra.mxu1 %v17615_v20 }
 0x46b   :  { %17085 = vmatprep.subr.bf16.mxu1 %v18806_v33 }
 0x46e   :  { %17086 = vmatpush3.bf16.msra.mxu1 %v17616_v0 }
 0x46f   :  { %17087 = vmatprep.subr.bf16.mxu1 %v18806_v33 }
 0x472   :  { %17088 = vmatpush3.bf16.msra.mxu1 %v17617_v42 }
 0x473   :  { %17089 = vmatprep.subr.bf16.mxu1 %v18806_v33 }
 0x476   :  { %17090 = vmatpush3.bf16.msra.mxu1 %v17618_v43 }
 0x477   :  { %17091 = vmatprep.subr.bf16.mxu1 %v18806_v33 }
 0x47a   :  { %17092 = vmatpush3.bf16.msra.mxu1 %v17619_v44 }
 0x47d   :  { %17094 = vmatmul.mubr.bf16.vlgmr.msra.gmra.mxu1 %v2819_v45 }
 0x53d   :  { %v2903_v47 = vpop.f32.mrf.mxu1 }
 0x53e   :  { %v2904_v48 = vadd.f32 %v2903_v47, %v2820_v46 }
 0x53f   :  { %v17095_v49 = vpop.f32.mrf.mxu1 }
 0x540   :  { %vm2909_vm8 = vcmp.ge.f32.partialorder %v2904_v48, 0.0  ;;  %v2910_v24 = vmul.f32 0.2, %v2904_v48 }
 0x541   :  { %v2906_v54 = vpop.f32.mrf.mxu1 }
 0x542   :  { %v19026_v50 = vsel %vm2909_vm8, %v2904_v48, %v2910_v24 }
 0x543   :  { %v17096_v3 = vpop.f32.mrf.mxu1 }
 0x544   :  { %18776 = dma.done.wait [#allocation13 + $0x4], 131072 }
 0x545   :  { %18777 = vsyncadd [#allocation13 + $0x4], 4294836224  ;;  %v19030_v25 = vcombine.high %v19010_v35, %v19010_v35  ;;  %v19034_v51 = vcombine.high %v19012_v36, %v19012_v36  ;;  %v2980_v52 = vld [vmem:[#allocation6 + $0x1c0] sm:$0xff] }
 0x546   :  { %v2984_v53 = vld [vmem:[#allocation6 + $0x1e0] sm:$0xff] }
 0x547   :  { %9201 = vmatprep.mubr.bf16.mxu0 %v19030_v25  ;;  %9242 = vmatprep.mubr.bf16.mxu1 %v19034_v51  ;;  %v3108_v55 = vld [vmem:[#allocation6 + $0x5c0] sm:$0xff]  ;;  %v15492_v56 = vcombine.high %v2980_v52, %v2984_v53  ;;  %v15491_v58 = vcombine.low %v2980_v52, %v2984_v53 }
 0x548   :  { %v3112_v57 = vld [vmem:[#allocation6 + $0x5e0] sm:$0xff] }
 0x549   :  { %v2972_v59 = vld [vmem:[#allocation6 + $0x180] sm:$0xff]  ;;  %v15620_v61 = vcombine.high %v3108_v55, %v3112_v57  ;;  %v15619_v62 = vcombine.low %v3108_v55, %v3112_v57  ;;  %9169 = vmatprep.subr.bf16.mxu0 %v15492_v56 }
 0x54a   :  { %v2976_v60 = vld [vmem:[#allocation6 + $0x1a0] sm:$0xff]  ;;  %9170 = vmatpush1.bf16.msra.mxu0 %v15491_v58 }
 0x54b   :  { %v15484_v63 = vcombine.high %v2972_v59, %v2976_v60  ;;  %v3100_v6 = vld [vmem:[#allocation6 + $0x580] sm:$0xff]  ;;  %9210 = vmatprep.subr.bf16.mxu1 %v15620_v61  ;;  %v15483_v17 = vcombine.low %v2972_v59, %v2976_v60 }
 0x54c   :  { %v3104_v9 = vld [vmem:[#allocation6 + $0x5a0] sm:$0xff]  ;;  %9211 = vmatpush1.bf16.msra.mxu1 %v15619_v62 }
 0x54d   :  { %v2964_v10 = vld [vmem:[#allocation6 + $0x140] sm:$0xff]  ;;  %v15612_v11 = vcombine.high %v3100_v6, %v3104_v9  ;;  %9171 = vmatprep.subr.bf16.mxu0 %v15484_v63  ;;  %v15611_v18 = vcombine.low %v3100_v6, %v3104_v9 }
 0x54e   :  { %v2968_v12 = vld [vmem:[#allocation6 + $0x160] sm:$0xff]  ;;  %9172 = vmatpush1.bf16.msra.mxu0 %v15483_v17 }
 0x54f   :  { %v3092_v13 = vld [vmem:[#allocation6 + $0x540] sm:$0xff]  ;;  %v15476_v19 = vcombine.high %v2964_v10, %v2968_v12  ;;  %9212 = vmatprep.subr.bf16.mxu1 %v15612_v11  ;;  %v15475_v27 = vcombine.low %v2964_v10, %v2968_v12 }
 0x550   :  { %v3096_v16 = vld [vmem:[#allocation6 + $0x560] sm:$0xff]  ;;  %9213 = vmatpush1.bf16.msra.mxu1 %v15611_v18 }
 0x551   :  { %v15604_v1 = vcombine.high %v3092_v13, %v3096_v16  ;;  %v2956_v21 = vld [vmem:[#allocation6 + $0x100] sm:$0xff]  ;;  %9173 = vmatprep.subr.bf16.mxu0 %v15476_v19  ;;  %v15603_v28 = vcombine.low %v3092_v13, %v3096_v16 }
 0x552   :  { %v2960_v22 = vld [vmem:[#allocation6 + $0x120] sm:$0xff]  ;;  %9174 = vmatpush1.bf16.msra.mxu0 %v15475_v27 }
 0x553   :  { %v3084_v23 = vld [vmem:[#allocation6 + $0x500] sm:$0xff]  ;;  %v15468_v30 = vcombine.high %v2956_v21, %v2960_v22  ;;  %9214 = vmatprep.subr.bf16.mxu1 %v15604_v1  ;;  %v15467_v41 = vcombine.low %v2956_v21, %v2960_v22 }
 0x554   :  { %v3088_v26 = vld [vmem:[#allocation6 + $0x520] sm:$0xff]  ;;  %9215 = vmatpush1.bf16.msra.mxu1 %v15603_v28 }
 0x555   :  { %v15596_v31 = vcombine.high %v3084_v23, %v3088_v26  ;;  %v2948_v2 = vld [vmem:[#allocation6 + $0xc0] sm:$0xff]  ;;  %9175 = vmatprep.subr.bf16.mxu0 %v15468_v30  ;;  %v15595_v20 = vcombine.low %v3084_v23, %v3088_v26 }
 0x556   :  { %v2952_v33 = vld [vmem:[#allocation6 + $0xe0] sm:$0xff]  ;;  %9176 = vmatpush1.bf16.msra.mxu0 %v15467_v41 }
 0x557   :  { %v3076_v4 = vld [vmem:[#allocation6 + $0x4c0] sm:$0xff]  ;;  %v15460_v0 = vcombine.high %v2948_v2, %v2952_v33  ;;  %9216 = vmatprep.subr.bf16.mxu1 %v15596_v31  ;;  %v15459_v47 = vcombine.low %v2948_v2, %v2952_v33 }
 0x558   :  { %v3080_v5 = vld [vmem:[#allocation6 + $0x4e0] sm:$0xff]  ;;  %9217 = vmatpush1.bf16.msra.mxu1 %v15595_v20 }
 0x559   :  { %v15588_v42 = vcombine.high %v3076_v4, %v3080_v5  ;;  %v2940_v43 = vld [vmem:[#allocation6 + $0x80] sm:$0xff]  ;;  %9177 = vmatprep.subr.bf16.mxu0 %v15460_v0  ;;  %v15587_v48 = vcombine.low %v3076_v4, %v3080_v5 }
 0x55a   :  { %v2944_v44 = vld [vmem:[#allocation6 + $0xa0] sm:$0xff]  ;;  %9178 = vmatpush1.bf16.msra.mxu0 %v15459_v47 }
 0x55b   :  { %v3068_v45 = vld [vmem:[#allocation6 + $0x480] sm:$0xff]  ;;  %v15452_v49 = vcombine.high %v2940_v43, %v2944_v44  ;;  %9218 = vmatprep.subr.bf16.mxu1 %v15588_v42  ;;  %v15451_v55 = vcombine.low %v2940_v43, %v2944_v44 }
 0x55c   :  { %v3072_v46 = vld [vmem:[#allocation6 + $0x4a0] sm:$0xff]  ;;  %9219 = vmatpush1.bf16.msra.mxu1 %v15587_v48 }
 0x55d   :  { %v15580_v24 = vcombine.high %v3068_v45, %v3072_v46  ;;  %v2932_v54 = vld [vmem:[#allocation6 + $0x40] sm:$0xff]  ;;  %9179 = vmatprep.subr.bf16.mxu0 %v15452_v49  ;;  %v15579_v56 = vcombine.low %v3068_v45, %v3072_v46 }
 0x55e   :  { %v2936_v3 = vld [vmem:[#allocation6 + $0x60] sm:$0xff]  ;;  %9180 = vmatpush1.bf16.msra.mxu0 %v15451_v55 }
 0x55f   :  { %v3060_v52 = vld [vmem:[#allocation6 + $0x440] sm:$0xff]  ;;  %v15444_v57 = vcombine.high %v2932_v54, %v2936_v3  ;;  %9220 = vmatprep.subr.bf16.mxu1 %v15580_v24  ;;  %v15443_v63 = vcombine.low %v2932_v54, %v2936_v3 }
 0x560   :  { %v3064_v53 = vld [vmem:[#allocation6 + $0x460] sm:$0xff]  ;;  %9221 = vmatpush1.bf16.msra.mxu1 %v15579_v56 }
 0x561   :  { %v15572_v58 = vcombine.high %v3060_v52, %v3064_v53  ;;  %v2924_v59 = vld [vmem:[#allocation6] sm:$0xff]  ;;  %9181 = vmatprep.subr.bf16.mxu0 %v15444_v57  ;;  %v15571_v6 = vcombine.low %v3060_v52, %v3064_v53 }
 0x562   :  { %v2928_v60 = vld [vmem:[#allocation6 + $0x20] sm:$0xff]  ;;  %9182 = vmatpush1.bf16.msra.mxu0 %v15443_v63 }
 0x563   :  { %v3052_v61 = vld [vmem:[#allocation6 + $0x400] sm:$0xff]  ;;  %v15436_v9 = vcombine.high %v2924_v59, %v2928_v60  ;;  %9222 = vmatprep.subr.bf16.mxu1 %v15572_v58  ;;  %v15435_v17 = vcombine.low %v2924_v59, %v2928_v60 }
 0x564   :  { %v3056_v62 = vld [vmem:[#allocation6 + $0x420] sm:$0xff]  ;;  %9223 = vmatpush1.bf16.msra.mxu1 %v15571_v6 }
 0x565   :  { %v15564_v10 = vcombine.high %v3052_v61, %v3056_v62  ;;  %v3044_v11 = vld [vmem:[#allocation6 + $0x3c0] sm:$0xff]  ;;  %9183 = vmatprep.subr.bf16.mxu0 %v15436_v9  ;;  %v15563_v18 = vcombine.low %v3052_v61, %v3056_v62 }
 0x566   :  { %v3048_v12 = vld [vmem:[#allocation6 + $0x3e0] sm:$0xff]  ;;  %9184 = vmatpush1.bf16.msra.mxu0 %v15435_v17 }
 0x567   :  { %v3172_v13 = vld [vmem:[#allocation6 + $0x7c0] sm:$0xff]  ;;  %v15556_v19 = vcombine.high %v3044_v11, %v3048_v12  ;;  %9224 = vmatprep.subr.bf16.mxu1 %v15564_v10  ;;  %v15555_v27 = vcombine.low %v3044_v11, %v3048_v12 }
 0x568   :  { %v3176_v16 = vld [vmem:[#allocation6 + $0x7e0] sm:$0xff]  ;;  %9225 = vmatpush1.bf16.msra.mxu1 %v15563_v18 }
 0x569   :  { %v15684_v1 = vcombine.high %v3172_v13, %v3176_v16  ;;  %v3036_v21 = vld [vmem:[#allocation6 + $0x380] sm:$0xff]  ;;  %9185 = vmatprep.subr.bf16.mxu0 %v15556_v19  ;;  %v15683_v28 = vcombine.low %v3172_v13, %v3176_v16 }
 0x56a   :  { %v3040_v22 = vld [vmem:[#allocation6 + $0x3a0] sm:$0xff]  ;;  %9186 = vmatpush2.bf16.msra.mxu0 %v15555_v27 }
 0x56b   :  { %v3164_v23 = vld [vmem:[#allocation6 + $0x780] sm:$0xff]  ;;  %v15548_v30 = vcombine.high %v3036_v21, %v3040_v22  ;;  %9226 = vmatprep.subr.bf16.mxu1 %v15684_v1  ;;  %v15547_v41 = vcombine.low %v3036_v21, %v3040_v22 }
 0x56c   :  { %v3168_v26 = vld [vmem:[#allocation6 + $0x7a0] sm:$0xff]  ;;  %9227 = vmatpush2.bf16.msra.mxu1 %v15683_v28 }
 0x56d   :  { %v15676_v31 = vcombine.high %v3164_v23, %v3168_v26  ;;  %v3028_v2 = vld [vmem:[#allocation6 + $0x340] sm:$0xff]  ;;  %9187 = vmatprep.subr.bf16.mxu0 %v15548_v30  ;;  %v15675_v20 = vcombine.low %v3164_v23, %v3168_v26 }
 0x56e   :  { %v3032_v33 = vld [vmem:[#allocation6 + $0x360] sm:$0xff]  ;;  %9188 = vmatpush2.bf16.msra.mxu0 %v15547_v41 }
 0x56f   :  { %v3156_v4 = vld [vmem:[#allocation6 + $0x740] sm:$0xff]  ;;  %v15540_v0 = vcombine.high %v3028_v2, %v3032_v33  ;;  %9228 = vmatprep.subr.bf16.mxu1 %v15676_v31  ;;  %v15539_v47 = vcombine.low %v3028_v2, %v3032_v33 }
 0x570   :  { %v3160_v5 = vld [vmem:[#allocation6 + $0x760] sm:$0xff]  ;;  %9229 = vmatpush2.bf16.msra.mxu1 %v15675_v20 }
 0x571   :  { %v15668_v42 = vcombine.high %v3156_v4, %v3160_v5  ;;  %v3020_v43 = vld [vmem:[#allocation6 + $0x300] sm:$0xff]  ;;  %9189 = vmatprep.subr.bf16.mxu0 %v15540_v0  ;;  %v15667_v48 = vcombine.low %v3156_v4, %v3160_v5 }
 0x572   :  { %v3024_v44 = vld [vmem:[#allocation6 + $0x320] sm:$0xff]  ;;  %9190 = vmatpush2.bf16.msra.mxu0 %v15539_v47 }
 0x573   :  { %v3148_v45 = vld [vmem:[#allocation6 + $0x700] sm:$0xff]  ;;  %v15532_v49 = vcombine.high %v3020_v43, %v3024_v44  ;;  %9230 = vmatprep.subr.bf16.mxu1 %v15668_v42  ;;  %v15531_v55 = vcombine.low %v3020_v43, %v3024_v44 }
 0x574   :  { %v3152_v46 = vld [vmem:[#allocation6 + $0x720] sm:$0xff]  ;;  %9231 = vmatpush2.bf16.msra.mxu1 %v15667_v48  ;;  %v19044_v48 = vcombine.low %v19012_v36, %v19012_v36  ;;  %v19053_v36 = vcombine.high %v19016_v38, %v19016_v38 }
 0x575   :  { %v15660_v24 = vcombine.high %v3148_v45, %v3152_v46  ;;  %v3012_v54 = vld [vmem:[#allocation6 + $0x2c0] sm:$0xff]  ;;  %9191 = vmatprep.subr.bf16.mxu0 %v15532_v49  ;;  %v15659_v56 = vcombine.low %v3148_v45, %v3152_v46  ;;  %v19040_v45 = vcombine.low %v19010_v35, %v19010_v35  ;;  %v19048_v35 = vcombine.high %v19014_v37, %v19014_v37 }
 0x576   :  { %v3016_v3 = vld [vmem:[#allocation6 + $0x2e0] sm:$0xff]  ;;  %9192 = vmatpush2.bf16.msra.mxu0 %v15531_v55 }
 0x577   :  { %v3140_v52 = vld [vmem:[#allocation6 + $0x6c0] sm:$0xff]  ;;  %v15524_v57 = vcombine.high %v3012_v54, %v3016_v3  ;;  %9232 = vmatprep.subr.bf16.mxu1 %v15660_v24  ;;  %v15523_v63 = vcombine.low %v3012_v54, %v3016_v3 }
 0x578   :  { %v3144_v53 = vld [vmem:[#allocation6 + $0x6e0] sm:$0xff]  ;;  %9233 = vmatpush2.bf16.msra.mxu1 %v15659_v56 }
 0x579   :  { %v15652_v58 = vcombine.high %v3140_v52, %v3144_v53  ;;  %v3004_v59 = vld [vmem:[#allocation6 + $0x280] sm:$0xff]  ;;  %9193 = vmatprep.subr.bf16.mxu0 %v15524_v57  ;;  %v15651_v6 = vcombine.low %v3140_v52, %v3144_v53 }
 0x57a   :  { %v3008_v60 = vld [vmem:[#allocation6 + $0x2a0] sm:$0xff]  ;;  %9194 = vmatpush2.bf16.msra.mxu0 %v15523_v63 }
 0x57b   :  { %v3132_v61 = vld [vmem:[#allocation6 + $0x680] sm:$0xff]  ;;  %v15516_v9 = vcombine.high %v3004_v59, %v3008_v60  ;;  %9234 = vmatprep.subr.bf16.mxu1 %v15652_v58  ;;  %v15515_v17 = vcombine.low %v3004_v59, %v3008_v60 }
 0x57c   :  { %v3136_v62 = vld [vmem:[#allocation6 + $0x6a0] sm:$0xff]  ;;  %9235 = vmatpush2.bf16.msra.mxu1 %v15651_v6 }
 0x57d   :  { %v15644_v10 = vcombine.high %v3132_v61, %v3136_v62  ;;  %v2996_v11 = vld [vmem:[#allocation6 + $0x240] sm:$0xff]  ;;  %9195 = vmatprep.subr.bf16.mxu0 %v15516_v9  ;;  %v15643_v18 = vcombine.low %v3132_v61, %v3136_v62 }
 0x57e   :  { %v3000_v12 = vld [vmem:[#allocation6 + $0x260] sm:$0xff]  ;;  %9196 = vmatpush2.bf16.msra.mxu0 %v15515_v17 }
 0x57f   :  { %v3124_v13 = vld [vmem:[#allocation6 + $0x640] sm:$0xff]  ;;  %v15508_v19 = vcombine.high %v2996_v11, %v3000_v12  ;;  %9236 = vmatprep.subr.bf16.mxu1 %v15644_v10  ;;  %v15507_v27 = vcombine.low %v2996_v11, %v3000_v12 }
 0x580   :  { %v3128_v16 = vld [vmem:[#allocation6 + $0x660] sm:$0xff]  ;;  %9237 = vmatpush2.bf16.msra.mxu1 %v15643_v18 }
 0x581   :  { %v15636_v1 = vcombine.high %v3124_v13, %v3128_v16  ;;  %v2988_v21 = vld [vmem:[#allocation6 + $0x200] sm:$0xff]  ;;  %9197 = vmatprep.subr.bf16.mxu0 %v15508_v19  ;;  %v15635_v28 = vcombine.low %v3124_v13, %v3128_v16 }
 0x582   :  { %v2992_v22 = vld [vmem:[#allocation6 + $0x220] sm:$0xff]  ;;  %9198 = vmatpush2.bf16.msra.mxu0 %v15507_v27 }
 0x583   :  { %v3116_v23 = vld [vmem:[#allocation6 + $0x600] sm:$0xff]  ;;  %v15500_v30 = vcombine.high %v2988_v21, %v2992_v22  ;;  %9238 = vmatprep.subr.bf16.mxu1 %v15636_v1  ;;  %v15499_v41 = vcombine.low %v2988_v21, %v2992_v22 }
 0x584   :  { %v3120_v26 = vld [vmem:[#allocation6 + $0x620] sm:$0xff]  ;;  %9239 = vmatpush2.bf16.msra.mxu1 %v15635_v28 }
 0x585   :  { %v15628_v31 = vcombine.high %v3116_v23, %v3120_v26  ;;  %v3236_v2 = vld [vmem:[#allocation6 + $0x9c0] sm:$0xff]  ;;  %9199 = vmatprep.subr.bf16.mxu0 %v15500_v30  ;;  %v15627_v20 = vcombine.low %v3116_v23, %v3120_v26 }
 0x586   :  { %v3240_v33 = vld [vmem:[#allocation6 + $0x9e0] sm:$0xff]  ;;  %9200 = vmatpush2.bf16.msra.mxu0 %v15499_v41 }
 0x587   :  { %v3364_v4 = vld [vmem:[#allocation6 + $0xdc0] sm:$0xff]  ;;  %v15748_v0 = vcombine.high %v3236_v2, %v3240_v33  ;;  %9240 = vmatprep.subr.bf16.mxu1 %v15628_v31  ;;  %v15747_v49 = vcombine.low %v3236_v2, %v3240_v33 }
 0x588   :  { %v3368_v5 = vld [vmem:[#allocation6 + $0xde0] sm:$0xff]  ;;  %9241 = vmatpush2.bf16.msra.mxu1 %v15627_v20 }
 0x589   :  { %v15876_v42 = vcombine.high %v3364_v4, %v3368_v5  ;;  %v3228_v43 = vld [vmem:[#allocation6 + $0x980] sm:$0xff]  ;;  %9251 = vmatprep.subr.bf16.mxu0 %v15748_v0  ;;  %v15875_v24 = vcombine.low %v3364_v4, %v3368_v5  ;;  %9202 = vmatmul.mubr.bf16.vlgmr.msra.gmra.mxu0 %v19040_v45 }
 0x58a   :  { %v3232_v44 = vld [vmem:[#allocation6 + $0x9a0] sm:$0xff]  ;;  %9252 = vmatpush1.bf16.msra.mxu0 %v15747_v49  ;;  %9283 = vmatprep.mubr.bf16.mxu0 %v19048_v35 }
 0x58b   :  { %v3356_v46 = vld [vmem:[#allocation6 + $0xd80] sm:$0xff]  ;;  %v15740_v54 = vcombine.high %v3228_v43, %v3232_v44  ;;  %9292 = vmatprep.subr.bf16.mxu1 %v15876_v42  ;;  %9243 = vmatmul.mubr.bf16.vlgmr.msra.gmra.mxu1 %v19044_v48  ;;  %v15739_v57 = vcombine.low %v3228_v43, %v3232_v44 }
 0x58c   :  { %v3360_v47 = vld [vmem:[#allocation6 + $0xda0] sm:$0xff]  ;;  %9293 = vmatpush1.bf16.msra.mxu1 %v15875_v24  ;;  %9324 = vmatprep.mubr.bf16.mxu1 %v19053_v36 }
 0x58d   :  { %v15868_v3 = vcombine.high %v3356_v46, %v3360_v47  ;;  %v3220_v52 = vld [vmem:[#allocation6 + $0x940] sm:$0xff]  ;;  %9253 = vmatprep.subr.bf16.mxu0 %v15740_v54  ;;  %v15867_v58 = vcombine.low %v3356_v46, %v3360_v47 }
 0x58e   :  { %v3224_v53 = vld [vmem:[#allocation6 + $0x960] sm:$0xff]  ;;  %9254 = vmatpush1.bf16.msra.mxu0 %v15739_v57 }
 0x58f   :  { %v3348_v55 = vld [vmem:[#allocation6 + $0xd40] sm:$0xff]  ;;  %v15732_v59 = vcombine.high %v3220_v52, %v3224_v53  ;;  %9294 = vmatprep.subr.bf16.mxu1 %v15868_v3  ;;  %v15731_v9 = vcombine.low %v3220_v52, %v3224_v53 }
 0x590   :  { %v3352_v56 = vld [vmem:[#allocation6 + $0xd60] sm:$0xff]  ;;  %9295 = vmatpush1.bf16.msra.mxu1 %v15867_v58 }
 0x591   :  { %v15860_v60 = vcombine.high %v3348_v55, %v3352_v56  ;;  %v3212_v61 = vld [vmem:[#allocation6 + $0x900] sm:$0xff]  ;;  %9255 = vmatprep.subr.bf16.mxu0 %v15732_v59  ;;  %v15859_v10 = vcombine.low %v3348_v55, %v3352_v56 }
 0x592   :  { %v3216_v62 = vld [vmem:[#allocation6 + $0x920] sm:$0xff]  ;;  %9256 = vmatpush1.bf16.msra.mxu0 %v15731_v9 }
 0x593   :  { %v3340_v63 = vld [vmem:[#allocation6 + $0xd00] sm:$0xff]  ;;  %v15724_v11 = vcombine.high %v3212_v61, %v3216_v62  ;;  %9296 = vmatprep.subr.bf16.mxu1 %v15860_v60  ;;  %v15723_v19 = vcombine.low %v3212_v61, %v3216_v62 }
 0x594   :  { %v3344_v6 = vld [vmem:[#allocation6 + $0xd20] sm:$0xff]  ;;  %9297 = vmatpush1.bf16.msra.mxu1 %v15859_v10 }
 0x595   :  { %v15852_v12 = vcombine.high %v3340_v63, %v3344_v6  ;;  %v3204_v13 = vld [vmem:[#allocation6 + $0x8c0] sm:$0xff]  ;;  %9257 = vmatprep.subr.bf16.mxu0 %v15724_v11  ;;  %v15851_v1 = vcombine.low %v3340_v63, %v3344_v6 }
 0x596   :  { %v3208_v16 = vld [vmem:[#allocation6 + $0x8e0] sm:$0xff]  ;;  %9258 = vmatpush1.bf16.msra.mxu0 %v15723_v19 }
 0x597   :  { %v3332_v17 = vld [vmem:[#allocation6 + $0xcc0] sm:$0xff]  ;;  %v15716_v21 = vcombine.high %v3204_v13, %v3208_v16  ;;  %9298 = vmatprep.subr.bf16.mxu1 %v15852_v12  ;;  %v15715_v30 = vcombine.low %v3204_v13, %v3208_v16 }
 0x598   :  { %v3336_v18 = vld [vmem:[#allocation6 + $0xce0] sm:$0xff]  ;;  %9299 = vmatpush1.bf16.msra.mxu1 %v15851_v1 }
 0x599   :  { %v15844_v22 = vcombine.high %v3332_v17, %v3336_v18  ;;  %v3196_v23 = vld [vmem:[#allocation6 + $0x880] sm:$0xff]  ;;  %9259 = vmatprep.subr.bf16.mxu0 %v15716_v21  ;;  %v15843_v31 = vcombine.low %v3332_v17, %v3336_v18 }
 0x59a   :  { %v3200_v26 = vld [vmem:[#allocation6 + $0x8a0] sm:$0xff]  ;;  %9260 = vmatpush1.bf16.msra.mxu0 %v15715_v30 }
 0x59b   :  { %v3324_v27 = vld [vmem:[#allocation6 + $0xc80] sm:$0xff]  ;;  %v15708_v2 = vcombine.high %v3196_v23, %v3200_v26  ;;  %9300 = vmatprep.subr.bf16.mxu1 %v15844_v22  ;;  %v15707_v0 = vcombine.low %v3196_v23, %v3200_v26 }
 0x59c   :  { %v3328_v28 = vld [vmem:[#allocation6 + $0xca0] sm:$0xff]  ;;  %9301 = vmatpush1.bf16.msra.mxu1 %v15843_v31 }
 0x59d   :  { %v15836_v33 = vcombine.high %v3324_v27, %v3328_v28  ;;  %v3188_v4 = vld [vmem:[#allocation6 + $0x840] sm:$0xff]  ;;  %9261 = vmatprep.subr.bf16.mxu0 %v15708_v2  ;;  %v15835_v42 = vcombine.low %v3324_v27, %v3328_v28 }
 0x59e   :  { %v3192_v5 = vld [vmem:[#allocation6 + $0x860] sm:$0xff]  ;;  %9262 = vmatpush1.bf16.msra.mxu0 %v15707_v0 }
 0x59f   :  { %v3316_v41 = vld [vmem:[#allocation6 + $0xc40] sm:$0xff]  ;;  %v15700_v43 = vcombine.high %v3188_v4, %v3192_v5  ;;  %9302 = vmatprep.subr.bf16.mxu1 %v15836_v33  ;;  %v15699_v54 = vcombine.low %v3188_v4, %v3192_v5 }
 0x5a0   :  { %v3320_v20 = vld [vmem:[#allocation6 + $0xc60] sm:$0xff]  ;;  %9303 = vmatpush1.bf16.msra.mxu1 %v15835_v42 }
 0x5a1   :  { %v15828_v44 = vcombine.high %v3316_v41, %v3320_v20  ;;  %v3180_v46 = vld [vmem:[#allocation6 + $0x800] sm:$0xff]  ;;  %9263 = vmatprep.subr.bf16.mxu0 %v15700_v43  ;;  %v15827_v3 = vcombine.low %v3316_v41, %v3320_v20 }
 0x5a2   :  { %v3184_v47 = vld [vmem:[#allocation6 + $0x820] sm:$0xff]  ;;  %9264 = vmatpush1.bf16.msra.mxu0 %v15699_v54 }
 0x5a3   :  { %v3308_v49 = vld [vmem:[#allocation6 + $0xc00] sm:$0xff]  ;;  %v15692_v52 = vcombine.high %v3180_v46, %v3184_v47  ;;  %9304 = vmatprep.subr.bf16.mxu1 %v15828_v44  ;;  %v15691_v59 = vcombine.low %v3180_v46, %v3184_v47 }
 0x5a4   :  { %v3312_v24 = vld [vmem:[#allocation6 + $0xc20] sm:$0xff]  ;;  %9305 = vmatpush1.bf16.msra.mxu1 %v15827_v3 }
 0x5a5   :  { %v15820_v53 = vcombine.high %v3308_v49, %v3312_v24  ;;  %v3300_v55 = vld [vmem:[#allocation6 + $0xbc0] sm:$0xff]  ;;  %9265 = vmatprep.subr.bf16.mxu0 %v15692_v52  ;;  %v15819_v60 = vcombine.low %v3308_v49, %v3312_v24 }
 0x5a6   :  { %v3304_v56 = vld [vmem:[#allocation6 + $0xbe0] sm:$0xff]  ;;  %9266 = vmatpush1.bf16.msra.mxu0 %v15691_v59 }
 0x5a7   :  { %v3428_v57 = vld [vmem:[#allocation6 + $0xfc0] sm:$0xff]  ;;  %v15812_v61 = vcombine.high %v3300_v55, %v3304_v56  ;;  %9306 = vmatprep.subr.bf16.mxu1 %v15820_v53  ;;  %v15811_v11 = vcombine.low %v3300_v55, %v3304_v56 }
 0x5a8   :  { %v3432_v58 = vld [vmem:[#allocation6 + $0xfe0] sm:$0xff]  ;;  %9307 = vmatpush1.bf16.msra.mxu1 %v15819_v60 }
 0x5a9   :  { %v15940_v62 = vcombine.high %v3428_v57, %v3432_v58  ;;  %v3292_v63 = vld [vmem:[#allocation6 + $0xb80] sm:$0xff]  ;;  %9267 = vmatprep.subr.bf16.mxu0 %v15812_v61  ;;  %v15939_v12 = vcombine.low %v3428_v57, %v3432_v58 }
 0x5aa   :  { %v3296_v6 = vld [vmem:[#allocation6 + $0xba0] sm:$0xff]  ;;  %9268 = vmatpush2.bf16.msra.mxu0 %v15811_v11 }
 0x5ab   :  { %v3420_v9 = vld [vmem:[#allocation6 + $0xf80] sm:$0xff]  ;;  %v15804_v13 = vcombine.high %v3292_v63, %v3296_v6  ;;  %9308 = vmatprep.subr.bf16.mxu1 %v15940_v62  ;;  %v15803_v21 = vcombine.low %v3292_v63, %v3296_v6 }
 0x5ac   :  { %v3424_v10 = vld [vmem:[#allocation6 + $0xfa0] sm:$0xff]  ;;  %9309 = vmatpush2.bf16.msra.mxu1 %v15939_v12 }
 0x5ad   :  { %v15932_v16 = vcombine.high %v3420_v9, %v3424_v10  ;;  %v3284_v17 = vld [vmem:[#allocation6 + $0xb40] sm:$0xff]  ;;  %9269 = vmatprep.subr.bf16.mxu0 %v15804_v13  ;;  %v15931_v22 = vcombine.low %v3420_v9, %v3424_v10 }
 0x5ae   :  { %v3288_v18 = vld [vmem:[#allocation6 + $0xb60] sm:$0xff]  ;;  %9270 = vmatpush2.bf16.msra.mxu0 %v15803_v21 }
 0x5af   :  { %v3412_v19 = vld [vmem:[#allocation6 + $0xf40] sm:$0xff]  ;;  %v15796_v23 = vcombine.high %v3284_v17, %v3288_v18  ;;  %9310 = vmatprep.subr.bf16.mxu1 %v15932_v16  ;;  %v15795_v2 = vcombine.low %v3284_v17, %v3288_v18 }
 0x5b0   :  { %v3416_v1 = vld [vmem:[#allocation6 + $0xf60] sm:$0xff]  ;;  %9311 = vmatpush2.bf16.msra.mxu1 %v15931_v22 }
 0x5b1   :  { %v15924_v26 = vcombine.high %v3412_v19, %v3416_v1  ;;  %v3276_v27 = vld [vmem:[#allocation6 + $0xb00] sm:$0xff]  ;;  %9271 = vmatprep.subr.bf16.mxu0 %v15796_v23  ;;  %v15923_v33 = vcombine.low %v3412_v19, %v3416_v1 }
 0x5b2   :  { %v3280_v28 = vld [vmem:[#allocation6 + $0xb20] sm:$0xff]  ;;  %9272 = vmatpush2.bf16.msra.mxu0 %v15795_v2  ;;  %v19060_v2 = vcombine.low %v19014_v37, %v19014_v37  ;;  %v19068_v37 = vcombine.high %v19018_v39, %v19018_v39 }
 0x5b3   :  { %v3404_v30 = vld [vmem:[#allocation6 + $0xf00] sm:$0xff]  ;;  %v15788_v4 = vcombine.high %v3276_v27, %v3280_v28  ;;  %9312 = vmatprep.subr.bf16.mxu1 %v15924_v26  ;;  %v15787_v43 = vcombine.low %v3276_v27, %v3280_v28 }
 0x5b4   :  { %v3408_v31 = vld [vmem:[#allocation6 + $0xf20] sm:$0xff]  ;;  %9313 = vmatpush2.bf16.msra.mxu1 %v15923_v33 }
 0x5b5   :  { %v15916_v5 = vcombine.high %v3404_v30, %v3408_v31  ;;  %v3268_v41 = vld [vmem:[#allocation6 + $0xac0] sm:$0xff]  ;;  %9273 = vmatprep.subr.bf16.mxu0 %v15788_v4  ;;  %v15915_v44 = vcombine.low %v3404_v30, %v3408_v31 }
 0x5b6   :  { %v3272_v20 = vld [vmem:[#allocation6 + $0xae0] sm:$0xff]  ;;  %9274 = vmatpush2.bf16.msra.mxu0 %v15787_v43 }
 0x5b7   :  { %v3396_v0 = vld [vmem:[#allocation6 + $0xec0] sm:$0xff]  ;;  %v15780_v46 = vcombine.high %v3268_v41, %v3272_v20  ;;  %9314 = vmatprep.subr.bf16.mxu1 %v15916_v5  ;;  %v15779_v52 = vcombine.low %v3268_v41, %v3272_v20  ;;  %v19064_v5 = vcombine.low %v19016_v38, %v19016_v38  ;;  %v19073_v38 = vcombine.high %v19020_v14, %v19020_v14 }
 0x5b8   :  { %v3400_v42 = vld [vmem:[#allocation6 + $0xee0] sm:$0xff]  ;;  %9315 = vmatpush2.bf16.msra.mxu1 %v15915_v44 }
 0x5b9   :  { %v15908_v47 = vcombine.high %v3396_v0, %v3400_v42  ;;  %v3260_v49 = vld [vmem:[#allocation6 + $0xa80] sm:$0xff]  ;;  %9275 = vmatprep.subr.bf16.mxu0 %v15780_v46  ;;  %v15907_v53 = vcombine.low %v3396_v0, %v3400_v42 }
 0x5ba   :  { %v3264_v24 = vld [vmem:[#allocation6 + $0xaa0] sm:$0xff]  ;;  %9276 = vmatpush2.bf16.msra.mxu0 %v15779_v52 }
 0x5bb   :  { %v3388_v54 = vld [vmem:[#allocation6 + $0xe80] sm:$0xff]  ;;  %v15772_v55 = vcombine.high %v3260_v49, %v3264_v24  ;;  %9316 = vmatprep.subr.bf16.mxu1 %v15908_v47  ;;  %v15771_v61 = vcombine.low %v3260_v49, %v3264_v24 }
 0x5bc   :  { %v3392_v3 = vld [vmem:[#allocation6 + $0xea0] sm:$0xff]  ;;  %9317 = vmatpush2.bf16.msra.mxu1 %v15907_v53 }
 0x5bd   :  { %v15900_v56 = vcombine.high %v3388_v54, %v3392_v3  ;;  %v3252_v57 = vld [vmem:[#allocation6 + $0xa40] sm:$0xff]  ;;  %9277 = vmatprep.subr.bf16.mxu0 %v15772_v55  ;;  %v15899_v62 = vcombine.low %v3388_v54, %v3392_v3 }
 0x5be   :  { %v3256_v58 = vld [vmem:[#allocation6 + $0xa60] sm:$0xff]  ;;  %9278 = vmatpush2.bf16.msra.mxu0 %v15771_v61 }
 0x5bf   :  { %v3380_v59 = vld [vmem:[#allocation6 + $0xe40] sm:$0xff]  ;;  %v15764_v63 = vcombine.high %v3252_v57, %v3256_v58  ;;  %9318 = vmatprep.subr.bf16.mxu1 %v15900_v56  ;;  %v15763_v13 = vcombine.low %v3252_v57, %v3256_v58 }
 0x5c0   :  { %v3384_v60 = vld [vmem:[#allocation6 + $0xe60] sm:$0xff]  ;;  %9319 = vmatpush2.bf16.msra.mxu1 %v15899_v62 }
 0x5c1   :  { %v15892_v6 = vcombine.high %v3380_v59, %v3384_v60  ;;  %v3244_v9 = vld [vmem:[#allocation6 + $0xa00] sm:$0xff]  ;;  %9279 = vmatprep.subr.bf16.mxu0 %v15764_v63  ;;  %v15891_v16 = vcombine.low %v3380_v59, %v3384_v60 }
 0x5c2   :  { %v3248_v10 = vld [vmem:[#allocation6 + $0xa20] sm:$0xff]  ;;  %9280 = vmatpush2.bf16.msra.mxu0 %v15763_v13 }
 0x5c3   :  { %v3372_v11 = vld [vmem:[#allocation6 + $0xe00] sm:$0xff]  ;;  %v15756_v17 = vcombine.high %v3244_v9, %v3248_v10  ;;  %9320 = vmatprep.subr.bf16.mxu1 %v15892_v6  ;;  %v15755_v23 = vcombine.low %v3244_v9, %v3248_v10 }
 0x5c4   :  { %v3376_v12 = vld [vmem:[#allocation6 + $0xe20] sm:$0xff]  ;;  %9321 = vmatpush2.bf16.msra.mxu1 %v15891_v16 }
 0x5c5   :  { %v15884_v18 = vcombine.high %v3372_v11, %v3376_v12  ;;  %v3492_v19 = vld [vmem:[#allocation6 + $0x11c0] sm:$0xff]  ;;  %9281 = vmatprep.subr.bf16.mxu0 %v15756_v17  ;;  %v15883_v26 = vcombine.low %v3372_v11, %v3376_v12 }
 0x5c6   :  { %v3496_v1 = vld [vmem:[#allocation6 + $0x11e0] sm:$0xff]  ;;  %9282 = vmatpush2.bf16.msra.mxu0 %v15755_v23 }
 0x5c7   :  { %v3620_v21 = vld [vmem:[#allocation6 + $0x15c0] sm:$0xff]  ;;  %v16004_v27 = vcombine.high %v3492_v19, %v3496_v1  ;;  %9322 = vmatprep.subr.bf16.mxu1 %v15884_v18  ;;  %v16003_v41 = vcombine.low %v3492_v19, %v3496_v1 }
 0x5c8   :  { %v3624_v22 = vld [vmem:[#allocation6 + $0x15e0] sm:$0xff]  ;;  %9323 = vmatpush2.bf16.msra.mxu1 %v15883_v26 }
 0x5c9   :  { %v16132_v28 = vcombine.high %v3620_v21, %v3624_v22  ;;  %v3484_v30 = vld [vmem:[#allocation6 + $0x1180] sm:$0xff]  ;;  %9333 = vmatprep.subr.bf16.mxu0 %v16004_v27  ;;  %v16131_v20 = vcombine.low %v3620_v21, %v3624_v22  ;;  %9284 = vmatmul.mubr.bf16.vlgmr.msra.gmra.mxu0 %v19060_v2 }
 0x5ca   :  { %v3488_v31 = vld [vmem:[#allocation6 + $0x11a0] sm:$0xff]  ;;  %9334 = vmatpush1.bf16.msra.mxu0 %v16003_v41  ;;  %9365 = vmatprep.mubr.bf16.mxu0 %v19068_v37 }
 0x5cb   :  { %v3612_v33 = vld [vmem:[#allocation6 + $0x1580] sm:$0xff]  ;;  %v15996_v0 = vcombine.high %v3484_v30, %v3488_v31  ;;  %9374 = vmatprep.subr.bf16.mxu1 %v16132_v28  ;;  %9325 = vmatmul.mubr.bf16.vlgmr.msra.gmra.mxu1 %v19064_v5  ;;  %v15995_v49 = vcombine.low %v3484_v30, %v3488_v31 }
 0x5cc   :  { %v3616_v4 = vld [vmem:[#allocation6 + $0x15a0] sm:$0xff]  ;;  %9375 = vmatpush1.bf16.msra.mxu1 %v16131_v20  ;;  %9406 = vmatprep.mubr.bf16.mxu1 %v19073_v38 }
 0x5cd   :  { %v16124_v42 = vcombine.high %v3612_v33, %v3616_v4  ;;  %v3476_v43 = vld [vmem:[#allocation6 + $0x1140] sm:$0xff]  ;;  %9335 = vmatprep.subr.bf16.mxu0 %v15996_v0  ;;  %v16123_v24 = vcombine.low %v3612_v33, %v3616_v4 }
 0x5ce   :  { %v3480_v44 = vld [vmem:[#allocation6 + $0x1160] sm:$0xff]  ;;  %9336 = vmatpush1.bf16.msra.mxu0 %v15995_v49 }
 0x5cf   :  { %v3604_v46 = vld [vmem:[#allocation6 + $0x1540] sm:$0xff]  ;;  %v15988_v54 = vcombine.high %v3476_v43, %v3480_v44  ;;  %9376 = vmatprep.subr.bf16.mxu1 %v16124_v42  ;;  %v15987_v57 = vcombine.low %v3476_v43, %v3480_v44 }
 0x5d0   :  { %v3608_v47 = vld [vmem:[#allocation6 + $0x1560] sm:$0xff]  ;;  %9377 = vmatpush1.bf16.msra.mxu1 %v16123_v24 }
 0x5d1   :  { %v16116_v3 = vcombine.high %v3604_v46, %v3608_v47  ;;  %v3468_v52 = vld [vmem:[#allocation6 + $0x1100] sm:$0xff]  ;;  %9337 = vmatprep.subr.bf16.mxu0 %v15988_v54  ;;  %v16115_v58 = vcombine.low %v3604_v46, %v3608_v47 }
 0x5d2   :  { %v3472_v53 = vld [vmem:[#allocation6 + $0x1120] sm:$0xff]  ;;  %9338 = vmatpush1.bf16.msra.mxu0 %v15987_v57 }
 0x5d3   :  { %v3596_v55 = vld [vmem:[#allocation6 + $0x1500] sm:$0xff]  ;;  %v15980_v59 = vcombine.high %v3468_v52, %v3472_v53  ;;  %9378 = vmatprep.subr.bf16.mxu1 %v16116_v3  ;;  %v15979_v9 = vcombine.low %v3468_v52, %v3472_v53 }
 0x5d4   :  { %v3600_v56 = vld [vmem:[#allocation6 + $0x1520] sm:$0xff]  ;;  %9379 = vmatpush1.bf16.msra.mxu1 %v16115_v58 }
 0x5d5   :  { %v16108_v60 = vcombine.high %v3596_v55, %v3600_v56  ;;  %v3460_v61 = vld [vmem:[#allocation6 + $0x10c0] sm:$0xff]  ;;  %9339 = vmatprep.subr.bf16.mxu0 %v15980_v59  ;;  %v16107_v10 = vcombine.low %v3596_v55, %v3600_v56 }
 0x5d6   :  { %v3464_v62 = vld [vmem:[#allocation6 + $0x10e0] sm:$0xff]  ;;  %9340 = vmatpush1.bf16.msra.mxu0 %v15979_v9 }
 0x5d7   :  { %v3588_v63 = vld [vmem:[#allocation6 + $0x14c0] sm:$0xff]  ;;  %v15972_v11 = vcombine.high %v3460_v61, %v3464_v62  ;;  %9380 = vmatprep.subr.bf16.mxu1 %v16108_v60  ;;  %v15971_v19 = vcombine.low %v3460_v61, %v3464_v62 }
 0x5d8   :  { %v3592_v6 = vld [vmem:[#allocation6 + $0x14e0] sm:$0xff]  ;;  %9381 = vmatpush1.bf16.msra.mxu1 %v16107_v10 }
 0x5d9   :  { %v16100_v12 = vcombine.high %v3588_v63, %v3592_v6  ;;  %v3452_v13 = vld [vmem:[#allocation6 + $0x1080] sm:$0xff]  ;;  %9341 = vmatprep.subr.bf16.mxu0 %v15972_v11  ;;  %v16099_v1 = vcombine.low %v3588_v63, %v3592_v6 }
 0x5da   :  { %v3456_v16 = vld [vmem:[#allocation6 + $0x10a0] sm:$0xff]  ;;  %9342 = vmatpush1.bf16.msra.mxu0 %v15971_v19 }
 0x5db   :  { %v3580_v17 = vld [vmem:[#allocation6 + $0x1480] sm:$0xff]  ;;  %v15964_v21 = vcombine.high %v3452_v13, %v3456_v16  ;;  %9382 = vmatprep.subr.bf16.mxu1 %v16100_v12  ;;  %v15963_v30 = vcombine.low %v3452_v13, %v3456_v16 }
 0x5dc   :  { %v3584_v18 = vld [vmem:[#allocation6 + $0x14a0] sm:$0xff]  ;;  %9383 = vmatpush1.bf16.msra.mxu1 %v16099_v1 }
 0x5dd   :  { %v16092_v22 = vcombine.high %v3580_v17, %v3584_v18  ;;  %v3444_v23 = vld [vmem:[#allocation6 + $0x1040] sm:$0xff]  ;;  %9343 = vmatprep.subr.bf16.mxu0 %v15964_v21  ;;  %v16091_v31 = vcombine.low %v3580_v17, %v3584_v18 }
 0x5de   :  { %v3448_v26 = vld [vmem:[#allocation6 + $0x1060] sm:$0xff]  ;;  %9344 = vmatpush1.bf16.msra.mxu0 %v15963_v30 }
 0x5df   :  { %v3572_v27 = vld [vmem:[#allocation6 + $0x1440] sm:$0xff]  ;;  %v15956_v33 = vcombine.high %v3444_v23, %v3448_v26  ;;  %9384 = vmatprep.subr.bf16.mxu1 %v16092_v22  ;;  %v15955_v43 = vcombine.low %v3444_v23, %v3448_v26 }
 0x5e0   :  { %v3576_v28 = vld [vmem:[#allocation6 + $0x1460] sm:$0xff]  ;;  %9385 = vmatpush1.bf16.msra.mxu1 %v16091_v31 }
 0x5e1   :  { %v16084_v4 = vcombine.high %v3572_v27, %v3576_v28  ;;  %v3436_v41 = vld [vmem:[#allocation6 + $0x1000] sm:$0xff]  ;;  %9345 = vmatprep.subr.bf16.mxu0 %v15956_v33  ;;  %v16083_v44 = vcombine.low %v3572_v27, %v3576_v28 }
 0x5e2   :  { %v3440_v20 = vld [vmem:[#allocation6 + $0x1020] sm:$0xff]  ;;  %9346 = vmatpush1.bf16.msra.mxu0 %v15955_v43 }
 0x5e3   :  { %v3564_v0 = vld [vmem:[#allocation6 + $0x1400] sm:$0xff]  ;;  %v15948_v46 = vcombine.high %v3436_v41, %v3440_v20  ;;  %9386 = vmatprep.subr.bf16.mxu1 %v16084_v4  ;;  %v15947_v52 = vcombine.low %v3436_v41, %v3440_v20 }
 0x5e4   :  { %v3568_v42 = vld [vmem:[#allocation6 + $0x1420] sm:$0xff]  ;;  %9387 = vmatpush1.bf16.msra.mxu1 %v16083_v44 }
 0x5e5   :  { %v16076_v47 = vcombine.high %v3564_v0, %v3568_v42  ;;  %v3556_v49 = vld [vmem:[#allocation6 + $0x13c0] sm:$0xff]  ;;  %9347 = vmatprep.subr.bf16.mxu0 %v15948_v46  ;;  %v16075_v53 = vcombine.low %v3564_v0, %v3568_v42 }
 0x5e6   :  { %v3560_v24 = vld [vmem:[#allocation6 + $0x13e0] sm:$0xff]  ;;  %9348 = vmatpush1.bf16.msra.mxu0 %v15947_v52 }
 0x5e7   :  { %v3684_v54 = vld [vmem:[#allocation6 + $0x17c0] sm:$0xff]  ;;  %v16068_v55 = vcombine.high %v3556_v49, %v3560_v24  ;;  %9388 = vmatprep.subr.bf16.mxu1 %v16076_v47  ;;  %v16067_v61 = vcombine.low %v3556_v49, %v3560_v24 }
 0x5e8   :  { %v3688_v3 = vld [vmem:[#allocation6 + $0x17e0] sm:$0xff]  ;;  %9389 = vmatpush1.bf16.msra.mxu1 %v16075_v53 }
 0x5e9   :  { %v16196_v56 = vcombine.high %v3684_v54, %v3688_v3  ;;  %v3548_v57 = vld [vmem:[#allocation6 + $0x1380] sm:$0xff]  ;;  %9349 = vmatprep.subr.bf16.mxu0 %v16068_v55  ;;  %v16195_v62 = vcombine.low %v3684_v54, %v3688_v3 }
 0x5ea   :  { %v3552_v58 = vld [vmem:[#allocation6 + $0x13a0] sm:$0xff]  ;;  %9350 = vmatpush2.bf16.msra.mxu0 %v16067_v61 }
 0x5eb   :  { %v3676_v59 = vld [vmem:[#allocation6 + $0x1780] sm:$0xff]  ;;  %v16060_v63 = vcombine.high %v3548_v57, %v3552_v58  ;;  %9390 = vmatprep.subr.bf16.mxu1 %v16196_v56  ;;  %v16059_v13 = vcombine.low %v3548_v57, %v3552_v58 }
 0x5ec   :  { %v3680_v60 = vld [vmem:[#allocation6 + $0x17a0] sm:$0xff]  ;;  %9391 = vmatpush2.bf16.msra.mxu1 %v16195_v62 }
 0x5ed   :  { %v16188_v6 = vcombine.high %v3676_v59, %v3680_v60  ;;  %v3540_v9 = vld [vmem:[#allocation6 + $0x1340] sm:$0xff]  ;;  %9351 = vmatprep.subr.bf16.mxu0 %v16060_v63  ;;  %v16187_v16 = vcombine.low %v3676_v59, %v3680_v60 }
 0x5ee   :  { %v3544_v10 = vld [vmem:[#allocation6 + $0x1360] sm:$0xff]  ;;  %9352 = vmatpush2.bf16.msra.mxu0 %v16059_v13 }
 0x5ef   :  { %v3668_v11 = vld [vmem:[#allocation6 + $0x1740] sm:$0xff]  ;;  %v16052_v17 = vcombine.high %v3540_v9, %v3544_v10  ;;  %9392 = vmatprep.subr.bf16.mxu1 %v16188_v6  ;;  %v16051_v23 = vcombine.low %v3540_v9, %v3544_v10 }
 0x5f0   :  { %v3672_v12 = vld [vmem:[#allocation6 + $0x1760] sm:$0xff]  ;;  %9393 = vmatpush2.bf16.msra.mxu1 %v16187_v16 }
 0x5f1   :  { %v16180_v18 = vcombine.high %v3668_v11, %v3672_v12  ;;  %v3532_v19 = vld [vmem:[#allocation6 + $0x1300] sm:$0xff]  ;;  %9353 = vmatprep.subr.bf16.mxu0 %v16052_v17  ;;  %v16179_v26 = vcombine.low %v3668_v11, %v3672_v12 }
 0x5f2   :  { %v3536_v1 = vld [vmem:[#allocation6 + $0x1320] sm:$0xff]  ;;  %9354 = vmatpush2.bf16.msra.mxu0 %v16051_v23 }
 0x5f3   :  { %v3660_v21 = vld [vmem:[#allocation6 + $0x1700] sm:$0xff]  ;;  %v16044_v27 = vcombine.high %v3532_v19, %v3536_v1  ;;  %9394 = vmatprep.subr.bf16.mxu1 %v16180_v18  ;;  %v16043_v41 = vcombine.low %v3532_v19, %v3536_v1 }
 0x5f4   :  { %v3664_v22 = vld [vmem:[#allocation6 + $0x1720] sm:$0xff]  ;;  %9395 = vmatpush2.bf16.msra.mxu1 %v16179_v26 }
 0x5f5   :  { %v16172_v28 = vcombine.high %v3660_v21, %v3664_v22  ;;  %v3524_v30 = vld [vmem:[#allocation6 + $0x12c0] sm:$0xff]  ;;  %9355 = vmatprep.subr.bf16.mxu0 %v16044_v27  ;;  %v16171_v20 = vcombine.low %v3660_v21, %v3664_v22  ;;  %v19080_v27 = vcombine.low %v19018_v39, %v19018_v39  ;;  %v19088_v39 = vcombine.high %v19022_v15, %v19022_v15 }
 0x5f6   :  { %v3528_v31 = vld [vmem:[#allocation6 + $0x12e0] sm:$0xff]  ;;  %9356 = vmatpush2.bf16.msra.mxu0 %v16043_v41 }
 0x5f7   :  { %v3652_v33 = vld [vmem:[#allocation6 + $0x16c0] sm:$0xff]  ;;  %v16036_v0 = vcombine.high %v3524_v30, %v3528_v31  ;;  %9396 = vmatprep.subr.bf16.mxu1 %v16172_v28  ;;  %v16035_v49 = vcombine.low %v3524_v30, %v3528_v31  ;;  %v19084_v31 = vcombine.low %v19020_v14, %v19020_v14  ;;  %v19093_v14 = vcombine.high %v19024_v40, %v19024_v40 }
 0x5f8   :  { %v3656_v4 = vld [vmem:[#allocation6 + $0x16e0] sm:$0xff]  ;;  %9397 = vmatpush2.bf16.msra.mxu1 %v16171_v20 }
 0x5f9   :  { %v16164_v42 = vcombine.high %v3652_v33, %v3656_v4  ;;  %v3516_v43 = vld [vmem:[#allocation6 + $0x1280] sm:$0xff]  ;;  %9357 = vmatprep.subr.bf16.mxu0 %v16036_v0  ;;  %v16163_v24 = vcombine.low %v3652_v33, %v3656_v4 }
 0x5fa   :  { %v3520_v44 = vld [vmem:[#allocation6 + $0x12a0] sm:$0xff]  ;;  %9358 = vmatpush2.bf16.msra.mxu0 %v16035_v49 }
 0x5fb   :  { %v3644_v46 = vld [vmem:[#allocation6 + $0x1680] sm:$0xff]  ;;  %v16028_v54 = vcombine.high %v3516_v43, %v3520_v44  ;;  %9398 = vmatprep.subr.bf16.mxu1 %v16164_v42  ;;  %v16027_v57 = vcombine.low %v3516_v43, %v3520_v44 }
 0x5fc   :  { %v3648_v47 = vld [vmem:[#allocation6 + $0x16a0] sm:$0xff]  ;;  %9399 = vmatpush2.bf16.msra.mxu1 %v16163_v24 }
 0x5fd   :  { %v16156_v3 = vcombine.high %v3644_v46, %v3648_v47  ;;  %v3508_v52 = vld [vmem:[#allocation6 + $0x1240] sm:$0xff]  ;;  %9359 = vmatprep.subr.bf16.mxu0 %v16028_v54  ;;  %v16155_v58 = vcombine.low %v3644_v46, %v3648_v47 }
 0x5fe   :  { %v3512_v53 = vld [vmem:[#allocation6 + $0x1260] sm:$0xff]  ;;  %9360 = vmatpush2.bf16.msra.mxu0 %v16027_v57 }
 0x5ff   :  { %v3636_v55 = vld [vmem:[#allocation6 + $0x1640] sm:$0xff]  ;;  %v16020_v59 = vcombine.high %v3508_v52, %v3512_v53  ;;  %9400 = vmatprep.subr.bf16.mxu1 %v16156_v3  ;;  %v16019_v9 = vcombine.low %v3508_v52, %v3512_v53 }
 0x600   :  { %v3640_v56 = vld [vmem:[#allocation6 + $0x1660] sm:$0xff]  ;;  %9401 = vmatpush2.bf16.msra.mxu1 %v16155_v58 }
 0x601   :  { %v16148_v60 = vcombine.high %v3636_v55, %v3640_v56  ;;  %v3500_v61 = vld [vmem:[#allocation6 + $0x1200] sm:$0xff]  ;;  %9361 = vmatprep.subr.bf16.mxu0 %v16020_v59  ;;  %v16147_v10 = vcombine.low %v3636_v55, %v3640_v56 }
 0x602   :  { %v3504_v62 = vld [vmem:[#allocation6 + $0x1220] sm:$0xff]  ;;  %9362 = vmatpush2.bf16.msra.mxu0 %v16019_v9 }
 0x603   :  { %v3628_v63 = vld [vmem:[#allocation6 + $0x1600] sm:$0xff]  ;;  %v16012_v11 = vcombine.high %v3500_v61, %v3504_v62  ;;  %9402 = vmatprep.subr.bf16.mxu1 %v16148_v60  ;;  %v16011_v19 = vcombine.low %v3500_v61, %v3504_v62 }
 0x604   :  { %v3632_v6 = vld [vmem:[#allocation6 + $0x1620] sm:$0xff]  ;;  %9403 = vmatpush2.bf16.msra.mxu1 %v16147_v10 }
 0x605   :  { %v16140_v12 = vcombine.high %v3628_v63, %v3632_v6  ;;  %v3748_v13 = vld [vmem:[#allocation6 + $0x19c0] sm:$0xff]  ;;  %9363 = vmatprep.subr.bf16.mxu0 %v16012_v11  ;;  %v16139_v1 = vcombine.low %v3628_v63, %v3632_v6 }
 0x606   :  { %v3752_v16 = vld [vmem:[#allocation6 + $0x19e0] sm:$0xff]  ;;  %9364 = vmatpush2.bf16.msra.mxu0 %v16011_v19 }
 0x607   :  { %v3876_v17 = vld [vmem:[#allocation6 + $0x1dc0] sm:$0xff]  ;;  %v16260_v21 = vcombine.high %v3748_v13, %v3752_v16  ;;  %9404 = vmatprep.subr.bf16.mxu1 %v16140_v12  ;;  %v16259_v33 = vcombine.low %v3748_v13, %v3752_v16 }
 0x608   :  { %v3880_v18 = vld [vmem:[#allocation6 + $0x1de0] sm:$0xff]  ;;  %9405 = vmatpush2.bf16.msra.mxu1 %v16139_v1 }
 0x609   :  { %v16388_v22 = vcombine.high %v3876_v17, %v3880_v18  ;;  %v3740_v23 = vld [vmem:[#allocation6 + $0x1980] sm:$0xff]  ;;  %9415 = vmatprep.subr.bf16.mxu0 %v16260_v21  ;;  %v16387_v4 = vcombine.low %v3876_v17, %v3880_v18  ;;  %9366 = vmatmul.mubr.bf16.vlgmr.msra.gmra.mxu0 %v19080_v27 }
 0x60a   :  { %v3744_v26 = vld [vmem:[#allocation6 + $0x19a0] sm:$0xff]  ;;  %9416 = vmatpush1.bf16.msra.mxu0 %v16259_v33  ;;  %9447 = vmatprep.mubr.bf16.mxu0 %v19088_v39 }
 0x60b   :  { %v3868_v28 = vld [vmem:[#allocation6 + $0x1d80] sm:$0xff]  ;;  %v16252_v41 = vcombine.high %v3740_v23, %v3744_v26  ;;  %9456 = vmatprep.subr.bf16.mxu1 %v16388_v22  ;;  %9407 = vmatmul.mubr.bf16.vlgmr.msra.gmra.mxu1 %v19084_v31  ;;  %v16251_v46 = vcombine.low %v3740_v23, %v3744_v26 }
 0x60c   :  { %v3872_v30 = vld [vmem:[#allocation6 + $0x1da0] sm:$0xff]  ;;  %9457 = vmatpush1.bf16.msra.mxu1 %v16387_v4  ;;  %9488 = vmatprep.mubr.bf16.mxu1 %v19093_v14 }
 0x60d   :  { %v16380_v20 = vcombine.high %v3868_v28, %v3872_v30  ;;  %v3732_v0 = vld [vmem:[#allocation6 + $0x1940] sm:$0xff]  ;;  %9417 = vmatprep.subr.bf16.mxu0 %v16252_v41  ;;  %v16379_v47 = vcombine.low %v3868_v28, %v3872_v30 }
 0x60e   :  { %v3736_v42 = vld [vmem:[#allocation6 + $0x1960] sm:$0xff]  ;;  %9418 = vmatpush1.bf16.msra.mxu0 %v16251_v46 }
 0x60f   :  { %v3860_v43 = vld [vmem:[#allocation6 + $0x1d40] sm:$0xff]  ;;  %v16244_v49 = vcombine.high %v3732_v0, %v3736_v42  ;;  %9458 = vmatprep.subr.bf16.mxu1 %v16380_v20  ;;  %v16243_v55 = vcombine.low %v3732_v0, %v3736_v42 }
 0x610   :  { %v3864_v44 = vld [vmem:[#allocation6 + $0x1d60] sm:$0xff]  ;;  %9459 = vmatpush1.bf16.msra.mxu1 %v16379_v47 }
 0x611   :  { %v16372_v24 = vcombine.high %v3860_v43, %v3864_v44  ;;  %v3724_v54 = vld [vmem:[#allocation6 + $0x1900] sm:$0xff]  ;;  %9419 = vmatprep.subr.bf16.mxu0 %v16244_v49  ;;  %v16371_v56 = vcombine.low %v3860_v43, %v3864_v44 }
 0x612   :  { %v3728_v3 = vld [vmem:[#allocation6 + $0x1920] sm:$0xff]  ;;  %9420 = vmatpush1.bf16.msra.mxu0 %v16243_v55 }
 0x613   :  { %v3852_v52 = vld [vmem:[#allocation6 + $0x1d00] sm:$0xff]  ;;  %v16236_v57 = vcombine.high %v3724_v54, %v3728_v3  ;;  %9460 = vmatprep.subr.bf16.mxu1 %v16372_v24  ;;  %v16235_v63 = vcombine.low %v3724_v54, %v3728_v3 }
 0x614   :  { %v3856_v53 = vld [vmem:[#allocation6 + $0x1d20] sm:$0xff]  ;;  %9461 = vmatpush1.bf16.msra.mxu1 %v16371_v56 }
 0x615   :  { %v16364_v58 = vcombine.high %v3852_v52, %v3856_v53  ;;  %v3716_v59 = vld [vmem:[#allocation6 + $0x18c0] sm:$0xff]  ;;  %9421 = vmatprep.subr.bf16.mxu0 %v16236_v57  ;;  %v16363_v6 = vcombine.low %v3852_v52, %v3856_v53 }
 0x616   :  { %v3720_v60 = vld [vmem:[#allocation6 + $0x18e0] sm:$0xff]  ;;  %9422 = vmatpush1.bf16.msra.mxu0 %v16235_v63 }
 0x617   :  { %v3844_v61 = vld [vmem:[#allocation6 + $0x1cc0] sm:$0xff]  ;;  %v16228_v9 = vcombine.high %v3716_v59, %v3720_v60  ;;  %9462 = vmatprep.subr.bf16.mxu1 %v16364_v58  ;;  %v16227_v17 = vcombine.low %v3716_v59, %v3720_v60 }
 0x618   :  { %v3848_v62 = vld [vmem:[#allocation6 + $0x1ce0] sm:$0xff]  ;;  %9463 = vmatpush1.bf16.msra.mxu1 %v16363_v6 }
 0x619   :  { %v16356_v10 = vcombine.high %v3844_v61, %v3848_v62  ;;  %v3708_v11 = vld [vmem:[#allocation6 + $0x1880] sm:$0xff]  ;;  %9423 = vmatprep.subr.bf16.mxu0 %v16228_v9  ;;  %v16355_v18 = vcombine.low %v3844_v61, %v3848_v62 }
 0x61a   :  { %v3712_v12 = vld [vmem:[#allocation6 + $0x18a0] sm:$0xff]  ;;  %9424 = vmatpush1.bf16.msra.mxu0 %v16227_v17 }
 0x61b   :  { %v3836_v13 = vld [vmem:[#allocation6 + $0x1c80] sm:$0xff]  ;;  %v16220_v19 = vcombine.high %v3708_v11, %v3712_v12  ;;  %9464 = vmatprep.subr.bf16.mxu1 %v16356_v10  ;;  %v16219_v28 = vcombine.low %v3708_v11, %v3712_v12 }
 0x61c   :  { %v3840_v16 = vld [vmem:[#allocation6 + $0x1ca0] sm:$0xff]  ;;  %9465 = vmatpush1.bf16.msra.mxu1 %v16355_v18 }
 0x61d   :  { %v16348_v1 = vcombine.high %v3836_v13, %v3840_v16  ;;  %v3700_v21 = vld [vmem:[#allocation6 + $0x1840] sm:$0xff]  ;;  %9425 = vmatprep.subr.bf16.mxu0 %v16220_v19  ;;  %v16347_v30 = vcombine.low %v3836_v13, %v3840_v16 }
 0x61e   :  { %v3704_v22 = vld [vmem:[#allocation6 + $0x1860] sm:$0xff]  ;;  %9426 = vmatpush1.bf16.msra.mxu0 %v16219_v28 }
 0x61f   :  { %v3828_v23 = vld [vmem:[#allocation6 + $0x1c40] sm:$0xff]  ;;  %v16212_v33 = vcombine.high %v3700_v21, %v3704_v22  ;;  %9466 = vmatprep.subr.bf16.mxu1 %v16348_v1  ;;  %v16211_v43 = vcombine.low %v3700_v21, %v3704_v22 }
 0x620   :  { %v3832_v26 = vld [vmem:[#allocation6 + $0x1c60] sm:$0xff]  ;;  %9467 = vmatpush1.bf16.msra.mxu1 %v16347_v30 }
 0x621   :  { %v16340_v4 = vcombine.high %v3828_v23, %v3832_v26  ;;  %v3692_v41 = vld [vmem:[#allocation6 + $0x1800] sm:$0xff]  ;;  %9427 = vmatprep.subr.bf16.mxu0 %v16212_v33  ;;  %v16339_v44 = vcombine.low %v3828_v23, %v3832_v26 }
 0x622   :  { %v3696_v20 = vld [vmem:[#allocation6 + $0x1820] sm:$0xff]  ;;  %9428 = vmatpush1.bf16.msra.mxu0 %v16211_v43 }
 0x623   :  { %v3820_v0 = vld [vmem:[#allocation6 + $0x1c00] sm:$0xff]  ;;  %v16204_v46 = vcombine.high %v3692_v41, %v3696_v20  ;;  %9468 = vmatprep.subr.bf16.mxu1 %v16340_v4  ;;  %v16203_v52 = vcombine.low %v3692_v41, %v3696_v20 }
 0x624   :  { %v3824_v42 = vld [vmem:[#allocation6 + $0x1c20] sm:$0xff]  ;;  %9469 = vmatpush1.bf16.msra.mxu1 %v16339_v44 }
 0x625   :  { %v16332_v47 = vcombine.high %v3820_v0, %v3824_v42  ;;  %v3812_v49 = vld [vmem:[#allocation6 + $0x1bc0] sm:$0xff]  ;;  %9429 = vmatprep.subr.bf16.mxu0 %v16204_v46  ;;  %v16331_v53 = vcombine.low %v3820_v0, %v3824_v42 }
 0x626   :  { %v3816_v24 = vld [vmem:[#allocation6 + $0x1be0] sm:$0xff]  ;;  %9430 = vmatpush1.bf16.msra.mxu0 %v16203_v52 }
 0x627   :  { %v3940_v54 = vld [vmem:[#allocation6 + $0x1fc0] sm:$0xff]  ;;  %v16324_v55 = vcombine.high %v3812_v49, %v3816_v24  ;;  %9470 = vmatprep.subr.bf16.mxu1 %v16332_v47  ;;  %v16323_v61 = vcombine.low %v3812_v49, %v3816_v24 }
 0x628   :  { %v3944_v3 = vld [vmem:[#allocation6 + $0x1fe0] sm:$0xff]  ;;  %9471 = vmatpush1.bf16.msra.mxu1 %v16331_v53 }
 0x629   :  { %v16452_v56 = vcombine.high %v3940_v54, %v3944_v3  ;;  %v3804_v57 = vld [vmem:[#allocation6 + $0x1b80] sm:$0xff]  ;;  %9431 = vmatprep.subr.bf16.mxu0 %v16324_v55  ;;  %v16451_v62 = vcombine.low %v3940_v54, %v3944_v3 }
 0x62a   :  { %v3808_v58 = vld [vmem:[#allocation6 + $0x1ba0] sm:$0xff]  ;;  %9432 = vmatpush2.bf16.msra.mxu0 %v16323_v61 }
 0x62b   :  { %v3932_v59 = vld [vmem:[#allocation6 + $0x1f80] sm:$0xff]  ;;  %v16316_v63 = vcombine.high %v3804_v57, %v3808_v58  ;;  %9472 = vmatprep.subr.bf16.mxu1 %v16452_v56  ;;  %v16315_v13 = vcombine.low %v3804_v57, %v3808_v58 }
 0x62c   :  { %v3936_v60 = vld [vmem:[#allocation6 + $0x1fa0] sm:$0xff]  ;;  %9473 = vmatpush2.bf16.msra.mxu1 %v16451_v62 }
 0x62d   :  { %v16444_v6 = vcombine.high %v3932_v59, %v3936_v60  ;;  %v3796_v9 = vld [vmem:[#allocation6 + $0x1b40] sm:$0xff]  ;;  %9433 = vmatprep.subr.bf16.mxu0 %v16316_v63  ;;  %v16443_v16 = vcombine.low %v3932_v59, %v3936_v60 }
 0x62e   :  { %v3800_v10 = vld [vmem:[#allocation6 + $0x1b60] sm:$0xff]  ;;  %9434 = vmatpush2.bf16.msra.mxu0 %v16315_v13 }
 0x62f   :  { %v3924_v11 = vld [vmem:[#allocation6 + $0x1f40] sm:$0xff]  ;;  %v16308_v17 = vcombine.high %v3796_v9, %v3800_v10  ;;  %9474 = vmatprep.subr.bf16.mxu1 %v16444_v6  ;;  %v16307_v23 = vcombine.low %v3796_v9, %v3800_v10 }
 0x630   :  { %v3928_v12 = vld [vmem:[#allocation6 + $0x1f60] sm:$0xff]  ;;  %9475 = vmatpush2.bf16.msra.mxu1 %v16443_v16 }
 0x631   :  { %v16436_v18 = vcombine.high %v3924_v11, %v3928_v12  ;;  %v3788_v19 = vld [vmem:[#allocation6 + $0x1b00] sm:$0xff]  ;;  %9435 = vmatprep.subr.bf16.mxu0 %v16308_v17  ;;  %v16435_v26 = vcombine.low %v3924_v11, %v3928_v12 }
 0x632   :  { %v3792_v1 = vld [vmem:[#allocation6 + $0x1b20] sm:$0xff]  ;;  %9436 = vmatpush2.bf16.msra.mxu0 %v16307_v23 }
 0x633   :  { %v3916_v21 = vld [vmem:[#allocation6 + $0x1f00] sm:$0xff]  ;;  %v16300_v28 = vcombine.high %v3788_v19, %v3792_v1  ;;  %9476 = vmatprep.subr.bf16.mxu1 %v16436_v18  ;;  %v16299_v0 = vcombine.low %v3788_v19, %v3792_v1  ;;  %v2981_v19 = vld [vmem:[#allocation6 + $0x1c8] sm:$0xff] }
 0x634   :  { %v3920_v22 = vld [vmem:[#allocation6 + $0x1f20] sm:$0xff]  ;;  %9477 = vmatpush2.bf16.msra.mxu1 %v16435_v26  ;;  %v2985_v1 = vld [vmem:[#allocation6 + $0x1e8] sm:$0xff] }
 0x635   :  { %v16428_v30 = vcombine.high %v3916_v21, %v3920_v22  ;;  %v3780_v33 = vld [vmem:[#allocation6 + $0x1ac0] sm:$0xff]  ;;  %9437 = vmatprep.subr.bf16.mxu0 %v16300_v28  ;;  %v16427_v42 = vcombine.low %v3916_v21, %v3920_v22  ;;  %v3109_v21 = vld [vmem:[#allocation6 + $0x5c8] sm:$0xff] }
 0x636   :  { %v3784_v4 = vld [vmem:[#allocation6 + $0x1ae0] sm:$0xff]  ;;  %9438 = vmatpush2.bf16.msra.mxu0 %v16299_v0  ;;  %v3113_v22 = vld [vmem:[#allocation6 + $0x5e8] sm:$0xff] }
 0x637   :  { %v3908_v41 = vld [vmem:[#allocation6 + $0x1ec0] sm:$0xff]  ;;  %v16292_v43 = vcombine.high %v3780_v33, %v3784_v4  ;;  %9478 = vmatprep.subr.bf16.mxu1 %v16428_v30  ;;  %v16291_v54 = vcombine.low %v3780_v33, %v3784_v4  ;;  %v15494_v30 = vcombine.high %v2981_v19, %v2985_v1  ;;  %v15622_v33 = vcombine.high %v3109_v21, %v3113_v22  ;;  %v2973_v4 = vld [vmem:[#allocation6 + $0x188] sm:$0xff] }
 0x638   :  { %v3912_v20 = vld [vmem:[#allocation6 + $0x1ee0] sm:$0xff]  ;;  %9479 = vmatpush2.bf16.msra.mxu1 %v16427_v42  ;;  %v3101_v0 = vld [vmem:[#allocation6 + $0x588] sm:$0xff] }
 0x639   :  { %v16420_v44 = vcombine.high %v3908_v41, %v3912_v20  ;;  %v3772_v46 = vld [vmem:[#allocation6 + $0x1a80] sm:$0xff]  ;;  %9439 = vmatprep.subr.bf16.mxu0 %v16292_v43  ;;  %v16419_v3 = vcombine.low %v3908_v41, %v3912_v20  ;;  %v2977_v41 = vld [vmem:[#allocation6 + $0x1a8] sm:$0xff]  ;;  %v19102_v20 = vcombine.low %v19022_v15, %v19022_v15 }
 0x63a   :  { %v3776_v47 = vld [vmem:[#allocation6 + $0x1aa0] sm:$0xff]  ;;  %9440 = vmatpush2.bf16.msra.mxu0 %v16291_v54  ;;  %v3105_v42 = vld [vmem:[#allocation6 + $0x5a8] sm:$0xff] }
 0x63b   :  { %v3900_v49 = vld [vmem:[#allocation6 + $0x1e80] sm:$0xff]  ;;  %v16284_v52 = vcombine.high %v3772_v46, %v3776_v47  ;;  %9480 = vmatprep.subr.bf16.mxu1 %v16420_v44  ;;  %v16283_v59 = vcombine.low %v3772_v46, %v3776_v47  ;;  %v19108_v44 = vcombine.low %v19024_v40, %v19024_v40  ;;  %v15493_v46 = vcombine.low %v2981_v19, %v2985_v1  ;;  %v2965_v54 = vld [vmem:[#allocation6 + $0x148] sm:$0xff] }
 0x63c   :  { %v3904_v24 = vld [vmem:[#allocation6 + $0x1ea0] sm:$0xff]  ;;  %9481 = vmatpush2.bf16.msra.mxu1 %v16419_v3  ;;  %v15621_v47 = vcombine.low %v3109_v21, %v3113_v22  ;;  %v2969_v3 = vld [vmem:[#allocation6 + $0x168] sm:$0xff] }
 0x63d   :  { %v16412_v53 = vcombine.high %v3900_v49, %v3904_v24  ;;  %v3764_v55 = vld [vmem:[#allocation6 + $0x1a40] sm:$0xff]  ;;  %9441 = vmatprep.subr.bf16.mxu0 %v16284_v52  ;;  %v16411_v60 = vcombine.low %v3900_v49, %v3904_v24  ;;  %v15486_v49 = vcombine.high %v2973_v4, %v2977_v41  ;;  %v15614_v24 = vcombine.high %v3101_v0, %v3105_v42 }
 0x63e   :  { %v3768_v56 = vld [vmem:[#allocation6 + $0x1a60] sm:$0xff]  ;;  %9442 = vmatpush2.bf16.msra.mxu0 %v16283_v59  ;;  %v15613_v59 = vcombine.low %v3101_v0, %v3105_v42 }
 0x63f   :  { %v3892_v57 = vld [vmem:[#allocation6 + $0x1e40] sm:$0xff]  ;;  %v16276_v61 = vcombine.high %v3764_v55, %v3768_v56  ;;  %9482 = vmatprep.subr.bf16.mxu1 %v16412_v53  ;;  %v16275_v11 = vcombine.low %v3764_v55, %v3768_v56  ;;  %v3093_v53 = vld [vmem:[#allocation6 + $0x548] sm:$0xff] }
 0x640   :  { %v3896_v58 = vld [vmem:[#allocation6 + $0x1e60] sm:$0xff]  ;;  %9483 = vmatpush2.bf16.msra.mxu1 %v16411_v60  ;;  %v3097_v55 = vld [vmem:[#allocation6 + $0x568] sm:$0xff]  ;;  %v15478_v60 = vcombine.high %v2965_v54, %v2969_v3 }
 0x641   :  { %v16404_v62 = vcombine.high %v3892_v57, %v3896_v58  ;;  %v3756_v63 = vld [vmem:[#allocation6 + $0x1a00] sm:$0xff]  ;;  %9443 = vmatprep.subr.bf16.mxu0 %v16276_v61  ;;  %v16403_v12 = vcombine.low %v3892_v57, %v3896_v58  ;;  %v15485_v57 = vcombine.low %v2973_v4, %v2977_v41  ;;  %v15605_v1 = vcombine.low %v3093_v53, %v3097_v55  ;;  %v3081_v4 = vld [vmem:[#allocation6 + $0x4e8] sm:$0xff] }
 0x642   :  { %v3760_v6 = vld [vmem:[#allocation6 + $0x1a20] sm:$0xff]  ;;  %9444 = vmatpush2.bf16.msra.mxu0 %v16275_v11 }
 0x643   :  { %v3884_v9 = vld [vmem:[#allocation6 + $0x1e00] sm:$0xff]  ;;  %v16268_v13 = vcombine.high %v3756_v63, %v3760_v6  ;;  %9484 = vmatprep.subr.bf16.mxu1 %v16404_v62  ;;  %v16267_v23 = vcombine.low %v3756_v63, %v3760_v6  ;;  %v15606_v6 = vcombine.high %v3093_v53, %v3097_v55  ;;  %v2933_v53 = vld [vmem:[#allocation6 + $0x48] sm:$0xff] }
 0x644   :  { %v3888_v10 = vld [vmem:[#allocation6 + $0x1e20] sm:$0xff]  ;;  %9485 = vmatpush2.bf16.msra.mxu1 %v16403_v12  ;;  %v3085_v12 = vld [vmem:[#allocation6 + $0x508] sm:$0xff] }
 0x645   :  { %v3949_v16 = vld [vmem:[#allocation18 + $0x4] ss:$8 sm:$0xf]  ;;  %v16396_v18 = vcombine.high %v3884_v9, %v3888_v10  ;;  %9445 = vmatprep.subr.bf16.mxu0 %v16268_v13  ;;  %v16395_v28 = vcombine.low %v3884_v9, %v3888_v10 }
 0x646   :  { %v3950_v17 = vld [vmem:[#allocation18 + $0x4] ss:$8 sm:$0xf0]  ;;  %9446 = vmatpush2.bf16.msra.mxu0 %v16267_v23 }
 0x647   :  { %v19098_v26 = vor.u32 %v3950_v17, %v3949_v16  ;;  %9486 = vmatprep.subr.bf16.mxu1 %v16396_v18  ;;  %9497 = vmatprep.subr.bf16.mxu0 %v15494_v30  ;;  %v2957_v9 = vld [vmem:[#allocation6 + $0x108] sm:$0xff]  ;;  %v15477_v18 = vcombine.low %v2965_v54, %v2969_v3 }
 0x648   :  { %9487 = vmatpush2.bf16.msra.mxu1 %v16395_v28  ;;  %v2961_v10 = vld [vmem:[#allocation6 + $0x128] sm:$0xff] }
 0x649   :  { %v3956_v43 = vrot.slane %v19098_v26, %v18983_v32  ;;  %9538 = vmatprep.subr.bf16.mxu1 %v15622_v33  ;;  %v3960_v15 = vrot.slane %v19098_v26, %v18986_v34  ;;  %v9203_v52 = vpop.f32.mrf.mxu0  ;;  %9448 = vmatmul.mubr.bf16.vlgmr.msra.gmra.mxu0 %v19102_v20  ;;  %v3089_v13 = vld [vmem:[#allocation6 + $0x528] sm:$0xff]  ;;  %v15470_v21 = vcombine.high %v2957_v9, %v2961_v10 }
 0x64a   :  { %9498 = vmatpush1.bf16.msra.mxu0 %v15493_v46  ;;  %9529 = vmatprep.mubr.bf16.mxu0 %v19030_v25  ;;  %v15598_v23 = vcombine.high %v3085_v12, %v3089_v13  ;;  %v2949_v28 = vld [vmem:[#allocation6 + $0xc8] sm:$0xff]  ;;  %v15469_v41 = vcombine.low %v2957_v9, %v2961_v10  ;;  %v15597_v0 = vcombine.low %v3085_v12, %v3089_v13 }
 0x64b   :  { %v9204_v56 = vadd.f32 %v9203_v52, %v3956_v43  ;;  %v9244_v40 = vpop.f32.mrf.mxu1  ;;  %9489 = vmatmul.mubr.bf16.vlgmr.msra.gmra.mxu1 %v19108_v44  ;;  %v9205_v58 = vpop.f32.mrf.mxu0  ;;  %9499 = vmatprep.subr.bf16.mxu0 %v15486_v49  ;;  %v2953_v30 = vld [vmem:[#allocation6 + $0xe8] sm:$0xff] }
 0x64c   :  { %9539 = vmatpush1.bf16.msra.mxu1 %v15621_v47  ;;  %v9206_v62 = vadd.f32 %v9205_v58, %v3960_v15  ;;  %9570 = vmatprep.mubr.bf16.mxu1 %v19034_v51  ;;  %v3077_v33 = vld [vmem:[#allocation6 + $0x4c8] sm:$0xff]  ;;  %v15462_v42 = vcombine.high %v2949_v28, %v2953_v30 }
 0x64d   :  { %v19114_v61 = vadd.f32 %v9244_v40, %v9204_v56  ;;  %v9246_v63 = vpop.f32.mrf.mxu1  ;;  %9540 = vmatprep.subr.bf16.mxu1 %v15614_v24  ;;  %v9207_v11 = vpop.f32.mrf.mxu0  ;;  %v15590_v43 = vcombine.high %v3077_v33, %v3081_v4  ;;  %v2941_v46 = vld [vmem:[#allocation6 + $0x88] sm:$0xff]  ;;  %v15461_v24 = vcombine.low %v2949_v28, %v2953_v30  ;;  %v15589_v54 = vcombine.low %v3077_v33, %v3081_v4 }
 0x64e   :  { %v19118_v16 = vadd.f32 %v9246_v63, %v9206_v62  ;;  %9500 = vmatpush1.bf16.msra.mxu0 %v15485_v57  ;;  %v2945_v47 = vld [vmem:[#allocation6 + $0xa8] sm:$0xff] }
 0x64f   :  { %v9248_v17 = vpop.f32.mrf.mxu1  ;;  %v9208_v19 = vpop.f32.mrf.mxu0  ;;  %9501 = vmatprep.subr.bf16.mxu0 %v15478_v60  ;;  %v3069_v49 = vld [vmem:[#allocation6 + $0x488] sm:$0xff]  ;;  %v15454_v3 = vcombine.high %v2941_v46, %v2945_v47  ;;  %v15453_v57 = vcombine.low %v2941_v46, %v2945_v47 }
 0x650   :  { %9541 = vmatpush1.bf16.msra.mxu1 %v15613_v59  ;;  %v3073_v15 = vld [vmem:[#allocation6 + $0x4a8] sm:$0xff] }
 0x651   :  { %v9249_v22 = vpop.f32.mrf.mxu1  ;;  %9542 = vmatprep.subr.bf16.mxu1 %v15606_v6  ;;  %v15582_v52 = vcombine.high %v3069_v49, %v3073_v15  ;;  %v2937_v55 = vld [vmem:[#allocation6 + $0x68] sm:$0xff]  ;;  %v15581_v58 = vcombine.low %v3069_v49, %v3073_v15 }
 0x652   :  { %9502 = vmatpush1.bf16.msra.mxu0 %v15477_v18  ;;  %v3061_v56 = vld [vmem:[#allocation6 + $0x448] sm:$0xff]  ;;  %v15446_v59 = vcombine.high %v2933_v53, %v2937_v55  ;;  %v15445_v10 = vcombine.low %v2933_v53, %v2937_v55 }
 0x653   :  { %9503 = vmatprep.subr.bf16.mxu0 %v15470_v21  ;;  %v3065_v40 = vld [vmem:[#allocation6 + $0x468] sm:$0xff] }
 0x654   :  { %9543 = vmatpush1.bf16.msra.mxu1 %v15605_v1  ;;  %v15574_v60 = vcombine.high %v3061_v56, %v3065_v40  ;;  %v2925_v62 = vld [vmem:[#allocation6 + $0x8] sm:$0xff]  ;;  %v15573_v11 = vcombine.low %v3061_v56, %v3065_v40 }
 0x655   :  { %9544 = vmatprep.subr.bf16.mxu1 %v15598_v23  ;;  %v2929_v63 = vld [vmem:[#allocation6 + $0x28] sm:$0xff] }
 0x656   :  { %9504 = vmatpush1.bf16.msra.mxu0 %v15469_v41  ;;  %v3053_v6 = vld [vmem:[#allocation6 + $0x408] sm:$0xff]  ;;  %v15438_v12 = vcombine.high %v2925_v62, %v2929_v63  ;;  %v15437_v21 = vcombine.low %v2925_v62, %v2929_v63 }
 0x657   :  { %9505 = vmatprep.subr.bf16.mxu0 %v15462_v42  ;;  %v3057_v9 = vld [vmem:[#allocation6 + $0x428] sm:$0xff] }
 0x658   :  { %9545 = vmatpush1.bf16.msra.mxu1 %v15597_v0  ;;  %v15566_v13 = vcombine.high %v3053_v6, %v3057_v9  ;;  %v3045_v17 = vld [vmem:[#allocation6 + $0x3c8] sm:$0xff]  ;;  %v15565_v22 = vcombine.low %v3053_v6, %v3057_v9 }
 0x659   :  { %9546 = vmatprep.subr.bf16.mxu1 %v15590_v43  ;;  %v3049_v18 = vld [vmem:[#allocation6 + $0x3e8] sm:$0xff] }
 0x65a   :  { %9506 = vmatpush1.bf16.msra.mxu0 %v15461_v24  ;;  %v3173_v19 = vld [vmem:[#allocation6 + $0x7c8] sm:$0xff]  ;;  %v15558_v23 = vcombine.high %v3045_v17, %v3049_v18  ;;  %v15557_v0 = vcombine.low %v3045_v17, %v3049_v18 }
 0x65b   :  { %9507 = vmatprep.subr.bf16.mxu0 %v15454_v3  ;;  %v3177_v1 = vld [vmem:[#allocation6 + $0x7e8] sm:$0xff] }
 0x65c   :  { %9547 = vmatpush1.bf16.msra.mxu1 %v15589_v54  ;;  %v15686_v28 = vcombine.high %v3173_v19, %v3177_v1  ;;  %v3037_v30 = vld [vmem:[#allocation6 + $0x388] sm:$0xff]  ;;  %v15685_v42 = vcombine.low %v3173_v19, %v3177_v1 }
 0x65d   :  { %9548 = vmatprep.subr.bf16.mxu1 %v15582_v52  ;;  %v3041_v33 = vld [vmem:[#allocation6 + $0x3a8] sm:$0xff] }
 0x65e   :  { %9508 = vmatpush1.bf16.msra.mxu0 %v15453_v57  ;;  %v3165_v4 = vld [vmem:[#allocation6 + $0x788] sm:$0xff]  ;;  %v15550_v43 = vcombine.high %v3037_v30, %v3041_v33  ;;  %v15549_v54 = vcombine.low %v3037_v30, %v3041_v33 }
 0x65f   :  { %9509 = vmatprep.subr.bf16.mxu0 %v15446_v59  ;;  %v3169_v41 = vld [vmem:[#allocation6 + $0x7a8] sm:$0xff] }
 0x660   :  { %9549 = vmatpush1.bf16.msra.mxu1 %v15581_v58  ;;  %v15678_v46 = vcombine.high %v3165_v4, %v3169_v41  ;;  %v3029_v47 = vld [vmem:[#allocation6 + $0x348] sm:$0xff]  ;;  %v15677_v3 = vcombine.low %v3165_v4, %v3169_v41 }
 0x661   :  { %9550 = vmatprep.subr.bf16.mxu1 %v15574_v60  ;;  %v3033_v49 = vld [vmem:[#allocation6 + $0x368] sm:$0xff] }
 0x662   :  { %9510 = vmatpush1.bf16.msra.mxu0 %v15445_v10  ;;  %v3157_v15 = vld [vmem:[#allocation6 + $0x748] sm:$0xff]  ;;  %v15542_v52 = vcombine.high %v3029_v47, %v3033_v49  ;;  %v15541_v58 = vcombine.low %v3029_v47, %v3033_v49 }
 0x663   :  { %9511 = vmatprep.subr.bf16.mxu0 %v15438_v12  ;;  %v3161_v24 = vld [vmem:[#allocation6 + $0x768] sm:$0xff] }
 0x664   :  { %9551 = vmatpush1.bf16.msra.mxu1 %v15573_v11  ;;  %v15670_v53 = vcombine.high %v3157_v15, %v3161_v24  ;;  %v3021_v55 = vld [vmem:[#allocation6 + $0x308] sm:$0xff]  ;;  %v15669_v59 = vcombine.low %v3157_v15, %v3161_v24 }
 0x665   :  { %9552 = vmatprep.subr.bf16.mxu1 %v15566_v13  ;;  %v3025_v56 = vld [vmem:[#allocation6 + $0x328] sm:$0xff] }
 0x666   :  { %9512 = vmatpush1.bf16.msra.mxu0 %v15437_v21  ;;  %v3149_v40 = vld [vmem:[#allocation6 + $0x708] sm:$0xff]  ;;  %v15534_v60 = vcombine.high %v3021_v55, %v3025_v56  ;;  %v15533_v11 = vcombine.low %v3021_v55, %v3025_v56 }
 0x667   :  { %9513 = vmatprep.subr.bf16.mxu0 %v15558_v23  ;;  %v3153_v57 = vld [vmem:[#allocation6 + $0x728] sm:$0xff] }
 0x668   :  { %9553 = vmatpush1.bf16.msra.mxu1 %v15565_v22  ;;  %v15662_v62 = vcombine.high %v3149_v40, %v3153_v57  ;;  %v3013_v63 = vld [vmem:[#allocation6 + $0x2c8] sm:$0xff]  ;;  %v15661_v12 = vcombine.low %v3149_v40, %v3153_v57 }
 0x669   :  { %9554 = vmatprep.subr.bf16.mxu1 %v15686_v28  ;;  %v3017_v6 = vld [vmem:[#allocation6 + $0x2e8] sm:$0xff] }
 0x66a   :  { %9514 = vmatpush2.bf16.msra.mxu0 %v15557_v0  ;;  %v3141_v9 = vld [vmem:[#allocation6 + $0x6c8] sm:$0xff]  ;;  %v15526_v13 = vcombine.high %v3013_v63, %v3017_v6  ;;  %v15525_v22 = vcombine.low %v3013_v63, %v3017_v6 }
 0x66b   :  { %9515 = vmatprep.subr.bf16.mxu0 %v15550_v43  ;;  %v3145_v10 = vld [vmem:[#allocation6 + $0x6e8] sm:$0xff] }
 0x66c   :  { %9555 = vmatpush2.bf16.msra.mxu1 %v15685_v42  ;;  %v15654_v17 = vcombine.high %v3141_v9, %v3145_v10  ;;  %v3005_v18 = vld [vmem:[#allocation6 + $0x288] sm:$0xff]  ;;  %v15653_v23 = vcombine.low %v3141_v9, %v3145_v10 }
 0x66d   :  { %9556 = vmatprep.subr.bf16.mxu1 %v15678_v46  ;;  %v3009_v19 = vld [vmem:[#allocation6 + $0x2a8] sm:$0xff] }
 0x66e   :  { %9516 = vmatpush2.bf16.msra.mxu0 %v15549_v54  ;;  %v3133_v1 = vld [vmem:[#allocation6 + $0x688] sm:$0xff]  ;;  %v15518_v28 = vcombine.high %v3005_v18, %v3009_v19  ;;  %v15517_v42 = vcombine.low %v3005_v18, %v3009_v19 }
 0x66f   :  { %9517 = vmatprep.subr.bf16.mxu0 %v15542_v52  ;;  %v3137_v21 = vld [vmem:[#allocation6 + $0x6a8] sm:$0xff] }
 0x670   :  { %9557 = vmatpush2.bf16.msra.mxu1 %v15677_v3  ;;  %v15646_v30 = vcombine.high %v3133_v1, %v3137_v21  ;;  %v2997_v33 = vld [vmem:[#allocation6 + $0x248] sm:$0xff]  ;;  %v15645_v43 = vcombine.low %v3133_v1, %v3137_v21 }
 0x671   :  { %9558 = vmatprep.subr.bf16.mxu1 %v15670_v53  ;;  %v3001_v4 = vld [vmem:[#allocation6 + $0x268] sm:$0xff] }
 0x672   :  { %9518 = vmatpush2.bf16.msra.mxu0 %v15541_v58  ;;  %v3125_v41 = vld [vmem:[#allocation6 + $0x648] sm:$0xff]  ;;  %v15510_v46 = vcombine.high %v2997_v33, %v3001_v4  ;;  %v15509_v3 = vcombine.low %v2997_v33, %v3001_v4 }
 0x673   :  { %9519 = vmatprep.subr.bf16.mxu0 %v15534_v60  ;;  %v3129_v0 = vld [vmem:[#allocation6 + $0x668] sm:$0xff] }
 0x674   :  { %9559 = vmatpush2.bf16.msra.mxu1 %v15669_v59  ;;  %v15638_v47 = vcombine.high %v3125_v41, %v3129_v0  ;;  %v2989_v49 = vld [vmem:[#allocation6 + $0x208] sm:$0xff]  ;;  %v15637_v52 = vcombine.low %v3125_v41, %v3129_v0 }
 0x675   :  { %9560 = vmatprep.subr.bf16.mxu1 %v15662_v62  ;;  %v2993_v15 = vld [vmem:[#allocation6 + $0x228] sm:$0xff] }
 0x676   :  { %9520 = vmatpush2.bf16.msra.mxu0 %v15533_v11  ;;  %v3117_v24 = vld [vmem:[#allocation6 + $0x608] sm:$0xff]  ;;  %v15502_v53 = vcombine.high %v2989_v49, %v2993_v15  ;;  %v15501_v59 = vcombine.low %v2989_v49, %v2993_v15 }
 0x677   :  { %9521 = vmatprep.subr.bf16.mxu0 %v15526_v13  ;;  %v3121_v54 = vld [vmem:[#allocation6 + $0x628] sm:$0xff] }
 0x678   :  { %9561 = vmatpush2.bf16.msra.mxu1 %v15661_v12  ;;  %v15630_v55 = vcombine.high %v3117_v24, %v3121_v54  ;;  %v3237_v56 = vld [vmem:[#allocation6 + $0x9c8] sm:$0xff]  ;;  %v15629_v60 = vcombine.low %v3117_v24, %v3121_v54 }
 0x679   :  { %9562 = vmatprep.subr.bf16.mxu1 %v15654_v17  ;;  %v3241_v40 = vld [vmem:[#allocation6 + $0x9e8] sm:$0xff] }
 0x67a   :  { %9522 = vmatpush2.bf16.msra.mxu0 %v15525_v22  ;;  %v3365_v57 = vld [vmem:[#allocation6 + $0xdc8] sm:$0xff]  ;;  %v15750_v62 = vcombine.high %v3237_v56, %v3241_v40  ;;  %v15749_v12 = vcombine.low %v3237_v56, %v3241_v40 }
 0x67b   :  { %9523 = vmatprep.subr.bf16.mxu0 %v15518_v28  ;;  %v3369_v58 = vld [vmem:[#allocation6 + $0xde8] sm:$0xff] }
 0x67c   :  { %9563 = vmatpush2.bf16.msra.mxu1 %v15653_v23  ;;  %v15878_v63 = vcombine.high %v3365_v57, %v3369_v58  ;;  %v3229_v6 = vld [vmem:[#allocation6 + $0x988] sm:$0xff]  ;;  %v15877_v13 = vcombine.low %v3365_v57, %v3369_v58 }
 0x67d   :  { %9564 = vmatprep.subr.bf16.mxu1 %v15646_v30  ;;  %v3233_v9 = vld [vmem:[#allocation6 + $0x9a8] sm:$0xff] }
 0x67e   :  { %9524 = vmatpush2.bf16.msra.mxu0 %v15517_v42  ;;  %v3357_v10 = vld [vmem:[#allocation6 + $0xd88] sm:$0xff]  ;;  %v15742_v17 = vcombine.high %v3229_v6, %v3233_v9  ;;  %v15741_v33 = vcombine.low %v3229_v6, %v3233_v9 }
 0x67f   :  { %9525 = vmatprep.subr.bf16.mxu0 %v15510_v46  ;;  %v3361_v11 = vld [vmem:[#allocation6 + $0xda8] sm:$0xff] }
 0x680   :  { %9565 = vmatpush2.bf16.msra.mxu1 %v15645_v43  ;;  %v15870_v18 = vcombine.high %v3357_v10, %v3361_v11  ;;  %v3221_v19 = vld [vmem:[#allocation6 + $0x948] sm:$0xff]  ;;  %v15869_v41 = vcombine.low %v3357_v10, %v3361_v11 }
 0x681   :  { %9566 = vmatprep.subr.bf16.mxu1 %v15638_v47  ;;  %v3225_v1 = vld [vmem:[#allocation6 + $0x968] sm:$0xff] }
 0x682   :  { %9526 = vmatpush2.bf16.msra.mxu0 %v15509_v3  ;;  %v3349_v22 = vld [vmem:[#allocation6 + $0xd48] sm:$0xff]  ;;  %v15734_v0 = vcombine.high %v3221_v19, %v3225_v1 }
 0x683   :  { %9527 = vmatprep.subr.bf16.mxu0 %v15502_v53  ;;  %v3353_v23 = vld [vmem:[#allocation6 + $0xd68] sm:$0xff]  ;;  %v15733_v53 = vcombine.low %v3221_v19, %v3225_v1 }
 0x684   :  { %9567 = vmatpush2.bf16.msra.mxu1 %v15637_v52  ;;  %v15862_v47 = vcombine.high %v3349_v22, %v3353_v23  ;;  %v3213_v49 = vld [vmem:[#allocation6 + $0x908] sm:$0xff] }
 0x685   :  { %9568 = vmatprep.subr.bf16.mxu1 %v15630_v55  ;;  %v3217_v15 = vld [vmem:[#allocation6 + $0x928] sm:$0xff] }
 0x686   :  { %9528 = vmatpush2.bf16.msra.mxu0 %v15501_v59  ;;  %v3341_v24 = vld [vmem:[#allocation6 + $0xd08] sm:$0xff]  ;;  %v15726_v56 = vcombine.high %v3213_v49, %v3217_v15 }
 0x687   :  { %9579 = vmatprep.subr.bf16.mxu0 %v15750_v62  ;;  %v3345_v54 = vld [vmem:[#allocation6 + $0xd28] sm:$0xff] }
 0x688   :  { %9569 = vmatpush2.bf16.msra.mxu1 %v15629_v60  ;;  %v15854_v57 = vcombine.high %v3341_v24, %v3345_v54  ;;  %v3205_v58 = vld [vmem:[#allocation6 + $0x8c8] sm:$0xff]  ;;  %v15853_v6 = vcombine.low %v3341_v24, %v3345_v54 }
 0x689   :  { %9620 = vmatprep.subr.bf16.mxu1 %v15878_v63  ;;  %v9285_v21 = vpop.f32.mrf.mxu0  ;;  %9530 = vmatmul.mubr.bf16.vlgmr.msra.gmra.mxu0 %v19040_v45  ;;  %v3209_v59 = vld [vmem:[#allocation6 + $0x8e8] sm:$0xff]  ;;  %v15725_v63 = vcombine.low %v3213_v49, %v3217_v15 }
 0x68a   :  { %v9286_v28 = vadd.f32 %v9285_v21, %v19114_v61  ;;  %9580 = vmatpush1.bf16.msra.mxu0 %v15749_v12  ;;  %9611 = vmatprep.mubr.bf16.mxu0 %v19048_v35  ;;  %v3333_v60 = vld [vmem:[#allocation6 + $0xcc8] sm:$0xff]  ;;  %v15718_v9 = vcombine.high %v3205_v58, %v3209_v59 }
 0x68b   :  { %v9326_v30 = vpop.f32.mrf.mxu1  ;;  %9571 = vmatmul.mubr.bf16.vlgmr.msra.gmra.mxu1 %v19044_v48  ;;  %v9287_v4 = vpop.f32.mrf.mxu0  ;;  %9581 = vmatprep.subr.bf16.mxu0 %v15742_v17  ;;  %v3337_v62 = vld [vmem:[#allocation6 + $0xce8] sm:$0xff] }
 0x68c   :  { %9621 = vmatpush1.bf16.msra.mxu1 %v15877_v13  ;;  %v19123_v42 = vadd.f32 %v9326_v30, %v9286_v28  ;;  %v9288_v43 = vadd.f32 %v9287_v4, %v19118_v16  ;;  %9652 = vmatprep.mubr.bf16.mxu1 %v19053_v36  ;;  %v15861_v16 = vcombine.low %v3349_v22, %v3353_v23  ;;  %v3197_v11 = vld [vmem:[#allocation6 + $0x888] sm:$0xff] }
 0x68d   :  { %v9328_v46 = vpop.f32.mrf.mxu1  ;;  %9622 = vmatprep.subr.bf16.mxu1 %v15870_v18  ;;  %v9289_v61 = vpop.f32.mrf.mxu0  ;;  %v15846_v10 = vcombine.high %v3333_v60, %v3337_v62  ;;  %v3201_v12 = vld [vmem:[#allocation6 + $0x8a8] sm:$0xff]  ;;  %v15717_v18 = vcombine.low %v3205_v58, %v3209_v59  ;;  %v15845_v19 = vcombine.low %v3333_v60, %v3337_v62 }
 0x68e   :  { %v19128_v3 = vadd.f32 %v9328_v46, %v9288_v43  ;;  %9582 = vmatpush1.bf16.msra.mxu0 %v15741_v33  ;;  %v3325_v13 = vld [vmem:[#allocation6 + $0xc88] sm:$0xff]  ;;  %v15710_v1 = vcombine.high %v3197_v11, %v3201_v12  ;;  %v15709_v33 = vcombine.low %v3197_v11, %v3201_v12 }
 0x68f   :  { %v9330_v52 = vpop.f32.mrf.mxu1  ;;  %v9290_v55 = vpop.f32.mrf.mxu0  ;;  %9583 = vmatprep.subr.bf16.mxu0 %v15734_v0  ;;  %v3329_v17 = vld [vmem:[#allocation6 + $0xca8] sm:$0xff] }
 0x690   :  { %9623 = vmatpush1.bf16.msra.mxu1 %v15869_v41  ;;  %v15838_v21 = vcombine.high %v3325_v13, %v3329_v17  ;;  %v3189_v22 = vld [vmem:[#allocation6 + $0x848] sm:$0xff]  ;;  %v15837_v4 = vcombine.low %v3325_v13, %v3329_v17 }
 0x691   :  { %v9331_v40 = vpop.f32.mrf.mxu1  ;;  %9624 = vmatprep.subr.bf16.mxu1 %v15862_v47  ;;  %v3193_v23 = vld [vmem:[#allocation6 + $0x868] sm:$0xff] }
 0x692   :  { %9584 = vmatpush1.bf16.msra.mxu0 %v15733_v53  ;;  %v3317_v28 = vld [vmem:[#allocation6 + $0xc48] sm:$0xff]  ;;  %v15702_v41 = vcombine.high %v3189_v22, %v3193_v23  ;;  %v15701_v15 = vcombine.low %v3189_v22, %v3193_v23 }
 0x693   :  { %9585 = vmatprep.subr.bf16.mxu0 %v15726_v56  ;;  %v3321_v30 = vld [vmem:[#allocation6 + $0xc68] sm:$0xff] }
 0x694   :  { %9625 = vmatpush1.bf16.msra.mxu1 %v15861_v16  ;;  %v15830_v0 = vcombine.high %v3317_v28, %v3321_v30  ;;  %v3181_v43 = vld [vmem:[#allocation6 + $0x808] sm:$0xff]  ;;  %v15829_v61 = vcombine.low %v3317_v28, %v3321_v30 }
 0x695   :  { %9626 = vmatprep.subr.bf16.mxu1 %v15854_v57  ;;  %v3185_v46 = vld [vmem:[#allocation6 + $0x828] sm:$0xff] }
 0x696   :  { %9586 = vmatpush1.bf16.msra.mxu0 %v15725_v63  ;;  %v3309_v47 = vld [vmem:[#allocation6 + $0xc08] sm:$0xff]  ;;  %v15694_v24 = vcombine.high %v3181_v43, %v3185_v46  ;;  %v15693_v56 = vcombine.low %v3181_v43, %v3185_v46 }
 0x697   :  { %9587 = vmatprep.subr.bf16.mxu0 %v15718_v9  ;;  %v3313_v49 = vld [vmem:[#allocation6 + $0xc28] sm:$0xff] }
 0x698   :  { %9627 = vmatpush1.bf16.msra.mxu1 %v15853_v6  ;;  %v15822_v54 = vcombine.high %v3309_v47, %v3313_v49  ;;  %v3301_v52 = vld [vmem:[#allocation6 + $0xbc8] sm:$0xff]  ;;  %v15821_v40 = vcombine.low %v3309_v47, %v3313_v49 }
 0x699   :  { %9628 = vmatprep.subr.bf16.mxu1 %v15846_v10  ;;  %v3305_v53 = vld [vmem:[#allocation6 + $0xbe8] sm:$0xff] }
 0x69a   :  { %9588 = vmatpush1.bf16.msra.mxu0 %v15717_v18  ;;  %v3429_v55 = vld [vmem:[#allocation6 + $0xfc8] sm:$0xff]  ;;  %v15814_v57 = vcombine.high %v3301_v52, %v3305_v53  ;;  %v15813_v6 = vcombine.low %v3301_v52, %v3305_v53 }
 0x69b   :  { %9589 = vmatprep.subr.bf16.mxu0 %v15710_v1  ;;  %v3433_v16 = vld [vmem:[#allocation6 + $0xfe8] sm:$0xff] }
 0x69c   :  { %9629 = vmatpush1.bf16.msra.mxu1 %v15845_v19  ;;  %v15942_v58 = vcombine.high %v3429_v55, %v3433_v16  ;;  %v3293_v59 = vld [vmem:[#allocation6 + $0xb88] sm:$0xff]  ;;  %v15941_v9 = vcombine.low %v3429_v55, %v3433_v16 }
 0x69d   :  { %9630 = vmatprep.subr.bf16.mxu1 %v15838_v21  ;;  %v3297_v60 = vld [vmem:[#allocation6 + $0xba8] sm:$0xff] }
 0x69e   :  { %9590 = vmatpush1.bf16.msra.mxu0 %v15709_v33  ;;  %v3421_v62 = vld [vmem:[#allocation6 + $0xf88] sm:$0xff]  ;;  %v15806_v10 = vcombine.high %v3293_v59, %v3297_v60  ;;  %v15805_v19 = vcombine.low %v3293_v59, %v3297_v60 }
 0x69f   :  { %9591 = vmatprep.subr.bf16.mxu0 %v15702_v41  ;;  %v3425_v63 = vld [vmem:[#allocation6 + $0xfa8] sm:$0xff] }
 0x6a0   :  { %9631 = vmatpush1.bf16.msra.mxu1 %v15837_v4  ;;  %v15934_v11 = vcombine.high %v3421_v62, %v3425_v63  ;;  %v3285_v12 = vld [vmem:[#allocation6 + $0xb48] sm:$0xff]  ;;  %v15933_v1 = vcombine.low %v3421_v62, %v3425_v63 }
 0x6a1   :  { %9632 = vmatprep.subr.bf16.mxu1 %v15830_v0  ;;  %v3289_v13 = vld [vmem:[#allocation6 + $0xb68] sm:$0xff] }
 0x6a2   :  { %9592 = vmatpush1.bf16.msra.mxu0 %v15701_v15  ;;  %v3413_v17 = vld [vmem:[#allocation6 + $0xf48] sm:$0xff]  ;;  %v15798_v21 = vcombine.high %v3285_v12, %v3289_v13  ;;  %v15797_v4 = vcombine.low %v3285_v12, %v3289_v13 }
 0x6a3   :  { %9593 = vmatprep.subr.bf16.mxu0 %v15694_v24  ;;  %v3417_v18 = vld [vmem:[#allocation6 + $0xf68] sm:$0xff] }
 0x6a4   :  { %9633 = vmatpush1.bf16.msra.mxu1 %v15829_v61  ;;  %v15926_v22 = vcombine.high %v3413_v17, %v3417_v18  ;;  %v3277_v23 = vld [vmem:[#allocation6 + $0xb08] sm:$0xff]  ;;  %v15925_v41 = vcombine.low %v3413_v17, %v3417_v18 }
 0x6a5   :  { %9634 = vmatprep.subr.bf16.mxu1 %v15822_v54  ;;  %v3281_v28 = vld [vmem:[#allocation6 + $0xb28] sm:$0xff] }
 0x6a6   :  { %9594 = vmatpush1.bf16.msra.mxu0 %v15693_v56  ;;  %v3405_v30 = vld [vmem:[#allocation6 + $0xf08] sm:$0xff]  ;;  %v15790_v0 = vcombine.high %v3277_v23, %v3281_v28  ;;  %v15789_v61 = vcombine.low %v3277_v23, %v3281_v28 }
 0x6a7   :  { %9595 = vmatprep.subr.bf16.mxu0 %v15814_v57  ;;  %v3409_v33 = vld [vmem:[#allocation6 + $0xf28] sm:$0xff] }
 0x6a8   :  { %9635 = vmatpush1.bf16.msra.mxu1 %v15821_v40  ;;  %v15918_v43 = vcombine.high %v3405_v30, %v3409_v33  ;;  %v3269_v46 = vld [vmem:[#allocation6 + $0xac8] sm:$0xff]  ;;  %v15917_v24 = vcombine.low %v3405_v30, %v3409_v33 }
 0x6a9   :  { %9636 = vmatprep.subr.bf16.mxu1 %v15942_v58  ;;  %v3273_v47 = vld [vmem:[#allocation6 + $0xae8] sm:$0xff] }
 0x6aa   :  { %9596 = vmatpush2.bf16.msra.mxu0 %v15813_v6  ;;  %v3397_v49 = vld [vmem:[#allocation6 + $0xec8] sm:$0xff]  ;;  %v15782_v54 = vcombine.high %v3269_v46, %v3273_v47  ;;  %v15781_v40 = vcombine.low %v3269_v46, %v3273_v47 }
 0x6ab   :  { %9597 = vmatprep.subr.bf16.mxu0 %v15806_v10  ;;  %v3401_v15 = vld [vmem:[#allocation6 + $0xee8] sm:$0xff] }
 0x6ac   :  { %9637 = vmatpush2.bf16.msra.mxu1 %v15941_v9  ;;  %v15910_v52 = vcombine.high %v3397_v49, %v3401_v15  ;;  %v3261_v53 = vld [vmem:[#allocation6 + $0xa88] sm:$0xff]  ;;  %v15909_v57 = vcombine.low %v3397_v49, %v3401_v15 }
 0x6ad   :  { %9638 = vmatprep.subr.bf16.mxu1 %v15934_v11  ;;  %v3265_v55 = vld [vmem:[#allocation6 + $0xaa8] sm:$0xff] }
 0x6ae   :  { %9598 = vmatpush2.bf16.msra.mxu0 %v15805_v19  ;;  %v3389_v16 = vld [vmem:[#allocation6 + $0xe88] sm:$0xff]  ;;  %v15774_v58 = vcombine.high %v3261_v53, %v3265_v55  ;;  %v15773_v9 = vcombine.low %v3261_v53, %v3265_v55 }
 0x6af   :  { %9599 = vmatprep.subr.bf16.mxu0 %v15798_v21  ;;  %v3393_v56 = vld [vmem:[#allocation6 + $0xea8] sm:$0xff] }
 0x6b0   :  { %9639 = vmatpush2.bf16.msra.mxu1 %v15933_v1  ;;  %v15902_v59 = vcombine.high %v3389_v16, %v3393_v56  ;;  %v3253_v60 = vld [vmem:[#allocation6 + $0xa48] sm:$0xff]  ;;  %v15901_v10 = vcombine.low %v3389_v16, %v3393_v56 }
 0x6b1   :  { %9640 = vmatprep.subr.bf16.mxu1 %v15926_v22  ;;  %v3257_v62 = vld [vmem:[#allocation6 + $0xa68] sm:$0xff] }
 0x6b2   :  { %9600 = vmatpush2.bf16.msra.mxu0 %v15797_v4  ;;  %v3381_v63 = vld [vmem:[#allocation6 + $0xe48] sm:$0xff]  ;;  %v15766_v11 = vcombine.high %v3253_v60, %v3257_v62  ;;  %v15765_v1 = vcombine.low %v3253_v60, %v3257_v62 }
 0x6b3   :  { %9601 = vmatprep.subr.bf16.mxu0 %v15790_v0  ;;  %v3385_v6 = vld [vmem:[#allocation6 + $0xe68] sm:$0xff] }
 0x6b4   :  { %9641 = vmatpush2.bf16.msra.mxu1 %v15925_v41  ;;  %v15894_v12 = vcombine.high %v3381_v63, %v3385_v6  ;;  %v3245_v13 = vld [vmem:[#allocation6 + $0xa08] sm:$0xff]  ;;  %v15893_v21 = vcombine.low %v3381_v63, %v3385_v6 }
 0x6b5   :  { %9642 = vmatprep.subr.bf16.mxu1 %v15918_v43  ;;  %v3249_v17 = vld [vmem:[#allocation6 + $0xa28] sm:$0xff] }
 0x6b6   :  { %9602 = vmatpush2.bf16.msra.mxu0 %v15789_v61  ;;  %v3373_v18 = vld [vmem:[#allocation6 + $0xe08] sm:$0xff]  ;;  %v15758_v22 = vcombine.high %v3245_v13, %v3249_v17  ;;  %v15757_v41 = vcombine.low %v3245_v13, %v3249_v17 }
 0x6b7   :  { %9603 = vmatprep.subr.bf16.mxu0 %v15782_v54  ;;  %v3377_v19 = vld [vmem:[#allocation6 + $0xe28] sm:$0xff] }
 0x6b8   :  { %9643 = vmatpush2.bf16.msra.mxu1 %v15917_v24  ;;  %v15886_v23 = vcombine.high %v3373_v18, %v3377_v19  ;;  %v3493_v28 = vld [vmem:[#allocation6 + $0x11c8] sm:$0xff]  ;;  %v15885_v0 = vcombine.low %v3373_v18, %v3377_v19 }
 0x6b9   :  { %9644 = vmatprep.subr.bf16.mxu1 %v15910_v52  ;;  %v3497_v30 = vld [vmem:[#allocation6 + $0x11e8] sm:$0xff] }
 0x6ba   :  { %9604 = vmatpush2.bf16.msra.mxu0 %v15781_v40  ;;  %v3621_v33 = vld [vmem:[#allocation6 + $0x15c8] sm:$0xff]  ;;  %v16006_v43 = vcombine.high %v3493_v28, %v3497_v30  ;;  %v16005_v24 = vcombine.low %v3493_v28, %v3497_v30 }
 0x6bb   :  { %9605 = vmatprep.subr.bf16.mxu0 %v15774_v58  ;;  %v3625_v4 = vld [vmem:[#allocation6 + $0x15e8] sm:$0xff] }
 0x6bc   :  { %9645 = vmatpush2.bf16.msra.mxu1 %v15909_v57  ;;  %v16134_v46 = vcombine.high %v3621_v33, %v3625_v4  ;;  %v3485_v47 = vld [vmem:[#allocation6 + $0x1188] sm:$0xff]  ;;  %v16133_v54 = vcombine.low %v3621_v33, %v3625_v4 }
 0x6bd   :  { %9646 = vmatprep.subr.bf16.mxu1 %v15902_v59  ;;  %v3489_v49 = vld [vmem:[#allocation6 + $0x11a8] sm:$0xff] }
 0x6be   :  { %9606 = vmatpush2.bf16.msra.mxu0 %v15773_v9  ;;  %v3613_v15 = vld [vmem:[#allocation6 + $0x1588] sm:$0xff]  ;;  %v15998_v52 = vcombine.high %v3485_v47, %v3489_v49  ;;  %v15997_v60 = vcombine.low %v3485_v47, %v3489_v49 }
 0x6bf   :  { %9607 = vmatprep.subr.bf16.mxu0 %v15766_v11  ;;  %v3617_v61 = vld [vmem:[#allocation6 + $0x15a8] sm:$0xff] }
 0x6c0   :  { %9647 = vmatpush2.bf16.msra.mxu1 %v15901_v10  ;;  %v16126_v53 = vcombine.high %v3613_v15, %v3617_v61  ;;  %v3477_v55 = vld [vmem:[#allocation6 + $0x1148] sm:$0xff]  ;;  %v16125_v63 = vcombine.low %v3613_v15, %v3617_v61 }
 0x6c1   :  { %9648 = vmatprep.subr.bf16.mxu1 %v15894_v12  ;;  %v3481_v16 = vld [vmem:[#allocation6 + $0x1168] sm:$0xff] }
 0x6c2   :  { %9608 = vmatpush2.bf16.msra.mxu0 %v15765_v1  ;;  %v3605_v40 = vld [vmem:[#allocation6 + $0x1548] sm:$0xff]  ;;  %v15990_v6 = vcombine.high %v3477_v55, %v3481_v16 }
 0x6c3   :  { %9609 = vmatprep.subr.bf16.mxu0 %v15758_v22  ;;  %v3609_v57 = vld [vmem:[#allocation6 + $0x1568] sm:$0xff]  ;;  %v15989_v22 = vcombine.low %v3477_v55, %v3481_v16 }
 0x6c4   :  { %9649 = vmatpush2.bf16.msra.mxu1 %v15893_v21  ;;  %v16118_v12 = vcombine.high %v3605_v40, %v3609_v57  ;;  %v3469_v13 = vld [vmem:[#allocation6 + $0x1108] sm:$0xff] }
 0x6c5   :  { %9650 = vmatprep.subr.bf16.mxu1 %v15886_v23  ;;  %v3473_v17 = vld [vmem:[#allocation6 + $0x1128] sm:$0xff] }
 0x6c6   :  { %9610 = vmatpush2.bf16.msra.mxu0 %v15757_v41  ;;  %v3597_v18 = vld [vmem:[#allocation6 + $0x1508] sm:$0xff]  ;;  %v15982_v28 = vcombine.high %v3469_v13, %v3473_v17 }
 0x6c7   :  { %9661 = vmatprep.subr.bf16.mxu0 %v16006_v43  ;;  %v3601_v19 = vld [vmem:[#allocation6 + $0x1528] sm:$0xff] }
 0x6c8   :  { %9651 = vmatpush2.bf16.msra.mxu1 %v15885_v0  ;;  %v16110_v33 = vcombine.high %v3597_v18, %v3601_v19  ;;  %v3461_v4 = vld [vmem:[#allocation6 + $0x10c8] sm:$0xff]  ;;  %v16109_v47 = vcombine.low %v3597_v18, %v3601_v19 }
 0x6c9   :  { %9702 = vmatprep.subr.bf16.mxu1 %v16134_v46  ;;  %v9367_v56 = vpop.f32.mrf.mxu0  ;;  %9612 = vmatmul.mubr.bf16.vlgmr.msra.gmra.mxu0 %v19060_v2  ;;  %v3465_v41 = vld [vmem:[#allocation6 + $0x10e8] sm:$0xff]  ;;  %v15981_v46 = vcombine.low %v3469_v13, %v3473_v17 }
 0x6ca   :  { %v9368_v58 = vadd.f32 %v9367_v56, %v19123_v42  ;;  %9662 = vmatpush1.bf16.msra.mxu0 %v16005_v24  ;;  %9693 = vmatprep.mubr.bf16.mxu0 %v19068_v37  ;;  %v3589_v0 = vld [vmem:[#allocation6 + $0x14c8] sm:$0xff]  ;;  %v15974_v49 = vcombine.high %v3461_v4, %v3465_v41 }
 0x6cb   :  { %v9408_v59 = vpop.f32.mrf.mxu1  ;;  %9653 = vmatmul.mubr.bf16.vlgmr.msra.gmra.mxu1 %v19064_v5  ;;  %v9369_v62 = vpop.f32.mrf.mxu0  ;;  %9663 = vmatprep.subr.bf16.mxu0 %v15998_v52  ;;  %v3593_v43 = vld [vmem:[#allocation6 + $0x14e8] sm:$0xff] }
 0x6cc   :  { %9703 = vmatpush1.bf16.msra.mxu1 %v16133_v54  ;;  %v19133_v9 = vadd.f32 %v9408_v59, %v9368_v58  ;;  %v9370_v10 = vadd.f32 %v9369_v62, %v19128_v3  ;;  %9734 = vmatprep.mubr.bf16.mxu1 %v19073_v38  ;;  %v16117_v3 = vcombine.low %v3605_v40, %v3609_v57  ;;  %v3453_v61 = vld [vmem:[#allocation6 + $0x1088] sm:$0xff] }
 0x6cd   :  { %v9410_v11 = vpop.f32.mrf.mxu1  ;;  %9704 = vmatprep.subr.bf16.mxu1 %v16126_v53  ;;  %v9371_v42 = vpop.f32.mrf.mxu0  ;;  %v16102_v15 = vcombine.high %v3589_v0, %v3593_v43  ;;  %v3457_v24 = vld [vmem:[#allocation6 + $0x10a8] sm:$0xff]  ;;  %v15973_v53 = vcombine.low %v3461_v4, %v3465_v41  ;;  %v16101_v55 = vcombine.low %v3589_v0, %v3593_v43 }
 0x6ce   :  { %v19138_v1 = vadd.f32 %v9410_v11, %v9370_v10  ;;  %9664 = vmatpush1.bf16.msra.mxu0 %v15997_v60  ;;  %v3581_v54 = vld [vmem:[#allocation6 + $0x1488] sm:$0xff]  ;;  %v15966_v16 = vcombine.high %v3453_v61, %v3457_v24  ;;  %v15965_v60 = vcombine.low %v3453_v61, %v3457_v24 }
 0x6cf   :  { %v9412_v21 = vpop.f32.mrf.mxu1  ;;  %v9372_v23 = vpop.f32.mrf.mxu0  ;;  %9665 = vmatprep.subr.bf16.mxu0 %v15990_v6  ;;  %v3585_v52 = vld [vmem:[#allocation6 + $0x14a8] sm:$0xff] }
 0x6d0   :  { %9705 = vmatpush1.bf16.msra.mxu1 %v16125_v63  ;;  %v16094_v56 = vcombine.high %v3581_v54, %v3585_v52  ;;  %v3445_v40 = vld [vmem:[#allocation6 + $0x1048] sm:$0xff]  ;;  %v16093_v62 = vcombine.low %v3581_v54, %v3585_v52 }
 0x6d1   :  { %v9413_v30 = vpop.f32.mrf.mxu1  ;;  %9706 = vmatprep.subr.bf16.mxu1 %v16118_v12  ;;  %v3449_v57 = vld [vmem:[#allocation6 + $0x1068] sm:$0xff] }
 0x6d2   :  { %9666 = vmatpush1.bf16.msra.mxu0 %v15989_v22  ;;  %v3573_v58 = vld [vmem:[#allocation6 + $0x1448] sm:$0xff]  ;;  %v15958_v63 = vcombine.high %v3445_v40, %v3449_v57  ;;  %v15957_v17 = vcombine.low %v3445_v40, %v3449_v57 }
 0x6d3   :  { %9667 = vmatprep.subr.bf16.mxu0 %v15982_v28  ;;  %v3577_v59 = vld [vmem:[#allocation6 + $0x1468] sm:$0xff] }
 0x6d4   :  { %9707 = vmatpush1.bf16.msra.mxu1 %v16117_v3  ;;  %v16086_v6 = vcombine.high %v3573_v58, %v3577_v59  ;;  %v3437_v10 = vld [vmem:[#allocation6 + $0x1008] sm:$0xff]  ;;  %v16085_v42 = vcombine.low %v3573_v58, %v3577_v59 }
 0x6d5   :  { %9708 = vmatprep.subr.bf16.mxu1 %v16110_v33  ;;  %v3441_v11 = vld [vmem:[#allocation6 + $0x1028] sm:$0xff] }
 0x6d6   :  { %9668 = vmatpush1.bf16.msra.mxu0 %v15981_v46  ;;  %v3565_v12 = vld [vmem:[#allocation6 + $0x1408] sm:$0xff]  ;;  %v15950_v18 = vcombine.high %v3437_v10, %v3441_v11  ;;  %v15949_v28 = vcombine.low %v3437_v10, %v3441_v11 }
 0x6d7   :  { %9669 = vmatprep.subr.bf16.mxu0 %v15974_v49  ;;  %v3569_v13 = vld [vmem:[#allocation6 + $0x1428] sm:$0xff] }
 0x6d8   :  { %9709 = vmatpush1.bf16.msra.mxu1 %v16109_v47  ;;  %v16078_v19 = vcombine.high %v3565_v12, %v3569_v13  ;;  %v3557_v21 = vld [vmem:[#allocation6 + $0x13c8] sm:$0xff]  ;;  %v16077_v30 = vcombine.low %v3565_v12, %v3569_v13 }
 0x6d9   :  { %9710 = vmatprep.subr.bf16.mxu1 %v16102_v15  ;;  %v3561_v22 = vld [vmem:[#allocation6 + $0x13e8] sm:$0xff] }
 0x6da   :  { %9670 = vmatpush1.bf16.msra.mxu0 %v15973_v53  ;;  %v3685_v23 = vld [vmem:[#allocation6 + $0x17c8] sm:$0xff]  ;;  %v16070_v33 = vcombine.high %v3557_v21, %v3561_v22  ;;  %v16069_v47 = vcombine.low %v3557_v21, %v3561_v22 }
 0x6db   :  { %9671 = vmatprep.subr.bf16.mxu0 %v15966_v16  ;;  %v3689_v3 = vld [vmem:[#allocation6 + $0x17e8] sm:$0xff] }
 0x6dc   :  { %9711 = vmatpush1.bf16.msra.mxu1 %v16101_v55  ;;  %v16198_v4 = vcombine.high %v3685_v23, %v3689_v3  ;;  %v3549_v41 = vld [vmem:[#allocation6 + $0x1388] sm:$0xff]  ;;  %v16197_v49 = vcombine.low %v3685_v23, %v3689_v3 }
 0x6dd   :  { %9712 = vmatprep.subr.bf16.mxu1 %v16094_v56  ;;  %v3553_v0 = vld [vmem:[#allocation6 + $0x13a8] sm:$0xff] }
 0x6de   :  { %9672 = vmatpush1.bf16.msra.mxu0 %v15965_v60  ;;  %v3677_v43 = vld [vmem:[#allocation6 + $0x1788] sm:$0xff]  ;;  %v16062_v15 = vcombine.high %v3549_v41, %v3553_v0  ;;  %v16061_v55 = vcombine.low %v3549_v41, %v3553_v0 }
 0x6df   :  { %9673 = vmatprep.subr.bf16.mxu0 %v15958_v63  ;;  %v3681_v46 = vld [vmem:[#allocation6 + $0x17a8] sm:$0xff] }
 0x6e0   :  { %9713 = vmatpush1.bf16.msra.mxu1 %v16093_v62  ;;  %v16190_v61 = vcombine.high %v3677_v43, %v3681_v46  ;;  %v3541_v24 = vld [vmem:[#allocation6 + $0x1348] sm:$0xff]  ;;  %v16189_v16 = vcombine.low %v3677_v43, %v3681_v46 }
 0x6e1   :  { %9714 = vmatprep.subr.bf16.mxu1 %v16086_v6  ;;  %v3545_v54 = vld [vmem:[#allocation6 + $0x1368] sm:$0xff] }
 0x6e2   :  { %9674 = vmatpush1.bf16.msra.mxu0 %v15957_v17  ;;  %v3669_v52 = vld [vmem:[#allocation6 + $0x1748] sm:$0xff]  ;;  %v16054_v56 = vcombine.high %v3541_v24, %v3545_v54  ;;  %v16053_v62 = vcombine.low %v3541_v24, %v3545_v54 }
 0x6e3   :  { %9675 = vmatprep.subr.bf16.mxu0 %v15950_v18  ;;  %v3673_v53 = vld [vmem:[#allocation6 + $0x1768] sm:$0xff] }
 0x6e4   :  { %9715 = vmatpush1.bf16.msra.mxu1 %v16085_v42  ;;  %v16182_v40 = vcombine.high %v3669_v52, %v3673_v53  ;;  %v3533_v57 = vld [vmem:[#allocation6 + $0x1308] sm:$0xff]  ;;  %v16181_v63 = vcombine.low %v3669_v52, %v3673_v53 }
 0x6e5   :  { %9716 = vmatprep.subr.bf16.mxu1 %v16078_v19  ;;  %v3537_v58 = vld [vmem:[#allocation6 + $0x1328] sm:$0xff] }
 0x6e6   :  { %9676 = vmatpush1.bf16.msra.mxu0 %v15949_v28  ;;  %v3661_v59 = vld [vmem:[#allocation6 + $0x1708] sm:$0xff]  ;;  %v16046_v6 = vcombine.high %v3533_v57, %v3537_v58  ;;  %v16045_v42 = vcombine.low %v3533_v57, %v3537_v58 }
 0x6e7   :  { %9677 = vmatprep.subr.bf16.mxu0 %v16070_v33  ;;  %v3665_v60 = vld [vmem:[#allocation6 + $0x1728] sm:$0xff] }
 0x6e8   :  { %9717 = vmatpush1.bf16.msra.mxu1 %v16077_v30  ;;  %v16174_v10 = vcombine.high %v3661_v59, %v3665_v60  ;;  %v3525_v11 = vld [vmem:[#allocation6 + $0x12c8] sm:$0xff]  ;;  %v16173_v18 = vcombine.low %v3661_v59, %v3665_v60 }
 0x6e9   :  { %9718 = vmatprep.subr.bf16.mxu1 %v16198_v4  ;;  %v3529_v12 = vld [vmem:[#allocation6 + $0x12e8] sm:$0xff] }
 0x6ea   :  { %9678 = vmatpush2.bf16.msra.mxu0 %v16069_v47  ;;  %v3653_v13 = vld [vmem:[#allocation6 + $0x16c8] sm:$0xff]  ;;  %v16038_v19 = vcombine.high %v3525_v11, %v3529_v12  ;;  %v16037_v30 = vcombine.low %v3525_v11, %v3529_v12 }
 0x6eb   :  { %9679 = vmatprep.subr.bf16.mxu0 %v16062_v15  ;;  %v3657_v17 = vld [vmem:[#allocation6 + $0x16e8] sm:$0xff] }
 0x6ec   :  { %9719 = vmatpush2.bf16.msra.mxu1 %v16197_v49  ;;  %v16166_v21 = vcombine.high %v3653_v13, %v3657_v17  ;;  %v3517_v22 = vld [vmem:[#allocation6 + $0x1288] sm:$0xff]  ;;  %v16165_v33 = vcombine.low %v3653_v13, %v3657_v17 }
 0x6ed   :  { %9720 = vmatprep.subr.bf16.mxu1 %v16190_v61  ;;  %v3521_v23 = vld [vmem:[#allocation6 + $0x12a8] sm:$0xff] }
 0x6ee   :  { %9680 = vmatpush2.bf16.msra.mxu0 %v16061_v55  ;;  %v3645_v3 = vld [vmem:[#allocation6 + $0x1688] sm:$0xff]  ;;  %v16030_v4 = vcombine.high %v3517_v22, %v3521_v23  ;;  %v16029_v49 = vcombine.low %v3517_v22, %v3521_v23 }
 0x6ef   :  { %9681 = vmatprep.subr.bf16.mxu0 %v16054_v56  ;;  %v3649_v28 = vld [vmem:[#allocation6 + $0x16a8] sm:$0xff] }
 0x6f0   :  { %9721 = vmatpush2.bf16.msra.mxu1 %v16189_v16  ;;  %v16158_v41 = vcombine.high %v3645_v3, %v3649_v28  ;;  %v3509_v0 = vld [vmem:[#allocation6 + $0x1248] sm:$0xff]  ;;  %v16157_v15 = vcombine.low %v3645_v3, %v3649_v28 }
 0x6f1   :  { %9722 = vmatprep.subr.bf16.mxu1 %v16182_v40  ;;  %v3513_v43 = vld [vmem:[#allocation6 + $0x1268] sm:$0xff] }
 0x6f2   :  { %9682 = vmatpush2.bf16.msra.mxu0 %v16053_v62  ;;  %v3637_v46 = vld [vmem:[#allocation6 + $0x1648] sm:$0xff]  ;;  %v16022_v61 = vcombine.high %v3509_v0, %v3513_v43  ;;  %v16021_v16 = vcombine.low %v3509_v0, %v3513_v43 }
 0x6f3   :  { %9683 = vmatprep.subr.bf16.mxu0 %v16046_v6  ;;  %v3641_v47 = vld [vmem:[#allocation6 + $0x1668] sm:$0xff] }
 0x6f4   :  { %9723 = vmatpush2.bf16.msra.mxu1 %v16181_v63  ;;  %v16150_v24 = vcombine.high %v3637_v46, %v3641_v47  ;;  %v3501_v54 = vld [vmem:[#allocation6 + $0x1208] sm:$0xff]  ;;  %v16149_v56 = vcombine.low %v3637_v46, %v3641_v47 }
 0x6f5   :  { %9724 = vmatprep.subr.bf16.mxu1 %v16174_v10  ;;  %v3505_v52 = vld [vmem:[#allocation6 + $0x1228] sm:$0xff] }
 0x6f6   :  { %9684 = vmatpush2.bf16.msra.mxu0 %v16045_v42  ;;  %v3629_v53 = vld [vmem:[#allocation6 + $0x1608] sm:$0xff]  ;;  %v16014_v40 = vcombine.high %v3501_v54, %v3505_v52  ;;  %v16013_v63 = vcombine.low %v3501_v54, %v3505_v52 }
 0x6f7   :  { %9685 = vmatprep.subr.bf16.mxu0 %v16038_v19  ;;  %v3633_v55 = vld [vmem:[#allocation6 + $0x1628] sm:$0xff] }
 0x6f8   :  { %9725 = vmatpush2.bf16.msra.mxu1 %v16173_v18  ;;  %v16142_v57 = vcombine.high %v3629_v53, %v3633_v55  ;;  %v3749_v58 = vld [vmem:[#allocation6 + $0x19c8] sm:$0xff]  ;;  %v16141_v6 = vcombine.low %v3629_v53, %v3633_v55 }
 0x6f9   :  { %9726 = vmatprep.subr.bf16.mxu1 %v16166_v21  ;;  %v3753_v59 = vld [vmem:[#allocation6 + $0x19e8] sm:$0xff] }
 0x6fa   :  { %9686 = vmatpush2.bf16.msra.mxu0 %v16037_v30  ;;  %v3877_v60 = vld [vmem:[#allocation6 + $0x1dc8] sm:$0xff]  ;;  %v16262_v10 = vcombine.high %v3749_v58, %v3753_v59  ;;  %v16261_v18 = vcombine.low %v3749_v58, %v3753_v59 }
 0x6fb   :  { %9687 = vmatprep.subr.bf16.mxu0 %v16030_v4  ;;  %v3881_v62 = vld [vmem:[#allocation6 + $0x1de8] sm:$0xff] }
 0x6fc   :  { %9727 = vmatpush2.bf16.msra.mxu1 %v16165_v33  ;;  %v16390_v11 = vcombine.high %v3877_v60, %v3881_v62  ;;  %v3741_v12 = vld [vmem:[#allocation6 + $0x1988] sm:$0xff]  ;;  %v16389_v19 = vcombine.low %v3877_v60, %v3881_v62 }
 0x6fd   :  { %9728 = vmatprep.subr.bf16.mxu1 %v16158_v41  ;;  %v3745_v13 = vld [vmem:[#allocation6 + $0x19a8] sm:$0xff] }
 0x6fe   :  { %9688 = vmatpush2.bf16.msra.mxu0 %v16029_v49  ;;  %v3869_v17 = vld [vmem:[#allocation6 + $0x1d88] sm:$0xff]  ;;  %v16254_v21 = vcombine.high %v3741_v12, %v3745_v13  ;;  %v16253_v0 = vcombine.low %v3741_v12, %v3745_v13 }
 0x6ff   :  { %9689 = vmatprep.subr.bf16.mxu0 %v16022_v61  ;;  %v3873_v42 = vld [vmem:[#allocation6 + $0x1da8] sm:$0xff] }
 0x700   :  { %9729 = vmatpush2.bf16.msra.mxu1 %v16157_v15  ;;  %v16382_v22 = vcombine.high %v3869_v17, %v3873_v42  ;;  %v3733_v23 = vld [vmem:[#allocation6 + $0x1948] sm:$0xff]  ;;  %v16381_v46 = vcombine.low %v3869_v17, %v3873_v42 }
 0x701   :  { %9730 = vmatprep.subr.bf16.mxu1 %v16150_v24  ;;  %v3737_v3 = vld [vmem:[#allocation6 + $0x1968] sm:$0xff] }
 0x702   :  { %9690 = vmatpush2.bf16.msra.mxu0 %v16021_v16  ;;  %v3861_v30 = vld [vmem:[#allocation6 + $0x1d48] sm:$0xff]  ;;  %v16246_v47 = vcombine.high %v3733_v23, %v3737_v3 }
 0x703   :  { %9691 = vmatprep.subr.bf16.mxu0 %v16014_v40  ;;  %v3865_v33 = vld [vmem:[#allocation6 + $0x1d68] sm:$0xff] }
 0x704   :  { %9731 = vmatpush2.bf16.msra.mxu1 %v16149_v56  ;;  %v16374_v24 = vcombine.high %v3861_v30, %v3865_v33  ;;  %v3725_v54 = vld [vmem:[#allocation6 + $0x1908] sm:$0xff]  ;;  %v16373_v58 = vcombine.low %v3861_v30, %v3865_v33 }
 0x705   :  { %9732 = vmatprep.subr.bf16.mxu1 %v16142_v57  ;;  %v3729_v52 = vld [vmem:[#allocation6 + $0x1928] sm:$0xff]  ;;  %v16245_v57 = vcombine.low %v3733_v23, %v3737_v3 }
 0x706   :  { %9692 = vmatpush2.bf16.msra.mxu0 %v16013_v63  ;;  %v3853_v53 = vld [vmem:[#allocation6 + $0x1d08] sm:$0xff]  ;;  %v16238_v59 = vcombine.high %v3725_v54, %v3729_v52  ;;  %v16237_v42 = vcombine.low %v3725_v54, %v3729_v52 }
 0x707   :  { %9743 = vmatprep.subr.bf16.mxu0 %v16262_v10  ;;  %v3857_v55 = vld [vmem:[#allocation6 + $0x1d28] sm:$0xff] }
 0x708   :  { %9733 = vmatpush2.bf16.msra.mxu1 %v16141_v6  ;;  %v16366_v6 = vcombine.high %v3853_v53, %v3857_v55  ;;  %v3717_v10 = vld [vmem:[#allocation6 + $0x18c8] sm:$0xff] }
 0x709   :  { %9784 = vmatprep.subr.bf16.mxu1 %v16390_v11  ;;  %v9449_v28 = vpop.f32.mrf.mxu0  ;;  %9694 = vmatmul.mubr.bf16.vlgmr.msra.gmra.mxu0 %v19080_v27  ;;  %v3721_v11 = vld [vmem:[#allocation6 + $0x18e8] sm:$0xff] }
 0x70a   :  { %v9450_v4 = vadd.f32 %v9449_v28, %v19133_v9  ;;  %9744 = vmatpush1.bf16.msra.mxu0 %v16261_v18  ;;  %9775 = vmatprep.mubr.bf16.mxu0 %v19088_v39  ;;  %v3845_v12 = vld [vmem:[#allocation6 + $0x1cc8] sm:$0xff]  ;;  %v16365_v18 = vcombine.low %v3853_v53, %v3857_v55  ;;  %v16229_v30 = vcombine.low %v3717_v10, %v3721_v11 }
 0x70b   :  { %v9490_v41 = vpop.f32.mrf.mxu1  ;;  %9735 = vmatmul.mubr.bf16.vlgmr.msra.gmra.mxu1 %v19084_v31  ;;  %v9451_v43 = vpop.f32.mrf.mxu0  ;;  %9745 = vmatprep.subr.bf16.mxu0 %v16254_v21  ;;  %v3849_v13 = vld [vmem:[#allocation6 + $0x1ce8] sm:$0xff] }
 0x70c   :  { %9785 = vmatpush1.bf16.msra.mxu1 %v16389_v19  ;;  %v9491_v49 = vadd.f32 %v9490_v41, %v9450_v4  ;;  %v9452_v15 = vadd.f32 %v9451_v43, %v19138_v1  ;;  %9816 = vmatprep.mubr.bf16.mxu1 %v19093_v14  ;;  %v16230_v19 = vcombine.high %v3717_v10, %v3721_v11  ;;  %v3713_v23 = vld [vmem:[#allocation6 + $0x18a8] sm:$0xff] }
 0x70d   :  { %v9492_v61 = vpop.f32.mrf.mxu1  ;;  %9786 = vmatprep.subr.bf16.mxu1 %v16382_v22  ;;  %v9453_v9 = vpop.f32.mrf.mxu0  ;;  %v16358_v21 = vcombine.high %v3845_v12, %v3849_v13  ;;  %v3709_v22 = vld [vmem:[#allocation6 + $0x1888] sm:$0xff]  ;;  %v16357_v33 = vcombine.low %v3845_v12, %v3849_v13 }
 0x70e   :  { %vm10481_vm9 = vcmp.ge.f32.partialorder %v9491_v49, 0.0  ;;  %v10489_v16 = vmul.f32 0.2, %v9491_v49  ;;  %v9493_v56 = vadd.f32 %v9492_v61, %v9452_v15  ;;  %9746 = vmatpush1.bf16.msra.mxu0 %v16253_v0  ;;  %v3837_v3 = vld [vmem:[#allocation6 + $0x1c88] sm:$0xff]  ;;  %v16222_v4 = vcombine.high %v3709_v22, %v3713_v23 }
 0x70f   :  { %v9494_v40 = vpop.f32.mrf.mxu1  ;;  %v9454_v1 = vpop.f32.mrf.mxu0  ;;  %9747 = vmatprep.subr.bf16.mxu0 %v16246_v47  ;;  %v3841_v28 = vld [vmem:[#allocation6 + $0x1ca8] sm:$0xff] }
 0x710   :  { %9787 = vmatpush1.bf16.msra.mxu1 %v16381_v46  ;;  %v19146_v60 = vsel %vm10481_vm9, %v9491_v49, %v10489_v16  ;;  %vm10482_vm10 = vcmp.ge.f32.partialorder %v9493_v56, 0.0  ;;  %v10490_v62 = vmul.f32 0.2, %v9493_v56  ;;  %v16350_v41 = vcombine.high %v3837_v3, %v3841_v28  ;;  %v3701_v0 = vld [vmem:[#allocation6 + $0x1848] sm:$0xff] }
 0x711   :  { %v9495_v63 = vpop.f32.mrf.mxu1  ;;  %9788 = vmatprep.subr.bf16.mxu1 %v16374_v24  ;;  %v3705_v43 = vld [vmem:[#allocation6 + $0x1868] sm:$0xff]  ;;  %v16221_v49 = vcombine.low %v3709_v22, %v3713_v23  ;;  %v16349_v15 = vcombine.low %v3837_v3, %v3841_v28 }
 0x712   :  { %v19148_v17 = vsel %vm10482_vm10, %v9493_v56, %v10490_v62  ;;  %9748 = vmatpush1.bf16.msra.mxu0 %v16245_v57  ;;  %v3829_v46 = vld [vmem:[#allocation6 + $0x1c48] sm:$0xff]  ;;  %v16214_v61 = vcombine.high %v3701_v0, %v3705_v43  ;;  %v16213_v55 = vcombine.low %v3701_v0, %v3705_v43 }
 0x713   :  { %9749 = vmatprep.subr.bf16.mxu0 %v16238_v59  ;;  %v3833_v47 = vld [vmem:[#allocation6 + $0x1c68] sm:$0xff] }
 0x714   :  { %9789 = vmatpush1.bf16.msra.mxu1 %v16373_v58  ;;  %v16342_v24 = vcombine.high %v3829_v46, %v3833_v47  ;;  %v3693_v54 = vld [vmem:[#allocation6 + $0x1808] sm:$0xff]  ;;  %v16341_v16 = vcombine.low %v3829_v46, %v3833_v47 }
 0x715   :  { %9790 = vmatprep.subr.bf16.mxu1 %v16366_v6  ;;  %v3697_v52 = vld [vmem:[#allocation6 + $0x1828] sm:$0xff] }
 0x716   :  { %9750 = vmatpush1.bf16.msra.mxu0 %v16237_v42  ;;  %v3821_v9 = vld [vmem:[#allocation6 + $0x1c08] sm:$0xff]  ;;  %v16206_v56 = vcombine.high %v3693_v54, %v3697_v52  ;;  %v16205_v62 = vcombine.low %v3693_v54, %v3697_v52 }
 0x717   :  { %9751 = vmatprep.subr.bf16.mxu0 %v16230_v19  ;;  %v3825_v53 = vld [vmem:[#allocation6 + $0x1c28] sm:$0xff] }
 0x718   :  { %9791 = vmatpush1.bf16.msra.mxu1 %v16365_v18  ;;  %v16334_v40 = vcombine.high %v3821_v9, %v3825_v53  ;;  %v3813_v57 = vld [vmem:[#allocation6 + $0x1bc8] sm:$0xff]  ;;  %v16333_v63 = vcombine.low %v3821_v9, %v3825_v53 }
 0x719   :  { %9792 = vmatprep.subr.bf16.mxu1 %v16358_v21  ;;  %v3817_v1 = vld [vmem:[#allocation6 + $0x1be8] sm:$0xff] }
 0x71a   :  { %9752 = vmatpush1.bf16.msra.mxu0 %v16229_v30  ;;  %v3941_v58 = vld [vmem:[#allocation6 + $0x1fc8] sm:$0xff]  ;;  %v16326_v6 = vcombine.high %v3813_v57, %v3817_v1  ;;  %v16325_v18 = vcombine.low %v3813_v57, %v3817_v1 }
 0x71b   :  { %9753 = vmatprep.subr.bf16.mxu0 %v16222_v4  ;;  %v3945_v59 = vld [vmem:[#allocation6 + $0x1fe8] sm:$0xff] }
 0x71c   :  { %9793 = vmatpush1.bf16.msra.mxu1 %v16357_v33  ;;  %v16454_v10 = vcombine.high %v3941_v58, %v3945_v59  ;;  %v3805_v11 = vld [vmem:[#allocation6 + $0x1b88] sm:$0xff]  ;;  %v16453_v19 = vcombine.low %v3941_v58, %v3945_v59 }
 0x71d   :  { %9794 = vmatprep.subr.bf16.mxu1 %v16350_v41  ;;  %v3809_v12 = vld [vmem:[#allocation6 + $0x1ba8] sm:$0xff] }
 0x71e   :  { %9754 = vmatpush1.bf16.msra.mxu0 %v16221_v49  ;;  %v3933_v13 = vld [vmem:[#allocation6 + $0x1f88] sm:$0xff]  ;;  %v16318_v21 = vcombine.high %v3805_v11, %v3809_v12  ;;  %v16317_v33 = vcombine.low %v3805_v11, %v3809_v12 }
 0x71f   :  { %9755 = vmatprep.subr.bf16.mxu0 %v16214_v61  ;;  %v3937_v42 = vld [vmem:[#allocation6 + $0x1fa8] sm:$0xff] }
 0x720   :  { %9795 = vmatpush1.bf16.msra.mxu1 %v16349_v15  ;;  %v16446_v22 = vcombine.high %v3933_v13, %v3937_v42  ;;  %v3797_v23 = vld [vmem:[#allocation6 + $0x1b48] sm:$0xff]  ;;  %v16445_v4 = vcombine.low %v3933_v13, %v3937_v42 }
 0x721   :  { %9796 = vmatprep.subr.bf16.mxu1 %v16342_v24  ;;  %v3801_v3 = vld [vmem:[#allocation6 + $0x1b68] sm:$0xff] }
 0x722   :  { %9756 = vmatpush1.bf16.msra.mxu0 %v16213_v55  ;;  %v3925_v28 = vld [vmem:[#allocation6 + $0x1f48] sm:$0xff]  ;;  %v16310_v41 = vcombine.high %v3797_v23, %v3801_v3  ;;  %v16309_v15 = vcombine.low %v3797_v23, %v3801_v3 }
 0x723   :  { %9757 = vmatprep.subr.bf16.mxu0 %v16206_v56  ;;  %v3929_v30 = vld [vmem:[#allocation6 + $0x1f68] sm:$0xff] }
 0x724   :  { %9797 = vmatpush1.bf16.msra.mxu1 %v16341_v16  ;;  %v16438_v0 = vcombine.high %v3925_v28, %v3929_v30  ;;  %v3789_v43 = vld [vmem:[#allocation6 + $0x1b08] sm:$0xff]  ;;  %v16437_v61 = vcombine.low %v3925_v28, %v3929_v30 }
 0x725   :  { %9798 = vmatprep.subr.bf16.mxu1 %v16334_v40  ;;  %v3793_v46 = vld [vmem:[#allocation6 + $0x1b28] sm:$0xff] }
 0x726   :  { %9758 = vmatpush1.bf16.msra.mxu0 %v16205_v62  ;;  %v3917_v47 = vld [vmem:[#allocation6 + $0x1f08] sm:$0xff]  ;;  %v16302_v24 = vcombine.high %v3789_v43, %v3793_v46  ;;  %v16301_v16 = vcombine.low %v3789_v43, %v3793_v46  ;;  %v2982_v46 = vld [vmem:[#allocation6 + $0x1d0] sm:$0xff] }
 0x727   :  { %9759 = vmatprep.subr.bf16.mxu0 %v16326_v6  ;;  %v3921_v49 = vld [vmem:[#allocation6 + $0x1f28] sm:$0xff] }
 0x728   :  { %9799 = vmatpush1.bf16.msra.mxu1 %v16333_v63  ;;  %v16430_v54 = vcombine.high %v3917_v47, %v3921_v49  ;;  %v3781_v52 = vld [vmem:[#allocation6 + $0x1ac8] sm:$0xff]  ;;  %v16429_v56 = vcombine.low %v3917_v47, %v3921_v49  ;;  %v2986_v47 = vld [vmem:[#allocation6 + $0x1f0] sm:$0xff] }
 0x729   :  { %9800 = vmatprep.subr.bf16.mxu1 %v16454_v10  ;;  %v3785_v9 = vld [vmem:[#allocation6 + $0x1ae8] sm:$0xff]  ;;  %v3110_v49 = vld [vmem:[#allocation6 + $0x5d0] sm:$0xff] }
 0x72a   :  { %9760 = vmatpush2.bf16.msra.mxu0 %v16325_v18  ;;  %v3909_v53 = vld [vmem:[#allocation6 + $0x1ec8] sm:$0xff]  ;;  %v16294_v40 = vcombine.high %v3781_v52, %v3785_v9  ;;  %v16293_v63 = vcombine.low %v3781_v52, %v3785_v9  ;;  %v2974_v9 = vld [vmem:[#allocation6 + $0x190] sm:$0xff] }
 0x72b   :  { %9761 = vmatprep.subr.bf16.mxu0 %v16318_v21  ;;  %v3913_v55 = vld [vmem:[#allocation6 + $0x1ee8] sm:$0xff] }
 0x72c   :  { %9801 = vmatpush2.bf16.msra.mxu1 %v16453_v19  ;;  %v16422_v57 = vcombine.high %v3909_v53, %v3913_v55  ;;  %v3773_v1 = vld [vmem:[#allocation6 + $0x1a88] sm:$0xff]  ;;  %v16421_v6 = vcombine.low %v3909_v53, %v3913_v55  ;;  %v2978_v53 = vld [vmem:[#allocation6 + $0x1b0] sm:$0xff] }
 0x72d   :  { %9802 = vmatprep.subr.bf16.mxu1 %v16446_v22  ;;  %v3777_v58 = vld [vmem:[#allocation6 + $0x1aa8] sm:$0xff]  ;;  %v3102_v55 = vld [vmem:[#allocation6 + $0x590] sm:$0xff] }
 0x72e   :  { %9762 = vmatpush2.bf16.msra.mxu0 %v16317_v33  ;;  %v3901_v59 = vld [vmem:[#allocation6 + $0x1e88] sm:$0xff]  ;;  %v16286_v10 = vcombine.high %v3773_v1, %v3777_v58  ;;  %v16285_v19 = vcombine.low %v3773_v1, %v3777_v58  ;;  %v15488_v1 = vcombine.high %v2974_v9, %v2978_v53  ;;  %v3968_v58 = vrot.slane %v19098_v26, %v18998_v8 }
 0x72f   :  { %9763 = vmatprep.subr.bf16.mxu0 %v16310_v41  ;;  %v3905_v62 = vld [vmem:[#allocation6 + $0x1ea8] sm:$0xff] }
 0x730   :  { %9803 = vmatpush2.bf16.msra.mxu1 %v16445_v4  ;;  %v16414_v11 = vcombine.high %v3901_v59, %v3905_v62  ;;  %v3765_v12 = vld [vmem:[#allocation6 + $0x1a48] sm:$0xff]  ;;  %v16413_v21 = vcombine.low %v3901_v59, %v3905_v62  ;;  %v2966_v62 = vld [vmem:[#allocation6 + $0x150] sm:$0xff] }
 0x731   :  { %9804 = vmatprep.subr.bf16.mxu1 %v16438_v0  ;;  %v3769_v13 = vld [vmem:[#allocation6 + $0x1a68] sm:$0xff] }
 0x732   :  { %9764 = vmatpush2.bf16.msra.mxu0 %v16309_v15  ;;  %v3893_v42 = vld [vmem:[#allocation6 + $0x1e48] sm:$0xff]  ;;  %v16278_v22 = vcombine.high %v3765_v12, %v3769_v13  ;;  %v16277_v4 = vcombine.low %v3765_v12, %v3769_v13  ;;  %v3114_v15 = vld [vmem:[#allocation6 + $0x5f0] sm:$0xff] }
 0x733   :  { %9765 = vmatprep.subr.bf16.mxu0 %v16302_v24  ;;  %v3897_v18 = vld [vmem:[#allocation6 + $0x1e68] sm:$0xff]  ;;  %v15624_v52 = vcombine.high %v3110_v49, %v3114_v15 }
 0x734   :  { %9805 = vmatpush2.bf16.msra.mxu1 %v16437_v61  ;;  %v16406_v23 = vcombine.high %v3893_v42, %v3897_v18  ;;  %v3757_v3 = vld [vmem:[#allocation6 + $0x1a08] sm:$0xff]  ;;  %v16405_v41 = vcombine.low %v3893_v42, %v3897_v18  ;;  %v15487_v42 = vcombine.low %v2974_v9, %v2978_v53  ;;  %v2954_v9 = vld [vmem:[#allocation6 + $0xf0] sm:$0xff] }
 0x735   :  { %9806 = vmatprep.subr.bf16.mxu1 %v16430_v54  ;;  %v3761_v28 = vld [vmem:[#allocation6 + $0x1a28] sm:$0xff]  ;;  %v15496_v54 = vcombine.high %v2982_v46, %v2986_v47  ;;  %v3078_v53 = vld [vmem:[#allocation6 + $0x4d0] sm:$0xff] }
 0x736   :  { %9766 = vmatpush2.bf16.msra.mxu0 %v16301_v16  ;;  %v3885_v30 = vld [vmem:[#allocation6 + $0x1e08] sm:$0xff]  ;;  %v16270_v0 = vcombine.high %v3757_v3, %v3761_v28  ;;  %v16269_v61 = vcombine.low %v3757_v3, %v3761_v28  ;;  %v3106_v16 = vld [vmem:[#allocation6 + $0x5b0] sm:$0xff] }
 0x737   :  { %9767 = vmatprep.subr.bf16.mxu0 %v16294_v40  ;;  %v3889_v33 = vld [vmem:[#allocation6 + $0x1e28] sm:$0xff]  ;;  %v15495_v40 = vcombine.low %v2982_v46, %v2986_v47  ;;  %v15616_v59 = vcombine.high %v3102_v55, %v3106_v16 }
 0x738   :  { %9807 = vmatpush2.bf16.msra.mxu1 %v16429_v56  ;;  %v16398_v43 = vcombine.high %v3885_v30, %v3889_v33  ;;  %v16397_v24 = vcombine.low %v3885_v30, %v3889_v33  ;;  %v3964_v56 = vrot.slane %v19098_v26, %v18995_v7  ;;  %v2958_v30 = vld [vmem:[#allocation6 + $0x110] sm:$0xff] }
 0x739   :  { %9808 = vmatprep.subr.bf16.mxu1 %v16422_v57  ;;  %v15623_v57 = vcombine.low %v3110_v49, %v3114_v15  ;;  %v2962_v33 = vld [vmem:[#allocation6 + $0x130] sm:$0xff] }
 0x73a   :  { %9768 = vmatpush2.bf16.msra.mxu0 %v16293_v63  ;;  %v2970_v63 = vld [vmem:[#allocation6 + $0x170] sm:$0xff] }
 0x73b   :  { %9769 = vmatprep.subr.bf16.mxu0 %v16286_v10  ;;  %v3094_v10 = vld [vmem:[#allocation6 + $0x550] sm:$0xff]  ;;  %v15479_v47 = vcombine.low %v2966_v62, %v2970_v63 }
 0x73c   :  { %9809 = vmatpush2.bf16.msra.mxu1 %v16421_v6 }
 0x73d   :  { %9810 = vmatprep.subr.bf16.mxu1 %v16414_v11  ;;  %v3098_v11 = vld [vmem:[#allocation6 + $0x570] sm:$0xff] }
 0x73e   :  { %9770 = vmatpush2.bf16.msra.mxu0 %v16285_v19  ;;  %v15615_v19 = vcombine.low %v3102_v55, %v3106_v16  ;;  %v15608_v28 = vcombine.high %v3094_v10, %v3098_v11  ;;  %v15607_v15 = vcombine.low %v3094_v10, %v3098_v11  ;;  %v3082_v55 = vld [vmem:[#allocation6 + $0x4f0] sm:$0xff]  ;;  %v15471_v16 = vcombine.low %v2958_v30, %v2962_v33 }
 0x73f   :  { %9771 = vmatprep.subr.bf16.mxu0 %v16278_v22 }
 0x740   :  { %9811 = vmatpush2.bf16.msra.mxu1 %v16413_v21  ;;  %v15480_v21 = vcombine.high %v2966_v62, %v2970_v63  ;;  %v3074_v62 = vld [vmem:[#allocation6 + $0x4b0] sm:$0xff] }
 0x741   :  { %9812 = vmatprep.subr.bf16.mxu1 %v16406_v23 }
 0x742   :  { %9772 = vmatpush2.bf16.msra.mxu0 %v16277_v4 }
 0x743   :  { %9773 = vmatprep.subr.bf16.mxu0 %v16270_v0  ;;  %v3090_v0 = vld [vmem:[#allocation6 + $0x530] sm:$0xff] }
 0x744   :  { %9813 = vmatpush2.bf16.msra.mxu1 %v16405_v41  ;;  %v3086_v41 = vld [vmem:[#allocation6 + $0x510] sm:$0xff] }
 0x745   :  { %9814 = vmatprep.subr.bf16.mxu1 %v16398_v43 }
 0x746   :  { %9774 = vmatpush2.bf16.msra.mxu0 %v16269_v61  ;;  %v15472_v61 = vcombine.high %v2958_v30, %v2962_v33  ;;  %v2930_v30 = vld [vmem:[#allocation6 + $0x30] sm:$0xff] }
 0x747   :  { %9825 = vmatprep.subr.bf16.mxu0 %v15496_v54  ;;  %v15600_v54 = vcombine.high %v3086_v41, %v3090_v0  ;;  %v3054_v33 = vld [vmem:[#allocation6 + $0x410] sm:$0xff] }
 0x748   :  { %9815 = vmatpush2.bf16.msra.mxu1 %v16397_v24 }
 0x749   :  { %9866 = vmatprep.subr.bf16.mxu1 %v15624_v52  ;;  %v9531_v6 = vpop.f32.mrf.mxu0  ;;  %9776 = vmatmul.mubr.bf16.vlgmr.msra.gmra.mxu0 %v19102_v20  ;;  %v2950_v52 = vld [vmem:[#allocation6 + $0xd0] sm:$0xff] }
 0x74a   :  { %v9532_v12 = vadd.f32 %v9531_v6, %v3964_v56  ;;  %9826 = vmatpush1.bf16.msra.mxu0 %v15495_v40  ;;  %9857 = vmatprep.mubr.bf16.mxu0 %v19030_v25  ;;  %v15599_v56 = vcombine.low %v3086_v41, %v3090_v0  ;;  %v15464_v40 = vcombine.high %v2950_v52, %v2954_v9 }
 0x74b   :  { %v9572_v13 = vpop.f32.mrf.mxu1  ;;  %9817 = vmatmul.mubr.bf16.vlgmr.msra.gmra.mxu1 %v19108_v44  ;;  %v9533_v18 = vpop.f32.mrf.mxu0  ;;  %9827 = vmatprep.subr.bf16.mxu0 %v15488_v1  ;;  %v2942_v1 = vld [vmem:[#allocation6 + $0x90] sm:$0xff]  ;;  %v15463_v63 = vcombine.low %v2950_v52, %v2954_v9  ;;  %v15591_v6 = vcombine.low %v3078_v53, %v3082_v55 }
 0x74c   :  { %9867 = vmatpush1.bf16.msra.mxu1 %v15623_v57  ;;  %v19156_v22 = vadd.f32 %v9572_v13, %v9532_v12  ;;  %v9534_v23 = vadd.f32 %v9533_v18, %v3968_v58  ;;  %9898 = vmatprep.mubr.bf16.mxu1 %v19034_v51  ;;  %v15592_v57 = vcombine.high %v3078_v53, %v3082_v55  ;;  %v2946_v58 = vld [vmem:[#allocation6 + $0xb0] sm:$0xff] }
 0x74d   :  { %v9574_v3 = vpop.f32.mrf.mxu1  ;;  %9868 = vmatprep.subr.bf16.mxu1 %v15616_v59  ;;  %v9535_v4 = vpop.f32.mrf.mxu0  ;;  %v3070_v59 = vld [vmem:[#allocation6 + $0x490] sm:$0xff]  ;;  %v15456_v10 = vcombine.high %v2942_v1, %v2946_v58 }
 0x74e   :  { %v19160_v43 = vadd.f32 %v9574_v3, %v9534_v23  ;;  %9828 = vmatpush1.bf16.msra.mxu0 %v15487_v42  ;;  %v15584_v11 = vcombine.high %v3070_v59, %v3074_v62  ;;  %v2934_v12 = vld [vmem:[#allocation6 + $0x50] sm:$0xff] }
 0x74f   :  { %v9576_v46 = vpop.f32.mrf.mxu1  ;;  %v9536_v49 = vpop.f32.mrf.mxu0  ;;  %9829 = vmatprep.subr.bf16.mxu0 %v15480_v21  ;;  %v2938_v13 = vld [vmem:[#allocation6 + $0x70] sm:$0xff]  ;;  %v15583_v21 = vcombine.low %v3070_v59, %v3074_v62 }
 0x750   :  { %9869 = vmatpush1.bf16.msra.mxu1 %v15615_v19  ;;  %v3062_v42 = vld [vmem:[#allocation6 + $0x450] sm:$0xff]  ;;  %v15455_v19 = vcombine.low %v2942_v1, %v2946_v58  ;;  %v15448_v23 = vcombine.high %v2934_v12, %v2938_v13  ;;  %v15447_v41 = vcombine.low %v2934_v12, %v2938_v13 }
 0x751   :  { %v9577_v24 = vpop.f32.mrf.mxu1  ;;  %9870 = vmatprep.subr.bf16.mxu1 %v15608_v28  ;;  %v3066_v18 = vld [vmem:[#allocation6 + $0x470] sm:$0xff] }
 0x752   :  { %9830 = vmatpush1.bf16.msra.mxu0 %v15479_v47  ;;  %v15576_v3 = vcombine.high %v3062_v42, %v3066_v18  ;;  %v2926_v28 = vld [vmem:[#allocation6 + $0x10] sm:$0xff]  ;;  %v15575_v0 = vcombine.low %v3062_v42, %v3066_v18 }
 0x753   :  { %9831 = vmatprep.subr.bf16.mxu0 %v15472_v61  ;;  %v3058_v4 = vld [vmem:[#allocation6 + $0x430] sm:$0xff]  ;;  %v15440_v46 = vcombine.high %v2926_v28, %v2930_v30 }
 0x754   :  { %9871 = vmatpush1.bf16.msra.mxu1 %v15607_v15  ;;  %v15568_v47 = vcombine.high %v3054_v33, %v3058_v4  ;;  %v3046_v49 = vld [vmem:[#allocation6 + $0x3d0] sm:$0xff]  ;;  %v15567_v52 = vcombine.low %v3054_v33, %v3058_v4 }
 0x755   :  { %9872 = vmatprep.subr.bf16.mxu1 %v15600_v54  ;;  %v3050_v15 = vld [vmem:[#allocation6 + $0x3f0] sm:$0xff]  ;;  %v15439_v54 = vcombine.low %v2926_v28, %v2930_v30 }
 0x756   :  { %9832 = vmatpush1.bf16.msra.mxu0 %v15471_v16  ;;  %v3174_v61 = vld [vmem:[#allocation6 + $0x7d0] sm:$0xff]  ;;  %v15560_v9 = vcombine.high %v3046_v49, %v3050_v15 }
 0x757   :  { %9833 = vmatprep.subr.bf16.mxu0 %v15464_v40  ;;  %v3178_v24 = vld [vmem:[#allocation6 + $0x7f0] sm:$0xff] }
 0x758   :  { %9873 = vmatpush1.bf16.msra.mxu1 %v15599_v56  ;;  %v15688_v53 = vcombine.high %v3174_v61, %v3178_v24  ;;  %v3038_v55 = vld [vmem:[#allocation6 + $0x390] sm:$0xff]  ;;  %v15687_v1 = vcombine.low %v3174_v61, %v3178_v24 }
 0x759   :  { %9874 = vmatprep.subr.bf16.mxu1 %v15592_v57  ;;  %v3042_v16 = vld [vmem:[#allocation6 + $0x3b0] sm:$0xff]  ;;  %v15559_v57 = vcombine.low %v3046_v49, %v3050_v15 }
 0x75a   :  { %9834 = vmatpush1.bf16.msra.mxu0 %v15463_v63  ;;  %v3166_v56 = vld [vmem:[#allocation6 + $0x790] sm:$0xff]  ;;  %v15552_v58 = vcombine.high %v3038_v55, %v3042_v16 }
 0x75b   :  { %9835 = vmatprep.subr.bf16.mxu0 %v15456_v10  ;;  %v3170_v40 = vld [vmem:[#allocation6 + $0x7b0] sm:$0xff] }
 0x75c   :  { %9875 = vmatpush1.bf16.msra.mxu1 %v15591_v6  ;;  %v15680_v59 = vcombine.high %v3166_v56, %v3170_v40  ;;  %v3030_v62 = vld [vmem:[#allocation6 + $0x350] sm:$0xff]  ;;  %v15679_v12 = vcombine.low %v3166_v56, %v3170_v40 }
 0x75d   :  { %9876 = vmatprep.subr.bf16.mxu1 %v15584_v11  ;;  %v3034_v63 = vld [vmem:[#allocation6 + $0x370] sm:$0xff]  ;;  %v15551_v11 = vcombine.low %v3038_v55, %v3042_v16 }
 0x75e   :  { %9836 = vmatpush1.bf16.msra.mxu0 %v15455_v19  ;;  %v3158_v6 = vld [vmem:[#allocation6 + $0x750] sm:$0xff]  ;;  %v15544_v13 = vcombine.high %v3030_v62, %v3034_v63 }
 0x75f   :  { %9837 = vmatprep.subr.bf16.mxu0 %v15448_v23  ;;  %v3162_v10 = vld [vmem:[#allocation6 + $0x770] sm:$0xff] }
 0x760   :  { %9877 = vmatpush1.bf16.msra.mxu1 %v15583_v21  ;;  %v15672_v42 = vcombine.high %v3158_v6, %v3162_v10  ;;  %v3022_v18 = vld [vmem:[#allocation6 + $0x310] sm:$0xff]  ;;  %v15671_v28 = vcombine.low %v3158_v6, %v3162_v10 }
 0x761   :  { %9878 = vmatprep.subr.bf16.mxu1 %v15576_v3  ;;  %v3026_v19 = vld [vmem:[#allocation6 + $0x330] sm:$0xff]  ;;  %v15543_v3 = vcombine.low %v3030_v62, %v3034_v63 }
 0x762   :  { %9838 = vmatpush1.bf16.msra.mxu0 %v15447_v41  ;;  %v3150_v21 = vld [vmem:[#allocation6 + $0x710] sm:$0xff]  ;;  %v15536_v30 = vcombine.high %v3022_v18, %v3026_v19 }
 0x763   :  { %9839 = vmatprep.subr.bf16.mxu0 %v15440_v46  ;;  %v3154_v23 = vld [vmem:[#allocation6 + $0x730] sm:$0xff] }
 0x764   :  { %9879 = vmatpush1.bf16.msra.mxu1 %v15575_v0  ;;  %v15664_v33 = vcombine.high %v3150_v21, %v3154_v23  ;;  %v3014_v4 = vld [vmem:[#allocation6 + $0x2d0] sm:$0xff]  ;;  %v15663_v49 = vcombine.low %v3150_v21, %v3154_v23 }
 0x765   :  { %9880 = vmatprep.subr.bf16.mxu1 %v15568_v47  ;;  %v3018_v41 = vld [vmem:[#allocation6 + $0x2f0] sm:$0xff]  ;;  %v15535_v47 = vcombine.low %v3022_v18, %v3026_v19 }
 0x766   :  { %9840 = vmatpush1.bf16.msra.mxu0 %v15439_v54  ;;  %v3142_v0 = vld [vmem:[#allocation6 + $0x6d0] sm:$0xff]  ;;  %v15528_v15 = vcombine.high %v3014_v4, %v3018_v41 }
 0x767   :  { %9841 = vmatprep.subr.bf16.mxu0 %v15560_v9  ;;  %v3146_v46 = vld [vmem:[#allocation6 + $0x6f0] sm:$0xff] }
 0x768   :  { %9881 = vmatpush1.bf16.msra.mxu1 %v15567_v52  ;;  %v15656_v61 = vcombine.high %v3142_v0, %v3146_v46  ;;  %v3006_v24 = vld [vmem:[#allocation6 + $0x290] sm:$0xff]  ;;  %v15655_v55 = vcombine.low %v3142_v0, %v3146_v46 }
 0x769   :  { %9882 = vmatprep.subr.bf16.mxu1 %v15688_v53  ;;  %v3010_v54 = vld [vmem:[#allocation6 + $0x2b0] sm:$0xff]  ;;  %v15527_v53 = vcombine.low %v3014_v4, %v3018_v41 }
 0x76a   :  { %9842 = vmatpush2.bf16.msra.mxu0 %v15559_v57  ;;  %v3134_v52 = vld [vmem:[#allocation6 + $0x690] sm:$0xff]  ;;  %v15520_v16 = vcombine.high %v3006_v24, %v3010_v54 }
 0x76b   :  { %9843 = vmatprep.subr.bf16.mxu0 %v15552_v58  ;;  %v3138_v9 = vld [vmem:[#allocation6 + $0x6b0] sm:$0xff] }
 0x76c   :  { %9883 = vmatpush2.bf16.msra.mxu1 %v15687_v1  ;;  %v15648_v56 = vcombine.high %v3134_v52, %v3138_v9  ;;  %v2998_v40 = vld [vmem:[#allocation6 + $0x250] sm:$0xff]  ;;  %v15647_v62 = vcombine.low %v3134_v52, %v3138_v9 }
 0x76d   :  { %9884 = vmatprep.subr.bf16.mxu1 %v15680_v59  ;;  %v3002_v57 = vld [vmem:[#allocation6 + $0x270] sm:$0xff]  ;;  %v15519_v59 = vcombine.low %v3006_v24, %v3010_v54 }
 0x76e   :  { %9844 = vmatpush2.bf16.msra.mxu0 %v15551_v11  ;;  %v3126_v1 = vld [vmem:[#allocation6 + $0x650] sm:$0xff]  ;;  %v15512_v63 = vcombine.high %v2998_v40, %v3002_v57 }
 0x76f   :  { %9845 = vmatprep.subr.bf16.mxu0 %v15544_v13  ;;  %v3130_v58 = vld [vmem:[#allocation6 + $0x670] sm:$0xff] }
 0x770   :  { %9885 = vmatpush2.bf16.msra.mxu1 %v15679_v12  ;;  %v15640_v6 = vcombine.high %v3126_v1, %v3130_v58  ;;  %v2990_v10 = vld [vmem:[#allocation6 + $0x210] sm:$0xff]  ;;  %v15639_v18 = vcombine.low %v3126_v1, %v3130_v58 }
 0x771   :  { %9886 = vmatprep.subr.bf16.mxu1 %v15672_v42  ;;  %v2994_v11 = vld [vmem:[#allocation6 + $0x230] sm:$0xff]  ;;  %v15511_v42 = vcombine.low %v2998_v40, %v3002_v57 }
 0x772   :  { %9846 = vmatpush2.bf16.msra.mxu0 %v15543_v3  ;;  %v3118_v12 = vld [vmem:[#allocation6 + $0x610] sm:$0xff]  ;;  %v15504_v19 = vcombine.high %v2990_v10, %v2994_v11 }
 0x773   :  { %9847 = vmatprep.subr.bf16.mxu0 %v15536_v30  ;;  %v3122_v13 = vld [vmem:[#allocation6 + $0x630] sm:$0xff] }
 0x774   :  { %9887 = vmatpush2.bf16.msra.mxu1 %v15671_v28  ;;  %v15632_v21 = vcombine.high %v3118_v12, %v3122_v13  ;;  %v3238_v23 = vld [vmem:[#allocation6 + $0x9d0] sm:$0xff]  ;;  %v15631_v4 = vcombine.low %v3118_v12, %v3122_v13 }
 0x775   :  { %9888 = vmatprep.subr.bf16.mxu1 %v15664_v33  ;;  %v3242_v3 = vld [vmem:[#allocation6 + $0x9f0] sm:$0xff]  ;;  %v15503_v33 = vcombine.low %v2990_v10, %v2994_v11 }
 0x776   :  { %9848 = vmatpush2.bf16.msra.mxu0 %v15535_v47  ;;  %v3366_v28 = vld [vmem:[#allocation6 + $0xdd0] sm:$0xff]  ;;  %v15752_v41 = vcombine.high %v3238_v23, %v3242_v3 }
 0x777   :  { %9849 = vmatprep.subr.bf16.mxu0 %v15528_v15  ;;  %v3370_v30 = vld [vmem:[#allocation6 + $0xdf0] sm:$0xff] }
 0x778   :  { %9889 = vmatpush2.bf16.msra.mxu1 %v15663_v49  ;;  %v15880_v0 = vcombine.high %v3366_v28, %v3370_v30  ;;  %v3230_v46 = vld [vmem:[#allocation6 + $0x990] sm:$0xff]  ;;  %v15879_v24 = vcombine.low %v3366_v28, %v3370_v30 }
 0x779   :  { %9890 = vmatprep.subr.bf16.mxu1 %v15656_v61  ;;  %v3234_v47 = vld [vmem:[#allocation6 + $0x9b0] sm:$0xff]  ;;  %v15751_v61 = vcombine.low %v3238_v23, %v3242_v3 }
 0x77a   :  { %9850 = vmatpush2.bf16.msra.mxu0 %v15527_v53  ;;  %v3358_v49 = vld [vmem:[#allocation6 + $0xd90] sm:$0xff]  ;;  %v15744_v54 = vcombine.high %v3230_v46, %v3234_v47  ;;  %v15743_v1 = vcombine.low %v3230_v46, %v3234_v47 }
 0x77b   :  { %9851 = vmatprep.subr.bf16.mxu0 %v15520_v16  ;;  %v3362_v15 = vld [vmem:[#allocation6 + $0xdb0] sm:$0xff] }
 0x77c   :  { %9891 = vmatpush2.bf16.msra.mxu1 %v15655_v55  ;;  %v15872_v52 = vcombine.high %v3358_v49, %v3362_v15  ;;  %v3222_v9 = vld [vmem:[#allocation6 + $0x950] sm:$0xff] }
 0x77d   :  { %9892 = vmatprep.subr.bf16.mxu1 %v15648_v56  ;;  %v3226_v53 = vld [vmem:[#allocation6 + $0x970] sm:$0xff] }
 0x77e   :  { %9852 = vmatpush2.bf16.msra.mxu0 %v15519_v59  ;;  %v3350_v16 = vld [vmem:[#allocation6 + $0xd50] sm:$0xff]  ;;  %v15871_v59 = vcombine.low %v3358_v49, %v3362_v15  ;;  %v15735_v23 = vcombine.low %v3222_v9, %v3226_v53 }
 0x77f   :  { %9853 = vmatprep.subr.bf16.mxu0 %v15512_v63  ;;  %v3354_v56 = vld [vmem:[#allocation6 + $0xd70] sm:$0xff] }
 0x780   :  { %9893 = vmatpush2.bf16.msra.mxu1 %v15647_v62  ;;  %v15736_v62 = vcombine.high %v3222_v9, %v3226_v53  ;;  %v15864_v11 = vcombine.high %v3350_v16, %v3354_v56  ;;  %v3214_v12 = vld [vmem:[#allocation6 + $0x910] sm:$0xff] }
 0x781   :  { %9894 = vmatprep.subr.bf16.mxu1 %v15640_v6  ;;  %v3218_v13 = vld [vmem:[#allocation6 + $0x930] sm:$0xff] }
 0x782   :  { %9854 = vmatpush2.bf16.msra.mxu0 %v15511_v42  ;;  %v3342_v42 = vld [vmem:[#allocation6 + $0xd10] sm:$0xff]  ;;  %v15728_v28 = vcombine.high %v3214_v12, %v3218_v13  ;;  %v15727_v47 = vcombine.low %v3214_v12, %v3218_v13 }
 0x783   :  { %9855 = vmatprep.subr.bf16.mxu0 %v15504_v19  ;;  %v3338_v46 = vld [vmem:[#allocation6 + $0xcf0] sm:$0xff] }
 0x784   :  { %9895 = vmatpush2.bf16.msra.mxu1 %v15639_v18  ;;  %v3346_v18 = vld [vmem:[#allocation6 + $0xd30] sm:$0xff] }
 0x785   :  { %9896 = vmatprep.subr.bf16.mxu1 %v15632_v21  ;;  %v15855_v49 = vcombine.low %v3342_v42, %v3346_v18  ;;  %v3330_v9 = vld [vmem:[#allocation6 + $0xcb0] sm:$0xff] }
 0x786   :  { %9856 = vmatpush2.bf16.msra.mxu0 %v15503_v33  ;;  %v15856_v33 = vcombine.high %v3342_v42, %v3346_v18  ;;  %v3186_v12 = vld [vmem:[#allocation6 + $0x830] sm:$0xff] }
 0x787   :  { %9907 = vmatprep.subr.bf16.mxu0 %v15752_v41  ;;  %v3210_v41 = vld [vmem:[#allocation6 + $0x8f0] sm:$0xff] }
 0x788   :  { %9897 = vmatpush2.bf16.msra.mxu1 %v15631_v4  ;;  %v3206_v4 = vld [vmem:[#allocation6 + $0x8d0] sm:$0xff] }
 0x789   :  { %9948 = vmatprep.subr.bf16.mxu1 %v15880_v0  ;;  %v9613_v55 = vpop.f32.mrf.mxu0  ;;  %9858 = vmatmul.mubr.bf16.vlgmr.msra.gmra.mxu0 %v19040_v45  ;;  %v3334_v0 = vld [vmem:[#allocation6 + $0xcd0] sm:$0xff]  ;;  %v15720_v15 = vcombine.high %v3206_v4, %v3210_v41  ;;  %v15719_v53 = vcombine.low %v3206_v4, %v3210_v41 }
 0x78a   :  { %v9614_v40 = vadd.f32 %v9613_v55, %v19156_v22  ;;  %9908 = vmatpush1.bf16.msra.mxu0 %v15751_v61  ;;  %9939 = vmatprep.mubr.bf16.mxu0 %v19048_v35  ;;  %v15848_v61 = vcombine.high %v3334_v0, %v3338_v46  ;;  %v15847_v55 = vcombine.low %v3334_v0, %v3338_v46  ;;  %v3310_v13 = vld [vmem:[#allocation6 + $0xc10] sm:$0xff] }
 0x78b   :  { %v9654_v57 = vpop.f32.mrf.mxu1  ;;  %9899 = vmatmul.mubr.bf16.vlgmr.msra.gmra.mxu1 %v19044_v48  ;;  %v9615_v58 = vpop.f32.mrf.mxu0  ;;  %9909 = vmatprep.subr.bf16.mxu0 %v15744_v54  ;;  %v3202_v54 = vld [vmem:[#allocation6 + $0x8b0] sm:$0xff] }
 0x78c   :  { %9949 = vmatpush1.bf16.msra.mxu1 %v15879_v24  ;;  %v19165_v63 = vadd.f32 %v9654_v57, %v9614_v40  ;;  %v9616_v6 = vadd.f32 %v9615_v58, %v19160_v43  ;;  %9980 = vmatprep.mubr.bf16.mxu1 %v19053_v36  ;;  %v15863_v43 = vcombine.low %v3350_v16, %v3354_v56  ;;  %v3198_v24 = vld [vmem:[#allocation6 + $0x890] sm:$0xff] }
 0x78d   :  { %v9656_v10 = vpop.f32.mrf.mxu1  ;;  %9950 = vmatprep.subr.bf16.mxu1 %v15872_v52  ;;  %v9617_v22 = vpop.f32.mrf.mxu0  ;;  %v3326_v52 = vld [vmem:[#allocation6 + $0xc90] sm:$0xff]  ;;  %v15712_v16 = vcombine.high %v3198_v24, %v3202_v54 }
 0x78e   :  { %v19170_v19 = vadd.f32 %v9656_v10, %v9616_v6  ;;  %9910 = vmatpush1.bf16.msra.mxu0 %v15743_v1  ;;  %v15840_v56 = vcombine.high %v3326_v52, %v3330_v9  ;;  %v3190_v40 = vld [vmem:[#allocation6 + $0x850] sm:$0xff] }
 0x78f   :  { %v9658_v21 = vpop.f32.mrf.mxu1  ;;  %v9618_v3 = vpop.f32.mrf.mxu0  ;;  %9911 = vmatprep.subr.bf16.mxu0 %v15736_v62  ;;  %v3194_v57 = vld [vmem:[#allocation6 + $0x870] sm:$0xff]  ;;  %v15839_v62 = vcombine.low %v3326_v52, %v3330_v9 }
 0x790   :  { %9951 = vmatpush1.bf16.msra.mxu1 %v15871_v59  ;;  %v3318_v1 = vld [vmem:[#allocation6 + $0xc50] sm:$0xff]  ;;  %v15711_v59 = vcombine.low %v3198_v24, %v3202_v54  ;;  %v15704_v6 = vcombine.high %v3190_v40, %v3194_v57  ;;  %v15703_v42 = vcombine.low %v3190_v40, %v3194_v57 }
 0x791   :  { %v9659_v30 = vpop.f32.mrf.mxu1  ;;  %9952 = vmatprep.subr.bf16.mxu1 %v15864_v11  ;;  %v3322_v58 = vld [vmem:[#allocation6 + $0xc70] sm:$0xff] }
 0x792   :  { %9912 = vmatpush1.bf16.msra.mxu0 %v15735_v23  ;;  %v15832_v10 = vcombine.high %v3318_v1, %v3322_v58  ;;  %v3182_v11 = vld [vmem:[#allocation6 + $0x810] sm:$0xff]  ;;  %v15831_v18 = vcombine.low %v3318_v1, %v3322_v58 }
 0x793   :  { %9913 = vmatprep.subr.bf16.mxu0 %v15728_v28  ;;  %v3314_v22 = vld [vmem:[#allocation6 + $0xc30] sm:$0xff]  ;;  %v15696_v21 = vcombine.high %v3182_v11, %v3186_v12 }
 0x794   :  { %9953 = vmatpush1.bf16.msra.mxu1 %v15863_v43  ;;  %v15824_v23 = vcombine.high %v3310_v13, %v3314_v22  ;;  %v3302_v3 = vld [vmem:[#allocation6 + $0xbd0] sm:$0xff]  ;;  %v15823_v4 = vcombine.low %v3310_v13, %v3314_v22 }
 0x795   :  { %9954 = vmatprep.subr.bf16.mxu1 %v15856_v33  ;;  %v3306_v43 = vld [vmem:[#allocation6 + $0xbf0] sm:$0xff]  ;;  %v15695_v33 = vcombine.low %v3182_v11, %v3186_v12 }
 0x796   :  { %9914 = vmatpush1.bf16.msra.mxu0 %v15727_v47  ;;  %v3430_v28 = vld [vmem:[#allocation6 + $0xfd0] sm:$0xff]  ;;  %v15816_v41 = vcombine.high %v3302_v3, %v3306_v43 }
 0x797   :  { %9915 = vmatprep.subr.bf16.mxu0 %v15720_v15  ;;  %v3434_v30 = vld [vmem:[#allocation6 + $0xff0] sm:$0xff] }
 0x798   :  { %9955 = vmatpush1.bf16.msra.mxu1 %v15855_v49  ;;  %v15944_v0 = vcombine.high %v3430_v28, %v3434_v30  ;;  %v3294_v46 = vld [vmem:[#allocation6 + $0xb90] sm:$0xff]  ;;  %v15943_v24 = vcombine.low %v3430_v28, %v3434_v30 }
 0x799   :  { %9956 = vmatprep.subr.bf16.mxu1 %v15848_v61  ;;  %v3298_v47 = vld [vmem:[#allocation6 + $0xbb0] sm:$0xff]  ;;  %v15815_v61 = vcombine.low %v3302_v3, %v3306_v43 }
 0x79a   :  { %9916 = vmatpush1.bf16.msra.mxu0 %v15719_v53  ;;  %v3422_v49 = vld [vmem:[#allocation6 + $0xf90] sm:$0xff]  ;;  %v15808_v54 = vcombine.high %v3294_v46, %v3298_v47 }
 0x79b   :  { %9917 = vmatprep.subr.bf16.mxu0 %v15712_v16  ;;  %v3426_v15 = vld [vmem:[#allocation6 + $0xfb0] sm:$0xff] }
 0x79c   :  { %9957 = vmatpush1.bf16.msra.mxu1 %v15847_v55  ;;  %v15936_v52 = vcombine.high %v3422_v49, %v3426_v15  ;;  %v3286_v9 = vld [vmem:[#allocation6 + $0xb50] sm:$0xff]  ;;  %v15935_v40 = vcombine.low %v3422_v49, %v3426_v15 }
 0x79d   :  { %9958 = vmatprep.subr.bf16.mxu1 %v15840_v56  ;;  %v3290_v53 = vld [vmem:[#allocation6 + $0xb70] sm:$0xff]  ;;  %v15807_v56 = vcombine.low %v3294_v46, %v3298_v47 }
 0x79e   :  { %9918 = vmatpush1.bf16.msra.mxu0 %v15711_v59  ;;  %v3414_v55 = vld [vmem:[#allocation6 + $0xf50] sm:$0xff]  ;;  %v15800_v57 = vcombine.high %v3286_v9, %v3290_v53 }
 0x79f   :  { %9919 = vmatprep.subr.bf16.mxu0 %v15704_v6  ;;  %v3418_v16 = vld [vmem:[#allocation6 + $0xf70] sm:$0xff] }
 0x7a0   :  { %9959 = vmatpush1.bf16.msra.mxu1 %v15839_v62  ;;  %v15928_v1 = vcombine.high %v3414_v55, %v3418_v16  ;;  %v3278_v58 = vld [vmem:[#allocation6 + $0xb10] sm:$0xff]  ;;  %v15927_v11 = vcombine.low %v3414_v55, %v3418_v16 }
 0x7a1   :  { %9960 = vmatprep.subr.bf16.mxu1 %v15832_v10  ;;  %v3282_v59 = vld [vmem:[#allocation6 + $0xb30] sm:$0xff]  ;;  %v15799_v10 = vcombine.low %v3286_v9, %v3290_v53 }
 0x7a2   :  { %9920 = vmatpush1.bf16.msra.mxu0 %v15703_v42  ;;  %v3406_v62 = vld [vmem:[#allocation6 + $0xf10] sm:$0xff]  ;;  %v15792_v12 = vcombine.high %v3278_v58, %v3282_v59 }
 0x7a3   :  { %9921 = vmatprep.subr.bf16.mxu0 %v15696_v21  ;;  %v3410_v6 = vld [vmem:[#allocation6 + $0xf30] sm:$0xff] }
 0x7a4   :  { %9961 = vmatpush1.bf16.msra.mxu1 %v15831_v18  ;;  %v15920_v13 = vcombine.high %v3406_v62, %v3410_v6  ;;  %v3270_v22 = vld [vmem:[#allocation6 + $0xad0] sm:$0xff]  ;;  %v15919_v3 = vcombine.low %v3406_v62, %v3410_v6 }
 0x7a5   :  { %9962 = vmatprep.subr.bf16.mxu1 %v15824_v23  ;;  %v3274_v42 = vld [vmem:[#allocation6 + $0xaf0] sm:$0xff]  ;;  %v15791_v23 = vcombine.low %v3278_v58, %v3282_v59 }
 0x7a6   :  { %9922 = vmatpush1.bf16.msra.mxu0 %v15695_v33  ;;  %v3398_v18 = vld [vmem:[#allocation6 + $0xed0] sm:$0xff]  ;;  %v15784_v43 = vcombine.high %v3270_v22, %v3274_v42 }
 0x7a7   :  { %9923 = vmatprep.subr.bf16.mxu0 %v15816_v41  ;;  %v3402_v21 = vld [vmem:[#allocation6 + $0xef0] sm:$0xff] }
 0x7a8   :  { %9963 = vmatpush1.bf16.msra.mxu1 %v15823_v4  ;;  %v15912_v28 = vcombine.high %v3398_v18, %v3402_v21  ;;  %v3262_v30 = vld [vmem:[#allocation6 + $0xa90] sm:$0xff]  ;;  %v15911_v46 = vcombine.low %v3398_v18, %v3402_v21 }
 0x7a9   :  { %9964 = vmatprep.subr.bf16.mxu1 %v15944_v0  ;;  %v3266_v33 = vld [vmem:[#allocation6 + $0xab0] sm:$0xff]  ;;  %v15783_v0 = vcombine.low %v3270_v22, %v3274_v42 }
 0x7aa   :  { %9924 = vmatpush2.bf16.msra.mxu0 %v15815_v61  ;;  %v3390_v4 = vld [vmem:[#allocation6 + $0xe90] sm:$0xff]  ;;  %v15776_v47 = vcombine.high %v3262_v30, %v3266_v33 }
 0x7ab   :  { %9925 = vmatprep.subr.bf16.mxu0 %v15808_v54  ;;  %v3394_v41 = vld [vmem:[#allocation6 + $0xeb0] sm:$0xff] }
 0x7ac   :  { %9965 = vmatpush2.bf16.msra.mxu1 %v15943_v24  ;;  %v15904_v49 = vcombine.high %v3390_v4, %v3394_v41  ;;  %v3254_v15 = vld [vmem:[#allocation6 + $0xa50] sm:$0xff]  ;;  %v15903_v9 = vcombine.low %v3390_v4, %v3394_v41 }
 0x7ad   :  { %9966 = vmatprep.subr.bf16.mxu1 %v15936_v52  ;;  %v3258_v61 = vld [vmem:[#allocation6 + $0xa70] sm:$0xff]  ;;  %v15775_v52 = vcombine.low %v3262_v30, %v3266_v33 }
 0x7ae   :  { %9926 = vmatpush2.bf16.msra.mxu0 %v15807_v56  ;;  %v3382_v24 = vld [vmem:[#allocation6 + $0xe50] sm:$0xff]  ;;  %v15768_v53 = vcombine.high %v3254_v15, %v3258_v61 }
 0x7af   :  { %9927 = vmatprep.subr.bf16.mxu0 %v15800_v57  ;;  %v3386_v54 = vld [vmem:[#allocation6 + $0xe70] sm:$0xff] }
 0x7b0   :  { %9967 = vmatpush2.bf16.msra.mxu1 %v15935_v40  ;;  %v15896_v55 = vcombine.high %v3382_v24, %v3386_v54  ;;  %v3246_v16 = vld [vmem:[#allocation6 + $0xa10] sm:$0xff]  ;;  %v15895_v58 = vcombine.low %v3382_v24, %v3386_v54 }
 0x7b1   :  { %9968 = vmatprep.subr.bf16.mxu1 %v15928_v1  ;;  %v3250_v56 = vld [vmem:[#allocation6 + $0xa30] sm:$0xff]  ;;  %v15767_v1 = vcombine.low %v3254_v15, %v3258_v61 }
 0x7b2   :  { %9928 = vmatpush2.bf16.msra.mxu0 %v15799_v10  ;;  %v3374_v40 = vld [vmem:[#allocation6 + $0xe10] sm:$0xff]  ;;  %v15760_v59 = vcombine.high %v3246_v16, %v3250_v56 }
 0x7b3   :  { %9929 = vmatprep.subr.bf16.mxu0 %v15792_v12  ;;  %v3378_v57 = vld [vmem:[#allocation6 + $0xe30] sm:$0xff] }
 0x7b4   :  { %9969 = vmatpush2.bf16.msra.mxu1 %v15927_v11  ;;  %v15888_v62 = vcombine.high %v3374_v40, %v3378_v57  ;;  %v3494_v6 = vld [vmem:[#allocation6 + $0x11d0] sm:$0xff]  ;;  %v15887_v22 = vcombine.low %v3374_v40, %v3378_v57 }
 0x7b5   :  { %9970 = vmatprep.subr.bf16.mxu1 %v15920_v13  ;;  %v3498_v10 = vld [vmem:[#allocation6 + $0x11f0] sm:$0xff]  ;;  %v15759_v13 = vcombine.low %v3246_v16, %v3250_v56 }
 0x7b6   :  { %9930 = vmatpush2.bf16.msra.mxu0 %v15791_v23  ;;  %v3622_v11 = vld [vmem:[#allocation6 + $0x15d0] sm:$0xff]  ;;  %v16008_v42 = vcombine.high %v3494_v6, %v3498_v10 }
 0x7b7   :  { %9931 = vmatprep.subr.bf16.mxu0 %v15784_v43  ;;  %v3626_v12 = vld [vmem:[#allocation6 + $0x15f0] sm:$0xff] }
 0x7b8   :  { %9971 = vmatpush2.bf16.msra.mxu1 %v15919_v3  ;;  %v16136_v18 = vcombine.high %v3622_v11, %v3626_v12  ;;  %v3486_v21 = vld [vmem:[#allocation6 + $0x1190] sm:$0xff]  ;;  %v16135_v30 = vcombine.low %v3622_v11, %v3626_v12 }
 0x7b9   :  { %9972 = vmatprep.subr.bf16.mxu1 %v15912_v28  ;;  %v3490_v23 = vld [vmem:[#allocation6 + $0x11b0] sm:$0xff]  ;;  %v16007_v28 = vcombine.low %v3494_v6, %v3498_v10 }
 0x7ba   :  { %9932 = vmatpush2.bf16.msra.mxu0 %v15783_v0  ;;  %v3614_v3 = vld [vmem:[#allocation6 + $0x1590] sm:$0xff]  ;;  %v16000_v33 = vcombine.high %v3486_v21, %v3490_v23  ;;  %v15999_v24 = vcombine.low %v3486_v21, %v3490_v23 }
 0x7bb   :  { %9933 = vmatprep.subr.bf16.mxu0 %v15776_v47  ;;  %v3618_v43 = vld [vmem:[#allocation6 + $0x15b0] sm:$0xff] }
 0x7bc   :  { %9973 = vmatpush2.bf16.msra.mxu1 %v15911_v46  ;;  %v16128_v4 = vcombine.high %v3614_v3, %v3618_v43  ;;  %v3478_v41 = vld [vmem:[#allocation6 + $0x1150] sm:$0xff] }
 0x7bd   :  { %9974 = vmatprep.subr.bf16.mxu1 %v15904_v49  ;;  %v3482_v0 = vld [vmem:[#allocation6 + $0x1170] sm:$0xff] }
 0x7be   :  { %9934 = vmatpush2.bf16.msra.mxu0 %v15775_v52  ;;  %v3606_v47 = vld [vmem:[#allocation6 + $0x1550] sm:$0xff]  ;;  %v16127_v52 = vcombine.low %v3614_v3, %v3618_v43  ;;  %v15991_v6 = vcombine.low %v3478_v41, %v3482_v0 }
 0x7bf   :  { %9935 = vmatprep.subr.bf16.mxu0 %v15768_v53  ;;  %v3610_v49 = vld [vmem:[#allocation6 + $0x1570] sm:$0xff] }
 0x7c0   :  { %9975 = vmatpush2.bf16.msra.mxu1 %v15903_v9  ;;  %v15992_v9 = vcombine.high %v3478_v41, %v3482_v0  ;;  %v16120_v56 = vcombine.high %v3606_v47, %v3610_v49  ;;  %v3470_v40 = vld [vmem:[#allocation6 + $0x1110] sm:$0xff] }
 0x7c1   :  { %9976 = vmatprep.subr.bf16.mxu1 %v15896_v55  ;;  %v3474_v57 = vld [vmem:[#allocation6 + $0x1130] sm:$0xff] }
 0x7c2   :  { %9936 = vmatpush2.bf16.msra.mxu0 %v15767_v1  ;;  %v3598_v1 = vld [vmem:[#allocation6 + $0x1510] sm:$0xff]  ;;  %v15984_v11 = vcombine.high %v3470_v40, %v3474_v57  ;;  %v15983_v23 = vcombine.low %v3470_v40, %v3474_v57 }
 0x7c3   :  { %9937 = vmatprep.subr.bf16.mxu0 %v15760_v59  ;;  %v3594_v21 = vld [vmem:[#allocation6 + $0x14f0] sm:$0xff] }
 0x7c4   :  { %9977 = vmatpush2.bf16.msra.mxu1 %v15895_v58  ;;  %v3602_v58 = vld [vmem:[#allocation6 + $0x1530] sm:$0xff] }
 0x7c5   :  { %9978 = vmatprep.subr.bf16.mxu1 %v15888_v62  ;;  %v16111_v3 = vcombine.low %v3598_v1, %v3602_v58  ;;  %v3586_v41 = vld [vmem:[#allocation6 + $0x14b0] sm:$0xff] }
 0x7c6   :  { %9938 = vmatpush2.bf16.msra.mxu0 %v15759_v13  ;;  %v16112_v13 = vcombine.high %v3598_v1, %v3602_v58  ;;  %v3442_v40 = vld [vmem:[#allocation6 + $0x1030] sm:$0xff] }
 0x7c7   :  { %9989 = vmatprep.subr.bf16.mxu0 %v16008_v42  ;;  %v3466_v42 = vld [vmem:[#allocation6 + $0x10f0] sm:$0xff] }
 0x7c8   :  { %9979 = vmatpush2.bf16.msra.mxu1 %v15887_v22  ;;  %v3462_v22 = vld [vmem:[#allocation6 + $0x10d0] sm:$0xff] }
 0x7c9   :  { %10030 = vmatprep.subr.bf16.mxu1 %v16136_v18  ;;  %v9695_v46 = vpop.f32.mrf.mxu0  ;;  %9940 = vmatmul.mubr.bf16.vlgmr.msra.gmra.mxu0 %v19060_v2  ;;  %v3590_v18 = vld [vmem:[#allocation6 + $0x14d0] sm:$0xff]  ;;  %v15976_v43 = vcombine.high %v3462_v22, %v3466_v42  ;;  %v15975_v0 = vcombine.low %v3462_v22, %v3466_v42 }
 0x7ca   :  { %v9696_v15 = vadd.f32 %v9695_v46, %v19165_v63  ;;  %9990 = vmatpush1.bf16.msra.mxu0 %v16007_v28  ;;  %10021 = vmatprep.mubr.bf16.mxu0 %v19068_v37  ;;  %v16104_v28 = vcombine.high %v3590_v18, %v3594_v21  ;;  %v16103_v46 = vcombine.low %v3590_v18, %v3594_v21  ;;  %v3566_v57 = vld [vmem:[#allocation6 + $0x1410] sm:$0xff] }
 0x7cb   :  { %v9736_v61 = vpop.f32.mrf.mxu1  ;;  %9981 = vmatmul.mubr.bf16.vlgmr.msra.gmra.mxu1 %v19064_v5  ;;  %v9697_v54 = vpop.f32.mrf.mxu0  ;;  %9991 = vmatprep.subr.bf16.mxu0 %v16000_v33  ;;  %v3458_v33 = vld [vmem:[#allocation6 + $0x10b0] sm:$0xff] }
 0x7cc   :  { %10031 = vmatpush1.bf16.msra.mxu1 %v16135_v30  ;;  %v19175_v53 = vadd.f32 %v9736_v61, %v9696_v15  ;;  %v9698_v55 = vadd.f32 %v9697_v54, %v19170_v19  ;;  %10062 = vmatprep.mubr.bf16.mxu1 %v19073_v38  ;;  %v16119_v19 = vcombine.low %v3606_v47, %v3610_v49  ;;  %v3454_v30 = vld [vmem:[#allocation6 + $0x1090] sm:$0xff] }
 0x7cd   :  { %v9738_v16 = vpop.f32.mrf.mxu1  ;;  %10032 = vmatprep.subr.bf16.mxu1 %v16128_v4  ;;  %v9699_v63 = vpop.f32.mrf.mxu0  ;;  %v3582_v4 = vld [vmem:[#allocation6 + $0x1490] sm:$0xff]  ;;  %v15968_v47 = vcombine.high %v3454_v30, %v3458_v33 }
 0x7ce   :  { %v19180_v59 = vadd.f32 %v9738_v16, %v9698_v55  ;;  %9992 = vmatpush1.bf16.msra.mxu0 %v15999_v24  ;;  %v16096_v49 = vcombine.high %v3582_v4, %v3586_v41  ;;  %v3446_v15 = vld [vmem:[#allocation6 + $0x1050] sm:$0xff] }
 0x7cf   :  { %v9740_v62 = vpop.f32.mrf.mxu1  ;;  %v9700_v10 = vpop.f32.mrf.mxu0  ;;  %9993 = vmatprep.subr.bf16.mxu0 %v15992_v9  ;;  %v3450_v61 = vld [vmem:[#allocation6 + $0x1070] sm:$0xff]  ;;  %v16095_v9 = vcombine.low %v3582_v4, %v3586_v41 }
 0x7d0   :  { %10033 = vmatpush1.bf16.msra.mxu1 %v16127_v52  ;;  %v3574_v24 = vld [vmem:[#allocation6 + $0x1450] sm:$0xff]  ;;  %v15967_v52 = vcombine.low %v3454_v30, %v3458_v33  ;;  %v15960_v55 = vcombine.high %v3446_v15, %v3450_v61  ;;  %v15959_v1 = vcombine.low %v3446_v15, %v3450_v61 }
 0x7d1   :  { %v9741_v12 = vpop.f32.mrf.mxu1  ;;  %10034 = vmatprep.subr.bf16.mxu1 %v16120_v56  ;;  %v3578_v54 = vld [vmem:[#allocation6 + $0x1470] sm:$0xff] }
 0x7d2   :  { %9994 = vmatpush1.bf16.msra.mxu0 %v15991_v6  ;;  %v16088_v16 = vcombine.high %v3574_v24, %v3578_v54  ;;  %v3438_v56 = vld [vmem:[#allocation6 + $0x1010] sm:$0xff]  ;;  %v16087_v58 = vcombine.low %v3574_v24, %v3578_v54 }
 0x7d3   :  { %9995 = vmatprep.subr.bf16.mxu0 %v15984_v11  ;;  %v3570_v63 = vld [vmem:[#allocation6 + $0x1430] sm:$0xff]  ;;  %v15952_v62 = vcombine.high %v3438_v56, %v3442_v40 }
 0x7d4   :  { %10035 = vmatpush1.bf16.msra.mxu1 %v16119_v19  ;;  %v16080_v6 = vcombine.high %v3566_v57, %v3570_v63  ;;  %v3558_v10 = vld [vmem:[#allocation6 + $0x13d0] sm:$0xff]  ;;  %v16079_v22 = vcombine.low %v3566_v57, %v3570_v63 }
 0x7d5   :  { %10036 = vmatprep.subr.bf16.mxu1 %v16112_v13  ;;  %v3562_v19 = vld [vmem:[#allocation6 + $0x13f0] sm:$0xff]  ;;  %v15951_v13 = vcombine.low %v3438_v56, %v3442_v40 }
 0x7d6   :  { %9996 = vmatpush1.bf16.msra.mxu0 %v15983_v23  ;;  %v3686_v11 = vld [vmem:[#allocation6 + $0x17d0] sm:$0xff]  ;;  %v16072_v42 = vcombine.high %v3558_v10, %v3562_v19 }
 0x7d7   :  { %9997 = vmatprep.subr.bf16.mxu0 %v15976_v43  ;;  %v3690_v12 = vld [vmem:[#allocation6 + $0x17f0] sm:$0xff] }
 0x7d8   :  { %10037 = vmatpush1.bf16.msra.mxu1 %v16111_v3  ;;  %v16200_v18 = vcombine.high %v3686_v11, %v3690_v12  ;;  %v3550_v21 = vld [vmem:[#allocation6 + $0x1390] sm:$0xff]  ;;  %v16199_v30 = vcombine.low %v3686_v11, %v3690_v12 }
 0x7d9   :  { %10038 = vmatprep.subr.bf16.mxu1 %v16104_v28  ;;  %v3554_v23 = vld [vmem:[#allocation6 + $0x13b0] sm:$0xff]  ;;  %v16071_v28 = vcombine.low %v3558_v10, %v3562_v19 }
 0x7da   :  { %9998 = vmatpush1.bf16.msra.mxu0 %v15975_v0  ;;  %v3678_v3 = vld [vmem:[#allocation6 + $0x1790] sm:$0xff]  ;;  %v16064_v33 = vcombine.high %v3550_v21, %v3554_v23 }
 0x7db   :  { %9999 = vmatprep.subr.bf16.mxu0 %v15968_v47  ;;  %v3682_v43 = vld [vmem:[#allocation6 + $0x17b0] sm:$0xff] }
 0x7dc   :  { %10039 = vmatpush1.bf16.msra.mxu1 %v16103_v46  ;;  %v16192_v4 = vcombine.high %v3678_v3, %v3682_v43  ;;  %v3542_v41 = vld [vmem:[#allocation6 + $0x1350] sm:$0xff]  ;;  %v16191_v15 = vcombine.low %v3678_v3, %v3682_v43 }
 0x7dd   :  { %10040 = vmatprep.subr.bf16.mxu1 %v16096_v49  ;;  %v3546_v0 = vld [vmem:[#allocation6 + $0x1370] sm:$0xff]  ;;  %v16063_v49 = vcombine.low %v3550_v21, %v3554_v23 }
 0x7de   :  { %10000 = vmatpush1.bf16.msra.mxu0 %v15967_v52  ;;  %v3670_v46 = vld [vmem:[#allocation6 + $0x1750] sm:$0xff]  ;;  %v16056_v61 = vcombine.high %v3542_v41, %v3546_v0 }
 0x7df   :  { %10001 = vmatprep.subr.bf16.mxu0 %v15960_v55  ;;  %v3674_v47 = vld [vmem:[#allocation6 + $0x1770] sm:$0xff] }
 0x7e0   :  { %10041 = vmatpush1.bf16.msra.mxu1 %v16095_v9  ;;  %v16184_v24 = vcombine.high %v3670_v46, %v3674_v47  ;;  %v3534_v54 = vld [vmem:[#allocation6 + $0x1310] sm:$0xff]  ;;  %v16183_v56 = vcombine.low %v3670_v46, %v3674_v47 }
 0x7e1   :  { %10042 = vmatprep.subr.bf16.mxu1 %v16088_v16  ;;  %v3538_v52 = vld [vmem:[#allocation6 + $0x1330] sm:$0xff]  ;;  %v16055_v16 = vcombine.low %v3542_v41, %v3546_v0 }
 0x7e2   :  { %10002 = vmatpush1.bf16.msra.mxu0 %v15959_v1  ;;  %v3662_v9 = vld [vmem:[#allocation6 + $0x1710] sm:$0xff]  ;;  %v16048_v40 = vcombine.high %v3534_v54, %v3538_v52 }
 0x7e3   :  { %10003 = vmatprep.subr.bf16.mxu0 %v15952_v62  ;;  %v3666_v55 = vld [vmem:[#allocation6 + $0x1730] sm:$0xff] }
 0x7e4   :  { %10043 = vmatpush1.bf16.msra.mxu1 %v16087_v58  ;;  %v16176_v57 = vcombine.high %v3662_v9, %v3666_v55  ;;  %v3526_v63 = vld [vmem:[#allocation6 + $0x12d0] sm:$0xff]  ;;  %v16175_v10 = vcombine.low %v3662_v9, %v3666_v55 }
 0x7e5   :  { %10044 = vmatprep.subr.bf16.mxu1 %v16080_v6  ;;  %v3530_v1 = vld [vmem:[#allocation6 + $0x12f0] sm:$0xff]  ;;  %v16047_v6 = vcombine.low %v3534_v54, %v3538_v52 }
 0x7e6   :  { %10004 = vmatpush1.bf16.msra.mxu0 %v15951_v13  ;;  %v3654_v58 = vld [vmem:[#allocation6 + $0x16d0] sm:$0xff]  ;;  %v16040_v19 = vcombine.high %v3526_v63, %v3530_v1 }
 0x7e7   :  { %10005 = vmatprep.subr.bf16.mxu0 %v16072_v42  ;;  %v3658_v62 = vld [vmem:[#allocation6 + $0x16f0] sm:$0xff] }
 0x7e8   :  { %10045 = vmatpush1.bf16.msra.mxu1 %v16079_v22  ;;  %v16168_v11 = vcombine.high %v3654_v58, %v3658_v62  ;;  %v3518_v12 = vld [vmem:[#allocation6 + $0x1290] sm:$0xff]  ;;  %v16167_v21 = vcombine.low %v3654_v58, %v3658_v62 }
 0x7e9   :  { %10046 = vmatprep.subr.bf16.mxu1 %v16200_v18  ;;  %v3522_v13 = vld [vmem:[#allocation6 + $0x12b0] sm:$0xff]  ;;  %v16039_v18 = vcombine.low %v3526_v63, %v3530_v1 }
 0x7ea   :  { %10006 = vmatpush2.bf16.msra.mxu0 %v16071_v28  ;;  %v3646_v22 = vld [vmem:[#allocation6 + $0x1690] sm:$0xff]  ;;  %v16032_v23 = vcombine.high %v3518_v12, %v3522_v13 }
 0x7eb   :  { %10007 = vmatprep.subr.bf16.mxu0 %v16064_v33  ;;  %v3650_v42 = vld [vmem:[#allocation6 + $0x16b0] sm:$0xff] }
 0x7ec   :  { %10047 = vmatpush2.bf16.msra.mxu1 %v16199_v30  ;;  %v16160_v3 = vcombine.high %v3646_v22, %v3650_v42  ;;  %v3510_v43 = vld [vmem:[#allocation6 + $0x1250] sm:$0xff]  ;;  %v16159_v41 = vcombine.low %v3646_v22, %v3650_v42 }
 0x7ed   :  { %10048 = vmatprep.subr.bf16.mxu1 %v16192_v4  ;;  %v3514_v28 = vld [vmem:[#allocation6 + $0x1270] sm:$0xff]  ;;  %v16031_v4 = vcombine.low %v3518_v12, %v3522_v13 }
 0x7ee   :  { %10008 = vmatpush2.bf16.msra.mxu0 %v16063_v49  ;;  %v3638_v30 = vld [vmem:[#allocation6 + $0x1650] sm:$0xff]  ;;  %v16024_v0 = vcombine.high %v3510_v43, %v3514_v28 }
 0x7ef   :  { %10009 = vmatprep.subr.bf16.mxu0 %v16056_v61  ;;  %v3642_v33 = vld [vmem:[#allocation6 + $0x1670] sm:$0xff] }
 0x7f0   :  { %10049 = vmatpush2.bf16.msra.mxu1 %v16191_v15  ;;  %v16152_v46 = vcombine.high %v3638_v30, %v3642_v33  ;;  %v3502_v47 = vld [vmem:[#allocation6 + $0x1210] sm:$0xff]  ;;  %v16151_v54 = vcombine.low %v3638_v30, %v3642_v33 }
 0x7f1   :  { %10050 = vmatprep.subr.bf16.mxu1 %v16184_v24  ;;  %v3506_v49 = vld [vmem:[#allocation6 + $0x1230] sm:$0xff]  ;;  %v16023_v24 = vcombine.low %v3510_v43, %v3514_v28 }
 0x7f2   :  { %10010 = vmatpush2.bf16.msra.mxu0 %v16055_v16  ;;  %v3630_v15 = vld [vmem:[#allocation6 + $0x1610] sm:$0xff]  ;;  %v16016_v52 = vcombine.high %v3502_v47, %v3506_v49 }
 0x7f3   :  { %10011 = vmatprep.subr.bf16.mxu0 %v16048_v40  ;;  %v3634_v61 = vld [vmem:[#allocation6 + $0x1630] sm:$0xff] }
 0x7f4   :  { %10051 = vmatpush2.bf16.msra.mxu1 %v16183_v56  ;;  %v16144_v9 = vcombine.high %v3630_v15, %v3634_v61  ;;  %v3750_v55 = vld [vmem:[#allocation6 + $0x19d0] sm:$0xff]  ;;  %v16143_v63 = vcombine.low %v3630_v15, %v3634_v61 }
 0x7f5   :  { %10052 = vmatprep.subr.bf16.mxu1 %v16176_v57  ;;  %v3754_v16 = vld [vmem:[#allocation6 + $0x19f0] sm:$0xff]  ;;  %v16015_v57 = vcombine.low %v3502_v47, %v3506_v49 }
 0x7f6   :  { %10012 = vmatpush2.bf16.msra.mxu0 %v16047_v6  ;;  %v3878_v56 = vld [vmem:[#allocation6 + $0x1dd0] sm:$0xff]  ;;  %v16264_v1 = vcombine.high %v3750_v55, %v3754_v16 }
 0x7f7   :  { %10013 = vmatprep.subr.bf16.mxu0 %v16040_v19  ;;  %v3882_v40 = vld [vmem:[#allocation6 + $0x1df0] sm:$0xff] }
 0x7f8   :  { %10053 = vmatpush2.bf16.msra.mxu1 %v16175_v10  ;;  %v16392_v58 = vcombine.high %v3878_v56, %v3882_v40  ;;  %v3742_v62 = vld [vmem:[#allocation6 + $0x1990] sm:$0xff]  ;;  %v16391_v12 = vcombine.low %v3878_v56, %v3882_v40 }
 0x7f9   :  { %10054 = vmatprep.subr.bf16.mxu1 %v16168_v11  ;;  %v3746_v6 = vld [vmem:[#allocation6 + $0x19b0] sm:$0xff]  ;;  %v16263_v11 = vcombine.low %v3750_v55, %v3754_v16 }
 0x7fa   :  { %10014 = vmatpush2.bf16.msra.mxu0 %v16039_v18  ;;  %v3870_v10 = vld [vmem:[#allocation6 + $0x1d90] sm:$0xff]  ;;  %v16256_v13 = vcombine.high %v3742_v62, %v3746_v6  ;;  %v16255_v30 = vcombine.low %v3742_v62, %v3746_v6 }
 0x7fb   :  { %10015 = vmatprep.subr.bf16.mxu0 %v16032_v23  ;;  %v3874_v19 = vld [vmem:[#allocation6 + $0x1db0] sm:$0xff] }
 0x7fc   :  { %10055 = vmatpush2.bf16.msra.mxu1 %v16167_v21  ;;  %v16384_v22 = vcombine.high %v3870_v10, %v3874_v19  ;;  %v3734_v42 = vld [vmem:[#allocation6 + $0x1950] sm:$0xff] }
 0x7fd   :  { %10056 = vmatprep.subr.bf16.mxu1 %v16160_v3  ;;  %v3738_v18 = vld [vmem:[#allocation6 + $0x1970] sm:$0xff] }
 0x7fe   :  { %10016 = vmatpush2.bf16.msra.mxu0 %v16031_v4  ;;  %v3862_v23 = vld [vmem:[#allocation6 + $0x1d50] sm:$0xff]  ;;  %v16383_v4 = vcombine.low %v3870_v10, %v3874_v19  ;;  %v16247_v16 = vcombine.low %v3734_v42, %v3738_v18 }
 0x7ff   :  { %10017 = vmatprep.subr.bf16.mxu0 %v16024_v0  ;;  %v3866_v3 = vld [vmem:[#allocation6 + $0x1d70] sm:$0xff] }
 0x800   :  { %10057 = vmatpush2.bf16.msra.mxu1 %v16159_v41  ;;  %v16248_v41 = vcombine.high %v3734_v42, %v3738_v18  ;;  %v16376_v49 = vcombine.high %v3862_v23, %v3866_v3  ;;  %v3726_v15 = vld [vmem:[#allocation6 + $0x1910] sm:$0xff]  ;;  %v16375_v56 = vcombine.low %v3862_v23, %v3866_v3 }
 0x801   :  { %10058 = vmatprep.subr.bf16.mxu1 %v16152_v46  ;;  %v3730_v61 = vld [vmem:[#allocation6 + $0x1930] sm:$0xff] }
 0x802   :  { %10018 = vmatpush2.bf16.msra.mxu0 %v16023_v24  ;;  %v3854_v24 = vld [vmem:[#allocation6 + $0x1d10] sm:$0xff]  ;;  %v16240_v40 = vcombine.high %v3726_v15, %v3730_v61 }
 0x803   :  { %10019 = vmatprep.subr.bf16.mxu0 %v16016_v52  ;;  %v3718_v62 = vld [vmem:[#allocation6 + $0x18d0] sm:$0xff] }
 0x804   :  { %10059 = vmatpush2.bf16.msra.mxu1 %v16151_v54  ;;  %v3858_v54 = vld [vmem:[#allocation6 + $0x1d30] sm:$0xff] }
 0x805   :  { %10060 = vmatprep.subr.bf16.mxu1 %v16144_v9  ;;  %v3722_v6 = vld [vmem:[#allocation6 + $0x18f0] sm:$0xff] }
 0x806   :  { %10020 = vmatpush2.bf16.msra.mxu0 %v16015_v57  ;;  %v3846_v10 = vld [vmem:[#allocation6 + $0x1cd0] sm:$0xff] }
 0x807   :  { %10071 = vmatprep.subr.bf16.mxu0 %v16264_v1  ;;  %v3850_v19 = vld [vmem:[#allocation6 + $0x1cf0] sm:$0xff] }
 0x808   :  { %10061 = vmatpush2.bf16.msra.mxu1 %v16143_v63  ;;  %v16360_v42 = vcombine.high %v3846_v10, %v3850_v19  ;;  %v3710_v18 = vld [vmem:[#allocation6 + $0x1890] sm:$0xff] }
 0x809   :  { %10112 = vmatprep.subr.bf16.mxu1 %v16392_v58  ;;  %v9777_v21 = vpop.f32.mrf.mxu0  ;;  %10022 = vmatmul.mubr.bf16.vlgmr.msra.gmra.mxu0 %v19080_v27  ;;  %v16368_v58 = vcombine.high %v3854_v24, %v3858_v54  ;;  %v3838_v23 = vld [vmem:[#allocation6 + $0x1c90] sm:$0xff] }
 0x80a   :  { %v9778_v43 = vadd.f32 %v9777_v21, %v19175_v53  ;;  %10072 = vmatpush1.bf16.msra.mxu0 %v16263_v11  ;;  %10103 = vmatprep.mubr.bf16.mxu0 %v19088_v39  ;;  %v3714_v21 = vld [vmem:[#allocation6 + $0x18b0] sm:$0xff] }
 0x80b   :  { %v9818_v28 = vpop.f32.mrf.mxu1  ;;  %10063 = vmatmul.mubr.bf16.vlgmr.msra.gmra.mxu1 %v19084_v31  ;;  %v9779_v33 = vpop.f32.mrf.mxu0  ;;  %10073 = vmatprep.subr.bf16.mxu0 %v16256_v13  ;;  %v16367_v13 = vcombine.low %v3854_v24, %v3858_v54  ;;  %v3842_v3 = vld [vmem:[#allocation6 + $0x1cb0] sm:$0xff] }
 0x80c   :  { %10113 = vmatpush1.bf16.msra.mxu1 %v16391_v12  ;;  %v9819_v0 = vadd.f32 %v9818_v28, %v9778_v43  ;;  %v9780_v46 = vadd.f32 %v9779_v33, %v19180_v59  ;;  %10144 = vmatprep.mubr.bf16.mxu1 %v19093_v14  ;;  %v16239_v12 = vcombine.low %v3726_v15, %v3730_v61  ;;  %v3698_v24 = vld [vmem:[#allocation6 + $0x1830] sm:$0xff] }
 0x80d   :  { %v9820_v47 = vpop.f32.mrf.mxu1  ;;  %10114 = vmatprep.subr.bf16.mxu1 %v16384_v22  ;;  %v9781_v53 = vpop.f32.mrf.mxu0  ;;  %v16232_v22 = vcombine.high %v3718_v62, %v3722_v6  ;;  %v16231_v43 = vcombine.low %v3718_v62, %v3722_v6  ;;  %v16359_v28 = vcombine.low %v3846_v10, %v3850_v19  ;;  %v16352_v33 = vcombine.high %v3838_v23, %v3842_v3  ;;  %v3822_v54 = vld [vmem:[#allocation6 + $0x1c10] sm:$0xff] }
 0x80e   :  { %vm10483_vm11 = vcmp.ge.f32.partialorder %v9819_v0, 0.0  ;;  %v10491_v52 = vmul.f32 0.2, %v9819_v0  ;;  %v9821_v9 = vadd.f32 %v9820_v47, %v9780_v46  ;;  %10074 = vmatpush1.bf16.msra.mxu0 %v16255_v30  ;;  %v16224_v30 = vcombine.high %v3710_v18, %v3714_v21  ;;  %v3834_v46 = vld [vmem:[#allocation6 + $0x1c70] sm:$0xff] }
 0x80f   :  { %v9822_v55 = vpop.f32.mrf.mxu1  ;;  %v9782_v59 = vpop.f32.mrf.mxu0  ;;  %10075 = vmatprep.subr.bf16.mxu0 %v16248_v41  ;;  %v3706_v41 = vld [vmem:[#allocation6 + $0x1870] sm:$0xff]  ;;  %v16223_v47 = vcombine.low %v3710_v18, %v3714_v21 }
 0x810   :  { %10115 = vmatpush1.bf16.msra.mxu1 %v16383_v4  ;;  %v19188_v57 = vsel %vm10483_vm11, %v9819_v0, %v10491_v52  ;;  %vm10484_vm12 = vcmp.ge.f32.partialorder %v9821_v9, 0.0  ;;  %v10492_v63 = vmul.f32 0.2, %v9821_v9  ;;  %v3702_v4 = vld [vmem:[#allocation6 + $0x1850] sm:$0xff] }
 0x811   :  { %v9823_v1 = vpop.f32.mrf.mxu1  ;;  %10116 = vmatprep.subr.bf16.mxu1 %v16376_v49  ;;  %v3830_v0 = vld [vmem:[#allocation6 + $0x1c50] sm:$0xff]  ;;  %v16351_v49 = vcombine.low %v3838_v23, %v3842_v3  ;;  %v16216_v15 = vcombine.high %v3702_v4, %v3706_v41 }
 0x812   :  { %v19190_v11 = vsel %vm10484_vm12, %v9821_v9, %v10492_v63  ;;  %10076 = vmatpush1.bf16.msra.mxu0 %v16247_v16  ;;  %v16344_v61 = vcombine.high %v3830_v0, %v3834_v46  ;;  %v3694_v53 = vld [vmem:[#allocation6 + $0x1810] sm:$0xff]  ;;  %v16215_v9 = vcombine.low %v3702_v4, %v3706_v41  ;;  %v16343_v55 = vcombine.low %v3830_v0, %v3834_v46 }
 0x813   :  { %10077 = vmatprep.subr.bf16.mxu0 %v16240_v40  ;;  %v3826_v52 = vld [vmem:[#allocation6 + $0x1c30] sm:$0xff]  ;;  %v16208_v16 = vcombine.high %v3694_v53, %v3698_v24 }
 0x814   :  { %10117 = vmatpush1.bf16.msra.mxu1 %v16375_v56  ;;  %v16336_v59 = vcombine.high %v3822_v54, %v3826_v52  ;;  %v3814_v56 = vld [vmem:[#allocation6 + $0x1bd0] sm:$0xff]  ;;  %v16335_v62 = vcombine.low %v3822_v54, %v3826_v52 }
 0x815   :  { %10118 = vmatprep.subr.bf16.mxu1 %v16368_v58  ;;  %v3818_v40 = vld [vmem:[#allocation6 + $0x1bf0] sm:$0xff]  ;;  %v16207_v58 = vcombine.low %v3694_v53, %v3698_v24 }
 0x816   :  { %10078 = vmatpush1.bf16.msra.mxu0 %v16239_v12  ;;  %v3942_v63 = vld [vmem:[#allocation6 + $0x1fd0] sm:$0xff]  ;;  %v16328_v6 = vcombine.high %v3814_v56, %v3818_v40 }
 0x817   :  { %10079 = vmatprep.subr.bf16.mxu0 %v16232_v22  ;;  %v3946_v1 = vld [vmem:[#allocation6 + $0x1ff0] sm:$0xff] }
 0x818   :  { %10119 = vmatpush1.bf16.msra.mxu1 %v16367_v13  ;;  %v16456_v10 = vcombine.high %v3942_v63, %v3946_v1  ;;  %v3806_v19 = vld [vmem:[#allocation6 + $0x1b90] sm:$0xff]  ;;  %v16455_v18 = vcombine.low %v3942_v63, %v3946_v1 }
 0x819   :  { %10120 = vmatprep.subr.bf16.mxu1 %v16360_v42  ;;  %v3810_v12 = vld [vmem:[#allocation6 + $0x1bb0] sm:$0xff]  ;;  %v16327_v42 = vcombine.low %v3814_v56, %v3818_v40 }
 0x81a   :  { %10080 = vmatpush1.bf16.msra.mxu0 %v16231_v43  ;;  %v3934_v13 = vld [vmem:[#allocation6 + $0x1f90] sm:$0xff]  ;;  %v16320_v21 = vcombine.high %v3806_v19, %v3810_v12 }
 0x81b   :  { %10081 = vmatprep.subr.bf16.mxu0 %v16224_v30  ;;  %v3938_v22 = vld [vmem:[#allocation6 + $0x1fb0] sm:$0xff] }
 0x81c   :  { %10121 = vmatpush1.bf16.msra.mxu1 %v16359_v28  ;;  %v16448_v23 = vcombine.high %v3934_v13, %v3938_v22  ;;  %v3798_v3 = vld [vmem:[#allocation6 + $0x1b50] sm:$0xff]  ;;  %v16447_v4 = vcombine.low %v3934_v13, %v3938_v22 }
 0x81d   :  { %10122 = vmatprep.subr.bf16.mxu1 %v16352_v33  ;;  %v3802_v43 = vld [vmem:[#allocation6 + $0x1b70] sm:$0xff]  ;;  %v16319_v33 = vcombine.low %v3806_v19, %v3810_v12 }
 0x81e   :  { %10082 = vmatpush1.bf16.msra.mxu0 %v16223_v47  ;;  %v3926_v28 = vld [vmem:[#allocation6 + $0x1f50] sm:$0xff]  ;;  %v16312_v41 = vcombine.high %v3798_v3, %v3802_v43 }
 0x81f   :  { %10083 = vmatprep.subr.bf16.mxu0 %v16216_v15  ;;  %v3930_v30 = vld [vmem:[#allocation6 + $0x1f70] sm:$0xff] }
 0x820   :  { %10123 = vmatpush1.bf16.msra.mxu1 %v16351_v49  ;;  %v16440_v0 = vcombine.high %v3926_v28, %v3930_v30  ;;  %v3790_v46 = vld [vmem:[#allocation6 + $0x1b10] sm:$0xff]  ;;  %v16439_v53 = vcombine.low %v3926_v28, %v3930_v30 }
 0x821   :  { %10124 = vmatprep.subr.bf16.mxu1 %v16344_v61  ;;  %v3794_v47 = vld [vmem:[#allocation6 + $0x1b30] sm:$0xff]  ;;  %v16311_v61 = vcombine.low %v3798_v3, %v3802_v43 }
 0x822   :  { %10084 = vmatpush1.bf16.msra.mxu0 %v16215_v9  ;;  %v3918_v49 = vld [vmem:[#allocation6 + $0x1f10] sm:$0xff]  ;;  %v16304_v24 = vcombine.high %v3790_v46, %v3794_v47 }
 0x823   :  { %10085 = vmatprep.subr.bf16.mxu0 %v16208_v16  ;;  %v3922_v15 = vld [vmem:[#allocation6 + $0x1f30] sm:$0xff] }
 0x824   :  { %10125 = vmatpush1.bf16.msra.mxu1 %v16343_v55  ;;  %v16432_v54 = vcombine.high %v3918_v49, %v3922_v15  ;;  %v3782_v52 = vld [vmem:[#allocation6 + $0x1ad0] sm:$0xff]  ;;  %v16431_v56 = vcombine.low %v3918_v49, %v3922_v15  ;;  %v2983_v15 = vld [vmem:[#allocation6 + $0x1d8] sm:$0xff] }
 0x825   :  { %10126 = vmatprep.subr.bf16.mxu1 %v16336_v59  ;;  %v3786_v9 = vld [vmem:[#allocation6 + $0x1af0] sm:$0xff]  ;;  %v16303_v59 = vcombine.low %v3790_v46, %v3794_v47 }
 0x826   :  { %10086 = vmatpush1.bf16.msra.mxu0 %v16207_v58  ;;  %v3910_v55 = vld [vmem:[#allocation6 + $0x1ed0] sm:$0xff]  ;;  %v16296_v40 = vcombine.high %v3782_v52, %v3786_v9 }
 0x827   :  { %10087 = vmatprep.subr.bf16.mxu0 %v16328_v6  ;;  %v3914_v16 = vld [vmem:[#allocation6 + $0x1ef0] sm:$0xff] }
 0x828   :  { %10127 = vmatpush1.bf16.msra.mxu1 %v16335_v62  ;;  %v16424_v63 = vcombine.high %v3910_v55, %v3914_v16  ;;  %v3774_v1 = vld [vmem:[#allocation6 + $0x1a90] sm:$0xff]  ;;  %v16423_v19 = vcombine.low %v3910_v55, %v3914_v16 }
 0x829   :  { %10128 = vmatprep.subr.bf16.mxu1 %v16456_v10  ;;  %v3778_v58 = vld [vmem:[#allocation6 + $0x1ab0] sm:$0xff]  ;;  %v16295_v10 = vcombine.low %v3782_v52, %v3786_v9  ;;  %v3971_v52 = vsub.s32 4, %v18980_v29 }
 0x82a   :  { %10088 = vmatpush2.bf16.msra.mxu0 %v16327_v42  ;;  %v3902_v62 = vld [vmem:[#allocation6 + $0x1e90] sm:$0xff]  ;;  %v16288_v12 = vcombine.high %v3774_v1, %v3778_v58 }
 0x82b   :  { %10089 = vmatprep.subr.bf16.mxu0 %v16320_v21  ;;  %v3906_v6 = vld [vmem:[#allocation6 + $0x1eb0] sm:$0xff] }
 0x82c   :  { %10129 = vmatpush2.bf16.msra.mxu1 %v16455_v18  ;;  %v16416_v13 = vcombine.high %v3902_v62, %v3906_v6  ;;  %v3766_v22 = vld [vmem:[#allocation6 + $0x1a50] sm:$0xff]  ;;  %v16415_v3 = vcombine.low %v3902_v62, %v3906_v6 }
 0x82d   :  { %10130 = vmatprep.subr.bf16.mxu1 %v16448_v23  ;;  %v3770_v42 = vld [vmem:[#allocation6 + $0x1a70] sm:$0xff]  ;;  %v16287_v23 = vcombine.low %v3774_v1, %v3778_v58  ;;  %v3107_v1 = vld [vmem:[#allocation6 + $0x5b8] sm:$0xff]  ;;  %v3972_v58 = vrot.slane %v19098_v26, %v3971_v52 }
 0x82e   :  { %10090 = vmatpush2.bf16.msra.mxu0 %v16319_v33  ;;  %v3894_v18 = vld [vmem:[#allocation6 + $0x1e50] sm:$0xff]  ;;  %v16280_v43 = vcombine.high %v3766_v22, %v3770_v42 }
 0x82f   :  { %10091 = vmatprep.subr.bf16.mxu0 %v16312_v41  ;;  %v3898_v21 = vld [vmem:[#allocation6 + $0x1e70] sm:$0xff] }
 0x830   :  { %10131 = vmatpush2.bf16.msra.mxu1 %v16447_v4  ;;  %v16408_v28 = vcombine.high %v3894_v18, %v3898_v21  ;;  %v3758_v30 = vld [vmem:[#allocation6 + $0x1a10] sm:$0xff]  ;;  %v16407_v46 = vcombine.low %v3894_v18, %v3898_v21  ;;  %v3095_v18 = vld [vmem:[#allocation6 + $0x558] sm:$0xff] }
 0x831   :  { %10132 = vmatprep.subr.bf16.mxu1 %v16440_v0  ;;  %v3762_v33 = vld [vmem:[#allocation6 + $0x1a30] sm:$0xff]  ;;  %v16279_v0 = vcombine.low %v3766_v22, %v3770_v42  ;;  %v2971_v22 = vld [vmem:[#allocation6 + $0x178] sm:$0xff] }
 0x832   :  { %10092 = vmatpush2.bf16.msra.mxu0 %v16311_v61  ;;  %v3886_v4 = vld [vmem:[#allocation6 + $0x1e10] sm:$0xff]  ;;  %v16272_v47 = vcombine.high %v3758_v30, %v3762_v33  ;;  %v2987_v61 = vld [vmem:[#allocation6 + $0x1f8] sm:$0xff] }
 0x833   :  { %10093 = vmatprep.subr.bf16.mxu0 %v16304_v24  ;;  %v3890_v41 = vld [vmem:[#allocation6 + $0x1e30] sm:$0xff]  ;;  %v3115_v24 = vld [vmem:[#allocation6 + $0x5f8] sm:$0xff]  ;;  %v15498_v55 = vcombine.high %v2983_v15, %v2987_v61  ;;  %v15497_v62 = vcombine.low %v2983_v15, %v2987_v61 }
 0x834   :  { %10133 = vmatpush2.bf16.msra.mxu1 %v16439_v53  ;;  %v16400_v49 = vcombine.high %v3886_v4, %v3890_v41  ;;  %v3111_v53 = vld [vmem:[#allocation6 + $0x5d8] sm:$0xff]  ;;  %v16399_v9 = vcombine.low %v3886_v4, %v3890_v41 }
 0x835   :  { %10134 = vmatprep.subr.bf16.mxu1 %v16432_v54  ;;  %v16271_v54 = vcombine.low %v3758_v30, %v3762_v33  ;;  %v15626_v16 = vcombine.high %v3111_v53, %v3115_v24  ;;  %v15625_v6 = vcombine.low %v3111_v53, %v3115_v24  ;;  %v3099_v21 = vld [vmem:[#allocation6 + $0x578] sm:$0xff] }
 0x836   :  { %10094 = vmatpush2.bf16.msra.mxu0 %v16303_v59  ;;  %v3975_v59 = vsub.s32 5, %v18980_v29  ;;  %v3087_v61 = vld [vmem:[#allocation6 + $0x518] sm:$0xff] }
 0x837   :  { %10095 = vmatprep.subr.bf16.mxu0 %v16296_v40  ;;  %v2979_v40 = vld [vmem:[#allocation6 + $0x1b8] sm:$0xff] }
 0x838   :  { %10135 = vmatpush2.bf16.msra.mxu1 %v16431_v56  ;;  %v2975_v56 = vld [vmem:[#allocation6 + $0x198] sm:$0xff] }
 0x839   :  { %10136 = vmatprep.subr.bf16.mxu1 %v16424_v63  ;;  %v3103_v63 = vld [vmem:[#allocation6 + $0x598] sm:$0xff] }
 0x83a   :  { %10096 = vmatpush2.bf16.msra.mxu0 %v16295_v10  ;;  %v15490_v10 = vcombine.high %v2975_v56, %v2979_v40  ;;  %v15617_v30 = vcombine.low %v3103_v63, %v3107_v1  ;;  %v3091_v53 = vld [vmem:[#allocation6 + $0x538] sm:$0xff] }
 0x83b   :  { %10097 = vmatprep.subr.bf16.mxu0 %v16288_v12  ;;  %v15618_v12 = vcombine.high %v3103_v63, %v3107_v1  ;;  %v2951_v63 = vld [vmem:[#allocation6 + $0xd8] sm:$0xff] }
 0x83c   :  { %10137 = vmatpush2.bf16.msra.mxu1 %v16423_v19  ;;  %v3976_v19 = vrot.slane %v19098_v26, %v3975_v59  ;;  %v3079_v1 = vld [vmem:[#allocation6 + $0x4d8] sm:$0xff] }
 0x83d   :  { %10138 = vmatprep.subr.bf16.mxu1 %v16416_v13  ;;  %v2967_v13 = vld [vmem:[#allocation6 + $0x158] sm:$0xff] }
 0x83e   :  { %10098 = vmatpush2.bf16.msra.mxu0 %v16287_v23  ;;  %v15482_v33 = vcombine.high %v2967_v13, %v2971_v22 }
 0x83f   :  { %10099 = vmatprep.subr.bf16.mxu0 %v16280_v43  ;;  %v15489_v43 = vcombine.low %v2975_v56, %v2979_v40  ;;  %v15602_v40 = vcombine.high %v3087_v61, %v3091_v53 }
 0x840   :  { %10139 = vmatpush2.bf16.msra.mxu1 %v16415_v3 }
 0x841   :  { %10140 = vmatprep.subr.bf16.mxu1 %v16408_v28 }
 0x842   :  { %10100 = vmatpush2.bf16.msra.mxu0 %v16279_v0 }
 0x843   :  { %10101 = vmatprep.subr.bf16.mxu0 %v16272_v47  ;;  %v2959_v47 = vld [vmem:[#allocation6 + $0x118] sm:$0xff] }
 0x844   :  { %10141 = vmatpush2.bf16.msra.mxu1 %v16407_v46  ;;  %v15610_v46 = vcombine.high %v3095_v18, %v3099_v21 }
 0x845   :  { %10142 = vmatprep.subr.bf16.mxu1 %v16400_v49  ;;  %v2963_v49 = vld [vmem:[#allocation6 + $0x138] sm:$0xff] }
 0x846   :  { %10102 = vmatpush2.bf16.msra.mxu0 %v16271_v54  ;;  %v15474_v59 = vcombine.high %v2959_v47, %v2963_v49 }
 0x847   :  { %10153 = vmatprep.subr.bf16.mxu0 %v15498_v55 }
 0x848   :  { %10143 = vmatpush2.bf16.msra.mxu1 %v16399_v9  ;;  %v15481_v9 = vcombine.low %v2967_v13, %v2971_v22  ;;  %v3071_v13 = vld [vmem:[#allocation6 + $0x498] sm:$0xff] }
 0x849   :  { %10194 = vmatprep.subr.bf16.mxu1 %v15626_v16  ;;  %v9859_v42 = vpop.f32.mrf.mxu0  ;;  %10104 = vmatmul.mubr.bf16.vlgmr.msra.gmra.mxu0 %v19102_v20  ;;  %v15609_v16 = vcombine.low %v3095_v18, %v3099_v21  ;;  %v3075_v22 = vld [vmem:[#allocation6 + $0x4b8] sm:$0xff] }
 0x84a   :  { %v9860_v23 = vadd.f32 %v9859_v42, %v3972_v58  ;;  %10154 = vmatpush1.bf16.msra.mxu0 %v15497_v62  ;;  %10185 = vmatprep.mubr.bf16.mxu0 %v19030_v25  ;;  %v2955_v25 = vld [vmem:[#allocation6 + $0xf8] sm:$0xff]  ;;  %v15473_v62 = vcombine.low %v2959_v47, %v2963_v49 }
 0x84b   :  { %v9900_v3 = vpop.f32.mrf.mxu1  ;;  %10145 = vmatmul.mubr.bf16.vlgmr.msra.gmra.mxu1 %v19108_v44  ;;  %v9861_v28 = vpop.f32.mrf.mxu0  ;;  %10155 = vmatprep.subr.bf16.mxu0 %v15490_v10  ;;  %v3083_v58 = vld [vmem:[#allocation6 + $0x4f8] sm:$0xff]  ;;  %v15465_v42 = vcombine.low %v2951_v63, %v2955_v25 }
 0x84c   :  { %10195 = vmatpush1.bf16.msra.mxu1 %v15625_v6  ;;  %v19200_v4 = vadd.f32 %v9900_v3, %v9860_v23  ;;  %v9862_v41 = vadd.f32 %v9861_v28, %v3976_v19  ;;  %10226 = vmatprep.mubr.bf16.mxu1 %v19034_v51  ;;  %v15601_v51 = vcombine.low %v3087_v61, %v3091_v53  ;;  %v2943_v19 = vld [vmem:[#allocation6 + $0x98] sm:$0xff] }
 0x84d   :  { %v9902_v0 = vpop.f32.mrf.mxu1  ;;  %10196 = vmatprep.subr.bf16.mxu1 %v15618_v12  ;;  %v9863_v15 = vpop.f32.mrf.mxu0  ;;  %v15466_v6 = vcombine.high %v2951_v63, %v2955_v25  ;;  %v15594_v10 = vcombine.high %v3079_v1, %v3083_v58  ;;  %v2947_v12 = vld [vmem:[#allocation6 + $0xb8] sm:$0xff]  ;;  %v15593_v18 = vcombine.low %v3079_v1, %v3083_v58  ;;  %v15586_v23 = vcombine.high %v3071_v13, %v3075_v22 }
 0x84e   :  { %v19204_v24 = vadd.f32 %v9902_v0, %v9862_v41  ;;  %10156 = vmatpush1.bf16.msra.mxu0 %v15489_v43  ;;  %v15458_v21 = vcombine.high %v2943_v19, %v2947_v12  ;;  %v2935_v3 = vld [vmem:[#allocation6 + $0x58] sm:$0xff]  ;;  %v15585_v41 = vcombine.low %v3071_v13, %v3075_v22 }
 0x84f   :  { %v9904_v54 = vpop.f32.mrf.mxu1  ;;  %v9864_v55 = vpop.f32.mrf.mxu0  ;;  %10157 = vmatprep.subr.bf16.mxu0 %v15482_v33  ;;  %v2939_v43 = vld [vmem:[#allocation6 + $0x78] sm:$0xff]  ;;  %v15457_v33 = vcombine.low %v2943_v19, %v2947_v12 }
 0x850   :  { %10197 = vmatpush1.bf16.msra.mxu1 %v15617_v30  ;;  %v3063_v28 = vld [vmem:[#allocation6 + $0x458] sm:$0xff]  ;;  %v15450_v0 = vcombine.high %v2935_v3, %v2939_v43  ;;  %v15449_v53 = vcombine.low %v2935_v3, %v2939_v43 }
 0x851   :  { %v9905_v56 = vpop.f32.mrf.mxu1  ;;  %10198 = vmatprep.subr.bf16.mxu1 %v15610_v46  ;;  %v3067_v30 = vld [vmem:[#allocation6 + $0x478] sm:$0xff] }
 0x852   :  { %10158 = vmatpush1.bf16.msra.mxu0 %v15481_v9  ;;  %v15578_v46 = vcombine.high %v3063_v28, %v3067_v30  ;;  %v2927_v47 = vld [vmem:[#allocation6 + $0x18] sm:$0xff]  ;;  %v15577_v54 = vcombine.low %v3063_v28, %v3067_v30 }
 0x853   :  { %10159 = vmatprep.subr.bf16.mxu0 %v15474_v59  ;;  %v2931_v49 = vld [vmem:[#allocation6 + $0x38] sm:$0xff] }
 0x854   :  { %10199 = vmatpush1.bf16.msra.mxu1 %v15609_v16  ;;  %v3055_v15 = vld [vmem:[#allocation6 + $0x418] sm:$0xff]  ;;  %v15442_v9 = vcombine.high %v2927_v47, %v2931_v49  ;;  %v15441_v63 = vcombine.low %v2927_v47, %v2931_v49 }
 0x855   :  { %10200 = vmatprep.subr.bf16.mxu1 %v15602_v40  ;;  %v3059_v61 = vld [vmem:[#allocation6 + $0x438] sm:$0xff] }
 0x856   :  { %10160 = vmatpush1.bf16.msra.mxu0 %v15473_v62  ;;  %v15570_v55 = vcombine.high %v3055_v15, %v3059_v61  ;;  %v3047_v16 = vld [vmem:[#allocation6 + $0x3d8] sm:$0xff]  ;;  %v15569_v25 = vcombine.low %v3055_v15, %v3059_v61 }
 0x857   :  { %10161 = vmatprep.subr.bf16.mxu0 %v15466_v6  ;;  %v3051_v59 = vld [vmem:[#allocation6 + $0x3f8] sm:$0xff] }
 0x858   :  { %10201 = vmatpush1.bf16.msra.mxu1 %v15601_v51  ;;  %v3175_v56 = vld [vmem:[#allocation6 + $0x7d8] sm:$0xff]  ;;  %v15562_v1 = vcombine.high %v3047_v16, %v3051_v59  ;;  %v15561_v19 = vcombine.low %v3047_v16, %v3051_v59 }
 0x859   :  { %10202 = vmatprep.subr.bf16.mxu1 %v15594_v10  ;;  %v3179_v40 = vld [vmem:[#allocation6 + $0x7f8] sm:$0xff] }
 0x85a   :  { %10162 = vmatpush1.bf16.msra.mxu0 %v15465_v42  ;;  %v15690_v58 = vcombine.high %v3175_v56, %v3179_v40  ;;  %v3039_v62 = vld [vmem:[#allocation6 + $0x398] sm:$0xff]  ;;  %v15689_v12 = vcombine.low %v3175_v56, %v3179_v40 }
 0x85b   :  { %10163 = vmatprep.subr.bf16.mxu0 %v15458_v21  ;;  %v3043_v51 = vld [vmem:[#allocation6 + $0x3b8] sm:$0xff] }
 0x85c   :  { %10203 = vmatpush1.bf16.msra.mxu1 %v15593_v18  ;;  %v3167_v6 = vld [vmem:[#allocation6 + $0x798] sm:$0xff]  ;;  %v15554_v13 = vcombine.high %v3039_v62, %v3043_v51  ;;  %v15553_v3 = vcombine.low %v3039_v62, %v3043_v51 }
 0x85d   :  { %10204 = vmatprep.subr.bf16.mxu1 %v15586_v23  ;;  %v3171_v10 = vld [vmem:[#allocation6 + $0x7b8] sm:$0xff] }
 0x85e   :  { %10164 = vmatpush1.bf16.msra.mxu0 %v15457_v33  ;;  %v15682_v22 = vcombine.high %v3167_v6, %v3171_v10  ;;  %v3031_v42 = vld [vmem:[#allocation6 + $0x358] sm:$0xff]  ;;  %v15681_v43 = vcombine.low %v3167_v6, %v3171_v10 }
 0x85f   :  { %10165 = vmatprep.subr.bf16.mxu0 %v15450_v0  ;;  %v3035_v18 = vld [vmem:[#allocation6 + $0x378] sm:$0xff] }
 0x860   :  { %10205 = vmatpush1.bf16.msra.mxu1 %v15585_v41  ;;  %v3159_v21 = vld [vmem:[#allocation6 + $0x758] sm:$0xff]  ;;  %v15546_v28 = vcombine.high %v3031_v42, %v3035_v18  ;;  %v15545_v47 = vcombine.low %v3031_v42, %v3035_v18 }
 0x861   :  { %10206 = vmatprep.subr.bf16.mxu1 %v15578_v46  ;;  %v3163_v23 = vld [vmem:[#allocation6 + $0x778] sm:$0xff] }
 0x862   :  { %10166 = vmatpush1.bf16.msra.mxu0 %v15449_v53  ;;  %v15674_v30 = vcombine.high %v3159_v21, %v3163_v23  ;;  %v3023_v33 = vld [vmem:[#allocation6 + $0x318] sm:$0xff]  ;;  %v15673_v49 = vcombine.low %v3159_v21, %v3163_v23 }
 0x863   :  { %10167 = vmatprep.subr.bf16.mxu0 %v15442_v9  ;;  %v3027_v41 = vld [vmem:[#allocation6 + $0x338] sm:$0xff] }
 0x864   :  { %10207 = vmatpush1.bf16.msra.mxu1 %v15577_v54  ;;  %v3151_v0 = vld [vmem:[#allocation6 + $0x718] sm:$0xff]  ;;  %v15538_v15 = vcombine.high %v3023_v33, %v3027_v41  ;;  %v15537_v16 = vcombine.low %v3023_v33, %v3027_v41 }
 0x865   :  { %10208 = vmatprep.subr.bf16.mxu1 %v15570_v55  ;;  %v3155_v46 = vld [vmem:[#allocation6 + $0x738] sm:$0xff] }
 0x866   :  { %10168 = vmatpush1.bf16.msra.mxu0 %v15441_v63  ;;  %v15666_v61 = vcombine.high %v3151_v0, %v3155_v46  ;;  %v3015_v53 = vld [vmem:[#allocation6 + $0x2d8] sm:$0xff]  ;;  %v15665_v59 = vcombine.low %v3151_v0, %v3155_v46 }
 0x867   :  { %10169 = vmatprep.subr.bf16.mxu0 %v15562_v1  ;;  %v3019_v54 = vld [vmem:[#allocation6 + $0x2f8] sm:$0xff] }
 0x868   :  { %10209 = vmatpush1.bf16.msra.mxu1 %v15569_v25  ;;  %v3143_v9 = vld [vmem:[#allocation6 + $0x6d8] sm:$0xff]  ;;  %v15530_v56 = vcombine.high %v3015_v53, %v3019_v54  ;;  %v15529_v62 = vcombine.low %v3015_v53, %v3019_v54 }
 0x869   :  { %10210 = vmatprep.subr.bf16.mxu1 %v15690_v58  ;;  %v3147_v55 = vld [vmem:[#allocation6 + $0x6f8] sm:$0xff] }
 0x86a   :  { %10170 = vmatpush2.bf16.msra.mxu0 %v15561_v19  ;;  %v15658_v40 = vcombine.high %v3143_v9, %v3147_v55  ;;  %v3007_v63 = vld [vmem:[#allocation6 + $0x298] sm:$0xff]  ;;  %v15657_v51 = vcombine.low %v3143_v9, %v3147_v55 }
 0x86b   :  { %10171 = vmatprep.subr.bf16.mxu0 %v15554_v13  ;;  %v3011_v25 = vld [vmem:[#allocation6 + $0x2b8] sm:$0xff] }
 0x86c   :  { %10211 = vmatpush2.bf16.msra.mxu1 %v15689_v12  ;;  %v3135_v1 = vld [vmem:[#allocation6 + $0x698] sm:$0xff]  ;;  %v15522_v6 = vcombine.high %v3007_v63, %v3011_v25  ;;  %v15521_v42 = vcombine.low %v3007_v63, %v3011_v25 }
 0x86d   :  { %10212 = vmatprep.subr.bf16.mxu1 %v15682_v22  ;;  %v3139_v58 = vld [vmem:[#allocation6 + $0x6b8] sm:$0xff] }
 0x86e   :  { %10172 = vmatpush2.bf16.msra.mxu0 %v15553_v3  ;;  %v15650_v10 = vcombine.high %v3135_v1, %v3139_v58  ;;  %v2999_v19 = vld [vmem:[#allocation6 + $0x258] sm:$0xff]  ;;  %v15649_v18 = vcombine.low %v3135_v1, %v3139_v58 }
 0x86f   :  { %10173 = vmatprep.subr.bf16.mxu0 %v15546_v28  ;;  %v3003_v12 = vld [vmem:[#allocation6 + $0x278] sm:$0xff] }
 0x870   :  { %10213 = vmatpush2.bf16.msra.mxu1 %v15681_v43  ;;  %v3127_v13 = vld [vmem:[#allocation6 + $0x658] sm:$0xff]  ;;  %v15514_v21 = vcombine.high %v2999_v19, %v3003_v12  ;;  %v15513_v33 = vcombine.low %v2999_v19, %v3003_v12 }
 0x871   :  { %10214 = vmatprep.subr.bf16.mxu1 %v15674_v30  ;;  %v3131_v22 = vld [vmem:[#allocation6 + $0x678] sm:$0xff] }
 0x872   :  { %10174 = vmatpush2.bf16.msra.mxu0 %v15545_v47  ;;  %v15642_v23 = vcombine.high %v3127_v13, %v3131_v22  ;;  %v2991_v3 = vld [vmem:[#allocation6 + $0x218] sm:$0xff]  ;;  %v15641_v41 = vcombine.low %v3127_v13, %v3131_v22 }
 0x873   :  { %10175 = vmatprep.subr.bf16.mxu0 %v15538_v15  ;;  %v2995_v43 = vld [vmem:[#allocation6 + $0x238] sm:$0xff] }
 0x874   :  { %10215 = vmatpush2.bf16.msra.mxu1 %v15673_v49  ;;  %v3119_v28 = vld [vmem:[#allocation6 + $0x618] sm:$0xff]  ;;  %v15506_v0 = vcombine.high %v2991_v3, %v2995_v43  ;;  %v15505_v53 = vcombine.low %v2991_v3, %v2995_v43 }
 0x875   :  { %10216 = vmatprep.subr.bf16.mxu1 %v15666_v61  ;;  %v3123_v30 = vld [vmem:[#allocation6 + $0x638] sm:$0xff] }
 0x876   :  { %10176 = vmatpush2.bf16.msra.mxu0 %v15537_v16  ;;  %v15634_v46 = vcombine.high %v3119_v28, %v3123_v30  ;;  %v3239_v47 = vld [vmem:[#allocation6 + $0x9d8] sm:$0xff]  ;;  %v15633_v54 = vcombine.low %v3119_v28, %v3123_v30 }
 0x877   :  { %10177 = vmatprep.subr.bf16.mxu0 %v15530_v56  ;;  %v3243_v49 = vld [vmem:[#allocation6 + $0x9f8] sm:$0xff] }
 0x878   :  { %10217 = vmatpush2.bf16.msra.mxu1 %v15665_v59  ;;  %v3367_v15 = vld [vmem:[#allocation6 + $0xdd8] sm:$0xff]  ;;  %v15754_v9 = vcombine.high %v3239_v47, %v3243_v49  ;;  %v15753_v63 = vcombine.low %v3239_v47, %v3243_v49 }
 0x879   :  { %10218 = vmatprep.subr.bf16.mxu1 %v15658_v40  ;;  %v3371_v61 = vld [vmem:[#allocation6 + $0xdf8] sm:$0xff] }
 0x87a   :  { %10178 = vmatpush2.bf16.msra.mxu0 %v15529_v62  ;;  %v15882_v55 = vcombine.high %v3367_v15, %v3371_v61  ;;  %v3231_v16 = vld [vmem:[#allocation6 + $0x998] sm:$0xff]  ;;  %v15881_v25 = vcombine.low %v3367_v15, %v3371_v61 }
 0x87b   :  { %10179 = vmatprep.subr.bf16.mxu0 %v15522_v6  ;;  %v3235_v59 = vld [vmem:[#allocation6 + $0x9b8] sm:$0xff] }
 0x87c   :  { %10219 = vmatpush2.bf16.msra.mxu1 %v15657_v51  ;;  %v3359_v56 = vld [vmem:[#allocation6 + $0xd98] sm:$0xff]  ;;  %v15746_v1 = vcombine.high %v3231_v16, %v3235_v59  ;;  %v15745_v22 = vcombine.low %v3231_v16, %v3235_v59 }
 0x87d   :  { %10220 = vmatprep.subr.bf16.mxu1 %v15650_v10  ;;  %v3363_v40 = vld [vmem:[#allocation6 + $0xdb8] sm:$0xff] }
 0x87e   :  { %10180 = vmatpush2.bf16.msra.mxu0 %v15521_v42  ;;  %v15874_v58 = vcombine.high %v3359_v56, %v3363_v40  ;;  %v3223_v62 = vld [vmem:[#allocation6 + $0x958] sm:$0xff] }
 0x87f   :  { %10181 = vmatprep.subr.bf16.mxu0 %v15514_v21  ;;  %v3227_v51 = vld [vmem:[#allocation6 + $0x978] sm:$0xff] }
 0x880   :  { %10221 = vmatpush2.bf16.msra.mxu1 %v15649_v18  ;;  %v3351_v10 = vld [vmem:[#allocation6 + $0xd58] sm:$0xff]  ;;  %v15873_v18 = vcombine.low %v3359_v56, %v3363_v40  ;;  %v15738_v21 = vcombine.high %v3223_v62, %v3227_v51 }
 0x881   :  { %10222 = vmatprep.subr.bf16.mxu1 %v15642_v23  ;;  %v3355_v19 = vld [vmem:[#allocation6 + $0xd78] sm:$0xff] }
 0x882   :  { %10182 = vmatpush2.bf16.msra.mxu0 %v15513_v33  ;;  %v3215_v28 = vld [vmem:[#allocation6 + $0x918] sm:$0xff] }
 0x883   :  { %10183 = vmatprep.subr.bf16.mxu0 %v15506_v0  ;;  %v3219_v30 = vld [vmem:[#allocation6 + $0x938] sm:$0xff] }
 0x884   :  { %10223 = vmatpush2.bf16.msra.mxu1 %v15641_v41  ;;  %v3347_v33 = vld [vmem:[#allocation6 + $0xd38] sm:$0xff]  ;;  %v15730_v49 = vcombine.high %v3215_v28, %v3219_v30 }
 0x885   :  { %10224 = vmatprep.subr.bf16.mxu1 %v15634_v46  ;;  %v15737_v46 = vcombine.low %v3223_v62, %v3227_v51  ;;  %v3199_v56 = vld [vmem:[#allocation6 + $0x898] sm:$0xff] }
 0x886   :  { %10184 = vmatpush2.bf16.msra.mxu0 %v15505_v53  ;;  %v3207_v53 = vld [vmem:[#allocation6 + $0x8d8] sm:$0xff] }
 0x887   :  { %10235 = vmatprep.subr.bf16.mxu0 %v15754_v9  ;;  %v3339_v9 = vld [vmem:[#allocation6 + $0xcf8] sm:$0xff] }
 0x888   :  { %10225 = vmatpush2.bf16.msra.mxu1 %v15633_v54  ;;  %v3335_v54 = vld [vmem:[#allocation6 + $0xcd8] sm:$0xff] }
 0x889   :  { %10276 = vmatprep.subr.bf16.mxu1 %v15882_v55  ;;  %v9941_v6 = vpop.f32.mrf.mxu0  ;;  %10186 = vmatmul.mubr.bf16.vlgmr.msra.gmra.mxu0 %v19040_v45  ;;  %v15866_v45 = vcombine.high %v3351_v10, %v3355_v19  ;;  %v15729_v55 = vcombine.low %v3215_v28, %v3219_v30  ;;  %v15850_v59 = vcombine.high %v3335_v54, %v3339_v9  ;;  %v3203_v40 = vld [vmem:[#allocation6 + $0x8b8] sm:$0xff] }
 0x88a   :  { %v9942_v12 = vadd.f32 %v9941_v6, %v19200_v4  ;;  %10236 = vmatpush1.bf16.msra.mxu0 %v15753_v63  ;;  %10267 = vmatprep.mubr.bf16.mxu0 %v19048_v35  ;;  %v3211_v35 = vld [vmem:[#allocation6 + $0x8f8] sm:$0xff]  ;;  %v15714_v62 = vcombine.high %v3199_v56, %v3203_v40 }
 0x88b   :  { %v9982_v13 = vpop.f32.mrf.mxu1  ;;  %10227 = vmatmul.mubr.bf16.vlgmr.msra.gmra.mxu1 %v19044_v48  ;;  %v9943_v42 = vpop.f32.mrf.mxu0  ;;  %10237 = vmatprep.subr.bf16.mxu0 %v15746_v1  ;;  %v3343_v48 = vld [vmem:[#allocation6 + $0xd18] sm:$0xff]  ;;  %v15722_v16 = vcombine.high %v3207_v53, %v3211_v35  ;;  %v15721_v1 = vcombine.low %v3207_v53, %v3211_v35 }
 0x88c   :  { %10277 = vmatpush1.bf16.msra.mxu1 %v15881_v25  ;;  %v19209_v23 = vadd.f32 %v9982_v13, %v9942_v12  ;;  %v9944_v3 = vadd.f32 %v9943_v42, %v19204_v24  ;;  %10308 = vmatprep.mubr.bf16.mxu1 %v19053_v36  ;;  %v15865_v24 = vcombine.low %v3351_v10, %v3355_v19  ;;  %v3327_v63 = vld [vmem:[#allocation6 + $0xc98] sm:$0xff] }
 0x88d   :  { %v9984_v43 = vpop.f32.mrf.mxu1  ;;  %10278 = vmatprep.subr.bf16.mxu1 %v15874_v58  ;;  %v9945_v4 = vpop.f32.mrf.mxu0  ;;  %v15858_v61 = vcombine.high %v3343_v48, %v3347_v33  ;;  %v15857_v36 = vcombine.low %v3343_v48, %v3347_v33  ;;  %v3331_v25 = vld [vmem:[#allocation6 + $0xcb8] sm:$0xff]  ;;  %v15849_v58 = vcombine.low %v3335_v54, %v3339_v9  ;;  %v15713_v13 = vcombine.low %v3199_v56, %v3203_v40 }
 0x88e   :  { %v19214_v41 = vadd.f32 %v9984_v43, %v9944_v3  ;;  %10238 = vmatpush1.bf16.msra.mxu0 %v15745_v22  ;;  %v15842_v51 = vcombine.high %v3327_v63, %v3331_v25  ;;  %v3191_v6 = vld [vmem:[#allocation6 + $0x858] sm:$0xff]  ;;  %v15841_v22 = vcombine.low %v3327_v63, %v3331_v25 }
 0x88f   :  { %v9986_v0 = vpop.f32.mrf.mxu1  ;;  %v9946_v47 = vpop.f32.mrf.mxu0  ;;  %10239 = vmatprep.subr.bf16.mxu0 %v15738_v21  ;;  %v3195_v10 = vld [vmem:[#allocation6 + $0x878] sm:$0xff] }
 0x890   :  { %10279 = vmatpush1.bf16.msra.mxu1 %v15873_v18  ;;  %v3319_v19 = vld [vmem:[#allocation6 + $0xc58] sm:$0xff]  ;;  %v15706_v42 = vcombine.high %v3191_v6, %v3195_v10  ;;  %v15705_v28 = vcombine.low %v3191_v6, %v3195_v10 }
 0x891   :  { %v9987_v15 = vpop.f32.mrf.mxu1  ;;  %10280 = vmatprep.subr.bf16.mxu1 %v15866_v45  ;;  %v3323_v12 = vld [vmem:[#allocation6 + $0xc78] sm:$0xff] }
 0x892   :  { %10240 = vmatpush1.bf16.msra.mxu0 %v15737_v46  ;;  %v15834_v18 = vcombine.high %v3319_v19, %v3323_v12  ;;  %v3183_v21 = vld [vmem:[#allocation6 + $0x818] sm:$0xff]  ;;  %v15833_v30 = vcombine.low %v3319_v19, %v3323_v12 }
 0x893   :  { %10241 = vmatprep.subr.bf16.mxu0 %v15730_v49  ;;  %v3187_v3 = vld [vmem:[#allocation6 + $0x838] sm:$0xff] }
 0x894   :  { %10281 = vmatpush1.bf16.msra.mxu1 %v15865_v24  ;;  %v3311_v43 = vld [vmem:[#allocation6 + $0xc18] sm:$0xff]  ;;  %v15698_v4 = vcombine.high %v3183_v21, %v3187_v3  ;;  %v15697_v24 = vcombine.low %v3183_v21, %v3187_v3 }
 0x895   :  { %10282 = vmatprep.subr.bf16.mxu1 %v15858_v61  ;;  %v3315_v45 = vld [vmem:[#allocation6 + $0xc38] sm:$0xff] }
 0x896   :  { %10242 = vmatpush1.bf16.msra.mxu0 %v15729_v55  ;;  %v15826_v48 = vcombine.high %v3311_v43, %v3315_v45  ;;  %v3303_v33 = vld [vmem:[#allocation6 + $0xbd8] sm:$0xff]  ;;  %v15825_v49 = vcombine.low %v3311_v43, %v3315_v45 }
 0x897   :  { %10243 = vmatprep.subr.bf16.mxu0 %v15722_v16  ;;  %v3307_v0 = vld [vmem:[#allocation6 + $0xbf8] sm:$0xff] }
 0x898   :  { %10283 = vmatpush1.bf16.msra.mxu1 %v15857_v36  ;;  %v3431_v46 = vld [vmem:[#allocation6 + $0xfd8] sm:$0xff]  ;;  %v15818_v15 = vcombine.high %v3303_v33, %v3307_v0  ;;  %v15817_v55 = vcombine.low %v3303_v33, %v3307_v0 }
 0x899   :  { %10284 = vmatprep.subr.bf16.mxu1 %v15850_v59  ;;  %v3435_v47 = vld [vmem:[#allocation6 + $0xff8] sm:$0xff] }
 0x89a   :  { %10244 = vmatpush1.bf16.msra.mxu0 %v15721_v1  ;;  %v15946_v61 = vcombine.high %v3431_v46, %v3435_v47  ;;  %v3295_v53 = vld [vmem:[#allocation6 + $0xb98] sm:$0xff]  ;;  %v15945_v36 = vcombine.low %v3431_v46, %v3435_v47 }
 0x89b   :  { %10245 = vmatprep.subr.bf16.mxu0 %v15714_v62  ;;  %v3299_v35 = vld [vmem:[#allocation6 + $0xbb8] sm:$0xff] }
 0x89c   :  { %10285 = vmatpush1.bf16.msra.mxu1 %v15849_v58  ;;  %v3423_v54 = vld [vmem:[#allocation6 + $0xf98] sm:$0xff]  ;;  %v15810_v16 = vcombine.high %v3295_v53, %v3299_v35  ;;  %v15809_v1 = vcombine.low %v3295_v53, %v3299_v35 }
 0x89d   :  { %10286 = vmatprep.subr.bf16.mxu1 %v15842_v51  ;;  %v3427_v9 = vld [vmem:[#allocation6 + $0xfb8] sm:$0xff] }
 0x89e   :  { %10246 = vmatpush1.bf16.msra.mxu0 %v15713_v13  ;;  %v15938_v59 = vcombine.high %v3423_v54, %v3427_v9  ;;  %v3287_v56 = vld [vmem:[#allocation6 + $0xb58] sm:$0xff]  ;;  %v15937_v58 = vcombine.low %v3423_v54, %v3427_v9 }
 0x89f   :  { %10247 = vmatprep.subr.bf16.mxu0 %v15706_v42  ;;  %v3291_v40 = vld [vmem:[#allocation6 + $0xb78] sm:$0xff] }
 0x8a0   :  { %10287 = vmatpush1.bf16.msra.mxu1 %v15841_v22  ;;  %v3415_v63 = vld [vmem:[#allocation6 + $0xf58] sm:$0xff]  ;;  %v15802_v62 = vcombine.high %v3287_v56, %v3291_v40  ;;  %v15801_v13 = vcombine.low %v3287_v56, %v3291_v40 }
 0x8a1   :  { %10288 = vmatprep.subr.bf16.mxu1 %v15834_v18  ;;  %v3419_v25 = vld [vmem:[#allocation6 + $0xf78] sm:$0xff] }
 0x8a2   :  { %10248 = vmatpush1.bf16.msra.mxu0 %v15705_v28  ;;  %v15930_v51 = vcombine.high %v3415_v63, %v3419_v25  ;;  %v3279_v6 = vld [vmem:[#allocation6 + $0xb18] sm:$0xff]  ;;  %v15929_v22 = vcombine.low %v3415_v63, %v3419_v25 }
 0x8a3   :  { %10249 = vmatprep.subr.bf16.mxu0 %v15698_v4  ;;  %v3283_v10 = vld [vmem:[#allocation6 + $0xb38] sm:$0xff] }
 0x8a4   :  { %10289 = vmatpush1.bf16.msra.mxu1 %v15833_v30  ;;  %v3407_v19 = vld [vmem:[#allocation6 + $0xf18] sm:$0xff]  ;;  %v15794_v42 = vcombine.high %v3279_v6, %v3283_v10  ;;  %v15793_v28 = vcombine.low %v3279_v6, %v3283_v10 }
 0x8a5   :  { %10290 = vmatprep.subr.bf16.mxu1 %v15826_v48  ;;  %v3411_v12 = vld [vmem:[#allocation6 + $0xf38] sm:$0xff] }
 0x8a6   :  { %10250 = vmatpush1.bf16.msra.mxu0 %v15697_v24  ;;  %v15922_v18 = vcombine.high %v3407_v19, %v3411_v12  ;;  %v3271_v21 = vld [vmem:[#allocation6 + $0xad8] sm:$0xff]  ;;  %v15921_v30 = vcombine.low %v3407_v19, %v3411_v12 }
 0x8a7   :  { %10251 = vmatprep.subr.bf16.mxu0 %v15818_v15  ;;  %v3275_v3 = vld [vmem:[#allocation6 + $0xaf8] sm:$0xff] }
 0x8a8   :  { %10291 = vmatpush1.bf16.msra.mxu1 %v15825_v49  ;;  %v3399_v43 = vld [vmem:[#allocation6 + $0xed8] sm:$0xff]  ;;  %v15786_v4 = vcombine.high %v3271_v21, %v3275_v3  ;;  %v15785_v24 = vcombine.low %v3271_v21, %v3275_v3 }
 0x8a9   :  { %10292 = vmatprep.subr.bf16.mxu1 %v15946_v61  ;;  %v3403_v45 = vld [vmem:[#allocation6 + $0xef8] sm:$0xff] }
 0x8aa   :  { %10252 = vmatpush2.bf16.msra.mxu0 %v15817_v55  ;;  %v15914_v48 = vcombine.high %v3399_v43, %v3403_v45  ;;  %v3263_v33 = vld [vmem:[#allocation6 + $0xa98] sm:$0xff]  ;;  %v15913_v49 = vcombine.low %v3399_v43, %v3403_v45 }
 0x8ab   :  { %10253 = vmatprep.subr.bf16.mxu0 %v15810_v16  ;;  %v3267_v0 = vld [vmem:[#allocation6 + $0xab8] sm:$0xff] }
 0x8ac   :  { %10293 = vmatpush2.bf16.msra.mxu1 %v15945_v36  ;;  %v3391_v46 = vld [vmem:[#allocation6 + $0xe98] sm:$0xff]  ;;  %v15778_v15 = vcombine.high %v3263_v33, %v3267_v0  ;;  %v15777_v55 = vcombine.low %v3263_v33, %v3267_v0 }
 0x8ad   :  { %10294 = vmatprep.subr.bf16.mxu1 %v15938_v59  ;;  %v3395_v47 = vld [vmem:[#allocation6 + $0xeb8] sm:$0xff] }
 0x8ae   :  { %10254 = vmatpush2.bf16.msra.mxu0 %v15809_v1  ;;  %v15906_v61 = vcombine.high %v3391_v46, %v3395_v47  ;;  %v3255_v53 = vld [vmem:[#allocation6 + $0xa58] sm:$0xff]  ;;  %v15905_v36 = vcombine.low %v3391_v46, %v3395_v47 }
 0x8af   :  { %10255 = vmatprep.subr.bf16.mxu0 %v15802_v62  ;;  %v3259_v35 = vld [vmem:[#allocation6 + $0xa78] sm:$0xff] }
 0x8b0   :  { %10295 = vmatpush2.bf16.msra.mxu1 %v15937_v58  ;;  %v3383_v54 = vld [vmem:[#allocation6 + $0xe58] sm:$0xff]  ;;  %v15770_v16 = vcombine.high %v3255_v53, %v3259_v35  ;;  %v15769_v1 = vcombine.low %v3255_v53, %v3259_v35 }
 0x8b1   :  { %10296 = vmatprep.subr.bf16.mxu1 %v15930_v51  ;;  %v3387_v9 = vld [vmem:[#allocation6 + $0xe78] sm:$0xff] }
 0x8b2   :  { %10256 = vmatpush2.bf16.msra.mxu0 %v15801_v13  ;;  %v15898_v59 = vcombine.high %v3383_v54, %v3387_v9  ;;  %v3247_v56 = vld [vmem:[#allocation6 + $0xa18] sm:$0xff]  ;;  %v15897_v58 = vcombine.low %v3383_v54, %v3387_v9 }
 0x8b3   :  { %10257 = vmatprep.subr.bf16.mxu0 %v15794_v42  ;;  %v3251_v40 = vld [vmem:[#allocation6 + $0xa38] sm:$0xff] }
 0x8b4   :  { %10297 = vmatpush2.bf16.msra.mxu1 %v15929_v22  ;;  %v3375_v63 = vld [vmem:[#allocation6 + $0xe18] sm:$0xff]  ;;  %v15762_v62 = vcombine.high %v3247_v56, %v3251_v40  ;;  %v15761_v13 = vcombine.low %v3247_v56, %v3251_v40 }
 0x8b5   :  { %10298 = vmatprep.subr.bf16.mxu1 %v15922_v18  ;;  %v3379_v25 = vld [vmem:[#allocation6 + $0xe38] sm:$0xff] }
 0x8b6   :  { %10258 = vmatpush2.bf16.msra.mxu0 %v15793_v28  ;;  %v15890_v51 = vcombine.high %v3375_v63, %v3379_v25  ;;  %v3495_v6 = vld [vmem:[#allocation6 + $0x11d8] sm:$0xff]  ;;  %v15889_v22 = vcombine.low %v3375_v63, %v3379_v25 }
 0x8b7   :  { %10259 = vmatprep.subr.bf16.mxu0 %v15786_v4  ;;  %v3499_v10 = vld [vmem:[#allocation6 + $0x11f8] sm:$0xff] }
 0x8b8   :  { %10299 = vmatpush2.bf16.msra.mxu1 %v15921_v30  ;;  %v3623_v19 = vld [vmem:[#allocation6 + $0x15d8] sm:$0xff]  ;;  %v16010_v42 = vcombine.high %v3495_v6, %v3499_v10  ;;  %v16009_v28 = vcombine.low %v3495_v6, %v3499_v10 }
 0x8b9   :  { %10300 = vmatprep.subr.bf16.mxu1 %v15914_v48  ;;  %v3627_v12 = vld [vmem:[#allocation6 + $0x15f8] sm:$0xff] }
 0x8ba   :  { %10260 = vmatpush2.bf16.msra.mxu0 %v15785_v24  ;;  %v16138_v18 = vcombine.high %v3623_v19, %v3627_v12  ;;  %v3487_v21 = vld [vmem:[#allocation6 + $0x1198] sm:$0xff]  ;;  %v16137_v30 = vcombine.low %v3623_v19, %v3627_v12 }
 0x8bb   :  { %10261 = vmatprep.subr.bf16.mxu0 %v15778_v15  ;;  %v3491_v3 = vld [vmem:[#allocation6 + $0x11b8] sm:$0xff] }
 0x8bc   :  { %10301 = vmatpush2.bf16.msra.mxu1 %v15913_v49  ;;  %v3615_v43 = vld [vmem:[#allocation6 + $0x1598] sm:$0xff]  ;;  %v16002_v4 = vcombine.high %v3487_v21, %v3491_v3 }
 0x8bd   :  { %10302 = vmatprep.subr.bf16.mxu1 %v15906_v61  ;;  %v3619_v45 = vld [vmem:[#allocation6 + $0x15b8] sm:$0xff]  ;;  %v16001_v61 = vcombine.low %v3487_v21, %v3491_v3 }
 0x8be   :  { %10262 = vmatpush2.bf16.msra.mxu0 %v15777_v55  ;;  %v16130_v48 = vcombine.high %v3615_v43, %v3619_v45  ;;  %v3479_v33 = vld [vmem:[#allocation6 + $0x1158] sm:$0xff]  ;;  %v16129_v35 = vcombine.low %v3615_v43, %v3619_v45 }
 0x8bf   :  { %10263 = vmatprep.subr.bf16.mxu0 %v15770_v16  ;;  %v3483_v0 = vld [vmem:[#allocation6 + $0x1178] sm:$0xff] }
 0x8c0   :  { %10303 = vmatpush2.bf16.msra.mxu1 %v15905_v36  ;;  %v3607_v47 = vld [vmem:[#allocation6 + $0x1558] sm:$0xff]  ;;  %v15994_v54 = vcombine.high %v3479_v33, %v3483_v0  ;;  %v15993_v25 = vcombine.low %v3479_v33, %v3483_v0 }
 0x8c1   :  { %10304 = vmatprep.subr.bf16.mxu1 %v15898_v59  ;;  %v3611_v24 = vld [vmem:[#allocation6 + $0x1578] sm:$0xff] }
 0x8c2   :  { %10264 = vmatpush2.bf16.msra.mxu0 %v15769_v1  ;;  %v3471_v16 = vld [vmem:[#allocation6 + $0x1118] sm:$0xff] }
 0x8c3   :  { %10265 = vmatprep.subr.bf16.mxu0 %v15762_v62  ;;  %v3475_v59 = vld [vmem:[#allocation6 + $0x1138] sm:$0xff] }
 0x8c4   :  { %10305 = vmatpush2.bf16.msra.mxu1 %v15897_v58  ;;  %v3603_v56 = vld [vmem:[#allocation6 + $0x1538] sm:$0xff]  ;;  %v15986_v58 = vcombine.high %v3471_v16, %v3475_v59  ;;  %v15985_v12 = vcombine.low %v3471_v16, %v3475_v59 }
 0x8c5   :  { %10306 = vmatprep.subr.bf16.mxu1 %v15890_v51  ;;  %v3463_v6 = vld [vmem:[#allocation6 + $0x10d8] sm:$0xff] }
 0x8c6   :  { %10266 = vmatpush2.bf16.msra.mxu0 %v15761_v13  ;;  %v3591_v10 = vld [vmem:[#allocation6 + $0x14d8] sm:$0xff] }
 0x8c7   :  { %10317 = vmatprep.subr.bf16.mxu0 %v16010_v42  ;;  %v3595_v19 = vld [vmem:[#allocation6 + $0x14f8] sm:$0xff] }
 0x8c8   :  { %10307 = vmatpush2.bf16.msra.mxu1 %v15889_v22  ;;  %v16106_v22 = vcombine.high %v3591_v10, %v3595_v19  ;;  %v3455_v42 = vld [vmem:[#allocation6 + $0x1098] sm:$0xff]  ;;  %v16105_v45 = vcombine.low %v3591_v10, %v3595_v19 }
 0x8c9   :  { %10358 = vmatprep.subr.bf16.mxu1 %v16138_v18  ;;  %v10023_v46 = vpop.f32.mrf.mxu0  ;;  %10268 = vmatmul.mubr.bf16.vlgmr.msra.gmra.mxu0 %v19060_v2  ;;  %v16122_v2 = vcombine.high %v3607_v47, %v3611_v24  ;;  %v3459_v18 = vld [vmem:[#allocation6 + $0x10b8] sm:$0xff] }
 0x8ca   :  { %v10024_v49 = vadd.f32 %v10023_v46, %v19209_v23  ;;  %10318 = vmatpush1.bf16.msra.mxu0 %v16009_v28  ;;  %10349 = vmatprep.mubr.bf16.mxu0 %v19068_v37  ;;  %v3467_v37 = vld [vmem:[#allocation6 + $0x10f8] sm:$0xff]  ;;  %v15970_v28 = vcombine.high %v3455_v42, %v3459_v18  ;;  %v15969_v46 = vcombine.low %v3455_v42, %v3459_v18 }
 0x8cb   :  { %v10064_v15 = vpop.f32.mrf.mxu1  ;;  %10309 = vmatmul.mubr.bf16.vlgmr.msra.gmra.mxu1 %v19064_v5  ;;  %v10025_v53 = vpop.f32.mrf.mxu0  ;;  %10319 = vmatprep.subr.bf16.mxu0 %v16002_v4  ;;  %v3599_v5 = vld [vmem:[#allocation6 + $0x1518] sm:$0xff]  ;;  %v15978_v13 = vcombine.high %v3463_v6, %v3467_v37  ;;  %v15977_v43 = vcombine.low %v3463_v6, %v3467_v37 }
 0x8cc   :  { %10359 = vmatpush1.bf16.msra.mxu1 %v16137_v30  ;;  %v19219_v9 = vadd.f32 %v10064_v15, %v10024_v49  ;;  %v10026_v55 = vadd.f32 %v10025_v53, %v19214_v41  ;;  %10390 = vmatprep.mubr.bf16.mxu1 %v19073_v38  ;;  %v16121_v41 = vcombine.low %v3607_v47, %v3611_v24  ;;  %v3583_v21 = vld [vmem:[#allocation6 + $0x1498] sm:$0xff] }
 0x8cd   :  { %v10066_v36 = vpop.f32.mrf.mxu1  ;;  %10360 = vmatprep.subr.bf16.mxu1 %v16130_v48  ;;  %v10027_v23 = vpop.f32.mrf.mxu0  ;;  %v16114_v51 = vcombine.high %v3599_v5, %v3603_v56  ;;  %v16113_v38 = vcombine.low %v3599_v5, %v3603_v56  ;;  %v3587_v3 = vld [vmem:[#allocation6 + $0x14b8] sm:$0xff] }
 0x8ce   :  { %v19224_v40 = vadd.f32 %v10066_v36, %v10026_v55  ;;  %10320 = vmatpush1.bf16.msra.mxu0 %v16001_v61  ;;  %v16098_v30 = vcombine.high %v3583_v21, %v3587_v3  ;;  %v3447_v4 = vld [vmem:[#allocation6 + $0x1058] sm:$0xff]  ;;  %v16097_v47 = vcombine.low %v3583_v21, %v3587_v3 }
 0x8cf   :  { %v10068_v63 = vpop.f32.mrf.mxu1  ;;  %v10028_v1 = vpop.f32.mrf.mxu0  ;;  %10321 = vmatprep.subr.bf16.mxu0 %v15994_v54  ;;  %v3451_v48 = vld [vmem:[#allocation6 + $0x1078] sm:$0xff] }
 0x8d0   :  { %10361 = vmatpush1.bf16.msra.mxu1 %v16129_v35  ;;  %v3575_v33 = vld [vmem:[#allocation6 + $0x1458] sm:$0xff]  ;;  %v15962_v24 = vcombine.high %v3447_v4, %v3451_v48  ;;  %v15961_v54 = vcombine.low %v3447_v4, %v3451_v48 }
 0x8d1   :  { %v10069_v62 = vpop.f32.mrf.mxu1  ;;  %10362 = vmatprep.subr.bf16.mxu1 %v16122_v2  ;;  %v3579_v0 = vld [vmem:[#allocation6 + $0x1478] sm:$0xff] }
 0x8d2   :  { %10322 = vmatpush1.bf16.msra.mxu0 %v15993_v25  ;;  %v16090_v49 = vcombine.high %v3575_v33, %v3579_v0  ;;  %v3439_v15 = vld [vmem:[#allocation6 + $0x1018] sm:$0xff]  ;;  %v16089_v55 = vcombine.low %v3575_v33, %v3579_v0 }
 0x8d3   :  { %10323 = vmatprep.subr.bf16.mxu0 %v15986_v58  ;;  %v3443_v61 = vld [vmem:[#allocation6 + $0x1038] sm:$0xff] }
 0x8d4   :  { %10363 = vmatpush1.bf16.msra.mxu1 %v16121_v41  ;;  %v3567_v53 = vld [vmem:[#allocation6 + $0x1418] sm:$0xff]  ;;  %v15954_v36 = vcombine.high %v3439_v15, %v3443_v61  ;;  %v15953_v56 = vcombine.low %v3439_v15, %v3443_v61 }
 0x8d5   :  { %10364 = vmatprep.subr.bf16.mxu1 %v16114_v51  ;;  %v3571_v35 = vld [vmem:[#allocation6 + $0x1438] sm:$0xff] }
 0x8d6   :  { %10324 = vmatpush1.bf16.msra.mxu0 %v15985_v12  ;;  %v16082_v2 = vcombine.high %v3567_v53, %v3571_v35  ;;  %v3559_v16 = vld [vmem:[#allocation6 + $0x13d8] sm:$0xff]  ;;  %v16081_v63 = vcombine.low %v3567_v53, %v3571_v35 }
 0x8d7   :  { %10325 = vmatprep.subr.bf16.mxu0 %v15978_v13  ;;  %v3563_v59 = vld [vmem:[#allocation6 + $0x13f8] sm:$0xff] }
 0x8d8   :  { %10365 = vmatpush1.bf16.msra.mxu1 %v16113_v38  ;;  %v3687_v23 = vld [vmem:[#allocation6 + $0x17d8] sm:$0xff]  ;;  %v16074_v25 = vcombine.high %v3559_v16, %v3563_v59  ;;  %v16073_v6 = vcombine.low %v3559_v16, %v3563_v59 }
 0x8d9   :  { %10366 = vmatprep.subr.bf16.mxu1 %v16106_v22  ;;  %v3691_v5 = vld [vmem:[#allocation6 + $0x17f8] sm:$0xff] }
 0x8da   :  { %10326 = vmatpush1.bf16.msra.mxu0 %v15977_v43  ;;  %v16202_v1 = vcombine.high %v3687_v23, %v3691_v5  ;;  %v3551_v41 = vld [vmem:[#allocation6 + $0x1398] sm:$0xff]  ;;  %v16201_v37 = vcombine.low %v3687_v23, %v3691_v5 }
 0x8db   :  { %10327 = vmatprep.subr.bf16.mxu0 %v15970_v28  ;;  %v3555_v58 = vld [vmem:[#allocation6 + $0x13b8] sm:$0xff] }
 0x8dc   :  { %10367 = vmatpush1.bf16.msra.mxu1 %v16105_v45  ;;  %v3679_v62 = vld [vmem:[#allocation6 + $0x1798] sm:$0xff]  ;;  %v16066_v10 = vcombine.high %v3551_v41, %v3555_v58  ;;  %v16065_v42 = vcombine.low %v3551_v41, %v3555_v58 }
 0x8dd   :  { %10368 = vmatprep.subr.bf16.mxu1 %v16098_v30  ;;  %v3683_v51 = vld [vmem:[#allocation6 + $0x17b8] sm:$0xff] }
 0x8de   :  { %10328 = vmatpush1.bf16.msra.mxu0 %v15969_v46  ;;  %v16194_v19 = vcombine.high %v3679_v62, %v3683_v51  ;;  %v3543_v12 = vld [vmem:[#allocation6 + $0x1358] sm:$0xff]  ;;  %v16193_v18 = vcombine.low %v3679_v62, %v3683_v51 }
 0x8df   :  { %10329 = vmatprep.subr.bf16.mxu0 %v15962_v24  ;;  %v3547_v38 = vld [vmem:[#allocation6 + $0x1378] sm:$0xff] }
 0x8e0   :  { %10369 = vmatpush1.bf16.msra.mxu1 %v16097_v47  ;;  %v3671_v13 = vld [vmem:[#allocation6 + $0x1758] sm:$0xff]  ;;  %v16058_v21 = vcombine.high %v3543_v12, %v3547_v38  ;;  %v16057_v4 = vcombine.low %v3543_v12, %v3547_v38 }
 0x8e1   :  { %10370 = vmatprep.subr.bf16.mxu1 %v16090_v49  ;;  %v3675_v22 = vld [vmem:[#allocation6 + $0x1778] sm:$0xff] }
 0x8e2   :  { %10330 = vmatpush1.bf16.msra.mxu0 %v15961_v54  ;;  %v16186_v3 = vcombine.high %v3671_v13, %v3675_v22  ;;  %v3535_v43 = vld [vmem:[#allocation6 + $0x1318] sm:$0xff]  ;;  %v16185_v48 = vcombine.low %v3671_v13, %v3675_v22 }
 0x8e3   :  { %10331 = vmatprep.subr.bf16.mxu0 %v15954_v36  ;;  %v3539_v45 = vld [vmem:[#allocation6 + $0x1338] sm:$0xff] }
 0x8e4   :  { %10371 = vmatpush1.bf16.msra.mxu1 %v16089_v55  ;;  %v3663_v28 = vld [vmem:[#allocation6 + $0x1718] sm:$0xff]  ;;  %v16050_v33 = vcombine.high %v3535_v43, %v3539_v45  ;;  %v16049_v15 = vcombine.low %v3535_v43, %v3539_v45 }
 0x8e5   :  { %10372 = vmatprep.subr.bf16.mxu1 %v16082_v2  ;;  %v3667_v30 = vld [vmem:[#allocation6 + $0x1738] sm:$0xff] }
 0x8e6   :  { %10332 = vmatpush1.bf16.msra.mxu0 %v15953_v56  ;;  %v16178_v0 = vcombine.high %v3663_v28, %v3667_v30  ;;  %v3527_v46 = vld [vmem:[#allocation6 + $0x12d8] sm:$0xff]  ;;  %v16177_v61 = vcombine.low %v3663_v28, %v3667_v30 }
 0x8e7   :  { %10333 = vmatprep.subr.bf16.mxu0 %v16074_v25  ;;  %v3531_v47 = vld [vmem:[#allocation6 + $0x12f8] sm:$0xff] }
 0x8e8   :  { %10373 = vmatpush1.bf16.msra.mxu1 %v16081_v63  ;;  %v3655_v24 = vld [vmem:[#allocation6 + $0x16d8] sm:$0xff]  ;;  %v16042_v53 = vcombine.high %v3527_v46, %v3531_v47  ;;  %v16041_v16 = vcombine.low %v3527_v46, %v3531_v47 }
 0x8e9   :  { %10374 = vmatprep.subr.bf16.mxu1 %v16202_v1  ;;  %v3659_v49 = vld [vmem:[#allocation6 + $0x16f8] sm:$0xff] }
 0x8ea   :  { %10334 = vmatpush2.bf16.msra.mxu0 %v16073_v6  ;;  %v16170_v35 = vcombine.high %v3655_v24, %v3659_v49  ;;  %v3519_v54 = vld [vmem:[#allocation6 + $0x1298] sm:$0xff]  ;;  %v16169_v59 = vcombine.low %v3655_v24, %v3659_v49 }
 0x8eb   :  { %10335 = vmatprep.subr.bf16.mxu0 %v16066_v10  ;;  %v3523_v55 = vld [vmem:[#allocation6 + $0x12b8] sm:$0xff] }
 0x8ec   :  { %10375 = vmatpush2.bf16.msra.mxu1 %v16201_v37  ;;  %v3647_v36 = vld [vmem:[#allocation6 + $0x1698] sm:$0xff]  ;;  %v16034_v23 = vcombine.high %v3519_v54, %v3523_v55  ;;  %v16033_v41 = vcombine.low %v3519_v54, %v3523_v55 }
 0x8ed   :  { %10376 = vmatprep.subr.bf16.mxu1 %v16194_v19  ;;  %v3651_v2 = vld [vmem:[#allocation6 + $0x16b8] sm:$0xff] }
 0x8ee   :  { %10336 = vmatpush2.bf16.msra.mxu0 %v16065_v42  ;;  %v16162_v5 = vcombine.high %v3647_v36, %v3651_v2  ;;  %v3511_v56 = vld [vmem:[#allocation6 + $0x1258] sm:$0xff]  ;;  %v16161_v58 = vcombine.low %v3647_v36, %v3651_v2 }
 0x8ef   :  { %10337 = vmatprep.subr.bf16.mxu0 %v16058_v21  ;;  %v3515_v63 = vld [vmem:[#allocation6 + $0x1278] sm:$0xff] }
 0x8f0   :  { %10377 = vmatpush2.bf16.msra.mxu1 %v16193_v18  ;;  %v3639_v25 = vld [vmem:[#allocation6 + $0x1658] sm:$0xff]  ;;  %v16026_v62 = vcombine.high %v3511_v56, %v3515_v63  ;;  %v16025_v12 = vcombine.low %v3511_v56, %v3515_v63 }
 0x8f1   :  { %10378 = vmatprep.subr.bf16.mxu1 %v16186_v3  ;;  %v3643_v1 = vld [vmem:[#allocation6 + $0x1678] sm:$0xff] }
 0x8f2   :  { %10338 = vmatpush2.bf16.msra.mxu0 %v16057_v4  ;;  %v16154_v51 = vcombine.high %v3639_v25, %v3643_v1  ;;  %v3503_v6 = vld [vmem:[#allocation6 + $0x1218] sm:$0xff]  ;;  %v16153_v38 = vcombine.low %v3639_v25, %v3643_v1 }
 0x8f3   :  { %10339 = vmatprep.subr.bf16.mxu0 %v16050_v33  ;;  %v3507_v37 = vld [vmem:[#allocation6 + $0x1238] sm:$0xff] }
 0x8f4   :  { %10379 = vmatpush2.bf16.msra.mxu1 %v16185_v48  ;;  %v3631_v10 = vld [vmem:[#allocation6 + $0x1618] sm:$0xff]  ;;  %v16018_v13 = vcombine.high %v3503_v6, %v3507_v37  ;;  %v16017_v43 = vcombine.low %v3503_v6, %v3507_v37 }
 0x8f5   :  { %10380 = vmatprep.subr.bf16.mxu1 %v16178_v0  ;;  %v3635_v19 = vld [vmem:[#allocation6 + $0x1638] sm:$0xff] }
 0x8f6   :  { %10340 = vmatpush2.bf16.msra.mxu0 %v16049_v15  ;;  %v16146_v22 = vcombine.high %v3631_v10, %v3635_v19  ;;  %v3751_v42 = vld [vmem:[#allocation6 + $0x19d8] sm:$0xff]  ;;  %v16145_v45 = vcombine.low %v3631_v10, %v3635_v19 }
 0x8f7   :  { %10341 = vmatprep.subr.bf16.mxu0 %v16042_v53  ;;  %v3755_v18 = vld [vmem:[#allocation6 + $0x19f8] sm:$0xff] }
 0x8f8   :  { %10381 = vmatpush2.bf16.msra.mxu1 %v16177_v61  ;;  %v3879_v21 = vld [vmem:[#allocation6 + $0x1dd8] sm:$0xff]  ;;  %v16266_v28 = vcombine.high %v3751_v42, %v3755_v18  ;;  %v16265_v46 = vcombine.low %v3751_v42, %v3755_v18 }
 0x8f9   :  { %10382 = vmatprep.subr.bf16.mxu1 %v16170_v35  ;;  %v3883_v3 = vld [vmem:[#allocation6 + $0x1df8] sm:$0xff] }
 0x8fa   :  { %10342 = vmatpush2.bf16.msra.mxu0 %v16041_v16  ;;  %v16394_v30 = vcombine.high %v3879_v21, %v3883_v3  ;;  %v3743_v4 = vld [vmem:[#allocation6 + $0x1998] sm:$0xff]  ;;  %v16393_v47 = vcombine.low %v3879_v21, %v3883_v3 }
 0x8fb   :  { %10343 = vmatprep.subr.bf16.mxu0 %v16034_v23  ;;  %v3747_v48 = vld [vmem:[#allocation6 + $0x19b8] sm:$0xff] }
 0x8fc   :  { %10383 = vmatpush2.bf16.msra.mxu1 %v16169_v59  ;;  %v3871_v33 = vld [vmem:[#allocation6 + $0x1d98] sm:$0xff]  ;;  %v16258_v24 = vcombine.high %v3743_v4, %v3747_v48  ;;  %v16257_v2 = vcombine.low %v3743_v4, %v3747_v48 }
 0x8fd   :  { %10384 = vmatprep.subr.bf16.mxu1 %v16162_v5  ;;  %v3875_v0 = vld [vmem:[#allocation6 + $0x1db8] sm:$0xff] }
 0x8fe   :  { %10344 = vmatpush2.bf16.msra.mxu0 %v16033_v41  ;;  %v16386_v49 = vcombine.high %v3871_v33, %v3875_v0  ;;  %v3735_v15 = vld [vmem:[#allocation6 + $0x1958] sm:$0xff]  ;;  %v16385_v59 = vcombine.low %v3871_v33, %v3875_v0 }
 0x8ff   :  { %10345 = vmatprep.subr.bf16.mxu0 %v16026_v62  ;;  %v3739_v61 = vld [vmem:[#allocation6 + $0x1978] sm:$0xff] }
 0x900   :  { %10385 = vmatpush2.bf16.msra.mxu1 %v16161_v58  ;;  %v3863_v35 = vld [vmem:[#allocation6 + $0x1d58] sm:$0xff]  ;;  %v16250_v23 = vcombine.high %v3735_v15, %v3739_v61  ;;  %v16249_v6 = vcombine.low %v3735_v15, %v3739_v61 }
 0x901   :  { %10386 = vmatprep.subr.bf16.mxu1 %v16154_v51  ;;  %v3867_v54 = vld [vmem:[#allocation6 + $0x1d78] sm:$0xff] }
 0x902   :  { %10346 = vmatpush2.bf16.msra.mxu0 %v16025_v12  ;;  %v3727_v25 = vld [vmem:[#allocation6 + $0x1918] sm:$0xff]  ;;  %v16377_v37 = vcombine.low %v3863_v35, %v3867_v54 }
 0x903   :  { %10347 = vmatprep.subr.bf16.mxu0 %v16018_v13  ;;  %v3731_v1 = vld [vmem:[#allocation6 + $0x1938] sm:$0xff] }
 0x904   :  { %10387 = vmatpush2.bf16.msra.mxu1 %v16153_v38  ;;  %v3855_v41 = vld [vmem:[#allocation6 + $0x1d18] sm:$0xff]  ;;  %v16242_v10 = vcombine.high %v3727_v25, %v3731_v1  ;;  %v16241_v21 = vcombine.low %v3727_v25, %v3731_v1 }
 0x905   :  { %10388 = vmatprep.subr.bf16.mxu1 %v16146_v22  ;;  %v3719_v13 = vld [vmem:[#allocation6 + $0x18d8] sm:$0xff] }
 0x906   :  { %10348 = vmatpush2.bf16.msra.mxu0 %v16017_v43  ;;  %v3847_v22 = vld [vmem:[#allocation6 + $0x1cd8] sm:$0xff] }
 0x907   :  { %10399 = vmatprep.subr.bf16.mxu0 %v16266_v28  ;;  %v3851_v42 = vld [vmem:[#allocation6 + $0x1cf8] sm:$0xff] }
 0x908   :  { %10389 = vmatpush2.bf16.msra.mxu1 %v16145_v45  ;;  %v16362_v45 = vcombine.high %v3847_v22, %v3851_v42  ;;  %v3711_v28 = vld [vmem:[#allocation6 + $0x1898] sm:$0xff]  ;;  %v16361_v0 = vcombine.low %v3847_v22, %v3851_v42 }
 0x909   :  { %10440 = vmatprep.subr.bf16.mxu1 %v16394_v30  ;;  %v10105_v53 = vpop.f32.mrf.mxu0  ;;  %10350 = vmatmul.mubr.bf16.vlgmr.msra.gmra.mxu0 %v19080_v27  ;;  %v16378_v27 = vcombine.high %v3863_v35, %v3867_v54  ;;  %v3715_v30 = vld [vmem:[#allocation6 + $0x18b8] sm:$0xff] }
 0x90a   :  { %v10106_v55 = vadd.f32 %v10105_v53, %v19219_v9  ;;  %10400 = vmatpush1.bf16.msra.mxu0 %v16265_v46  ;;  %10431 = vmatprep.mubr.bf16.mxu0 %v19088_v39  ;;  %v3839_v4 = vld [vmem:[#allocation6 + $0x1c98] sm:$0xff]  ;;  %v16226_v46 = vcombine.high %v3711_v28, %v3715_v30  ;;  %v16225_v53 = vcombine.low %v3711_v28, %v3715_v30 }
 0x90b   :  { %v10146_v36 = vpop.f32.mrf.mxu1  ;;  %10391 = vmatmul.mubr.bf16.vlgmr.msra.gmra.mxu1 %v19084_v31  ;;  %v10107_v16 = vpop.f32.mrf.mxu0  ;;  %10401 = vmatprep.subr.bf16.mxu0 %v16258_v24  ;;  %v3859_v31 = vld [vmem:[#allocation6 + $0x1d38] sm:$0xff] }
 0x90c   :  { %10441 = vmatpush1.bf16.msra.mxu1 %v16393_v47  ;;  %v10147_v5 = vadd.f32 %v10146_v36, %v10106_v55  ;;  %v10108_v56 = vadd.f32 %v10107_v16, %v19224_v40  ;;  %10472 = vmatprep.mubr.bf16.mxu1 %v19093_v14  ;;  %v16370_v38 = vcombine.high %v3855_v41, %v3859_v31  ;;  %v3723_v14 = vld [vmem:[#allocation6 + $0x18f8] sm:$0xff] }
 0x90d   :  { %v10148_v63 = vpop.f32.mrf.mxu1  ;;  %10442 = vmatprep.subr.bf16.mxu1 %v16386_v49  ;;  %v10109_v9 = vpop.f32.mrf.mxu0  ;;  %v16369_v3 = vcombine.low %v3855_v41, %v3859_v31  ;;  %v16234_v43 = vcombine.high %v3719_v13, %v3723_v14  ;;  %v3843_v48 = vld [vmem:[#allocation6 + $0x1cb8] sm:$0xff]  ;;  %v16233_v33 = vcombine.low %v3719_v13, %v3723_v14 }
 0x90e   :  { %vm10485_vm13 = vcmp.ge.f32.partialorder %v10147_v5, 0.0  ;;  %v10493_v58 = vmul.f32 0.2, %v10147_v5  ;;  %v10149_v62 = vadd.f32 %v10148_v63, %v10108_v56  ;;  %10402 = vmatpush1.bf16.msra.mxu0 %v16257_v2  ;;  %v16354_v47 = vcombine.high %v3839_v4, %v3843_v48  ;;  %v3703_v24 = vld [vmem:[#allocation6 + $0x1858] sm:$0xff] }
 0x90f   :  { %v10150_v51 = vpop.f32.mrf.mxu1  ;;  %v10110_v40 = vpop.f32.mrf.mxu0  ;;  %10403 = vmatprep.subr.bf16.mxu0 %v16250_v23  ;;  %v3707_v49 = vld [vmem:[#allocation6 + $0x1878] sm:$0xff]  ;;  %v16353_v35 = vcombine.low %v3839_v4, %v3843_v48 }
 0x910   :  { %10443 = vmatpush1.bf16.msra.mxu1 %v16385_v59  ;;  %v19232_v19 = vsel %vm10485_vm13, %v10147_v5, %v10493_v58  ;;  %vm10486_vm14 = vcmp.ge.f32.partialorder %v10149_v62, 0.0  ;;  %v10494_v39 = vmul.f32 0.2, %v10149_v62  ;;  %v3831_v15 = vld [vmem:[#allocation6 + $0x1c58] sm:$0xff]  ;;  %v16218_v54 = vcombine.high %v3703_v24, %v3707_v49 }
 0x911   :  { %v10151_v12 = vpop.f32.mrf.mxu1  ;;  %10444 = vmatprep.subr.bf16.mxu1 %v16378_v27  ;;  %v3835_v61 = vld [vmem:[#allocation6 + $0x1c78] sm:$0xff]  ;;  %v16217_v23 = vcombine.low %v3703_v24, %v3707_v49 }
 0x912   :  { %v19234_v18 = vsel %vm10486_vm14, %v10149_v62, %v10494_v39  ;;  %10404 = vmatpush1.bf16.msra.mxu0 %v16249_v6  ;;  %v16346_v55 = vcombine.high %v3831_v15, %v3835_v61  ;;  %v3695_v36 = vld [vmem:[#allocation6 + $0x1818] sm:$0xff]  ;;  %v16345_v5 = vcombine.low %v3831_v15, %v3835_v61 }
 0x913   :  { %10405 = vmatprep.subr.bf16.mxu0 %v16242_v10  ;;  %v3699_v2 = vld [vmem:[#allocation6 + $0x1838] sm:$0xff] }
 0x914   :  { %10445 = vmatpush1.bf16.msra.mxu1 %v16377_v37  ;;  %v3823_v16 = vld [vmem:[#allocation6 + $0x1c18] sm:$0xff]  ;;  %v16210_v56 = vcombine.high %v3695_v36, %v3699_v2  ;;  %v16209_v41 = vcombine.low %v3695_v36, %v3699_v2 }
 0x915   :  { %10446 = vmatprep.subr.bf16.mxu1 %v16370_v38  ;;  %v3827_v59 = vld [vmem:[#allocation6 + $0x1c38] sm:$0xff] }
 0x916   :  { %10406 = vmatpush1.bf16.msra.mxu0 %v16241_v21  ;;  %v16338_v63 = vcombine.high %v3823_v16, %v3827_v59  ;;  %v3815_v27 = vld [vmem:[#allocation6 + $0x1bd8] sm:$0xff]  ;;  %v16337_v31 = vcombine.low %v3823_v16, %v3827_v59 }
 0x917   :  { %10407 = vmatprep.subr.bf16.mxu0 %v16234_v43  ;;  %v3819_v25 = vld [vmem:[#allocation6 + $0x1bf8] sm:$0xff] }
 0x918   :  { %10447 = vmatpush1.bf16.msra.mxu1 %v16369_v3  ;;  %v3943_v1 = vld [vmem:[#allocation6 + $0x1fd8] sm:$0xff]  ;;  %v16330_v58 = vcombine.high %v3815_v27, %v3819_v25  ;;  %v16329_v10 = vcombine.low %v3815_v27, %v3819_v25 }
 0x919   :  { %10448 = vmatprep.subr.bf16.mxu1 %v16362_v45  ;;  %v3947_v9 = vld [vmem:[#allocation6 + $0x1ff8] sm:$0xff] }
 0x91a   :  { %10408 = vmatpush1.bf16.msra.mxu0 %v16233_v33  ;;  %v16458_v62 = vcombine.high %v3943_v1, %v3947_v9  ;;  %v3807_v51 = vld [vmem:[#allocation6 + $0x1b98] sm:$0xff]  ;;  %v16457_v39 = vcombine.low %v3943_v1, %v3947_v9 }
 0x91b   :  { %10409 = vmatprep.subr.bf16.mxu0 %v16226_v46  ;;  %v3811_v6 = vld [vmem:[#allocation6 + $0x1bb8] sm:$0xff] }
 0x91c   :  { %10449 = vmatpush1.bf16.msra.mxu1 %v16361_v0  ;;  %v3935_v40 = vld [vmem:[#allocation6 + $0x1f98] sm:$0xff]  ;;  %v16322_v12 = vcombine.high %v3807_v51, %v3811_v6  ;;  %v16321_v21 = vcombine.low %v3807_v51, %v3811_v6 }
 0x91d   :  { %10450 = vmatprep.subr.bf16.mxu1 %v16354_v47  ;;  %v3939_v37 = vld [vmem:[#allocation6 + $0x1fb8] sm:$0xff] }
 0x91e   :  { %10410 = vmatpush1.bf16.msra.mxu0 %v16225_v53  ;;  %v16450_v38 = vcombine.high %v3935_v40, %v3939_v37  ;;  %v3799_v13 = vld [vmem:[#allocation6 + $0x1b58] sm:$0xff]  ;;  %v16449_v3 = vcombine.low %v3935_v40, %v3939_v37 }
 0x91f   :  { %10411 = vmatprep.subr.bf16.mxu0 %v16218_v54  ;;  %v3803_v14 = vld [vmem:[#allocation6 + $0x1b78] sm:$0xff] }
 0x920   :  { %10451 = vmatpush1.bf16.msra.mxu1 %v16353_v35  ;;  %v3927_v22 = vld [vmem:[#allocation6 + $0x1f58] sm:$0xff]  ;;  %v16314_v43 = vcombine.high %v3799_v13, %v3803_v14  ;;  %v16313_v33 = vcombine.low %v3799_v13, %v3803_v14  ;;  %v3979_v14 = vsub.s32 6, %v18980_v29 }
 0x921   :  { %10452 = vmatprep.subr.bf16.mxu1 %v16346_v55  ;;  %v3931_v42 = vld [vmem:[#allocation6 + $0x1f78] sm:$0xff] }
 0x922   :  { %10412 = vmatpush1.bf16.msra.mxu0 %v16217_v23  ;;  %v16442_v45 = vcombine.high %v3927_v22, %v3931_v42  ;;  %v3791_v28 = vld [vmem:[#allocation6 + $0x1b18] sm:$0xff]  ;;  %v16441_v0 = vcombine.low %v3927_v22, %v3931_v42  ;;  %v3983_v42 = vsub.s32 7, %v18980_v29 }
 0x923   :  { %10413 = vmatprep.subr.bf16.mxu0 %v16210_v56  ;;  %v3795_v30 = vld [vmem:[#allocation6 + $0x1b38] sm:$0xff] }
 0x924   :  { %10453 = vmatpush1.bf16.msra.mxu1 %v16345_v5  ;;  %v3919_v4 = vld [vmem:[#allocation6 + $0x1f18] sm:$0xff]  ;;  %v16306_v46 = vcombine.high %v3791_v28, %v3795_v30  ;;  %v16305_v53 = vcombine.low %v3791_v28, %v3795_v30 }
 0x925   :  { %10454 = vmatprep.subr.bf16.mxu1 %v16338_v63  ;;  %v3923_v48 = vld [vmem:[#allocation6 + $0x1f38] sm:$0xff] }
 0x926   :  { %10414 = vmatpush1.bf16.msra.mxu0 %v16209_v41  ;;  %v16434_v47 = vcombine.high %v3919_v4, %v3923_v48  ;;  %v3783_v24 = vld [vmem:[#allocation6 + $0x1ad8] sm:$0xff]  ;;  %v16433_v35 = vcombine.low %v3919_v4, %v3923_v48 }
 0x927   :  { %10415 = vmatprep.subr.bf16.mxu0 %v16330_v58  ;;  %v3787_v49 = vld [vmem:[#allocation6 + $0x1af8] sm:$0xff] }
 0x928   :  { %10455 = vmatpush1.bf16.msra.mxu1 %v16337_v31  ;;  %v3911_v15 = vld [vmem:[#allocation6 + $0x1ed8] sm:$0xff]  ;;  %v16298_v54 = vcombine.high %v3783_v24, %v3787_v49  ;;  %v16297_v23 = vcombine.low %v3783_v24, %v3787_v49 }
 0x929   :  { %10456 = vmatprep.subr.bf16.mxu1 %v16458_v62  ;;  %v3915_v61 = vld [vmem:[#allocation6 + $0x1ef8] sm:$0xff] }
 0x92a   :  { %10416 = vmatpush2.bf16.msra.mxu0 %v16329_v10  ;;  %v16426_v55 = vcombine.high %v3911_v15, %v3915_v61  ;;  %v3775_v36 = vld [vmem:[#allocation6 + $0x1a98] sm:$0xff]  ;;  %v16425_v5 = vcombine.low %v3911_v15, %v3915_v61 }
 0x92b   :  { %10417 = vmatprep.subr.bf16.mxu0 %v16322_v12  ;;  %v3779_v2 = vld [vmem:[#allocation6 + $0x1ab8] sm:$0xff] }
 0x92c   :  { %10457 = vmatpush2.bf16.msra.mxu1 %v16457_v39  ;;  %v3903_v16 = vld [vmem:[#allocation6 + $0x1e98] sm:$0xff]  ;;  %v16290_v56 = vcombine.high %v3775_v36, %v3779_v2  ;;  %v16289_v41 = vcombine.low %v3775_v36, %v3779_v2 }
 0x92d   :  { %10458 = vmatprep.subr.bf16.mxu1 %v16450_v38  ;;  %v3907_v59 = vld [vmem:[#allocation6 + $0x1eb8] sm:$0xff] }
 0x92e   :  { %10418 = vmatpush2.bf16.msra.mxu0 %v16321_v21  ;;  %v16418_v63 = vcombine.high %v3903_v16, %v3907_v59  ;;  %v3767_v27 = vld [vmem:[#allocation6 + $0x1a58] sm:$0xff]  ;;  %v16417_v31 = vcombine.low %v3903_v16, %v3907_v59  ;;  %v3980_v21 = vrot.slane %v19098_v26, %v3979_v14 }
 0x92f   :  { %10419 = vmatprep.subr.bf16.mxu0 %v16314_v43  ;;  %v3771_v25 = vld [vmem:[#allocation6 + $0x1a78] sm:$0xff] }
 0x930   :  { %10459 = vmatpush2.bf16.msra.mxu1 %v16449_v3  ;;  %v3895_v1 = vld [vmem:[#allocation6 + $0x1e58] sm:$0xff]  ;;  %v16282_v58 = vcombine.high %v3767_v27, %v3771_v25  ;;  %v16281_v10 = vcombine.low %v3767_v27, %v3771_v25  ;;  %v3984_v3 = vrot.slane %v19098_v26, %v3983_v42 }
 0x931   :  { %10460 = vmatprep.subr.bf16.mxu1 %v16442_v45  ;;  %v3899_v9 = vld [vmem:[#allocation6 + $0x1e78] sm:$0xff] }
 0x932   :  { %10420 = vmatpush2.bf16.msra.mxu0 %v16313_v33  ;;  %v16410_v62 = vcombine.high %v3895_v1, %v3899_v9  ;;  %v3759_v51 = vld [vmem:[#allocation6 + $0x1a18] sm:$0xff]  ;;  %v16409_v39 = vcombine.low %v3895_v1, %v3899_v9 }
 0x933   :  { %10421 = vmatprep.subr.bf16.mxu0 %v16306_v46  ;;  %v3763_v6 = vld [vmem:[#allocation6 + $0x1a38] sm:$0xff] }
 0x934   :  { %10461 = vmatpush2.bf16.msra.mxu1 %v16441_v0  ;;  %v3887_v40 = vld [vmem:[#allocation6 + $0x1e18] sm:$0xff]  ;;  %v16274_v12 = vcombine.high %v3759_v51, %v3763_v6  ;;  %v16273_v13 = vcombine.low %v3759_v51, %v3763_v6 }
 0x935   :  { %10462 = vmatprep.subr.bf16.mxu1 %v16434_v47  ;;  %v3891_v37 = vld [vmem:[#allocation6 + $0x1e38] sm:$0xff] }
 0x936   :  { %10422 = vmatpush2.bf16.msra.mxu0 %v16305_v53  ;;  %v16402_v38 = vcombine.high %v3887_v40, %v3891_v37  ;;  %v16401_v22 = vcombine.low %v3887_v40, %v3891_v37 }
 0x937   :  { %10423 = vmatprep.subr.bf16.mxu0 %v16298_v54 }
 0x938   :  { %10463 = vmatpush2.bf16.msra.mxu1 %v16433_v35 }
 0x939   :  { %10464 = vmatprep.subr.bf16.mxu1 %v16426_v55 }
 0x93a   :  { %10424 = vmatpush2.bf16.msra.mxu0 %v16297_v23 }
 0x93b   :  { %10425 = vmatprep.subr.bf16.mxu0 %v16290_v56 }
 0x93c   :  { %10465 = vmatpush2.bf16.msra.mxu1 %v16425_v5 }
 0x93d   :  { %10466 = vmatprep.subr.bf16.mxu1 %v16418_v63 }
 0x93e   :  { %10426 = vmatpush2.bf16.msra.mxu0 %v16289_v41 }
 0x93f   :  { %10427 = vmatprep.subr.bf16.mxu0 %v16282_v58 }
 0x940   :  { %10467 = vmatpush2.bf16.msra.mxu1 %v16417_v31 }
 0x941   :  { %10468 = vmatprep.subr.bf16.mxu1 %v16410_v62 }
 0x942   :  { %10428 = vmatpush2.bf16.msra.mxu0 %v16281_v10 }
 0x943   :  { %10429 = vmatprep.subr.bf16.mxu0 %v16274_v12 }
 0x944   :  { %10469 = vmatpush2.bf16.msra.mxu1 %v16409_v39 }
 0x945   :  { %10470 = vmatprep.subr.bf16.mxu1 %v16402_v38 }
 0x946   :  { %10430 = vmatpush2.bf16.msra.mxu0 %v16273_v13 }
 0x948   :  { %10471 = vmatpush2.bf16.msra.mxu1 %v16401_v22 }
 0x949   :  { %v10187_v43 = vpop.f32.mrf.mxu0  ;;  %10432 = vmatmul.mubr.bf16.vlgmr.msra.gmra.mxu0 %v19102_v20 }
 0x94a   :  { %v10188_v45 = vadd.f32 %v10187_v43, %v3980_v21 }
 0x94b   :  { %v10228_v28 = vpop.f32.mrf.mxu1  ;;  %10473 = vmatmul.mubr.bf16.vlgmr.msra.gmra.mxu1 %v19108_v44  ;;  %v10189_v30 = vpop.f32.mrf.mxu0 }
 0x94c   :  { %v10229_v4 = vadd.f32 %v10228_v28, %v10188_v45  ;;  %v10190_v48 = vadd.f32 %v10189_v30, %v3984_v3 }
 0x94d   :  { %v10230_v33 = vpop.f32.mrf.mxu1  ;;  %v10191_v0 = vpop.f32.mrf.mxu0 }
 0x94e   :  { %v10231_v46 = vadd.f32 %v10230_v33, %v10190_v48 }
 0x94f   :  { %v10232_v47 = vpop.f32.mrf.mxu1  ;;  %v10192_v24 = vpop.f32.mrf.mxu0 }
 0x951   :  { %v10233_v49 = vpop.f32.mrf.mxu1 }
 0x989   :  { %v10269_v15 = vpop.f32.mrf.mxu0 }
 0x98a   :  { %v10270_v61 = vadd.f32 %v10269_v15, %v10229_v4 }
 0x98b   :  { %v10310_v53 = vpop.f32.mrf.mxu1  ;;  %v10271_v26 = vpop.f32.mrf.mxu0 }
 0x98c   :  { %v10311_v35 = vadd.f32 %v10310_v53, %v10270_v61  ;;  %v10272_v54 = vadd.f32 %v10271_v26, %v10231_v46 }
 0x98d   :  { %v10312_v20 = vpop.f32.mrf.mxu1  ;;  %v10273_v55 = vpop.f32.mrf.mxu0 }
 0x98e   :  { %v10313_v36 = vadd.f32 %v10312_v20, %v10272_v54 }
 0x98f   :  { %v10314_v2 = vpop.f32.mrf.mxu1  ;;  %v10274_v44 = vpop.f32.mrf.mxu0 }
 0x991   :  { %v10315_v16 = vpop.f32.mrf.mxu1 }
 0x9c9   :  { %v10351_v59 = vpop.f32.mrf.mxu0 }
 0x9ca   :  { %v10352_v9 = vadd.f32 %v10351_v59, %v10311_v35 }
 0x9cb   :  { %v10392_v23 = vpop.f32.mrf.mxu1  ;;  %v10353_v5 = vpop.f32.mrf.mxu0 }
 0x9cc   :  { %v10354_v41 = vadd.f32 %v10353_v5, %v10313_v36  ;;  %v10393_v31 = vadd.f32 %v10392_v23, %v10352_v9 }
 0x9cd   :  { %v10394_v56 = vpop.f32.mrf.mxu1  ;;  %v10355_v63 = vpop.f32.mrf.mxu0 }
 0x9ce   :  { %v10395_v62 = vadd.f32 %v10394_v56, %v10354_v41 }
 0x9cf   :  { %v10396_v27 = vpop.f32.mrf.mxu1  ;;  %v10356_v25 = vpop.f32.mrf.mxu0 }
 0x9d1   :  { %v10397_v1 = vpop.f32.mrf.mxu1 }
 0xa09   :  { %v10433_v58 = vpop.f32.mrf.mxu0 }
 0xa0a   :  { %v10434_v51 = vadd.f32 %v10433_v58, %v10393_v31 }
 0xa0b   :  { %v10474_v6 = vpop.f32.mrf.mxu1  ;;  %v10435_v40 = vpop.f32.mrf.mxu0 }
 0xa0c   :  { %v10475_v37 = vadd.f32 %v10474_v6, %v10434_v51  ;;  %v10436_v10 = vadd.f32 %v10435_v40, %v10395_v62 }
 0xa0d   :  { %v10476_v39 = vpop.f32.mrf.mxu1  ;;  %v10437_v12 = vpop.f32.mrf.mxu0 }
 0xa0e   :  { %vm10487_vm15 = vcmp.ge.f32.partialorder %v10475_v37, 0.0  ;;  %v10495_v38 = vmul.f32 0.2, %v10475_v37  ;;  %v10477_v13 = vadd.f32 %v10476_v39, %v10436_v10 }
 0xa0f   :  { %v10478_v22 = vpop.f32.mrf.mxu1  ;;  %v10438_v42 = vpop.f32.mrf.mxu0 }
 0xa10   :  { %v19244_v21 = vsel %vm10487_vm15, %v10475_v37, %v10495_v38  ;;  %vm10488_vm0 = vcmp.ge.f32.partialorder %v10477_v13, 0.0  ;;  %v10496_v3 = vmul.f32 0.2, %v10477_v13 }
 0xa11   :  { %v10479_v43 = vpop.f32.mrf.mxu1 }
 0xa12   :  { %v19246_v45 = vsel %vm10488_vm0, %v10477_v13, %v10496_v3 }
 0xa13   :  { %18778 = dma.done.wait [#allocation13 + $0x5], 32768 }
 0xa14   :  { %18779 = vsyncadd [#allocation13 + $0x5], 4294934528  ;;  %v19250_v28 = vpack.c.bf16 %v19148_v17, %v19148_v17  ;;  %v19254_v30 = vpack.c.bf16 %v19190_v11, %v19190_v11  ;;  %v17620_v4 = vld [vmem:[#allocation7 + $0xe4] ss:$16 sps:$4 sm:$0xff]   ;;  %v17624_v33 = vld [vmem:[#allocation7 + $0xe0] ss:$16 sps:$4 sm:$0xff]  }
 0xa15   :  { %v17622_v48 = vld [vmem:[#allocation7 + $0x2e4] ss:$16 sps:$4 sm:$0xff]   ;;  %12074 = vmatprep.subr.bf16.mxu0 %v17620_v4  ;;  %v17625_v0 = vld [vmem:[#allocation7 + $0x2e0] ss:$16 sps:$4 sm:$0xff]  }
 0xa16   :  { %12106 = vmatprep.mubr.bf16.mxu0 %v19250_v28  ;;  %12147 = vmatprep.mubr.bf16.mxu1 %v19254_v30  ;;  %v17626_v46 = vld [vmem:[#allocation7 + $0xc4] ss:$16 sps:$4 sm:$0xff]   ;;  %v17630_v17 = vld [vmem:[#allocation7 + $0xc0] ss:$16 sps:$4 sm:$0xff]  }
 0xa17   :  { %12115 = vmatprep.subr.bf16.mxu1 %v17622_v48  ;;  %12075 = vmatpush1.bf16.msra.mxu0 %v17624_v33  ;;  %v17628_v47 = vld [vmem:[#allocation7 + $0x2c4] ss:$16 sps:$4 sm:$0xff]   ;;  %v17631_v24 = vld [vmem:[#allocation7 + $0x2c0] ss:$16 sps:$4 sm:$0xff]  }
 0xa18   :  { %12116 = vmatpush1.bf16.msra.mxu1 %v17625_v0  ;;  %12076 = vmatprep.subr.bf16.mxu0 %v17626_v46  ;;  %v17632_v11 = vld [vmem:[#allocation7 + $0xa4] ss:$16 sps:$4 sm:$0xff]   ;;  %v17636_v15 = vld [vmem:[#allocation7 + $0xa0] ss:$16 sps:$4 sm:$0xff]  }
 0xa19   :  { %12117 = vmatprep.subr.bf16.mxu1 %v17628_v47  ;;  %v17634_v49 = vld [vmem:[#allocation7 + $0x2a4] ss:$16 sps:$4 sm:$0xff]   ;;  %v17637_v61 = vld [vmem:[#allocation7 + $0x2a0] ss:$16 sps:$4 sm:$0xff]  }
 0xa1a   :  { %v17638_v53 = vld [vmem:[#allocation7 + $0x84] ss:$16 sps:$4 sm:$0xff]   ;;  %v17642_v35 = vld [vmem:[#allocation7 + $0x80] ss:$16 sps:$4 sm:$0xff]  }
 0xa1b   :  { %12077 = vmatpush1.bf16.msra.mxu0 %v17630_v17  ;;  %v17640_v26 = vld [vmem:[#allocation7 + $0x284] ss:$16 sps:$4 sm:$0xff]   ;;  %v17643_v54 = vld [vmem:[#allocation7 + $0x280] ss:$16 sps:$4 sm:$0xff]  }
 0xa1c   :  { %12118 = vmatpush1.bf16.msra.mxu1 %v17631_v24  ;;  %12078 = vmatprep.subr.bf16.mxu0 %v17632_v11  ;;  %v17644_v20 = vld [vmem:[#allocation7 + $0x64] ss:$16 sps:$4 sm:$0xff]   ;;  %v17648_v36 = vld [vmem:[#allocation7 + $0x60] ss:$16 sps:$4 sm:$0xff]  }
 0xa1d   :  { %12119 = vmatprep.subr.bf16.mxu1 %v17634_v49  ;;  %v17646_v55 = vld [vmem:[#allocation7 + $0x264] ss:$16 sps:$4 sm:$0xff]   ;;  %v17649_v2 = vld [vmem:[#allocation7 + $0x260] ss:$16 sps:$4 sm:$0xff]  }
 0xa1e   :  { %v17650_v44 = vld [vmem:[#allocation7 + $0x44] ss:$16 sps:$4 sm:$0xff]   ;;  %v17654_v59 = vld [vmem:[#allocation7 + $0x40] ss:$16 sps:$4 sm:$0xff]  }
 0xa1f   :  { %12079 = vmatpush1.bf16.msra.mxu0 %v17636_v15  ;;  %v17652_v16 = vld [vmem:[#allocation7 + $0x244] ss:$16 sps:$4 sm:$0xff]   ;;  %v17655_v23 = vld [vmem:[#allocation7 + $0x240] ss:$16 sps:$4 sm:$0xff]  }
 0xa20   :  { %12120 = vmatpush1.bf16.msra.mxu1 %v17637_v61  ;;  %12080 = vmatprep.subr.bf16.mxu0 %v17638_v53  ;;  %v17656_v5 = vld [vmem:[#allocation7 + $0x24] ss:$16 sps:$4 sm:$0xff]   ;;  %v17660_v63 = vld [vmem:[#allocation7 + $0x20] ss:$16 sps:$4 sm:$0xff]  }
 0xa21   :  { %12121 = vmatprep.subr.bf16.mxu1 %v17640_v26  ;;  %v17658_v56 = vld [vmem:[#allocation7 + $0x224] ss:$16 sps:$4 sm:$0xff]   ;;  %v17661_v27 = vld [vmem:[#allocation7 + $0x220] ss:$16 sps:$4 sm:$0xff]  }
 0xa22   :  { %v17662_v25 = vld [vmem:[#allocation7 + $0x4] ss:$16 sps:$4 sm:$0xff]   ;;  %v17666_v9 = vld [vmem:[#allocation7] ss:$16 sps:$4 sm:$0xff]  }
 0xa23   :  { %12081 = vmatpush1.bf16.msra.mxu0 %v17642_v35  ;;  %v17664_v1 = vld [vmem:[#allocation7 + $0x204] ss:$16 sps:$4 sm:$0xff]   ;;  %v17667_v41 = vld [vmem:[#allocation7 + $0x200] ss:$16 sps:$4 sm:$0xff]  }
 0xa24   :  { %12122 = vmatpush1.bf16.msra.mxu1 %v17643_v54  ;;  %12082 = vmatprep.subr.bf16.mxu0 %v17644_v20  ;;  %v17668_v31 = vld [vmem:[#allocation7 + $0x1e4] ss:$16 sps:$4 sm:$0xff]   ;;  %v17672_v62 = vld [vmem:[#allocation7 + $0x1e0] ss:$16 sps:$4 sm:$0xff]  }
 0xa25   :  { %12123 = vmatprep.subr.bf16.mxu1 %v17646_v55  ;;  %v17670_v58 = vld [vmem:[#allocation7 + $0x3e4] ss:$16 sps:$4 sm:$0xff]   ;;  %v17673_v51 = vld [vmem:[#allocation7 + $0x3e0] ss:$16 sps:$4 sm:$0xff]  }
 0xa26   :  { %v17674_v6 = vld [vmem:[#allocation7 + $0x1c4] ss:$16 sps:$4 sm:$0xff]   ;;  %v17678_v37 = vld [vmem:[#allocation7 + $0x1c0] ss:$16 sps:$4 sm:$0xff]  }
 0xa27   :  { %12083 = vmatpush1.bf16.msra.mxu0 %v17648_v36  ;;  %v17676_v40 = vld [vmem:[#allocation7 + $0x3c4] ss:$16 sps:$4 sm:$0xff]   ;;  %v17679_v10 = vld [vmem:[#allocation7 + $0x3c0] ss:$16 sps:$4 sm:$0xff]   ;;  %v19260_v36 = vpack.c.bf16 %v19146_v60, %v19146_v60  ;;  %v19272_v60 = vpack.c.bf16 %v19246_v45, %v19246_v45 }
 0xa28   :  { %12124 = vmatpush1.bf16.msra.mxu1 %v17649_v2  ;;  %12084 = vmatprep.subr.bf16.mxu0 %v17650_v44  ;;  %v17680_v39 = vld [vmem:[#allocation7 + $0x1a4] ss:$16 sps:$4 sm:$0xff]   ;;  %v17684_v38 = vld [vmem:[#allocation7 + $0x1a0] ss:$16 sps:$4 sm:$0xff]   ;;  %v19264_v2 = vpack.c.bf16 %v19188_v57, %v19188_v57 }
 0xa29   :  { %12125 = vmatprep.subr.bf16.mxu1 %v17652_v16  ;;  %v17682_v12 = vld [vmem:[#allocation7 + $0x3a4] ss:$16 sps:$4 sm:$0xff]   ;;  %v17685_v13 = vld [vmem:[#allocation7 + $0x3a0] ss:$16 sps:$4 sm:$0xff]  }
 0xa2a   :  { %v17686_v22 = vld [vmem:[#allocation7 + $0x184] ss:$16 sps:$4 sm:$0xff]   ;;  %v17690_v3 = vld [vmem:[#allocation7 + $0x180] ss:$16 sps:$4 sm:$0xff]  }
 0xa2b   :  { %12085 = vmatpush1.bf16.msra.mxu0 %v17654_v59  ;;  %v17688_v42 = vld [vmem:[#allocation7 + $0x384] ss:$16 sps:$4 sm:$0xff]   ;;  %v17691_v43 = vld [vmem:[#allocation7 + $0x380] ss:$16 sps:$4 sm:$0xff]  }
 0xa2c   :  { %12126 = vmatpush1.bf16.msra.mxu1 %v17655_v23  ;;  %12086 = vmatprep.subr.bf16.mxu0 %v17656_v5  ;;  %v17692_v4 = vld [vmem:[#allocation7 + $0x164] ss:$16 sps:$4 sm:$0xff]   ;;  %v17696_v33 = vld [vmem:[#allocation7 + $0x160] ss:$16 sps:$4 sm:$0xff]   ;;  %v19268_v5 = vpack.c.bf16 %v19234_v18, %v19234_v18 }
 0xa2d   :  { %12127 = vmatprep.subr.bf16.mxu1 %v17658_v56  ;;  %v17694_v48 = vld [vmem:[#allocation7 + $0x364] ss:$16 sps:$4 sm:$0xff]   ;;  %v17697_v0 = vld [vmem:[#allocation7 + $0x360] ss:$16 sps:$4 sm:$0xff]  }
 0xa2e   :  { %v17698_v46 = vld [vmem:[#allocation7 + $0x144] ss:$16 sps:$4 sm:$0xff]   ;;  %v17702_v17 = vld [vmem:[#allocation7 + $0x140] ss:$16 sps:$4 sm:$0xff]  }
 0xa2f   :  { %12087 = vmatpush1.bf16.msra.mxu0 %v17660_v63  ;;  %v17700_v47 = vld [vmem:[#allocation7 + $0x344] ss:$16 sps:$4 sm:$0xff]   ;;  %v17703_v24 = vld [vmem:[#allocation7 + $0x340] ss:$16 sps:$4 sm:$0xff]  }
 0xa30   :  { %12128 = vmatpush1.bf16.msra.mxu1 %v17661_v27  ;;  %12088 = vmatprep.subr.bf16.mxu0 %v17662_v25  ;;  %v17704_v11 = vld [vmem:[#allocation7 + $0x124] ss:$16 sps:$4 sm:$0xff]   ;;  %v17708_v15 = vld [vmem:[#allocation7 + $0x120] ss:$16 sps:$4 sm:$0xff]  }
 0xa31   :  { %12129 = vmatprep.subr.bf16.mxu1 %v17664_v1  ;;  %v17706_v49 = vld [vmem:[#allocation7 + $0x324] ss:$16 sps:$4 sm:$0xff]   ;;  %v17709_v61 = vld [vmem:[#allocation7 + $0x320] ss:$16 sps:$4 sm:$0xff]  }
 0xa32   :  { %v17710_v53 = vld [vmem:[#allocation7 + $0x104] ss:$16 sps:$4 sm:$0xff]   ;;  %v17714_v35 = vld [vmem:[#allocation7 + $0x100] ss:$16 sps:$4 sm:$0xff]  }
 0xa33   :  { %12089 = vmatpush1.bf16.msra.mxu0 %v17666_v9  ;;  %v17712_v26 = vld [vmem:[#allocation7 + $0x304] ss:$16 sps:$4 sm:$0xff]   ;;  %v17715_v54 = vld [vmem:[#allocation7 + $0x300] ss:$16 sps:$4 sm:$0xff]  }
 0xa34   :  { %12130 = vmatpush1.bf16.msra.mxu1 %v17667_v41  ;;  %12090 = vmatprep.subr.bf16.mxu0 %v17668_v31  ;;  %v17718_v20 = vld [vmem:[#allocation7 + $0x4e4] ss:$16 sps:$4 sm:$0xff]   ;;  %v17716_v44 = vld [vmem:[#allocation7 + $0x4e0] ss:$16 sps:$4 sm:$0xff]  }
 0xa35   :  { %12131 = vmatprep.subr.bf16.mxu1 %v17670_v58  ;;  %v17721_v55 = vld [vmem:[#allocation7 + $0x6e4] ss:$16 sps:$4 sm:$0xff]   ;;  %v17719_v16 = vld [vmem:[#allocation7 + $0x6e0] ss:$16 sps:$4 sm:$0xff]  }
 0xa36   :  { %v17724_v59 = vld [vmem:[#allocation7 + $0x4c4] ss:$16 sps:$4 sm:$0xff]   ;;  %v17722_v57 = vld [vmem:[#allocation7 + $0x4c0] ss:$16 sps:$4 sm:$0xff]  }
 0xa37   :  { %12091 = vmatpush2.bf16.msra.mxu0 %v17672_v62  ;;  %v17727_v23 = vld [vmem:[#allocation7 + $0x6c4] ss:$16 sps:$4 sm:$0xff]   ;;  %v17725_v56 = vld [vmem:[#allocation7 + $0x6c0] ss:$16 sps:$4 sm:$0xff]  }
 0xa38   :  { %12132 = vmatpush2.bf16.msra.mxu1 %v17673_v51  ;;  %12092 = vmatprep.subr.bf16.mxu0 %v17674_v6  ;;  %v17730_v63 = vld [vmem:[#allocation7 + $0x4a4] ss:$16 sps:$4 sm:$0xff]   ;;  %v17728_v18 = vld [vmem:[#allocation7 + $0x4a0] ss:$16 sps:$4 sm:$0xff]  }
 0xa39   :  { %12133 = vmatprep.subr.bf16.mxu1 %v17676_v40  ;;  %v17733_v27 = vld [vmem:[#allocation7 + $0x6a4] ss:$16 sps:$4 sm:$0xff]   ;;  %v17731_v25 = vld [vmem:[#allocation7 + $0x6a0] ss:$16 sps:$4 sm:$0xff]  }
 0xa3a   :  { %v17736_v45 = vld [vmem:[#allocation7 + $0x484] ss:$16 sps:$4 sm:$0xff]   ;;  %v17734_v9 = vld [vmem:[#allocation7 + $0x480] ss:$16 sps:$4 sm:$0xff]  }
 0xa3b   :  { %12093 = vmatpush2.bf16.msra.mxu0 %v17678_v37  ;;  %v17739_v1 = vld [vmem:[#allocation7 + $0x684] ss:$16 sps:$4 sm:$0xff]   ;;  %v17737_v41 = vld [vmem:[#allocation7 + $0x680] ss:$16 sps:$4 sm:$0xff]  }
 0xa3c   :  { %12134 = vmatpush2.bf16.msra.mxu1 %v17679_v10  ;;  %12094 = vmatprep.subr.bf16.mxu0 %v17680_v39  ;;  %v17742_v31 = vld [vmem:[#allocation7 + $0x464] ss:$16 sps:$4 sm:$0xff]   ;;  %v17740_v62 = vld [vmem:[#allocation7 + $0x460] ss:$16 sps:$4 sm:$0xff]  }
 0xa3d   :  { %12135 = vmatprep.subr.bf16.mxu1 %v17682_v12  ;;  %v17745_v58 = vld [vmem:[#allocation7 + $0x664] ss:$16 sps:$4 sm:$0xff]   ;;  %v17743_v51 = vld [vmem:[#allocation7 + $0x660] ss:$16 sps:$4 sm:$0xff]  }
 0xa3e   :  { %v17748_v6 = vld [vmem:[#allocation7 + $0x444] ss:$16 sps:$4 sm:$0xff]   ;;  %v17746_v37 = vld [vmem:[#allocation7 + $0x440] ss:$16 sps:$4 sm:$0xff]  }
 0xa3f   :  { %12095 = vmatpush2.bf16.msra.mxu0 %v17684_v38  ;;  %v17751_v40 = vld [vmem:[#allocation7 + $0x644] ss:$16 sps:$4 sm:$0xff]   ;;  %v17749_v10 = vld [vmem:[#allocation7 + $0x640] ss:$16 sps:$4 sm:$0xff]  }
 0xa40   :  { %12136 = vmatpush2.bf16.msra.mxu1 %v17685_v13  ;;  %12096 = vmatprep.subr.bf16.mxu0 %v17686_v22  ;;  %v17754_v39 = vld [vmem:[#allocation7 + $0x424] ss:$16 sps:$4 sm:$0xff]   ;;  %v17752_v38 = vld [vmem:[#allocation7 + $0x420] ss:$16 sps:$4 sm:$0xff]  }
 0xa41   :  { %12137 = vmatprep.subr.bf16.mxu1 %v17688_v42  ;;  %v17757_v12 = vld [vmem:[#allocation7 + $0x624] ss:$16 sps:$4 sm:$0xff]   ;;  %v17755_v13 = vld [vmem:[#allocation7 + $0x620] ss:$16 sps:$4 sm:$0xff]  }
 0xa42   :  { %v17760_v22 = vld [vmem:[#allocation7 + $0x404] ss:$16 sps:$4 sm:$0xff]  }
 0xa43   :  { %12097 = vmatpush2.bf16.msra.mxu0 %v17690_v3  ;;  %v17763_v42 = vld [vmem:[#allocation7 + $0x604] ss:$16 sps:$4 sm:$0xff]   ;;  %v17758_v3 = vld [vmem:[#allocation7 + $0x400] ss:$16 sps:$4 sm:$0xff]  }
 0xa44   :  { %12138 = vmatpush2.bf16.msra.mxu1 %v17691_v43  ;;  %12098 = vmatprep.subr.bf16.mxu0 %v17692_v4  ;;  %v17761_v43 = vld [vmem:[#allocation7 + $0x600] ss:$16 sps:$4 sm:$0xff]   ;;  %v17766_v4 = vld [vmem:[#allocation7 + $0x5e4] ss:$16 sps:$4 sm:$0xff]  }
 0xa45   :  { %12139 = vmatprep.subr.bf16.mxu1 %v17694_v48  ;;  %v17769_v48 = vld [vmem:[#allocation7 + $0x7e4] ss:$16 sps:$4 sm:$0xff]  }
 0xa47   :  { %12099 = vmatpush2.bf16.msra.mxu0 %v17696_v33  ;;  %v17764_v33 = vld [vmem:[#allocation7 + $0x5e0] ss:$16 sps:$4 sm:$0xff]  }
 0xa48   :  { %12140 = vmatpush2.bf16.msra.mxu1 %v17697_v0  ;;  %12100 = vmatprep.subr.bf16.mxu0 %v17698_v46  ;;  %v17767_v0 = vld [vmem:[#allocation7 + $0x7e0] ss:$16 sps:$4 sm:$0xff]   ;;  %v17772_v46 = vld [vmem:[#allocation7 + $0x5c4] ss:$16 sps:$4 sm:$0xff]  }
 0xa49   :  { %12141 = vmatprep.subr.bf16.mxu1 %v17700_v47  ;;  %v17775_v47 = vld [vmem:[#allocation7 + $0x7c4] ss:$16 sps:$4 sm:$0xff]  }
 0xa4b   :  { %12101 = vmatpush2.bf16.msra.mxu0 %v17702_v17  ;;  %v17770_v17 = vld [vmem:[#allocation7 + $0x5c0] ss:$16 sps:$4 sm:$0xff]  }
 0xa4c   :  { %12142 = vmatpush2.bf16.msra.mxu1 %v17703_v24  ;;  %12102 = vmatprep.subr.bf16.mxu0 %v17704_v11  ;;  %v17773_v24 = vld [vmem:[#allocation7 + $0x7c0] ss:$16 sps:$4 sm:$0xff]   ;;  %v17778_v11 = vld [vmem:[#allocation7 + $0x5a4] ss:$16 sps:$4 sm:$0xff]  }
 0xa4d   :  { %12143 = vmatprep.subr.bf16.mxu1 %v17706_v49  ;;  %v17781_v49 = vld [vmem:[#allocation7 + $0x7a4] ss:$16 sps:$4 sm:$0xff]  }
 0xa4f   :  { %12103 = vmatpush2.bf16.msra.mxu0 %v17708_v15  ;;  %v17776_v15 = vld [vmem:[#allocation7 + $0x5a0] ss:$16 sps:$4 sm:$0xff]  }
 0xa50   :  { %12144 = vmatpush2.bf16.msra.mxu1 %v17709_v61  ;;  %12104 = vmatprep.subr.bf16.mxu0 %v17710_v53  ;;  %v17779_v61 = vld [vmem:[#allocation7 + $0x7a0] ss:$16 sps:$4 sm:$0xff]   ;;  %v17784_v53 = vld [vmem:[#allocation7 + $0x584] ss:$16 sps:$4 sm:$0xff]  }
 0xa51   :  { %12145 = vmatprep.subr.bf16.mxu1 %v17712_v26  ;;  %v17787_v26 = vld [vmem:[#allocation7 + $0x784] ss:$16 sps:$4 sm:$0xff]  }
 0xa53   :  { %12105 = vmatpush2.bf16.msra.mxu0 %v17714_v35  ;;  %v17782_v35 = vld [vmem:[#allocation7 + $0x580] ss:$16 sps:$4 sm:$0xff]  }
 0xa54   :  { %12146 = vmatpush2.bf16.msra.mxu1 %v17715_v54  ;;  %12156 = vmatprep.subr.bf16.mxu0 %v17718_v20  ;;  %v17785_v54 = vld [vmem:[#allocation7 + $0x780] ss:$16 sps:$4 sm:$0xff]   ;;  %v17790_v20 = vld [vmem:[#allocation7 + $0x564] ss:$16 sps:$4 sm:$0xff]  }
 0xa55   :  { %12197 = vmatprep.subr.bf16.mxu1 %v17721_v55  ;;  %v17793_v55 = vld [vmem:[#allocation7 + $0x764] ss:$16 sps:$4 sm:$0xff]  }
 0xa56   :  { %12107 = vmatmul.mubr.bf16.vlgmr.msra.gmra.mxu0 %v19260_v36 }
 0xa57   :  { %12148 = vmatmul.mubr.bf16.vlgmr.msra.gmra.mxu1 %v19264_v2  ;;  %12157 = vmatpush1.bf16.msra.mxu0 %v17716_v44  ;;  %v17788_v44 = vld [vmem:[#allocation7 + $0x560] ss:$16 sps:$4 sm:$0xff]  }
 0xa58   :  { %12198 = vmatpush1.bf16.msra.mxu1 %v17719_v16  ;;  %12158 = vmatprep.subr.bf16.mxu0 %v17724_v59  ;;  %v17791_v16 = vld [vmem:[#allocation7 + $0x760] ss:$16 sps:$4 sm:$0xff]   ;;  %v17796_v59 = vld [vmem:[#allocation7 + $0x544] ss:$16 sps:$4 sm:$0xff]  }
 0xa59   :  { %12199 = vmatprep.subr.bf16.mxu1 %v17727_v23  ;;  %12188 = vmatprep.mubr.bf16.mxu0 %v19268_v5  ;;  %v17799_v23 = vld [vmem:[#allocation7 + $0x744] ss:$16 sps:$4 sm:$0xff]  }
 0xa5a   :  { %12229 = vmatprep.mubr.bf16.mxu1 %v19272_v60 }
 0xa5b   :  { %12159 = vmatpush1.bf16.msra.mxu0 %v17722_v57  ;;  %v17794_v57 = vld [vmem:[#allocation7 + $0x540] ss:$16 sps:$4 sm:$0xff]  }
 0xa5c   :  { %12200 = vmatpush1.bf16.msra.mxu1 %v17725_v56  ;;  %12160 = vmatprep.subr.bf16.mxu0 %v17730_v63  ;;  %v17797_v56 = vld [vmem:[#allocation7 + $0x740] ss:$16 sps:$4 sm:$0xff]   ;;  %v17802_v63 = vld [vmem:[#allocation7 + $0x524] ss:$16 sps:$4 sm:$0xff]  }
 0xa5d   :  { %12201 = vmatprep.subr.bf16.mxu1 %v17733_v27  ;;  %v17805_v27 = vld [vmem:[#allocation7 + $0x724] ss:$16 sps:$4 sm:$0xff]  }
 0xa5f   :  { %12161 = vmatpush1.bf16.msra.mxu0 %v17728_v18  ;;  %v17800_v18 = vld [vmem:[#allocation7 + $0x520] ss:$16 sps:$4 sm:$0xff]  }
 0xa60   :  { %12202 = vmatpush1.bf16.msra.mxu1 %v17731_v25  ;;  %12162 = vmatprep.subr.bf16.mxu0 %v17736_v45  ;;  %v17803_v25 = vld [vmem:[#allocation7 + $0x720] ss:$16 sps:$4 sm:$0xff]   ;;  %v17808_v45 = vld [vmem:[#allocation7 + $0x504] ss:$16 sps:$4 sm:$0xff]  }
 0xa61   :  { %12203 = vmatprep.subr.bf16.mxu1 %v17739_v1  ;;  %v17811_v1 = vld [vmem:[#allocation7 + $0x704] ss:$16 sps:$4 sm:$0xff]  }
 0xa63   :  { %12163 = vmatpush1.bf16.msra.mxu0 %v17734_v9  ;;  %v17806_v9 = vld [vmem:[#allocation7 + $0x500] ss:$16 sps:$4 sm:$0xff]  }
 0xa64   :  { %12204 = vmatpush1.bf16.msra.mxu1 %v17737_v41  ;;  %12164 = vmatprep.subr.bf16.mxu0 %v17742_v31  ;;  %v17809_v41 = vld [vmem:[#allocation7 + $0x700] ss:$16 sps:$4 sm:$0xff]   ;;  %v17814_v31 = vld [vmem:[#allocation7 + $0xec] ss:$16 sps:$4 sm:$0xff]  }
 0xa65   :  { %12205 = vmatprep.subr.bf16.mxu1 %v17745_v58  ;;  %v17817_v58 = vld [vmem:[#allocation7 + $0x2ec] ss:$16 sps:$4 sm:$0xff]  }
 0xa67   :  { %12165 = vmatpush1.bf16.msra.mxu0 %v17740_v62  ;;  %v19280_v62 = vpack.c.bf16 %v19232_v19, %v19232_v19  ;;  %v17826_v19 = vld [vmem:[#allocation7 + $0xac] ss:$16 sps:$4 sm:$0xff]  }
 0xa68   :  { %12206 = vmatpush1.bf16.msra.mxu1 %v17743_v51  ;;  %12166 = vmatprep.subr.bf16.mxu0 %v17748_v6  ;;  %v19284_v51 = vpack.c.bf16 %v19244_v21, %v19244_v21  ;;  %v17812_v6 = vld [vmem:[#allocation7 + $0xe8] ss:$16 sps:$4 sm:$0xff]   ;;  %v17829_v21 = vld [vmem:[#allocation7 + $0x2ac] ss:$16 sps:$4 sm:$0xff]  }
 0xa69   :  { %12207 = vmatprep.subr.bf16.mxu1 %v17751_v40  ;;  %v17815_v40 = vld [vmem:[#allocation7 + $0x2e8] ss:$16 sps:$4 sm:$0xff]  }
 0xa6b   :  { %12167 = vmatpush1.bf16.msra.mxu0 %v17746_v37  ;;  %v17820_v37 = vld [vmem:[#allocation7 + $0xcc] ss:$16 sps:$4 sm:$0xff]  }
 0xa6c   :  { %12208 = vmatpush1.bf16.msra.mxu1 %v17749_v10  ;;  %12168 = vmatprep.subr.bf16.mxu0 %v17754_v39  ;;  %v17823_v10 = vld [vmem:[#allocation7 + $0x2cc] ss:$16 sps:$4 sm:$0xff]   ;;  %v17818_v39 = vld [vmem:[#allocation7 + $0xc8] ss:$16 sps:$4 sm:$0xff]  }
 0xa6d   :  { %12209 = vmatprep.subr.bf16.mxu1 %v17757_v12  ;;  %v17821_v12 = vld [vmem:[#allocation7 + $0x2c8] ss:$16 sps:$4 sm:$0xff]  }
 0xa6f   :  { %12169 = vmatpush1.bf16.msra.mxu0 %v17752_v38  ;;  %v17824_v38 = vld [vmem:[#allocation7 + $0xa8] ss:$16 sps:$4 sm:$0xff]  }
 0xa70   :  { %12210 = vmatpush1.bf16.msra.mxu1 %v17755_v13  ;;  %12170 = vmatprep.subr.bf16.mxu0 %v17760_v22  ;;  %v17827_v13 = vld [vmem:[#allocation7 + $0x2a8] ss:$16 sps:$4 sm:$0xff]   ;;  %v17832_v22 = vld [vmem:[#allocation7 + $0x8c] ss:$16 sps:$4 sm:$0xff]  }
 0xa71   :  { %12211 = vmatprep.subr.bf16.mxu1 %v17763_v42  ;;  %v17835_v42 = vld [vmem:[#allocation7 + $0x28c] ss:$16 sps:$4 sm:$0xff]  }
 0xa73   :  { %12171 = vmatpush1.bf16.msra.mxu0 %v17758_v3  ;;  %v17830_v3 = vld [vmem:[#allocation7 + $0x88] ss:$16 sps:$4 sm:$0xff]  }
 0xa74   :  { %12212 = vmatpush1.bf16.msra.mxu1 %v17761_v43  ;;  %12172 = vmatprep.subr.bf16.mxu0 %v17766_v4  ;;  %v17833_v43 = vld [vmem:[#allocation7 + $0x288] ss:$16 sps:$4 sm:$0xff]   ;;  %v17838_v4 = vld [vmem:[#allocation7 + $0x6c] ss:$16 sps:$4 sm:$0xff]  }
 0xa75   :  { %12213 = vmatprep.subr.bf16.mxu1 %v17769_v48  ;;  %v17841_v48 = vld [vmem:[#allocation7 + $0x26c] ss:$16 sps:$4 sm:$0xff]  }
 0xa77   :  { %12173 = vmatpush2.bf16.msra.mxu0 %v17764_v33  ;;  %v17836_v33 = vld [vmem:[#allocation7 + $0x68] ss:$16 sps:$4 sm:$0xff]  }
 0xa78   :  { %12214 = vmatpush2.bf16.msra.mxu1 %v17767_v0  ;;  %12174 = vmatprep.subr.bf16.mxu0 %v17772_v46  ;;  %v17847_v0 = vld [vmem:[#allocation7 + $0x24c] ss:$16 sps:$4 sm:$0xff]   ;;  %v17842_v46 = vld [vmem:[#allocation7 + $0x48] ss:$16 sps:$4 sm:$0xff]  }
 0xa79   :  { %12215 = vmatprep.subr.bf16.mxu1 %v17775_v47  ;;  %v17845_v47 = vld [vmem:[#allocation7 + $0x248] ss:$16 sps:$4 sm:$0xff]  }
 0xa7b   :  { %12175 = vmatpush2.bf16.msra.mxu0 %v17770_v17  ;;  %v17850_v17 = vld [vmem:[#allocation7 + $0x2c] ss:$16 sps:$4 sm:$0xff]  }
 0xa7c   :  { %12216 = vmatpush2.bf16.msra.mxu1 %v17773_v24  ;;  %12176 = vmatprep.subr.bf16.mxu0 %v17778_v11  ;;  %v17853_v24 = vld [vmem:[#allocation7 + $0x22c] ss:$16 sps:$4 sm:$0xff]   ;;  %v17848_v11 = vld [vmem:[#allocation7 + $0x28] ss:$16 sps:$4 sm:$0xff]  }
 0xa7d   :  { %12217 = vmatprep.subr.bf16.mxu1 %v17781_v49  ;;  %v17851_v49 = vld [vmem:[#allocation7 + $0x228] ss:$16 sps:$4 sm:$0xff]  }
 0xa7f   :  { %12177 = vmatpush2.bf16.msra.mxu0 %v17776_v15  ;;  %v17856_v15 = vld [vmem:[#allocation7 + $0xc] ss:$16 sps:$4 sm:$0xff]  }
 0xa80   :  { %12218 = vmatpush2.bf16.msra.mxu1 %v17779_v61  ;;  %12178 = vmatprep.subr.bf16.mxu0 %v17784_v53  ;;  %v17859_v61 = vld [vmem:[#allocation7 + $0x20c] ss:$16 sps:$4 sm:$0xff]   ;;  %v17854_v53 = vld [vmem:[#allocation7 + $0x8] ss:$16 sps:$4 sm:$0xff]  }
 0xa81   :  { %12219 = vmatprep.subr.bf16.mxu1 %v17787_v26  ;;  %v17857_v26 = vld [vmem:[#allocation7 + $0x208] ss:$16 sps:$4 sm:$0xff]  }
 0xa83   :  { %12179 = vmatpush2.bf16.msra.mxu0 %v17782_v35  ;;  %v17862_v35 = vld [vmem:[#allocation7 + $0x1ec] ss:$16 sps:$4 sm:$0xff]  }
 0xa84   :  { %12220 = vmatpush2.bf16.msra.mxu1 %v17785_v54  ;;  %12180 = vmatprep.subr.bf16.mxu0 %v17790_v20  ;;  %v17865_v54 = vld [vmem:[#allocation7 + $0x3ec] ss:$16 sps:$4 sm:$0xff]   ;;  %v17860_v20 = vld [vmem:[#allocation7 + $0x1e8] ss:$16 sps:$4 sm:$0xff]  }
 0xa85   :  { %12221 = vmatprep.subr.bf16.mxu1 %v17793_v55  ;;  %v17863_v55 = vld [vmem:[#allocation7 + $0x3e8] ss:$16 sps:$4 sm:$0xff]  }
 0xa87   :  { %12181 = vmatpush2.bf16.msra.mxu0 %v17788_v44  ;;  %v17868_v44 = vld [vmem:[#allocation7 + $0x1cc] ss:$16 sps:$4 sm:$0xff]  }
 0xa88   :  { %12222 = vmatpush2.bf16.msra.mxu1 %v17791_v16  ;;  %12182 = vmatprep.subr.bf16.mxu0 %v17796_v59  ;;  %v17871_v16 = vld [vmem:[#allocation7 + $0x3cc] ss:$16 sps:$4 sm:$0xff]   ;;  %v17866_v59 = vld [vmem:[#allocation7 + $0x1c8] ss:$16 sps:$4 sm:$0xff]  }
 0xa89   :  { %12223 = vmatprep.subr.bf16.mxu1 %v17799_v23  ;;  %v17869_v23 = vld [vmem:[#allocation7 + $0x3c8] ss:$16 sps:$4 sm:$0xff]  }
 0xa8b   :  { %12183 = vmatpush2.bf16.msra.mxu0 %v17794_v57  ;;  %v17874_v57 = vld [vmem:[#allocation7 + $0x1ac] ss:$16 sps:$4 sm:$0xff]  }
 0xa8c   :  { %12224 = vmatpush2.bf16.msra.mxu1 %v17797_v56  ;;  %12184 = vmatprep.subr.bf16.mxu0 %v17802_v63  ;;  %v17877_v56 = vld [vmem:[#allocation7 + $0x3ac] ss:$16 sps:$4 sm:$0xff]   ;;  %v17872_v63 = vld [vmem:[#allocation7 + $0x1a8] ss:$16 sps:$4 sm:$0xff]  }
 0xa8d   :  { %12225 = vmatprep.subr.bf16.mxu1 %v17805_v27  ;;  %v17875_v27 = vld [vmem:[#allocation7 + $0x3a8] ss:$16 sps:$4 sm:$0xff]  }
 0xa8f   :  { %12185 = vmatpush2.bf16.msra.mxu0 %v17800_v18  ;;  %v17880_v18 = vld [vmem:[#allocation7 + $0x18c] ss:$16 sps:$4 sm:$0xff]  }
 0xa90   :  { %12226 = vmatpush2.bf16.msra.mxu1 %v17803_v25  ;;  %12186 = vmatprep.subr.bf16.mxu0 %v17808_v45  ;;  %v17883_v25 = vld [vmem:[#allocation7 + $0x38c] ss:$16 sps:$4 sm:$0xff]   ;;  %v17878_v45 = vld [vmem:[#allocation7 + $0x188] ss:$16 sps:$4 sm:$0xff]  }
 0xa91   :  { %12227 = vmatprep.subr.bf16.mxu1 %v17811_v1  ;;  %v17881_v1 = vld [vmem:[#allocation7 + $0x388] ss:$16 sps:$4 sm:$0xff]  }
 0xa93   :  { %12187 = vmatpush2.bf16.msra.mxu0 %v17806_v9  ;;  %v17886_v9 = vld [vmem:[#allocation7 + $0x16c] ss:$16 sps:$4 sm:$0xff]  }
 0xa94   :  { %12228 = vmatpush2.bf16.msra.mxu1 %v17809_v41  ;;  %12238 = vmatprep.subr.bf16.mxu0 %v17814_v31  ;;  %v17889_v41 = vld [vmem:[#allocation7 + $0x36c] ss:$16 sps:$4 sm:$0xff]   ;;  %v17884_v31 = vld [vmem:[#allocation7 + $0x168] ss:$16 sps:$4 sm:$0xff]  }
 0xa95   :  { %12279 = vmatprep.subr.bf16.mxu1 %v17817_v58  ;;  %v17887_v58 = vld [vmem:[#allocation7 + $0x368] ss:$16 sps:$4 sm:$0xff]  }
 0xa96   :  { %12189 = vmatmul.mubr.bf16.vlgmr.msra.gmra.mxu0 %v19280_v62 }
 0xa97   :  { %12230 = vmatmul.mubr.bf16.vlgmr.msra.gmra.mxu1 %v19284_v51  ;;  %12239 = vmatpush1.bf16.msra.mxu0 %v17812_v6  ;;  %v17892_v6 = vld [vmem:[#allocation7 + $0x14c] ss:$16 sps:$4 sm:$0xff]  }
 0xa98   :  { %12280 = vmatpush1.bf16.msra.mxu1 %v17815_v40  ;;  %12240 = vmatprep.subr.bf16.mxu0 %v17820_v37  ;;  %v17895_v40 = vld [vmem:[#allocation7 + $0x34c] ss:$16 sps:$4 sm:$0xff]   ;;  %v17890_v37 = vld [vmem:[#allocation7 + $0x148] ss:$16 sps:$4 sm:$0xff]  }
 0xa99   :  { %12281 = vmatprep.subr.bf16.mxu1 %v17823_v10  ;;  %12270 = vmatprep.mubr.bf16.mxu0 %v19250_v28  ;;  %v17839_v28 = vld [vmem:[#allocation7 + $0x268] ss:$16 sps:$4 sm:$0xff]  }
 0xa9a   :  { %12311 = vmatprep.mubr.bf16.mxu1 %v19254_v30  ;;  %v17844_v30 = vld [vmem:[#allocation7 + $0x4c] ss:$16 sps:$4 sm:$0xff]   ;;  %v17893_v10 = vld [vmem:[#allocation7 + $0x348] ss:$16 sps:$4 sm:$0xff]  }
 0xa9b   :  { %12241 = vmatpush1.bf16.msra.mxu0 %v17818_v39  ;;  %v17898_v39 = vld [vmem:[#allocation7 + $0x12c] ss:$16 sps:$4 sm:$0xff]  }
 0xa9c   :  { %12282 = vmatpush1.bf16.msra.mxu1 %v17821_v12  ;;  %12242 = vmatprep.subr.bf16.mxu0 %v17826_v19  ;;  %v17901_v12 = vld [vmem:[#allocation7 + $0x32c] ss:$16 sps:$4 sm:$0xff]   ;;  %v17896_v19 = vld [vmem:[#allocation7 + $0x128] ss:$16 sps:$4 sm:$0xff]  }
 0xa9d   :  { %12283 = vmatprep.subr.bf16.mxu1 %v17829_v21  ;;  %v17899_v21 = vld [vmem:[#allocation7 + $0x328] ss:$16 sps:$4 sm:$0xff]  }
 0xa9f   :  { %12243 = vmatpush1.bf16.msra.mxu0 %v17824_v38  ;;  %v17904_v38 = vld [vmem:[#allocation7 + $0x10c] ss:$16 sps:$4 sm:$0xff]  }
 0xaa0   :  { %12284 = vmatpush1.bf16.msra.mxu1 %v17827_v13  ;;  %12244 = vmatprep.subr.bf16.mxu0 %v17832_v22  ;;  %v17907_v13 = vld [vmem:[#allocation7 + $0x30c] ss:$16 sps:$4 sm:$0xff]   ;;  %v17902_v22 = vld [vmem:[#allocation7 + $0x108] ss:$16 sps:$4 sm:$0xff]  }
 0xaa1   :  { %12285 = vmatprep.subr.bf16.mxu1 %v17835_v42  ;;  %v17905_v42 = vld [vmem:[#allocation7 + $0x308] ss:$16 sps:$4 sm:$0xff]  }
 0xaa3   :  { %12245 = vmatpush1.bf16.msra.mxu0 %v17830_v3  ;;  %v17910_v3 = vld [vmem:[#allocation7 + $0x4ec] ss:$16 sps:$4 sm:$0xff]  }
 0xaa4   :  { %12286 = vmatpush1.bf16.msra.mxu1 %v17833_v43  ;;  %12246 = vmatprep.subr.bf16.mxu0 %v17838_v4  ;;  %v17913_v43 = vld [vmem:[#allocation7 + $0x6ec] ss:$16 sps:$4 sm:$0xff]   ;;  %v17908_v4 = vld [vmem:[#allocation7 + $0x4e8] ss:$16 sps:$4 sm:$0xff]  }
 0xaa5   :  { %12287 = vmatprep.subr.bf16.mxu1 %v17841_v48  ;;  %v17911_v48 = vld [vmem:[#allocation7 + $0x6e8] ss:$16 sps:$4 sm:$0xff]  }
 0xaa7   :  { %12247 = vmatpush1.bf16.msra.mxu0 %v17836_v33  ;;  %v17916_v33 = vld [vmem:[#allocation7 + $0x4cc] ss:$16 sps:$4 sm:$0xff]  }
 0xaa8   :  { %12288 = vmatpush1.bf16.msra.mxu1 %v17839_v28  ;;  %12248 = vmatprep.subr.bf16.mxu0 %v17844_v30  ;;  %v17919_v28 = vld [vmem:[#allocation7 + $0x6cc] ss:$16 sps:$4 sm:$0xff]   ;;  %v17914_v30 = vld [vmem:[#allocation7 + $0x4c8] ss:$16 sps:$4 sm:$0xff]  }
 0xaa9   :  { %12289 = vmatprep.subr.bf16.mxu1 %v17847_v0  ;;  %v17917_v0 = vld [vmem:[#allocation7 + $0x6c8] ss:$16 sps:$4 sm:$0xff]  }
 0xaab   :  { %12249 = vmatpush1.bf16.msra.mxu0 %v17842_v46  ;;  %v17922_v46 = vld [vmem:[#allocation7 + $0x4ac] ss:$16 sps:$4 sm:$0xff]  }
 0xaac   :  { %12290 = vmatpush1.bf16.msra.mxu1 %v17845_v47  ;;  %12250 = vmatprep.subr.bf16.mxu0 %v17850_v17  ;;  %v17925_v47 = vld [vmem:[#allocation7 + $0x6ac] ss:$16 sps:$4 sm:$0xff]   ;;  %v17920_v17 = vld [vmem:[#allocation7 + $0x4a8] ss:$16 sps:$4 sm:$0xff]  }
 0xaad   :  { %12291 = vmatprep.subr.bf16.mxu1 %v17853_v24  ;;  %v17923_v24 = vld [vmem:[#allocation7 + $0x6a8] ss:$16 sps:$4 sm:$0xff]  }
 0xaaf   :  { %12251 = vmatpush1.bf16.msra.mxu0 %v17848_v11  ;;  %v17926_v11 = vld [vmem:[#allocation7 + $0x488] ss:$16 sps:$4 sm:$0xff]  }
 0xab0   :  { %12292 = vmatpush1.bf16.msra.mxu1 %v17851_v49  ;;  %12252 = vmatprep.subr.bf16.mxu0 %v17856_v15  ;;  %v17929_v49 = vld [vmem:[#allocation7 + $0x688] ss:$16 sps:$4 sm:$0xff]   ;;  %v17934_v15 = vld [vmem:[#allocation7 + $0x46c] ss:$16 sps:$4 sm:$0xff]  }
 0xab1   :  { %12293 = vmatprep.subr.bf16.mxu1 %v17859_v61  ;;  %v17937_v61 = vld [vmem:[#allocation7 + $0x66c] ss:$16 sps:$4 sm:$0xff]  }
 0xab3   :  { %12253 = vmatpush1.bf16.msra.mxu0 %v17854_v53  ;;  %v17940_v53 = vld [vmem:[#allocation7 + $0x44c] ss:$16 sps:$4 sm:$0xff]  }
 0xab4   :  { %12294 = vmatpush1.bf16.msra.mxu1 %v17857_v26  ;;  %12254 = vmatprep.subr.bf16.mxu0 %v17862_v35  ;;  %v17943_v26 = vld [vmem:[#allocation7 + $0x64c] ss:$16 sps:$4 sm:$0xff]   ;;  %v17938_v35 = vld [vmem:[#allocation7 + $0x448] ss:$16 sps:$4 sm:$0xff]  }
 0xab5   :  { %12295 = vmatprep.subr.bf16.mxu1 %v17865_v54  ;;  %v17941_v54 = vld [vmem:[#allocation7 + $0x648] ss:$16 sps:$4 sm:$0xff]  }
 0xab7   :  { %12255 = vmatpush2.bf16.msra.mxu0 %v17860_v20  ;;  %v17946_v20 = vld [vmem:[#allocation7 + $0x42c] ss:$16 sps:$4 sm:$0xff]  }
 0xab8   :  { %12296 = vmatpush2.bf16.msra.mxu1 %v17863_v55  ;;  %12256 = vmatprep.subr.bf16.mxu0 %v17868_v44  ;;  %v17949_v55 = vld [vmem:[#allocation7 + $0x62c] ss:$16 sps:$4 sm:$0xff]   ;;  %v17944_v44 = vld [vmem:[#allocation7 + $0x428] ss:$16 sps:$4 sm:$0xff]  }
 0xab9   :  { %12297 = vmatprep.subr.bf16.mxu1 %v17871_v16  ;;  %v17947_v16 = vld [vmem:[#allocation7 + $0x628] ss:$16 sps:$4 sm:$0xff]  }
 0xabb   :  { %12257 = vmatpush2.bf16.msra.mxu0 %v17866_v59  ;;  %v17952_v59 = vld [vmem:[#allocation7 + $0x40c] ss:$16 sps:$4 sm:$0xff]  }
 0xabc   :  { %12298 = vmatpush2.bf16.msra.mxu1 %v17869_v23  ;;  %12258 = vmatprep.subr.bf16.mxu0 %v17874_v57  ;;  %v17955_v23 = vld [vmem:[#allocation7 + $0x60c] ss:$16 sps:$4 sm:$0xff]   ;;  %v17950_v57 = vld [vmem:[#allocation7 + $0x408] ss:$16 sps:$4 sm:$0xff]  }
 0xabd   :  { %12299 = vmatprep.subr.bf16.mxu1 %v17877_v56  ;;  %v17953_v56 = vld [vmem:[#allocation7 + $0x608] ss:$16 sps:$4 sm:$0xff]  }
 0xabf   :  { %12259 = vmatpush2.bf16.msra.mxu0 %v17872_v63  ;;  %v17958_v63 = vld [vmem:[#allocation7 + $0x5ec] ss:$16 sps:$4 sm:$0xff]  }
 0xac0   :  { %12300 = vmatpush2.bf16.msra.mxu1 %v17875_v27  ;;  %12260 = vmatprep.subr.bf16.mxu0 %v17880_v18  ;;  %v17961_v27 = vld [vmem:[#allocation7 + $0x7ec] ss:$16 sps:$4 sm:$0xff]   ;;  %v17956_v18 = vld [vmem:[#allocation7 + $0x5e8] ss:$16 sps:$4 sm:$0xff]  }
 0xac1   :  { %12301 = vmatprep.subr.bf16.mxu1 %v17883_v25  ;;  %v17959_v25 = vld [vmem:[#allocation7 + $0x7e8] ss:$16 sps:$4 sm:$0xff]  }
 0xac3   :  { %12261 = vmatpush2.bf16.msra.mxu0 %v17878_v45  ;;  %v17964_v45 = vld [vmem:[#allocation7 + $0x5cc] ss:$16 sps:$4 sm:$0xff]  }
 0xac4   :  { %12302 = vmatpush2.bf16.msra.mxu1 %v17881_v1  ;;  %12262 = vmatprep.subr.bf16.mxu0 %v17886_v9  ;;  %v17967_v1 = vld [vmem:[#allocation7 + $0x7cc] ss:$16 sps:$4 sm:$0xff]   ;;  %v17962_v9 = vld [vmem:[#allocation7 + $0x5c8] ss:$16 sps:$4 sm:$0xff]  }
 0xac5   :  { %12303 = vmatprep.subr.bf16.mxu1 %v17889_v41  ;;  %v17965_v41 = vld [vmem:[#allocation7 + $0x7c8] ss:$16 sps:$4 sm:$0xff]  }
 0xac7   :  { %12263 = vmatpush2.bf16.msra.mxu0 %v17884_v31  ;;  %v17970_v31 = vld [vmem:[#allocation7 + $0x5ac] ss:$16 sps:$4 sm:$0xff]  }
 0xac8   :  { %12304 = vmatpush2.bf16.msra.mxu1 %v17887_v58  ;;  %12264 = vmatprep.subr.bf16.mxu0 %v17892_v6  ;;  %v17973_v58 = vld [vmem:[#allocation7 + $0x7ac] ss:$16 sps:$4 sm:$0xff]   ;;  %v17968_v6 = vld [vmem:[#allocation7 + $0x5a8] ss:$16 sps:$4 sm:$0xff]  }
 0xac9   :  { %12305 = vmatprep.subr.bf16.mxu1 %v17895_v40  ;;  %v17971_v40 = vld [vmem:[#allocation7 + $0x7a8] ss:$16 sps:$4 sm:$0xff]  }
 0xacb   :  { %12265 = vmatpush2.bf16.msra.mxu0 %v17890_v37  ;;  %v17976_v37 = vld [vmem:[#allocation7 + $0x58c] ss:$16 sps:$4 sm:$0xff]  }
 0xacc   :  { %12306 = vmatpush2.bf16.msra.mxu1 %v17893_v10  ;;  %12266 = vmatprep.subr.bf16.mxu0 %v17898_v39  ;;  %v17979_v10 = vld [vmem:[#allocation7 + $0x78c] ss:$16 sps:$4 sm:$0xff]   ;;  %v17974_v39 = vld [vmem:[#allocation7 + $0x588] ss:$16 sps:$4 sm:$0xff]  }
 0xacd   :  { %12307 = vmatprep.subr.bf16.mxu1 %v17901_v12  ;;  %v17977_v12 = vld [vmem:[#allocation7 + $0x788] ss:$16 sps:$4 sm:$0xff]  }
 0xacf   :  { %12267 = vmatpush2.bf16.msra.mxu0 %v17896_v19  ;;  %v17982_v19 = vld [vmem:[#allocation7 + $0x56c] ss:$16 sps:$4 sm:$0xff]  }
 0xad0   :  { %12308 = vmatpush2.bf16.msra.mxu1 %v17899_v21  ;;  %12268 = vmatprep.subr.bf16.mxu0 %v17904_v38  ;;  %v17985_v21 = vld [vmem:[#allocation7 + $0x76c] ss:$16 sps:$4 sm:$0xff]   ;;  %v17980_v38 = vld [vmem:[#allocation7 + $0x568] ss:$16 sps:$4 sm:$0xff]  }
 0xad1   :  { %12309 = vmatprep.subr.bf16.mxu1 %v17907_v13  ;;  %v17983_v13 = vld [vmem:[#allocation7 + $0x768] ss:$16 sps:$4 sm:$0xff]  }
 0xad3   :  { %12269 = vmatpush2.bf16.msra.mxu0 %v17902_v22  ;;  %v17988_v22 = vld [vmem:[#allocation7 + $0x54c] ss:$16 sps:$4 sm:$0xff]  }
 0xad4   :  { %12310 = vmatpush2.bf16.msra.mxu1 %v17905_v42  ;;  %12320 = vmatprep.subr.bf16.mxu0 %v17910_v3  ;;  %v17991_v42 = vld [vmem:[#allocation7 + $0x74c] ss:$16 sps:$4 sm:$0xff]   ;;  %v17986_v3 = vld [vmem:[#allocation7 + $0x548] ss:$16 sps:$4 sm:$0xff]  }
 0xad5   :  { %12361 = vmatprep.subr.bf16.mxu1 %v17913_v43  ;;  %v17989_v43 = vld [vmem:[#allocation7 + $0x748] ss:$16 sps:$4 sm:$0xff]  }
 0xad6   :  { %12271 = vmatmul.mubr.bf16.vlgmr.msra.gmra.mxu0 %v19260_v36  ;;  %v17928_v36 = vld [vmem:[#allocation7 + $0x48c] ss:$16 sps:$4 sm:$0xff]  }
 0xad7   :  { %12312 = vmatmul.mubr.bf16.vlgmr.msra.gmra.mxu1 %v19264_v2  ;;  %12321 = vmatpush1.bf16.msra.mxu0 %v17908_v4  ;;  %v17931_v2 = vld [vmem:[#allocation7 + $0x68c] ss:$16 sps:$4 sm:$0xff]  }
 0xad8   :  { %12362 = vmatpush1.bf16.msra.mxu1 %v17911_v48  ;;  %12322 = vmatprep.subr.bf16.mxu0 %v17916_v33  ;;  %v17994_v4 = vld [vmem:[#allocation7 + $0x52c] ss:$16 sps:$4 sm:$0xff]   ;;  %v17992_v33 = vld [vmem:[#allocation7 + $0x528] ss:$16 sps:$4 sm:$0xff]  }
 0xad9   :  { %12363 = vmatprep.subr.bf16.mxu1 %v17919_v28  ;;  %12352 = vmatprep.mubr.bf16.mxu0 %v19268_v5  ;;  %v17932_v5 = vld [vmem:[#allocation7 + $0x468] ss:$16 sps:$4 sm:$0xff]   ;;  %v17997_v48 = vld [vmem:[#allocation7 + $0x72c] ss:$16 sps:$4 sm:$0xff]  }
 0xada   :  { %12393 = vmatprep.mubr.bf16.mxu1 %v19272_v60  ;;  %v17935_v60 = vld [vmem:[#allocation7 + $0x668] ss:$16 sps:$4 sm:$0xff]  }
 0xadb   :  { %12323 = vmatpush1.bf16.msra.mxu0 %v17914_v30  ;;  %v17995_v28 = vld [vmem:[#allocation7 + $0x728] ss:$16 sps:$4 sm:$0xff]   ;;  %v18000_v30 = vld [vmem:[#allocation7 + $0x50c] ss:$16 sps:$4 sm:$0xff]  }
 0xadc   :  { %12364 = vmatpush1.bf16.msra.mxu1 %v17917_v0  ;;  %12324 = vmatprep.subr.bf16.mxu0 %v17922_v46  ;;  %v18003_v0 = vld [vmem:[#allocation7 + $0x70c] ss:$16 sps:$4 sm:$0xff]   ;;  %v17998_v46 = vld [vmem:[#allocation7 + $0x508] ss:$16 sps:$4 sm:$0xff]  }
 0xadd   :  { %12365 = vmatprep.subr.bf16.mxu1 %v17925_v47  ;;  %v18001_v47 = vld [vmem:[#allocation7 + $0x708] ss:$16 sps:$4 sm:$0xff]  }
 0xadf   :  { %12325 = vmatpush1.bf16.msra.mxu0 %v17920_v17  ;;  %v10772_v17 = vld [vmem:[#allocation18 + $0x5] ss:$8 sm:$0xf] }
 0xae0   :  { %12366 = vmatpush1.bf16.msra.mxu1 %v17923_v24  ;;  %12326 = vmatprep.subr.bf16.mxu0 %v17928_v36  ;;  %v10777_v24 = vrot.slane %v10772_v17, %v18983_v32  ;;  %v10781_v36 = vrot.slane %v10772_v17, %v18986_v34 }
 0xae1   :  { %12367 = vmatprep.subr.bf16.mxu1 %v17931_v2 }
 0xae3   :  { %12327 = vmatpush1.bf16.msra.mxu0 %v17926_v11 }
 0xae4   :  { %12368 = vmatpush1.bf16.msra.mxu1 %v17929_v49  ;;  %12328 = vmatprep.subr.bf16.mxu0 %v17934_v15 }
 0xae5   :  { %12369 = vmatprep.subr.bf16.mxu1 %v17937_v61 }
 0xae7   :  { %12329 = vmatpush1.bf16.msra.mxu0 %v17932_v5 }
 0xae8   :  { %12370 = vmatpush1.bf16.msra.mxu1 %v17935_v60  ;;  %12330 = vmatprep.subr.bf16.mxu0 %v17940_v53 }
 0xae9   :  { %12371 = vmatprep.subr.bf16.mxu1 %v17943_v26 }
 0xaeb   :  { %12331 = vmatpush1.bf16.msra.mxu0 %v17938_v35 }
 0xaec   :  { %12372 = vmatpush1.bf16.msra.mxu1 %v17941_v54  ;;  %12332 = vmatprep.subr.bf16.mxu0 %v17946_v20 }
 0xaed   :  { %12373 = vmatprep.subr.bf16.mxu1 %v17949_v55 }
 0xaef   :  { %12333 = vmatpush1.bf16.msra.mxu0 %v17944_v44 }
 0xaf0   :  { %12374 = vmatpush1.bf16.msra.mxu1 %v17947_v16  ;;  %12334 = vmatprep.subr.bf16.mxu0 %v17952_v59 }
 0xaf1   :  { %12375 = vmatprep.subr.bf16.mxu1 %v17955_v23 }
 0xaf3   :  { %12335 = vmatpush1.bf16.msra.mxu0 %v17950_v57 }
 0xaf4   :  { %12376 = vmatpush1.bf16.msra.mxu1 %v17953_v56  ;;  %12336 = vmatprep.subr.bf16.mxu0 %v17958_v63 }
 0xaf5   :  { %12377 = vmatprep.subr.bf16.mxu1 %v17961_v27 }
 0xaf7   :  { %12337 = vmatpush2.bf16.msra.mxu0 %v17956_v18 }
 0xaf8   :  { %12378 = vmatpush2.bf16.msra.mxu1 %v17959_v25  ;;  %12338 = vmatprep.subr.bf16.mxu0 %v17964_v45 }
 0xaf9   :  { %12379 = vmatprep.subr.bf16.mxu1 %v17967_v1 }
 0xafb   :  { %12339 = vmatpush2.bf16.msra.mxu0 %v17962_v9 }
 0xafc   :  { %12380 = vmatpush2.bf16.msra.mxu1 %v17965_v41  ;;  %12340 = vmatprep.subr.bf16.mxu0 %v17970_v31 }
 0xafd   :  { %12381 = vmatprep.subr.bf16.mxu1 %v17973_v58 }
 0xaff   :  { %12341 = vmatpush2.bf16.msra.mxu0 %v17968_v6 }
 0xb00   :  { %12382 = vmatpush2.bf16.msra.mxu1 %v17971_v40  ;;  %12342 = vmatprep.subr.bf16.mxu0 %v17976_v37 }
 0xb01   :  { %12383 = vmatprep.subr.bf16.mxu1 %v17979_v10 }
 0xb03   :  { %12343 = vmatpush2.bf16.msra.mxu0 %v17974_v39 }
 0xb04   :  { %12384 = vmatpush2.bf16.msra.mxu1 %v17977_v12  ;;  %12344 = vmatprep.subr.bf16.mxu0 %v17982_v19  ;;  %v10785_v12 = vrot.slane %v10772_v17, %v18995_v7  ;;  %v10789_v19 = vrot.slane %v10772_v17, %v18998_v8 }
 0xb05   :  { %12385 = vmatprep.subr.bf16.mxu1 %v17985_v21 }
 0xb07   :  { %12345 = vmatpush2.bf16.msra.mxu0 %v17980_v38 }
 0xb08   :  { %12386 = vmatpush2.bf16.msra.mxu1 %v17983_v13  ;;  %12346 = vmatprep.subr.bf16.mxu0 %v17988_v22 }
 0xb09   :  { %12387 = vmatprep.subr.bf16.mxu1 %v17991_v42 }
 0xb0b   :  { %12347 = vmatpush2.bf16.msra.mxu0 %v17986_v3 }
 0xb0c   :  { %12388 = vmatpush2.bf16.msra.mxu1 %v17989_v43  ;;  %12348 = vmatprep.subr.bf16.mxu0 %v17994_v4 }
 0xb0d   :  { %12389 = vmatprep.subr.bf16.mxu1 %v17997_v48 }
 0xb0f   :  { %12349 = vmatpush2.bf16.msra.mxu0 %v17992_v33 }
 0xb10   :  { %12390 = vmatpush2.bf16.msra.mxu1 %v17995_v28  ;;  %12350 = vmatprep.subr.bf16.mxu0 %v18000_v30 }
 0xb11   :  { %12391 = vmatprep.subr.bf16.mxu1 %v18003_v0 }
 0xb13   :  { %12351 = vmatpush2.bf16.msra.mxu0 %v17998_v46 }
 0xb14   :  { %12392 = vmatpush2.bf16.msra.mxu1 %v18001_v47 }
 0xb16   :  { %v12108_v2 = vpop.f32.mrf.mxu0  ;;  %12353 = vmatmul.mubr.bf16.vlgmr.msra.gmra.mxu0 %v19280_v62 }
 0xb17   :  { %v12149_v11 = vpop.f32.mrf.mxu1  ;;  %12394 = vmatmul.mubr.bf16.vlgmr.msra.gmra.mxu1 %v19284_v51  ;;  %v12109_v49 = vadd.f32 %v12108_v2, %v10777_v24 }
 0xb18   :  { %v12110_v15 = vpop.f32.mrf.mxu0 }
 0xb19   :  { %v12151_v61 = vpop.f32.mrf.mxu1  ;;  %v12150_v5 = vadd.f32 %v12149_v11, %v12109_v49  ;;  %v12111_v60 = vadd.f32 %v12110_v15, %v10781_v36 }
 0xb1a   :  { %v12112_v53 = vpop.f32.mrf.mxu0 }
 0xb1b   :  { %v12153_v26 = vpop.f32.mrf.mxu1  ;;  %v12152_v35 = vadd.f32 %v12151_v61, %v12111_v60 }
 0xb1c   :  { %v12113_v54 = vpop.f32.mrf.mxu0 }
 0xb1d   :  { %v12154_v20 = vpop.f32.mrf.mxu1 }
 0xb56   :  { %v12190_v55 = vpop.f32.mrf.mxu0 }
 0xb57   :  { %v12231_v44 = vpop.f32.mrf.mxu1  ;;  %v12191_v16 = vadd.f32 %v12190_v55, %v12150_v5 }
 0xb58   :  { %v12192_v59 = vpop.f32.mrf.mxu0 }
 0xb59   :  { %v12233_v23 = vpop.f32.mrf.mxu1  ;;  %v12232_v57 = vadd.f32 %v12231_v44, %v12191_v16  ;;  %v12193_v56 = vadd.f32 %v12192_v59, %v12152_v35 }
 0xb5a   :  { %v12194_v62 = vpop.f32.mrf.mxu0 }
 0xb5b   :  { %v12235_v63 = vpop.f32.mrf.mxu1  ;;  %vm12402_vm1 = vcmp.ge.f32.partialorder %v12232_v57, 0.0  ;;  %v12406_v51 = vmul.f32 0.2, %v12232_v57  ;;  %v12234_v27 = vadd.f32 %v12233_v23, %v12193_v56 }
 0xb5c   :  { %v12195_v18 = vpop.f32.mrf.mxu0 }
 0xb5d   :  { %v12236_v25 = vpop.f32.mrf.mxu1  ;;  %v19298_v45 = vsel %vm12402_vm1, %v12232_v57, %v12406_v51  ;;  %vm12403_vm2 = vcmp.ge.f32.partialorder %v12234_v27, 0.0  ;;  %v12407_v1 = vmul.f32 0.2, %v12234_v27 }
 0xb5f   :  { %v12411_v9 = vsel %vm12403_vm2, %v12234_v27, %v12407_v1 }
 0xb96   :  { %v12272_v41 = vpop.f32.mrf.mxu0 }
 0xb97   :  { %v12313_v31 = vpop.f32.mrf.mxu1  ;;  %v12273_v21 = vadd.f32 %v12272_v41, %v10785_v12 }
 0xb98   :  { %v12274_v58 = vpop.f32.mrf.mxu0 }
 0xb99   :  { %v12315_v6 = vpop.f32.mrf.mxu1  ;;  %v12275_v38 = vadd.f32 %v12274_v58, %v10789_v19  ;;  %v12314_v13 = vadd.f32 %v12313_v31, %v12273_v21 }
 0xb9a   :  { %v12276_v40 = vpop.f32.mrf.mxu0 }
 0xb9b   :  { %v12317_v37 = vpop.f32.mrf.mxu1  ;;  %v12316_v3 = vadd.f32 %v12315_v6, %v12275_v38 }
 0xb9c   :  { %v12277_v10 = vpop.f32.mrf.mxu0 }
 0xb9d   :  { %v12318_v39 = vpop.f32.mrf.mxu1 }
 0xbd6   :  { %v12354_v22 = vpop.f32.mrf.mxu0 }
 0xbd7   :  { %v12395_v42 = vpop.f32.mrf.mxu1  ;;  %v12355_v43 = vadd.f32 %v12354_v22, %v12314_v13 }
 0xbd8   :  { %v12356_v4 = vpop.f32.mrf.mxu0 }
 0xbd9   :  { %v12397_v48 = vpop.f32.mrf.mxu1  ;;  %v12396_v33 = vadd.f32 %v12395_v42, %v12355_v43  ;;  %v12357_v28 = vadd.f32 %v12356_v4, %v12316_v3 }
 0xbda   :  { %v12358_v30 = vpop.f32.mrf.mxu0 }
 0xbdb   :  { %v12399_v0 = vpop.f32.mrf.mxu1  ;;  %vm12404_vm3 = vcmp.ge.f32.partialorder %v12396_v33, 0.0  ;;  %v12408_v46 = vmul.f32 0.2, %v12396_v33  ;;  %v12398_v47 = vadd.f32 %v12397_v48, %v12357_v28 }
 0xbdc   :  { %v12359_v24 = vpop.f32.mrf.mxu0 }
 0xbdd   :  { %v12400_v36 = vpop.f32.mrf.mxu1  ;;  %v19302_v2 = vsel %vm12404_vm3, %v12396_v33, %v12408_v46  ;;  %vm12405_vm4 = vcmp.ge.f32.partialorder %v12398_v47, 0.0  ;;  %v12409_v17 = vmul.f32 0.2, %v12398_v47 }
 0xbdf   :  { %v12413_v11 = vsel %vm12405_vm4, %v12398_v47, %v12409_v17 }
 0xbe0   :  { %18780 = dma.done.wait [#allocation13 + $0x6], 8192 }
 0xbe1   :  { %18781 = vsyncadd [#allocation13 + $0x6], 4294959104  ;;  %v12481_v49 = vpack.c.bf16 %v12411_v9, %v12411_v9  ;;  %v12483_v15 = vpack.c.bf16 %v12413_v11, %v12413_v11  ;;  %v18004_v61 = vld [vmem:[#allocation8 + $0x74] ss:$8 sps:$4 sm:$0xff]   ;;  %v18008_v60 = vld [vmem:[#allocation8 + $0x70] ss:$8 sps:$4 sm:$0xff]  }
 0xbe2   :  { %v18006_v5 = vld [vmem:[#allocation8 + $0x174] ss:$8 sps:$4 sm:$0xff]   ;;  %12817 = vmatprep.subr.bf16.mxu0 %v18004_v61  ;;  %v18009_v53 = vld [vmem:[#allocation8 + $0x170] ss:$8 sps:$4 sm:$0xff]   ;;  %v18010_v26 = vld [vmem:[#allocation8 + $0x64] ss:$8 sps:$4 sm:$0xff]  }
 0xbe3   :  { %12849 = vmatprep.mubr.bf16.mxu0 %v12481_v49  ;;  %12890 = vmatprep.mubr.bf16.mxu1 %v12483_v15  ;;  %v18012_v35 = vld [vmem:[#allocation8 + $0x164] ss:$8 sps:$4 sm:$0xff]   ;;  %v18014_v54 = vld [vmem:[#allocation8 + $0x60] ss:$8 sps:$4 sm:$0xff]   ;;  %v18016_v55 = vld [vmem:[#allocation8 + $0x54] ss:$8 sps:$4 sm:$0xff]  }
 0xbe4   :  { %12858 = vmatprep.subr.bf16.mxu1 %v18006_v5  ;;  %12818 = vmatpush1.bf16.msra.mxu0 %v18008_v60  ;;  %v18015_v20 = vld [vmem:[#allocation8 + $0x160] ss:$8 sps:$4 sm:$0xff]   ;;  %v18018_v44 = vld [vmem:[#allocation8 + $0x154] ss:$8 sps:$4 sm:$0xff]   ;;  %v18020_v16 = vld [vmem:[#allocation8 + $0x50] ss:$8 sps:$4 sm:$0xff]  }
 0xbe5   :  { %12859 = vmatpush1.bf16.msra.mxu1 %v18009_v53  ;;  %12819 = vmatprep.subr.bf16.mxu0 %v18010_v26  ;;  %v18021_v59 = vld [vmem:[#allocation8 + $0x150] ss:$8 sps:$4 sm:$0xff]   ;;  %v18022_v23 = vld [vmem:[#allocation8 + $0x44] ss:$8 sps:$4 sm:$0xff]   ;;  %v18026_v56 = vld [vmem:[#allocation8 + $0x40] ss:$8 sps:$4 sm:$0xff]  }
 0xbe6   :  { %12860 = vmatprep.subr.bf16.mxu1 %v18012_v35  ;;  %v18024_v57 = vld [vmem:[#allocation8 + $0x144] ss:$8 sps:$4 sm:$0xff]   ;;  %v18027_v62 = vld [vmem:[#allocation8 + $0x140] ss:$8 sps:$4 sm:$0xff]   ;;  %v18028_v63 = vld [vmem:[#allocation8 + $0x34] ss:$8 sps:$4 sm:$0xff]  }
 0xbe7   :  { %v18030_v51 = vld [vmem:[#allocation8 + $0x134] ss:$8 sps:$4 sm:$0xff]   ;;  %v18032_v27 = vld [vmem:[#allocation8 + $0x30] ss:$8 sps:$4 sm:$0xff]   ;;  %v18034_v25 = vld [vmem:[#allocation8 + $0x24] ss:$8 sps:$4 sm:$0xff]  }
 0xbe8   :  { %12820 = vmatpush1.bf16.msra.mxu0 %v18014_v54  ;;  %v18033_v18 = vld [vmem:[#allocation8 + $0x130] ss:$8 sps:$4 sm:$0xff]   ;;  %v18036_v1 = vld [vmem:[#allocation8 + $0x124] ss:$8 sps:$4 sm:$0xff]   ;;  %v18038_v9 = vld [vmem:[#allocation8 + $0x20] ss:$8 sps:$4 sm:$0xff]  }
 0xbe9   :  { %12861 = vmatpush1.bf16.msra.mxu1 %v18015_v20  ;;  %12821 = vmatprep.subr.bf16.mxu0 %v18016_v55  ;;  %v18039_v41 = vld [vmem:[#allocation8 + $0x120] ss:$8 sps:$4 sm:$0xff]   ;;  %v18040_v31 = vld [vmem:[#allocation8 + $0x14] ss:$8 sps:$4 sm:$0xff]   ;;  %v18044_v6 = vld [vmem:[#allocation8 + $0x10] ss:$8 sps:$4 sm:$0xff]  }
 0xbea   :  { %12862 = vmatprep.subr.bf16.mxu1 %v18018_v44  ;;  %v18042_v58 = vld [vmem:[#allocation8 + $0x114] ss:$8 sps:$4 sm:$0xff]   ;;  %v18045_v40 = vld [vmem:[#allocation8 + $0x110] ss:$8 sps:$4 sm:$0xff]   ;;  %v18046_v37 = vld [vmem:[#allocation8 + $0x4] ss:$8 sps:$4 sm:$0xff]  }
 0xbeb   :  { %v18048_v10 = vld [vmem:[#allocation8 + $0x104] ss:$8 sps:$4 sm:$0xff]   ;;  %v18050_v39 = vld [vmem:[#allocation8] ss:$8 sps:$4 sm:$0xff]   ;;  %v18052_v19 = vld [vmem:[#allocation8 + $0xf4] ss:$8 sps:$4 sm:$0xff]  }
 0xbec   :  { %12822 = vmatpush1.bf16.msra.mxu0 %v18020_v16  ;;  %v18051_v12 = vld [vmem:[#allocation8 + $0x100] ss:$8 sps:$4 sm:$0xff]   ;;  %v18054_v21 = vld [vmem:[#allocation8 + $0x1f4] ss:$8 sps:$4 sm:$0xff]   ;;  %v18056_v38 = vld [vmem:[#allocation8 + $0xf0] ss:$8 sps:$4 sm:$0xff]   ;;  %v12480_v16 = vpack.c.bf16 %v19298_v45, %v19298_v45 }
 0xbed   :  { %12863 = vmatpush1.bf16.msra.mxu1 %v18021_v59  ;;  %12823 = vmatprep.subr.bf16.mxu0 %v18022_v23  ;;  %v18057_v13 = vld [vmem:[#allocation8 + $0x1f0] ss:$8 sps:$4 sm:$0xff]   ;;  %v18058_v22 = vld [vmem:[#allocation8 + $0xe4] ss:$8 sps:$4 sm:$0xff]   ;;  %v18062_v3 = vld [vmem:[#allocation8 + $0xe0] ss:$8 sps:$4 sm:$0xff]   ;;  %v12482_v59 = vpack.c.bf16 %v19302_v2, %v19302_v2 }
 0xbee   :  { %12864 = vmatprep.subr.bf16.mxu1 %v18024_v57  ;;  %v18060_v42 = vld [vmem:[#allocation8 + $0x1e4] ss:$8 sps:$4 sm:$0xff]   ;;  %v18063_v43 = vld [vmem:[#allocation8 + $0x1e0] ss:$8 sps:$4 sm:$0xff]   ;;  %v18064_v4 = vld [vmem:[#allocation8 + $0xd4] ss:$8 sps:$4 sm:$0xff]  }
 0xbef   :  { %v18066_v48 = vld [vmem:[#allocation8 + $0x1d4] ss:$8 sps:$4 sm:$0xff]   ;;  %v18068_v33 = vld [vmem:[#allocation8 + $0xd0] ss:$8 sps:$4 sm:$0xff]   ;;  %v18070_v30 = vld [vmem:[#allocation8 + $0xc4] ss:$8 sps:$4 sm:$0xff]  }
 0xbf0   :  { %12824 = vmatpush1.bf16.msra.mxu0 %v18026_v56  ;;  %v18069_v28 = vld [vmem:[#allocation8 + $0x1d0] ss:$8 sps:$4 sm:$0xff]   ;;  %v18072_v0 = vld [vmem:[#allocation8 + $0x1c4] ss:$8 sps:$4 sm:$0xff]   ;;  %v18074_v46 = vld [vmem:[#allocation8 + $0xc0] ss:$8 sps:$4 sm:$0xff]  }
 0xbf1   :  { %12865 = vmatpush1.bf16.msra.mxu1 %v18027_v62  ;;  %12825 = vmatprep.subr.bf16.mxu0 %v18028_v63  ;;  %v18075_v47 = vld [vmem:[#allocation8 + $0x1c0] ss:$8 sps:$4 sm:$0xff]   ;;  %v18076_v24 = vld [vmem:[#allocation8 + $0xb4] ss:$8 sps:$4 sm:$0xff]   ;;  %v18080_v17 = vld [vmem:[#allocation8 + $0xb0] ss:$8 sps:$4 sm:$0xff]  }
 0xbf2   :  { %12866 = vmatprep.subr.bf16.mxu1 %v18030_v51  ;;  %v18078_v36 = vld [vmem:[#allocation8 + $0x1b4] ss:$8 sps:$4 sm:$0xff]   ;;  %v18081_v11 = vld [vmem:[#allocation8 + $0x1b0] ss:$8 sps:$4 sm:$0xff]   ;;  %v18082_v49 = vld [vmem:[#allocation8 + $0xa4] ss:$8 sps:$4 sm:$0xff]  }
 0xbf3   :  { %v18084_v15 = vld [vmem:[#allocation8 + $0x1a4] ss:$8 sps:$4 sm:$0xff]   ;;  %v18086_v61 = vld [vmem:[#allocation8 + $0xa0] ss:$8 sps:$4 sm:$0xff]   ;;  %v18088_v60 = vld [vmem:[#allocation8 + $0x94] ss:$8 sps:$4 sm:$0xff]  }
 0xbf4   :  { %12826 = vmatpush1.bf16.msra.mxu0 %v18032_v27  ;;  %v18087_v5 = vld [vmem:[#allocation8 + $0x1a0] ss:$8 sps:$4 sm:$0xff]   ;;  %v18090_v53 = vld [vmem:[#allocation8 + $0x194] ss:$8 sps:$4 sm:$0xff]   ;;  %v18092_v26 = vld [vmem:[#allocation8 + $0x90] ss:$8 sps:$4 sm:$0xff]  }
 0xbf5   :  { %12867 = vmatpush1.bf16.msra.mxu1 %v18033_v18  ;;  %12827 = vmatprep.subr.bf16.mxu0 %v18034_v25  ;;  %v18093_v35 = vld [vmem:[#allocation8 + $0x190] ss:$8 sps:$4 sm:$0xff]   ;;  %v18094_v54 = vld [vmem:[#allocation8 + $0x84] ss:$8 sps:$4 sm:$0xff]   ;;  %v18098_v55 = vld [vmem:[#allocation8 + $0x80] ss:$8 sps:$4 sm:$0xff]  }
 0xbf6   :  { %12868 = vmatprep.subr.bf16.mxu1 %v18036_v1  ;;  %v18096_v20 = vld [vmem:[#allocation8 + $0x184] ss:$8 sps:$4 sm:$0xff]   ;;  %v18099_v44 = vld [vmem:[#allocation8 + $0x180] ss:$8 sps:$4 sm:$0xff]  }
 0xbf7   :  { %v12485_v23 = vld [vmem:[#allocation18 + $0x6] ss:$8 sm:$0x3] }
 0xbf8   :  { %12828 = vmatpush1.bf16.msra.mxu0 %v18038_v9  ;;  %v12490_v57 = vrot.slane %v12485_v23, %v18983_v32  ;;  %v12494_v56 = vrot.slane %v12485_v23, %v18986_v34 }
 0xbf9   :  { %12869 = vmatpush1.bf16.msra.mxu1 %v18039_v41  ;;  %12829 = vmatprep.subr.bf16.mxu0 %v18040_v31 }
 0xbfa   :  { %12870 = vmatprep.subr.bf16.mxu1 %v18042_v58 }
 0xbfc   :  { %12830 = vmatpush1.bf16.msra.mxu0 %v18044_v6 }
 0xbfd   :  { %12871 = vmatpush1.bf16.msra.mxu1 %v18045_v40  ;;  %12831 = vmatprep.subr.bf16.mxu0 %v18046_v37 }
 0xbfe   :  { %12872 = vmatprep.subr.bf16.mxu1 %v18048_v10 }
 0xc00   :  { %12832 = vmatpush1.bf16.msra.mxu0 %v18050_v39 }
 0xc01   :  { %12873 = vmatpush1.bf16.msra.mxu1 %v18051_v12  ;;  %12833 = vmatprep.subr.bf16.mxu0 %v18052_v19 }
 0xc02   :  { %12874 = vmatprep.subr.bf16.mxu1 %v18054_v21 }
 0xc04   :  { %12834 = vmatpush2.bf16.msra.mxu0 %v18056_v38 }
 0xc05   :  { %12875 = vmatpush2.bf16.msra.mxu1 %v18057_v13  ;;  %12835 = vmatprep.subr.bf16.mxu0 %v18058_v22 }
 0xc06   :  { %12876 = vmatprep.subr.bf16.mxu1 %v18060_v42 }
 0xc08   :  { %12836 = vmatpush2.bf16.msra.mxu0 %v18062_v3 }
 0xc09   :  { %12877 = vmatpush2.bf16.msra.mxu1 %v18063_v43  ;;  %12837 = vmatprep.subr.bf16.mxu0 %v18064_v4 }
 0xc0a   :  { %12878 = vmatprep.subr.bf16.mxu1 %v18066_v48 }
 0xc0c   :  { %12838 = vmatpush2.bf16.msra.mxu0 %v18068_v33 }
 0xc0d   :  { %12879 = vmatpush2.bf16.msra.mxu1 %v18069_v28  ;;  %12839 = vmatprep.subr.bf16.mxu0 %v18070_v30 }
 0xc0e   :  { %12880 = vmatprep.subr.bf16.mxu1 %v18072_v0 }
 0xc10   :  { %12840 = vmatpush2.bf16.msra.mxu0 %v18074_v46 }
 0xc11   :  { %12881 = vmatpush2.bf16.msra.mxu1 %v18075_v47  ;;  %12841 = vmatprep.subr.bf16.mxu0 %v18076_v24 }
 0xc12   :  { %12882 = vmatprep.subr.bf16.mxu1 %v18078_v36 }
 0xc14   :  { %12842 = vmatpush2.bf16.msra.mxu0 %v18080_v17 }
 0xc15   :  { %12883 = vmatpush2.bf16.msra.mxu1 %v18081_v11  ;;  %12843 = vmatprep.subr.bf16.mxu0 %v18082_v49 }
 0xc16   :  { %12884 = vmatprep.subr.bf16.mxu1 %v18084_v15 }
 0xc18   :  { %12844 = vmatpush2.bf16.msra.mxu0 %v18086_v61 }
 0xc19   :  { %12885 = vmatpush2.bf16.msra.mxu1 %v18087_v5  ;;  %12845 = vmatprep.subr.bf16.mxu0 %v18088_v60 }
 0xc1a   :  { %12886 = vmatprep.subr.bf16.mxu1 %v18090_v53 }
 0xc1c   :  { %12846 = vmatpush2.bf16.msra.mxu0 %v18092_v26 }
 0xc1d   :  { %12887 = vmatpush2.bf16.msra.mxu1 %v18093_v35  ;;  %12847 = vmatprep.subr.bf16.mxu0 %v18094_v54 }
 0xc1e   :  { %12888 = vmatprep.subr.bf16.mxu1 %v18096_v20 }
 0xc20   :  { %12848 = vmatpush2.bf16.msra.mxu0 %v18098_v55 }
 0xc21   :  { %12889 = vmatpush2.bf16.msra.mxu1 %v18099_v44 }
 0xc23   :  { %12850 = vmatmul.mubr.bf16.vlgmr.msra.gmra.mxu0 %v12480_v16 }
 0xc24   :  { %12891 = vmatmul.mubr.bf16.vlgmr.msra.gmra.mxu1 %v12482_v59 }
 0xce3   :  { %v12851_v62 = vpop.f32.mrf.mxu0 }
 0xce4   :  { %v12892_v63 = vpop.f32.mrf.mxu1  ;;  %v12852_v51 = vadd.f32 %v12851_v62, %v12490_v57 }
 0xce5   :  { %v12853_v27 = vpop.f32.mrf.mxu0 }
 0xce6   :  { %v12894_v18 = vpop.f32.mrf.mxu1  ;;  %v12893_v25 = vadd.f32 %v12892_v63, %v12852_v51  ;;  %v12854_v1 = vadd.f32 %v12853_v27, %v12494_v56 }
 0xce7   :  { %v12855_v45 = vpop.f32.mrf.mxu0 }
 0xce8   :  { %v12896_v9 = vpop.f32.mrf.mxu1  ;;  %vm12899_vm5 = vcmp.ge.f32.partialorder %v12893_v25, 0.0  ;;  %v12901_v2 = vmul.f32 0.2, %v12893_v25  ;;  %v12895_v41 = vadd.f32 %v12894_v18, %v12854_v1 }
 0xce9   :  { %v12856_v31 = vpop.f32.mrf.mxu0 }
 0xcea   :  { %v12897_v58 = vpop.f32.mrf.mxu1  ;;  %v19310_v6 = vsel %vm12899_vm5, %v12893_v25, %v12901_v2  ;;  %vm12900_vm6 = vcmp.ge.f32.partialorder %v12895_v41, 0.0  ;;  %v12902_v40 = vmul.f32 0.2, %v12895_v41 }
 0xcec   :  { %v12904_v37 = vsel %vm12900_vm6, %v12895_v41, %v12902_v40 }
 0xced   :  { %18782 = dma.done.wait [#allocation13 + $0x7], 4096 }
 0xcee   :  { %18783 = vsyncadd [#allocation13 + $0x7], 4294963200  ;;  %v12941_v10 = vpack.c.bf16 %v12904_v37, %v12904_v37  ;;  %v18100_v39 = vld [vmem:[#allocation9 + $0x74] ss:$8 sps:$4 sm:$0xff]   ;;  %v18102_v12 = vld [vmem:[#allocation9 + $0x70] ss:$8 sps:$4 sm:$0xff]   ;;  %v12940_v55 = vpack.c.bf16 %v19310_v6, %v19310_v6 }
 0xcef   :  { %13115 = vmatprep.subr.bf16.mxu0 %v18100_v39  ;;  %v18103_v19 = vld [vmem:[#allocation9 + $0x64] ss:$8 sps:$4 sm:$0xff]   ;;  %v18105_v21 = vld [vmem:[#allocation9 + $0x60] ss:$8 sps:$4 sm:$0xff]   ;;  %v18106_v38 = vld [vmem:[#allocation9 + $0x54] ss:$8 sps:$4 sm:$0xff]  }
 0xcf0   :  { %13147 = vmatprep.mubr.bf16.mxu0 %v12941_v10  ;;  %13116 = vmatpush1.bf16.msra.mxu0 %v18102_v12  ;;  %v18108_v13 = vld [vmem:[#allocation9 + $0x50] ss:$8 sps:$4 sm:$0xff]   ;;  %v18109_v22 = vld [vmem:[#allocation9 + $0x44] ss:$8 sps:$4 sm:$0xff]   ;;  %v18111_v42 = vld [vmem:[#allocation9 + $0x40] ss:$8 sps:$4 sm:$0xff]  }
 0xcf1   :  { %13117 = vmatprep.subr.bf16.mxu0 %v18103_v19  ;;  %v18112_v3 = vld [vmem:[#allocation9 + $0x34] ss:$8 sps:$4 sm:$0xff]   ;;  %v18114_v43 = vld [vmem:[#allocation9 + $0x30] ss:$8 sps:$4 sm:$0xff]   ;;  %v18115_v4 = vld [vmem:[#allocation9 + $0x24] ss:$8 sps:$4 sm:$0xff]  }
 0xcf2   :  { %v18117_v48 = vld [vmem:[#allocation9 + $0x20] ss:$8 sps:$4 sm:$0xff]   ;;  %v18118_v33 = vld [vmem:[#allocation9 + $0x14] ss:$8 sps:$4 sm:$0xff]   ;;  %v18120_v28 = vld [vmem:[#allocation9 + $0x10] ss:$8 sps:$4 sm:$0xff]  }
 0xcf3   :  { %v18121_v30 = vld [vmem:[#allocation9 + $0x4] ss:$8 sps:$4 sm:$0xff]   ;;  %v18123_v0 = vld [vmem:[#allocation9] ss:$8 sps:$4 sm:$0xff]   ;;  %v18124_v46 = vld [vmem:[#allocation9 + $0xf4] ss:$8 sps:$4 sm:$0xff]  }
 0xcf4   :  { %13118 = vmatpush1.bf16.msra.mxu0 %v18105_v21  ;;  %v18126_v47 = vld [vmem:[#allocation9 + $0xf0] ss:$8 sps:$4 sm:$0xff]   ;;  %v18127_v24 = vld [vmem:[#allocation9 + $0xe4] ss:$8 sps:$4 sm:$0xff]   ;;  %v18129_v36 = vld [vmem:[#allocation9 + $0xe0] ss:$8 sps:$4 sm:$0xff]  }
 0xcf5   :  { %13119 = vmatprep.subr.bf16.mxu0 %v18106_v38  ;;  %v18130_v17 = vld [vmem:[#allocation9 + $0xd4] ss:$8 sps:$4 sm:$0xff]   ;;  %v18132_v11 = vld [vmem:[#allocation9 + $0xd0] ss:$8 sps:$4 sm:$0xff]   ;;  %v18133_v49 = vld [vmem:[#allocation9 + $0xc4] ss:$8 sps:$4 sm:$0xff]  }
 0xcf6   :  { %v18135_v15 = vld [vmem:[#allocation9 + $0xc0] ss:$8 sps:$4 sm:$0xff]   ;;  %v18136_v61 = vld [vmem:[#allocation9 + $0xb4] ss:$8 sps:$4 sm:$0xff]   ;;  %v18138_v5 = vld [vmem:[#allocation9 + $0xb0] ss:$8 sps:$4 sm:$0xff]  }
 0xcf7   :  { %v18139_v60 = vld [vmem:[#allocation9 + $0xa4] ss:$8 sps:$4 sm:$0xff]   ;;  %v18141_v53 = vld [vmem:[#allocation9 + $0xa0] ss:$8 sps:$4 sm:$0xff]   ;;  %v18142_v26 = vld [vmem:[#allocation9 + $0x94] ss:$8 sps:$4 sm:$0xff]  }
 0xcf8   :  { %13120 = vmatpush1.bf16.msra.mxu0 %v18108_v13  ;;  %v18144_v35 = vld [vmem:[#allocation9 + $0x90] ss:$8 sps:$4 sm:$0xff]   ;;  %v18145_v54 = vld [vmem:[#allocation9 + $0x84] ss:$8 sps:$4 sm:$0xff]   ;;  %v18147_v20 = vld [vmem:[#allocation9 + $0x80] ss:$8 sps:$4 sm:$0xff]  }
 0xcf9   :  { %13121 = vmatprep.subr.bf16.mxu0 %v18109_v22  ;;  %v12943_v44 = vld [vmem:[#allocation18 + $0x7] ss:$8 sm:$0x3] }
 0xcfa   :  { %v12948_v16 = vrot.slane %v12943_v44, %v18983_v32  ;;  %v12952_v59 = vrot.slane %v12943_v44, %v18986_v34 }
 0xcfc   :  { %13122 = vmatpush1.bf16.msra.mxu0 %v18111_v42 }
 0xcfd   :  { %13123 = vmatprep.subr.bf16.mxu0 %v18112_v3 }
 0xd00   :  { %13124 = vmatpush1.bf16.msra.mxu0 %v18114_v43 }
 0xd01   :  { %13125 = vmatprep.subr.bf16.mxu0 %v18115_v4 }
 0xd04   :  { %13126 = vmatpush1.bf16.msra.mxu0 %v18117_v48 }
 0xd05   :  { %13127 = vmatprep.subr.bf16.mxu0 %v18118_v33 }
 0xd08   :  { %13128 = vmatpush1.bf16.msra.mxu0 %v18120_v28 }
 0xd09   :  { %13129 = vmatprep.subr.bf16.mxu0 %v18121_v30 }
 0xd0c   :  { %13130 = vmatpush1.bf16.msra.mxu0 %v18123_v0 }
 0xd0d   :  { %13131 = vmatprep.subr.bf16.mxu0 %v18124_v46 }
 0xd10   :  { %13132 = vmatpush2.bf16.msra.mxu0 %v18126_v47 }
 0xd11   :  { %13133 = vmatprep.subr.bf16.mxu0 %v18127_v24 }
 0xd14   :  { %13134 = vmatpush2.bf16.msra.mxu0 %v18129_v36 }
 0xd15   :  { %13135 = vmatprep.subr.bf16.mxu0 %v18130_v17 }
 0xd18   :  { %13136 = vmatpush2.bf16.msra.mxu0 %v18132_v11 }
 0xd19   :  { %13137 = vmatprep.subr.bf16.mxu0 %v18133_v49 }
 0xd1c   :  { %13138 = vmatpush2.bf16.msra.mxu0 %v18135_v15 }
 0xd1d   :  { %13139 = vmatprep.subr.bf16.mxu0 %v18136_v61 }
 0xd20   :  { %13140 = vmatpush2.bf16.msra.mxu0 %v18138_v5 }
 0xd21   :  { %13141 = vmatprep.subr.bf16.mxu0 %v18139_v60 }
 0xd24   :  { %13142 = vmatpush2.bf16.msra.mxu0 %v18141_v53 }
 0xd25   :  { %13143 = vmatprep.subr.bf16.mxu0 %v18142_v26 }
 0xd28   :  { %13144 = vmatpush2.bf16.msra.mxu0 %v18144_v35 }
 0xd29   :  { %13145 = vmatprep.subr.bf16.mxu0 %v18145_v54 }
 0xd2c   :  { %13146 = vmatpush2.bf16.msra.mxu0 %v18147_v20 }
 0xd2f   :  { %13148 = vmatmul.mubr.bf16.vlgmr.msra.gmra.mxu0 %v12940_v55 }
 0xdef   :  { %v13149_v23 = vpop.f32.mrf.mxu0 }
 0xdf0   :  { %v13150_v57 = vadd.f32 %v13149_v23, %v12948_v16 }
 0xdf1   :  { %v13151_v56 = vpop.f32.mrf.mxu0 }
 0xdf2   :  { %vm13156_vm7 = vcmp.ge.f32.partialorder %v13150_v57, 0.0  ;;  %v13158_v62 = vmul.f32 0.2, %v13150_v57  ;;  %v13152_v63 = vadd.f32 %v13151_v56, %v12952_v59 }
 0xdf3   :  { %v13153_v51 = vpop.f32.mrf.mxu0 }
 0xdf4   :  { %v19316_v27 = vsel %vm13156_vm7, %v13150_v57, %v13158_v62  ;;  %vm13157_vm8 = vcmp.ge.f32.partialorder %v13152_v63, 0.0  ;;  %v13159_v18 = vmul.f32 0.2, %v13152_v63 }
 0xdf5   :  { %v13154_v25 = vpop.f32.mrf.mxu0 }
 0xdf6   :  { %v13161_v1 = vsel %vm13157_vm8, %v13152_v63, %v13159_v18 }
 0xdf7   :  { %18784 = dma.done.wait [#allocation13 + $0x8], 12288 }
 0xdf8   :  { %18785 = vsyncadd [#allocation13 + $0x8], 4294955008  ;;  %v13264_v45 = vpack.c.bf16 %v13161_v1, %v13161_v1  ;;  %v18148_v9 = vld [vmem:[#allocation10 + $0x1e4] ss:$16 sps:$4 sm:$0xff]   ;;  %v18150_v2 = vld [vmem:[#allocation10 + $0x1e0] ss:$16 sps:$4 sm:$0xff]  }
 0xdf9   :  { %13585 = vmatprep.subr.bf16.mxu1 %v18148_v9  ;;  %v18151_v41 = vld [vmem:[#allocation10 + $0x1c4] ss:$16 sps:$4 sm:$0xff]   ;;  %v18153_v31 = vld [vmem:[#allocation10 + $0x1c0] ss:$16 sps:$4 sm:$0xff]   ;;  %v18193_v38 = vld [vmem:[#allocation10 + $0x1ec] ss:$16 sps:$4 sm:$0xff]  }
 0xdfa   :  { %13617 = vmatprep.mubr.bf16.mxu1 %v13264_v45  ;;  %13658 = vmatprep.mubr.bf16.mxu0 %v13264_v45  ;;  %v18154_v58 = vld [vmem:[#allocation10 + $0x1a4] ss:$16 sps:$4 sm:$0xff]   ;;  %v18156_v6 = vld [vmem:[#allocation10 + $0x1a0] ss:$16 sps:$4 sm:$0xff]   ;;  %v18195_v13 = vld [vmem:[#allocation10 + $0x1e8] ss:$16 sps:$4 sm:$0xff]  }
 0xdfb   :  { %13586 = vmatpush1.bf16.msra.mxu1 %v18150_v2  ;;  %v18157_v40 = vld [vmem:[#allocation10 + $0x184] ss:$16 sps:$4 sm:$0xff]   ;;  %v18159_v37 = vld [vmem:[#allocation10 + $0x180] ss:$16 sps:$4 sm:$0xff]   ;;  %13626 = vmatprep.subr.bf16.mxu0 %v18193_v38  ;;  %v18199_v42 = vld [vmem:[#allocation10 + $0x1cc] ss:$16 sps:$4 sm:$0xff]   ;;  %v13263_v2 = vpack.c.bf16 %v19316_v27, %v19316_v27 }
 0xdfc   :  { %13587 = vmatprep.subr.bf16.mxu1 %v18151_v41  ;;  %v18160_v10 = vld [vmem:[#allocation10 + $0x164] ss:$16 sps:$4 sm:$0xff]   ;;  %v18162_v39 = vld [vmem:[#allocation10 + $0x160] ss:$16 sps:$4 sm:$0xff]   ;;  %13627 = vmatpush1.bf16.msra.mxu0 %v18195_v13  ;;  %v18201_v3 = vld [vmem:[#allocation10 + $0x1c8] ss:$16 sps:$4 sm:$0xff]  }
 0xdfd   :  { %v18163_v12 = vld [vmem:[#allocation10 + $0x144] ss:$16 sps:$4 sm:$0xff]   ;;  %v18165_v19 = vld [vmem:[#allocation10 + $0x140] ss:$16 sps:$4 sm:$0xff]   ;;  %13628 = vmatprep.subr.bf16.mxu0 %v18199_v42  ;;  %v18205_v48 = vld [vmem:[#allocation10 + $0x1ac] ss:$16 sps:$4 sm:$0xff]  }
 0xdfe   :  { %v18166_v21 = vld [vmem:[#allocation10 + $0x124] ss:$16 sps:$4 sm:$0xff]   ;;  %v18168_v22 = vld [vmem:[#allocation10 + $0x120] ss:$16 sps:$4 sm:$0xff]   ;;  %v18207_v28 = vld [vmem:[#allocation10 + $0x1a8] ss:$16 sps:$4 sm:$0xff]  }
 0xdff   :  { %13588 = vmatpush1.bf16.msra.mxu1 %v18153_v31  ;;  %v18169_v43 = vld [vmem:[#allocation10 + $0x104] ss:$16 sps:$4 sm:$0xff]   ;;  %v18171_v4 = vld [vmem:[#allocation10 + $0x100] ss:$16 sps:$4 sm:$0xff]   ;;  %v18211_v30 = vld [vmem:[#allocation10 + $0x18c] ss:$16 sps:$4 sm:$0xff]  }
 0xe00   :  { %13589 = vmatprep.subr.bf16.mxu1 %v18154_v58  ;;  %v18172_v33 = vld [vmem:[#allocation10 + $0x2e4] ss:$16 sps:$4 sm:$0xff]   ;;  %13629 = vmatpush1.bf16.msra.mxu0 %v18201_v3  ;;  %v18174_v0 = vld [vmem:[#allocation10 + $0x2e0] ss:$16 sps:$4 sm:$0xff]   ;;  %v18213_v47 = vld [vmem:[#allocation10 + $0x188] ss:$16 sps:$4 sm:$0xff]  }
 0xe01   :  { %13630 = vmatprep.subr.bf16.mxu0 %v18205_v48  ;;  %v18175_v46 = vld [vmem:[#allocation10 + $0x2c4] ss:$16 sps:$4 sm:$0xff]   ;;  %v18217_v24 = vld [vmem:[#allocation10 + $0x16c] ss:$16 sps:$4 sm:$0xff]   ;;  %v18177_v36 = vld [vmem:[#allocation10 + $0x2c0] ss:$16 sps:$4 sm:$0xff]  }
 0xe02   :  { %v18178_v17 = vld [vmem:[#allocation10 + $0x2a4] ss:$16 sps:$4 sm:$0xff]   ;;  %v18219_v11 = vld [vmem:[#allocation10 + $0x168] ss:$16 sps:$4 sm:$0xff]   ;;  %v18223_v49 = vld [vmem:[#allocation10 + $0x14c] ss:$16 sps:$4 sm:$0xff]  }
 0xe03   :  { %13590 = vmatpush1.bf16.msra.mxu1 %v18156_v6  ;;  %v18180_v15 = vld [vmem:[#allocation10 + $0x2a0] ss:$16 sps:$4 sm:$0xff]   ;;  %v18181_v61 = vld [vmem:[#allocation10 + $0x284] ss:$16 sps:$4 sm:$0xff]   ;;  %v18225_v5 = vld [vmem:[#allocation10 + $0x148] ss:$16 sps:$4 sm:$0xff]  }
 0xe04   :  { %13591 = vmatprep.subr.bf16.mxu1 %v18157_v40  ;;  %13631 = vmatpush1.bf16.msra.mxu0 %v18207_v28  ;;  %v18229_v60 = vld [vmem:[#allocation10 + $0x12c] ss:$16 sps:$4 sm:$0xff]   ;;  %v18183_v53 = vld [vmem:[#allocation10 + $0x280] ss:$16 sps:$4 sm:$0xff]   ;;  %v18184_v26 = vld [vmem:[#allocation10 + $0x264] ss:$16 sps:$4 sm:$0xff]  }
 0xe05   :  { %13632 = vmatprep.subr.bf16.mxu0 %v18211_v30  ;;  %v18231_v35 = vld [vmem:[#allocation10 + $0x128] ss:$16 sps:$4 sm:$0xff]   ;;  %v18235_v54 = vld [vmem:[#allocation10 + $0x10c] ss:$16 sps:$4 sm:$0xff]   ;;  %v18186_v20 = vld [vmem:[#allocation10 + $0x260] ss:$16 sps:$4 sm:$0xff]  }
 0xe06   :  { %v18187_v55 = vld [vmem:[#allocation10 + $0x244] ss:$16 sps:$4 sm:$0xff]   ;;  %v18237_v44 = vld [vmem:[#allocation10 + $0x108] ss:$16 sps:$4 sm:$0xff]   ;;  %v18241_v16 = vld [vmem:[#allocation10 + $0x2ec] ss:$16 sps:$4 sm:$0xff]  }
 0xe07   :  { %13592 = vmatpush1.bf16.msra.mxu1 %v18159_v37  ;;  %v18189_v59 = vld [vmem:[#allocation10 + $0x240] ss:$16 sps:$4 sm:$0xff]   ;;  %v18190_v23 = vld [vmem:[#allocation10 + $0x224] ss:$16 sps:$4 sm:$0xff]   ;;  %v18243_v57 = vld [vmem:[#allocation10 + $0x2e8] ss:$16 sps:$4 sm:$0xff]  }
 0xe08   :  { %13593 = vmatprep.subr.bf16.mxu1 %v18160_v10  ;;  %13633 = vmatpush1.bf16.msra.mxu0 %v18213_v47  ;;  %v18247_v56 = vld [vmem:[#allocation10 + $0x2cc] ss:$16 sps:$4 sm:$0xff]   ;;  %v18192_v62 = vld [vmem:[#allocation10 + $0x220] ss:$16 sps:$4 sm:$0xff]   ;;  %v18196_v63 = vld [vmem:[#allocation10 + $0x204] ss:$16 sps:$4 sm:$0xff]  }
 0xe09   :  { %13634 = vmatprep.subr.bf16.mxu0 %v18217_v24  ;;  %v18249_v51 = vld [vmem:[#allocation10 + $0x2c8] ss:$16 sps:$4 sm:$0xff]   ;;  %v18253_v18 = vld [vmem:[#allocation10 + $0x2ac] ss:$16 sps:$4 sm:$0xff]   ;;  %v18198_v25 = vld [vmem:[#allocation10 + $0x200] ss:$16 sps:$4 sm:$0xff]   ;;  %v13262_v24 = vpack.c.bf16 %v19026_v50, %v19026_v50 }
 0xe0a   :  { %v18204_v1 = vld [vmem:[#allocation10 + $0xe4] ss:$16 sps:$4 sm:$0xff]   ;;  %v18255_v45 = vld [vmem:[#allocation10 + $0x2a8] ss:$16 sps:$4 sm:$0xff]   ;;  %v18259_v9 = vld [vmem:[#allocation10 + $0x28c] ss:$16 sps:$4 sm:$0xff]  }
 0xe0b   :  { %13594 = vmatpush1.bf16.msra.mxu1 %v18162_v39  ;;  %v18202_v41 = vld [vmem:[#allocation10 + $0xe0] ss:$16 sps:$4 sm:$0xff]   ;;  %v18210_v31 = vld [vmem:[#allocation10 + $0xc4] ss:$16 sps:$4 sm:$0xff]   ;;  %v18261_v58 = vld [vmem:[#allocation10 + $0x288] ss:$16 sps:$4 sm:$0xff]  }
 0xe0c   :  { %13595 = vmatprep.subr.bf16.mxu1 %v18163_v12  ;;  %13635 = vmatpush1.bf16.msra.mxu0 %v18219_v11  ;;  %v18265_v6 = vld [vmem:[#allocation10 + $0x26c] ss:$16 sps:$4 sm:$0xff]   ;;  %v18208_v40 = vld [vmem:[#allocation10 + $0xc0] ss:$16 sps:$4 sm:$0xff]   ;;  %v18808_v37 = vmov 0  }
 0xe0d   :  { %13636 = vmatprep.subr.bf16.mxu0 %v18223_v49  ;;  %v18216_v10 = vld [vmem:[#allocation10 + $0xa4] ss:$16 sps:$4 sm:$0xff]   ;;  %v18267_v39 = vld [vmem:[#allocation10 + $0x268] ss:$16 sps:$4 sm:$0xff]   ;;  %v18271_v12 = vld [vmem:[#allocation10 + $0x24c] ss:$16 sps:$4 sm:$0xff]  }
 0xe0e   :  { %v18214_v27 = vld [vmem:[#allocation10 + $0xa0] ss:$16 sps:$4 sm:$0xff]   ;;  %v18277_v38 = vld [vmem:[#allocation10 + $0x22c] ss:$16 sps:$4 sm:$0xff]   ;;  %v18279_v42 = vld [vmem:[#allocation10 + $0x228] ss:$16 sps:$4 sm:$0xff]  }
 0xe0f   :  { %13596 = vmatpush1.bf16.msra.mxu1 %v18165_v19  ;;  %v18222_v19 = vld [vmem:[#allocation10 + $0x84] ss:$16 sps:$4 sm:$0xff]   ;;  %v18220_v13 = vld [vmem:[#allocation10 + $0x80] ss:$16 sps:$4 sm:$0xff]   ;;  %v18283_v3 = vld [vmem:[#allocation10 + $0x20c] ss:$16 sps:$4 sm:$0xff]  }
 0xe10   :  { %13597 = vmatprep.subr.bf16.mxu1 %v18166_v21  ;;  %13637 = vmatpush1.bf16.msra.mxu0 %v18225_v5  ;;  %v18273_v21 = vld [vmem:[#allocation10 + $0x248] ss:$16 sps:$4 sm:$0xff]   ;;  %v18240_v28 = vld [vmem:[#allocation10 + $0x24] ss:$16 sps:$4 sm:$0xff]   ;;  %v18238_v30 = vld [vmem:[#allocation10 + $0x20] ss:$16 sps:$4 sm:$0xff]  }
 0xe11   :  { %13638 = vmatprep.subr.bf16.mxu0 %v18229_v60  ;;  %v18285_v48 = vld [vmem:[#allocation10 + $0x208] ss:$16 sps:$4 sm:$0xff]   ;;  %v18252_v47 = vld [vmem:[#allocation10 + $0xec] ss:$16 sps:$4 sm:$0xff]  }
 0xe12   :  { %v18256_v11 = vld [vmem:[#allocation10 + $0xc8] ss:$16 sps:$4 sm:$0xff]   ;;  %v18264_v49 = vld [vmem:[#allocation10 + $0xac] ss:$16 sps:$4 sm:$0xff]  }
 0xe13   :  { %13598 = vmatpush1.bf16.msra.mxu1 %v18168_v22  ;;  %v18228_v22 = vld [vmem:[#allocation10 + $0x64] ss:$16 sps:$4 sm:$0xff]   ;;  %v18268_v5 = vld [vmem:[#allocation10 + $0x88] ss:$16 sps:$4 sm:$0xff]   ;;  %v18276_v60 = vld [vmem:[#allocation10 + $0x6c] ss:$16 sps:$4 sm:$0xff]  }
 0xe14   :  { %13599 = vmatprep.subr.bf16.mxu1 %v18169_v43  ;;  %13639 = vmatpush1.bf16.msra.mxu0 %v18231_v35  ;;  %v18226_v43 = vld [vmem:[#allocation10 + $0x60] ss:$16 sps:$4 sm:$0xff]   ;;  %v18274_v50 = vld [vmem:[#allocation10 + $0x68] ss:$16 sps:$4 sm:$0xff]   ;;  %v18288_v35 = vld [vmem:[#allocation10 + $0x2c] ss:$16 sps:$4 sm:$0xff]  }
 0xe15   :  { %13640 = vmatprep.subr.bf16.mxu0 %v18235_v54  ;;  %v18286_v54 = vld [vmem:[#allocation10 + $0x28] ss:$16 sps:$4 sm:$0xff]  }
 0xe17   :  { %13600 = vmatpush1.bf16.msra.mxu1 %v18171_v4  ;;  %v18234_v4 = vld [vmem:[#allocation10 + $0x44] ss:$16 sps:$4 sm:$0xff]  }
 0xe18   :  { %13601 = vmatprep.subr.bf16.mxu1 %v18172_v33  ;;  %13641 = vmatpush1.bf16.msra.mxu0 %v18237_v44  ;;  %v18232_v33 = vld [vmem:[#allocation10 + $0x40] ss:$16 sps:$4 sm:$0xff]  }
 0xe19   :  { %13642 = vmatprep.subr.bf16.mxu0 %v18241_v16 }
 0xe1b   :  { %13602 = vmatpush2.bf16.msra.mxu1 %v18174_v0  ;;  %v18246_v0 = vld [vmem:[#allocation10 + $0x4] ss:$16 sps:$4 sm:$0xff]  }
 0xe1c   :  { %13603 = vmatprep.subr.bf16.mxu1 %v18175_v46  ;;  %13643 = vmatpush2.bf16.msra.mxu0 %v18243_v57  ;;  %v18244_v46 = vld [vmem:[#allocation10] ss:$16 sps:$4 sm:$0xff]  }
 0xe1d   :  { %13644 = vmatprep.subr.bf16.mxu0 %v18247_v56 }
 0xe1f   :  { %13604 = vmatpush2.bf16.msra.mxu1 %v18177_v36  ;;  %v18250_v36 = vld [vmem:[#allocation10 + $0xe8] ss:$16 sps:$4 sm:$0xff]  }
 0xe20   :  { %13605 = vmatprep.subr.bf16.mxu1 %v18178_v17  ;;  %13645 = vmatpush2.bf16.msra.mxu0 %v18249_v51  ;;  %v18258_v17 = vld [vmem:[#allocation10 + $0xcc] ss:$16 sps:$4 sm:$0xff]  }
 0xe21   :  { %13646 = vmatprep.subr.bf16.mxu0 %v18253_v18  ;;  %v13910_v51 = vld [vmem:[#allocation18 + $0x40] ss:$8 sm:$0xf] }
 0xe22   :  { %v13915_v18 = vrot.slane %v13910_v51, %v18983_v32 }
 0xe23   :  { %13606 = vmatpush2.bf16.msra.mxu1 %v18180_v15  ;;  %v18262_v15 = vld [vmem:[#allocation10 + $0xa8] ss:$16 sps:$4 sm:$0xff]  }
 0xe24   :  { %13607 = vmatprep.subr.bf16.mxu1 %v18181_v61  ;;  %13647 = vmatpush2.bf16.msra.mxu0 %v18255_v45  ;;  %v18270_v61 = vld [vmem:[#allocation10 + $0x8c] ss:$16 sps:$4 sm:$0xff]   ;;  %v13919_v45 = vrot.slane %v13910_v51, %v18986_v34 }
 0xe25   :  { %13648 = vmatprep.subr.bf16.mxu0 %v18259_v9 }
 0xe27   :  { %13608 = vmatpush2.bf16.msra.mxu1 %v18183_v53  ;;  %v18282_v53 = vld [vmem:[#allocation10 + $0x4c] ss:$16 sps:$4 sm:$0xff]  }
 0xe28   :  { %13609 = vmatprep.subr.bf16.mxu1 %v18184_v26  ;;  %13649 = vmatpush2.bf16.msra.mxu0 %v18261_v58  ;;  %v18280_v26 = vld [vmem:[#allocation10 + $0x48] ss:$16 sps:$4 sm:$0xff]  }
 0xe29   :  { %13650 = vmatprep.subr.bf16.mxu0 %v18265_v6 }
 0xe2b   :  { %13610 = vmatpush2.bf16.msra.mxu1 %v18186_v20  ;;  %v18291_v20 = vld [vmem:[#allocation10 + $0xc] ss:$16 sps:$4 sm:$0xff]  }
 0xe2c   :  { %13611 = vmatprep.subr.bf16.mxu1 %v18187_v55  ;;  %13651 = vmatpush2.bf16.msra.mxu0 %v18267_v39  ;;  %v18289_v55 = vld [vmem:[#allocation10 + $0x8] ss:$16 sps:$4 sm:$0xff]  }
 0xe2d   :  { %13652 = vmatprep.subr.bf16.mxu0 %v18271_v12  ;;  %v13923_v12 = vrot.slane %v13910_v51, %v18995_v7 }
 0xe2f   :  { %13612 = vmatpush2.bf16.msra.mxu1 %v18189_v59 }
 0xe30   :  { %13613 = vmatprep.subr.bf16.mxu1 %v18190_v23  ;;  %13653 = vmatpush2.bf16.msra.mxu0 %v18273_v21  ;;  %v13927_v21 = vrot.slane %v13910_v51, %v18998_v8 }
 0xe31   :  { %13654 = vmatprep.subr.bf16.mxu0 %v18277_v38 }
 0xe33   :  { %13614 = vmatpush2.bf16.msra.mxu1 %v18192_v62 }
 0xe34   :  { %13615 = vmatprep.subr.bf16.mxu1 %v18196_v63  ;;  %13655 = vmatpush2.bf16.msra.mxu0 %v18279_v42 }
 0xe35   :  { %13656 = vmatprep.subr.bf16.mxu0 %v18283_v3 }
 0xe37   :  { %13616 = vmatpush2.bf16.msra.mxu1 %v18198_v25 }
 0xe38   :  { %13827 = vmatprep.subr.bf16.mxu1 %v18204_v1  ;;  %13657 = vmatpush2.bf16.msra.mxu0 %v18285_v48 }
 0xe3a   :  { %13618 = vmatmul.mubr.bf16.vlgmr.msra.gmra.mxu1 %v13263_v2 }
 0xe3b   :  { %13828 = vmatpush1.bf16.msra.mxu1 %v18202_v41  ;;  %13859 = vmatprep.mubr.bf16.mxu1 %v18808_v37 }
 0xe3c   :  { %13829 = vmatprep.subr.bf16.mxu1 %v18210_v31  ;;  %13659 = vmatmul.mubr.bf16.vlgmr.msra.gmra.mxu0 %v13263_v2 }
 0xe3f   :  { %13830 = vmatpush1.bf16.msra.mxu1 %v18208_v40 }
 0xe40   :  { %13831 = vmatprep.subr.bf16.mxu1 %v18216_v10 }
 0xe43   :  { %13832 = vmatpush1.bf16.msra.mxu1 %v18214_v27 }
 0xe44   :  { %13833 = vmatprep.subr.bf16.mxu1 %v18222_v19 }
 0xe47   :  { %13834 = vmatpush1.bf16.msra.mxu1 %v18220_v13 }
 0xe48   :  { %13835 = vmatprep.subr.bf16.mxu1 %v18228_v22 }
 0xe4b   :  { %13836 = vmatpush1.bf16.msra.mxu1 %v18226_v43 }
 0xe4c   :  { %13837 = vmatprep.subr.bf16.mxu1 %v18234_v4 }
 0xe4f   :  { %13838 = vmatpush1.bf16.msra.mxu1 %v18232_v33 }
 0xe50   :  { %13839 = vmatprep.subr.bf16.mxu1 %v18240_v28 }
 0xe53   :  { %13840 = vmatpush1.bf16.msra.mxu1 %v18238_v30 }
 0xe54   :  { %13841 = vmatprep.subr.bf16.mxu1 %v18246_v0 }
 0xe57   :  { %13842 = vmatpush1.bf16.msra.mxu1 %v18244_v46 }
 0xe58   :  { %13868 = vmatprep.subr.bf16.mxu1 %v18252_v47 }
 0xe5a   :  { %13860 = vmatmul.mubr.bf16.vlgmr.msra.gmra.mxu1 %v13262_v24 }
 0xe5b   :  { %13869 = vmatpush1.bf16.msra.mxu1 %v18250_v36  ;;  %13900 = vmatprep.mubr.bf16.mxu1 %v18808_v37 }
 0xe5c   :  { %13870 = vmatprep.subr.bf16.mxu1 %v18258_v17 }
 0xe5f   :  { %13871 = vmatpush1.bf16.msra.mxu1 %v18256_v11 }
 0xe60   :  { %13872 = vmatprep.subr.bf16.mxu1 %v18264_v49 }
 0xe63   :  { %13873 = vmatpush1.bf16.msra.mxu1 %v18262_v15 }
 0xe64   :  { %13874 = vmatprep.subr.bf16.mxu1 %v18270_v61 }
 0xe67   :  { %13875 = vmatpush1.bf16.msra.mxu1 %v18268_v5 }
 0xe68   :  { %13876 = vmatprep.subr.bf16.mxu1 %v18276_v60 }
 0xe6b   :  { %13877 = vmatpush1.bf16.msra.mxu1 %v18274_v50 }
 0xe6c   :  { %13878 = vmatprep.subr.bf16.mxu1 %v18282_v53 }
 0xe6f   :  { %13879 = vmatpush1.bf16.msra.mxu1 %v18280_v26 }
 0xe70   :  { %13880 = vmatprep.subr.bf16.mxu1 %v18288_v35 }
 0xe73   :  { %13881 = vmatpush1.bf16.msra.mxu1 %v18286_v54 }
 0xe74   :  { %13882 = vmatprep.subr.bf16.mxu1 %v18291_v20 }
 0xe77   :  { %13883 = vmatpush1.bf16.msra.mxu1 %v18289_v55 }
 0xe7a   :  { %13901 = vmatmul.mubr.bf16.vlgmr.msra.gmra.mxu1 %v13262_v24 }
 0xefa   :  { %v13619_v44 = vpop.f32.mrf.mxu1 }
 0xefc   :  { %v13621_v16 = vpop.f32.mrf.mxu1  ;;  %v13660_v57 = vpop.f32.mrf.mxu0 }
 0xefe   :  { %v13623_v59 = vpop.f32.mrf.mxu1  ;;  %v13662_v56 = vpop.f32.mrf.mxu0 }
 0xf00   :  { %v13624_v23 = vpop.f32.mrf.mxu1  ;;  %v13664_v62 = vpop.f32.mrf.mxu0 }
 0xf02   :  { %v13665_v63 = vpop.f32.mrf.mxu0 }
 0xf1a   :  { %v13861_v25 = vpop.f32.mrf.mxu1 }
 0xf1b   :  { %v13862_v1 = vadd.f32 %v13861_v25, %v13619_v44 }
 0xf1c   :  { %v13863_v9 = vpop.f32.mrf.mxu1 }
 0xf1d   :  { %v13932_v2 = vadd.f32 %v13915_v18, %v13862_v1  ;;  %v13864_v41 = vadd.f32 %v13863_v9, %v13621_v16 }
 0xf1e   :  { %v13865_v31 = vpop.f32.mrf.mxu1 }
 0xf1f   :  { %vm13936_vm9 = vcmp.ge.f32.partialorder %v13932_v2, 0.0  ;;  %v13940_v58 = vmul.f32 0.2, %v13932_v2  ;;  %v13933_v6 = vadd.f32 %v13919_v45, %v13864_v41 }
 0xf20   :  { %v13866_v40 = vpop.f32.mrf.mxu1 }
 0xf21   :  { %v19324_v37 = vsel %vm13936_vm9, %v13932_v2, %v13940_v58  ;;  %vm13937_vm10 = vcmp.ge.f32.partialorder %v13933_v6, 0.0  ;;  %v13941_v10 = vmul.f32 0.2, %v13933_v6 }
 0xf23   :  { %v13945_v39 = vsel %vm13937_vm10, %v13933_v6, %v13941_v10 }
 0xf3a   :  { %v13902_v27 = vpop.f32.mrf.mxu1 }
 0xf3b   :  { %v13903_v19 = vadd.f32 %v13902_v27, %v13660_v57 }
 0xf3c   :  { %v13904_v38 = vpop.f32.mrf.mxu1 }
 0xf3d   :  { %v13934_v13 = vadd.f32 %v13923_v12, %v13903_v19  ;;  %v13905_v22 = vadd.f32 %v13904_v38, %v13662_v56 }
 0xf3e   :  { %v13906_v42 = vpop.f32.mrf.mxu1 }
 0xf3f   :  { %vm13938_vm11 = vcmp.ge.f32.partialorder %v13934_v13, 0.0  ;;  %v13942_v3 = vmul.f32 0.2, %v13934_v13  ;;  %v13935_v43 = vadd.f32 %v13927_v21, %v13905_v22 }
 0xf40   :  { %v13907_v4 = vpop.f32.mrf.mxu1 }
 0xf41   :  { %v19328_v48 = vsel %vm13938_vm11, %v13934_v13, %v13942_v3  ;;  %vm13939_vm12 = vcmp.ge.f32.partialorder %v13935_v43, 0.0  ;;  %v13943_v33 = vmul.f32 0.2, %v13935_v43 }
 0xf43   :  { %v13947_v28 = vsel %vm13939_vm12, %v13935_v43, %v13943_v33 }
 0xf44   :  { %18786 = dma.done.wait [#allocation13 + $0x9], 16384 }
 0xf45   :  { %18787 = vsyncadd [#allocation13 + $0x9], 4294950912  ;;  %v19330_v30 = vpack.c.bf16 %v13945_v39, %v13945_v39  ;;  %v19332_v0 = vpack.c.bf16 %v13947_v28, %v13947_v28  ;;  %v18292_v46 = vld [vmem:[#allocation11 + $0xe4] ss:$16 sps:$4 sm:$0xff]   ;;  %v18296_v24 = vld [vmem:[#allocation11 + $0xe0] ss:$16 sps:$4 sm:$0xff]  }
 0xf46   :  { %v18294_v47 = vld [vmem:[#allocation11 + $0x2e4] ss:$16 sps:$4 sm:$0xff]   ;;  %14746 = vmatprep.subr.bf16.mxu0 %v18292_v46  ;;  %v18297_v36 = vld [vmem:[#allocation11 + $0x2e0] ss:$16 sps:$4 sm:$0xff]  }
 0xf47   :  { %14778 = vmatprep.mubr.bf16.mxu0 %v19330_v30  ;;  %14819 = vmatprep.mubr.bf16.mxu1 %v19332_v0  ;;  %v18298_v17 = vld [vmem:[#allocation11 + $0xc4] ss:$16 sps:$4 sm:$0xff]   ;;  %v18302_v49 = vld [vmem:[#allocation11 + $0xc0] ss:$16 sps:$4 sm:$0xff]  }
 0xf48   :  { %14787 = vmatprep.subr.bf16.mxu1 %v18294_v47  ;;  %14747 = vmatpush1.bf16.msra.mxu0 %v18296_v24  ;;  %v18300_v11 = vld [vmem:[#allocation11 + $0x2c4] ss:$16 sps:$4 sm:$0xff]   ;;  %v18303_v15 = vld [vmem:[#allocation11 + $0x2c0] ss:$16 sps:$4 sm:$0xff]  }
 0xf49   :  { %14788 = vmatpush1.bf16.msra.mxu1 %v18297_v36  ;;  %14748 = vmatprep.subr.bf16.mxu0 %v18298_v17  ;;  %v18304_v61 = vld [vmem:[#allocation11 + $0xa4] ss:$16 sps:$4 sm:$0xff]   ;;  %v18308_v60 = vld [vmem:[#allocation11 + $0xa0] ss:$16 sps:$4 sm:$0xff]  }
 0xf4a   :  { %14789 = vmatprep.subr.bf16.mxu1 %v18300_v11  ;;  %v18306_v5 = vld [vmem:[#allocation11 + $0x2a4] ss:$16 sps:$4 sm:$0xff]   ;;  %v18309_v50 = vld [vmem:[#allocation11 + $0x2a0] ss:$16 sps:$4 sm:$0xff]  }
 0xf4b   :  { %v18310_v53 = vld [vmem:[#allocation11 + $0x84] ss:$16 sps:$4 sm:$0xff]   ;;  %v18314_v35 = vld [vmem:[#allocation11 + $0x80] ss:$16 sps:$4 sm:$0xff]  }
 0xf4c   :  { %14749 = vmatpush1.bf16.msra.mxu0 %v18302_v49  ;;  %v18312_v26 = vld [vmem:[#allocation11 + $0x284] ss:$16 sps:$4 sm:$0xff]   ;;  %v18315_v54 = vld [vmem:[#allocation11 + $0x280] ss:$16 sps:$4 sm:$0xff]  }
 0xf4d   :  { %14790 = vmatpush1.bf16.msra.mxu1 %v18303_v15  ;;  %14750 = vmatprep.subr.bf16.mxu0 %v18304_v61  ;;  %v18316_v20 = vld [vmem:[#allocation11 + $0x64] ss:$16 sps:$4 sm:$0xff]   ;;  %v18320_v44 = vld [vmem:[#allocation11 + $0x60] ss:$16 sps:$4 sm:$0xff]  }
 0xf4e   :  { %14791 = vmatprep.subr.bf16.mxu1 %v18306_v5  ;;  %v18318_v55 = vld [vmem:[#allocation11 + $0x264] ss:$16 sps:$4 sm:$0xff]   ;;  %v18321_v16 = vld [vmem:[#allocation11 + $0x260] ss:$16 sps:$4 sm:$0xff]  }
 0xf4f   :  { %v18322_v59 = vld [vmem:[#allocation11 + $0x44] ss:$16 sps:$4 sm:$0xff]   ;;  %v18326_v57 = vld [vmem:[#allocation11 + $0x40] ss:$16 sps:$4 sm:$0xff]  }
 0xf50   :  { %14751 = vmatpush1.bf16.msra.mxu0 %v18308_v60  ;;  %v18324_v23 = vld [vmem:[#allocation11 + $0x244] ss:$16 sps:$4 sm:$0xff]   ;;  %v18327_v56 = vld [vmem:[#allocation11 + $0x240] ss:$16 sps:$4 sm:$0xff]  }
 0xf51   :  { %14792 = vmatpush1.bf16.msra.mxu1 %v18309_v50  ;;  %14752 = vmatprep.subr.bf16.mxu0 %v18310_v53  ;;  %v18328_v62 = vld [vmem:[#allocation11 + $0x24] ss:$16 sps:$4 sm:$0xff]   ;;  %v18332_v51 = vld [vmem:[#allocation11 + $0x20] ss:$16 sps:$4 sm:$0xff]   ;;  %v18390_v50 = vld [vmem:[#allocation11 + $0xec] ss:$16 sps:$4 sm:$0xff]  }
 0xf52   :  { %14793 = vmatprep.subr.bf16.mxu1 %v18312_v26  ;;  %v18330_v63 = vld [vmem:[#allocation11 + $0x224] ss:$16 sps:$4 sm:$0xff]   ;;  %v18333_v18 = vld [vmem:[#allocation11 + $0x220] ss:$16 sps:$4 sm:$0xff]   ;;  %v18393_v53 = vld [vmem:[#allocation11 + $0x2ec] ss:$16 sps:$4 sm:$0xff]   ;;  %v19338_v26 = vpack.c.bf16 %v19324_v37, %v19324_v37 }
 0xf53   :  { %v18334_v25 = vld [vmem:[#allocation11 + $0x4] ss:$16 sps:$4 sm:$0xff]   ;;  %v18338_v45 = vld [vmem:[#allocation11] ss:$16 sps:$4 sm:$0xff]   ;;  %v18402_v37 = vld [vmem:[#allocation11 + $0xac] ss:$16 sps:$4 sm:$0xff]  }
 0xf54   :  { %14753 = vmatpush1.bf16.msra.mxu0 %v18314_v35  ;;  %v18336_v1 = vld [vmem:[#allocation11 + $0x204] ss:$16 sps:$4 sm:$0xff]   ;;  %v18339_v9 = vld [vmem:[#allocation11 + $0x200] ss:$16 sps:$4 sm:$0xff]   ;;  %v19342_v35 = vpack.c.bf16 %v19328_v48, %v19328_v48  ;;  %v18405_v48 = vld [vmem:[#allocation11 + $0x2ac] ss:$16 sps:$4 sm:$0xff]  }
 0xf55   :  { %14794 = vmatpush1.bf16.msra.mxu1 %v18315_v54  ;;  %14754 = vmatprep.subr.bf16.mxu0 %v18316_v20  ;;  %v18340_v2 = vld [vmem:[#allocation11 + $0x1e4] ss:$16 sps:$4 sm:$0xff]   ;;  %v18344_v31 = vld [vmem:[#allocation11 + $0x1e0] ss:$16 sps:$4 sm:$0xff]   ;;  %v18388_v54 = vld [vmem:[#allocation11 + $0xe8] ss:$16 sps:$4 sm:$0xff]  }
 0xf56   :  { %14795 = vmatprep.subr.bf16.mxu1 %v18318_v55  ;;  %v18342_v41 = vld [vmem:[#allocation11 + $0x3e4] ss:$16 sps:$4 sm:$0xff]   ;;  %v18345_v58 = vld [vmem:[#allocation11 + $0x3e0] ss:$16 sps:$4 sm:$0xff]   ;;  %v18391_v20 = vld [vmem:[#allocation11 + $0x2e8] ss:$16 sps:$4 sm:$0xff]  }
 0xf57   :  { %v18346_v6 = vld [vmem:[#allocation11 + $0x1c4] ss:$16 sps:$4 sm:$0xff]   ;;  %v18350_v10 = vld [vmem:[#allocation11 + $0x1c0] ss:$16 sps:$4 sm:$0xff]   ;;  %v18396_v55 = vld [vmem:[#allocation11 + $0xcc] ss:$16 sps:$4 sm:$0xff]  }
 0xf58   :  { %14755 = vmatpush1.bf16.msra.mxu0 %v18320_v44  ;;  %v18348_v40 = vld [vmem:[#allocation11 + $0x3c4] ss:$16 sps:$4 sm:$0xff]   ;;  %v18351_v39 = vld [vmem:[#allocation11 + $0x3c0] ss:$16 sps:$4 sm:$0xff]   ;;  %v18399_v44 = vld [vmem:[#allocation11 + $0x2cc] ss:$16 sps:$4 sm:$0xff]  }
 0xf59   :  { %14796 = vmatpush1.bf16.msra.mxu1 %v18321_v16  ;;  %14756 = vmatprep.subr.bf16.mxu0 %v18322_v59  ;;  %v18352_v12 = vld [vmem:[#allocation11 + $0x1a4] ss:$16 sps:$4 sm:$0xff]   ;;  %v18356_v19 = vld [vmem:[#allocation11 + $0x1a0] ss:$16 sps:$4 sm:$0xff]   ;;  %v18394_v16 = vld [vmem:[#allocation11 + $0xc8] ss:$16 sps:$4 sm:$0xff]  }
 0xf5a   :  { %14797 = vmatprep.subr.bf16.mxu1 %v18324_v23  ;;  %v18354_v27 = vld [vmem:[#allocation11 + $0x3a4] ss:$16 sps:$4 sm:$0xff]   ;;  %v18357_v21 = vld [vmem:[#allocation11 + $0x3a0] ss:$16 sps:$4 sm:$0xff]   ;;  %v18397_v59 = vld [vmem:[#allocation11 + $0x2c8] ss:$16 sps:$4 sm:$0xff]  }
 0xf5b   :  { %v18358_v38 = vld [vmem:[#allocation11 + $0x184] ss:$16 sps:$4 sm:$0xff]   ;;  %v18362_v22 = vld [vmem:[#allocation11 + $0x180] ss:$16 sps:$4 sm:$0xff]   ;;  %v18400_v23 = vld [vmem:[#allocation11 + $0xa8] ss:$16 sps:$4 sm:$0xff]  }
 0xf5c   :  { %14757 = vmatpush1.bf16.msra.mxu0 %v18326_v57  ;;  %v18360_v13 = vld [vmem:[#allocation11 + $0x384] ss:$16 sps:$4 sm:$0xff]   ;;  %v18363_v42 = vld [vmem:[#allocation11 + $0x380] ss:$16 sps:$4 sm:$0xff]   ;;  %v18403_v57 = vld [vmem:[#allocation11 + $0x2a8] ss:$16 sps:$4 sm:$0xff]  }
 0xf5d   :  { %14798 = vmatpush1.bf16.msra.mxu1 %v18327_v56  ;;  %14758 = vmatprep.subr.bf16.mxu0 %v18328_v62  ;;  %v18364_v3 = vld [vmem:[#allocation11 + $0x164] ss:$16 sps:$4 sm:$0xff]   ;;  %v18368_v4 = vld [vmem:[#allocation11 + $0x160] ss:$16 sps:$4 sm:$0xff]   ;;  %v18408_v56 = vld [vmem:[#allocation11 + $0x8c] ss:$16 sps:$4 sm:$0xff]  }
 0xf5e   :  { %14799 = vmatprep.subr.bf16.mxu1 %v18330_v63  ;;  %v18366_v43 = vld [vmem:[#allocation11 + $0x364] ss:$16 sps:$4 sm:$0xff]   ;;  %v18369_v33 = vld [vmem:[#allocation11 + $0x360] ss:$16 sps:$4 sm:$0xff]   ;;  %v18411_v62 = vld [vmem:[#allocation11 + $0x28c] ss:$16 sps:$4 sm:$0xff]  }
 0xf5f   :  { %v18370_v28 = vld [vmem:[#allocation11 + $0x144] ss:$16 sps:$4 sm:$0xff]   ;;  %v18374_v47 = vld [vmem:[#allocation11 + $0x140] ss:$16 sps:$4 sm:$0xff]   ;;  %v18406_v63 = vld [vmem:[#allocation11 + $0x88] ss:$16 sps:$4 sm:$0xff]  }
 0xf60   :  { %14759 = vmatpush1.bf16.msra.mxu0 %v18332_v51  ;;  %v18372_v46 = vld [vmem:[#allocation11 + $0x344] ss:$16 sps:$4 sm:$0xff]   ;;  %v18375_v24 = vld [vmem:[#allocation11 + $0x340] ss:$16 sps:$4 sm:$0xff]   ;;  %v18409_v51 = vld [vmem:[#allocation11 + $0x288] ss:$16 sps:$4 sm:$0xff]  }
 0xf61   :  { %14800 = vmatpush1.bf16.msra.mxu1 %v18333_v18  ;;  %14760 = vmatprep.subr.bf16.mxu0 %v18334_v25  ;;  %v18376_v36 = vld [vmem:[#allocation11 + $0x124] ss:$16 sps:$4 sm:$0xff]   ;;  %v18380_v11 = vld [vmem:[#allocation11 + $0x120] ss:$16 sps:$4 sm:$0xff]   ;;  %v18414_v18 = vld [vmem:[#allocation11 + $0x6c] ss:$16 sps:$4 sm:$0xff]  }
 0xf62   :  { %14801 = vmatprep.subr.bf16.mxu1 %v18336_v1  ;;  %v18378_v17 = vld [vmem:[#allocation11 + $0x324] ss:$16 sps:$4 sm:$0xff]   ;;  %v18381_v49 = vld [vmem:[#allocation11 + $0x320] ss:$16 sps:$4 sm:$0xff]   ;;  %v18417_v25 = vld [vmem:[#allocation11 + $0x26c] ss:$16 sps:$4 sm:$0xff]  }
 0xf63   :  { %v18382_v15 = vld [vmem:[#allocation11 + $0x104] ss:$16 sps:$4 sm:$0xff]   ;;  %v18386_v5 = vld [vmem:[#allocation11 + $0x100] ss:$16 sps:$4 sm:$0xff]   ;;  %v18412_v1 = vld [vmem:[#allocation11 + $0x68] ss:$16 sps:$4 sm:$0xff]  }
 0xf64   :  { %14761 = vmatpush1.bf16.msra.mxu0 %v18338_v45  ;;  %v18384_v61 = vld [vmem:[#allocation11 + $0x304] ss:$16 sps:$4 sm:$0xff]   ;;  %v18387_v60 = vld [vmem:[#allocation11 + $0x300] ss:$16 sps:$4 sm:$0xff]   ;;  %v18423_v45 = vld [vmem:[#allocation11 + $0x24c] ss:$16 sps:$4 sm:$0xff]  }
 0xf65   :  { %14802 = vmatpush1.bf16.msra.mxu1 %v18339_v9  ;;  %14762 = vmatprep.subr.bf16.mxu0 %v18340_v2  ;;  %v18418_v9 = vld [vmem:[#allocation11 + $0x48] ss:$16 sps:$4 sm:$0xff]  }
 0xf66   :  { %14803 = vmatprep.subr.bf16.mxu1 %v18342_v41  ;;  %v18421_v2 = vld [vmem:[#allocation11 + $0x248] ss:$16 sps:$4 sm:$0xff]   ;;  %v18426_v41 = vld [vmem:[#allocation11 + $0x2c] ss:$16 sps:$4 sm:$0xff]  }
 0xf68   :  { %14763 = vmatpush2.bf16.msra.mxu0 %v18344_v31  ;;  %v18429_v31 = vld [vmem:[#allocation11 + $0x22c] ss:$16 sps:$4 sm:$0xff]  }
 0xf69   :  { %14804 = vmatpush2.bf16.msra.mxu1 %v18345_v58  ;;  %14764 = vmatprep.subr.bf16.mxu0 %v18346_v6  ;;  %v18424_v58 = vld [vmem:[#allocation11 + $0x28] ss:$16 sps:$4 sm:$0xff]  }
 0xf6a   :  { %14805 = vmatprep.subr.bf16.mxu1 %v18348_v40  ;;  %v18427_v6 = vld [vmem:[#allocation11 + $0x228] ss:$16 sps:$4 sm:$0xff]   ;;  %v18432_v40 = vld [vmem:[#allocation11 + $0xc] ss:$16 sps:$4 sm:$0xff]  }
 0xf6c   :  { %14765 = vmatpush2.bf16.msra.mxu0 %v18350_v10  ;;  %v18435_v10 = vld [vmem:[#allocation11 + $0x20c] ss:$16 sps:$4 sm:$0xff]  }
 0xf6d   :  { %14806 = vmatpush2.bf16.msra.mxu1 %v18351_v39  ;;  %14766 = vmatprep.subr.bf16.mxu0 %v18352_v12  ;;  %v18430_v39 = vld [vmem:[#allocation11 + $0x8] ss:$16 sps:$4 sm:$0xff]  }
 0xf6e   :  { %14807 = vmatprep.subr.bf16.mxu1 %v18354_v27  ;;  %v18433_v12 = vld [vmem:[#allocation11 + $0x208] ss:$16 sps:$4 sm:$0xff]   ;;  %v18438_v27 = vld [vmem:[#allocation11 + $0x1ec] ss:$16 sps:$4 sm:$0xff]  }
 0xf70   :  { %14767 = vmatpush2.bf16.msra.mxu0 %v18356_v19  ;;  %v18441_v19 = vld [vmem:[#allocation11 + $0x3ec] ss:$16 sps:$4 sm:$0xff]  }
 0xf71   :  { %14808 = vmatpush2.bf16.msra.mxu1 %v18357_v21  ;;  %14768 = vmatprep.subr.bf16.mxu0 %v18358_v38  ;;  %v18436_v21 = vld [vmem:[#allocation11 + $0x1e8] ss:$16 sps:$4 sm:$0xff]  }
 0xf72   :  { %14809 = vmatprep.subr.bf16.mxu1 %v18360_v13  ;;  %v18439_v38 = vld [vmem:[#allocation11 + $0x3e8] ss:$16 sps:$4 sm:$0xff]   ;;  %v18444_v13 = vld [vmem:[#allocation11 + $0x1cc] ss:$16 sps:$4 sm:$0xff]  }
 0xf74   :  { %14769 = vmatpush2.bf16.msra.mxu0 %v18362_v22  ;;  %v18447_v22 = vld [vmem:[#allocation11 + $0x3cc] ss:$16 sps:$4 sm:$0xff]  }
 0xf75   :  { %14810 = vmatpush2.bf16.msra.mxu1 %v18363_v42  ;;  %14770 = vmatprep.subr.bf16.mxu0 %v18364_v3  ;;  %v18442_v42 = vld [vmem:[#allocation11 + $0x1c8] ss:$16 sps:$4 sm:$0xff]  }
 0xf76   :  { %14811 = vmatprep.subr.bf16.mxu1 %v18366_v43  ;;  %v18445_v3 = vld [vmem:[#allocation11 + $0x3c8] ss:$16 sps:$4 sm:$0xff]   ;;  %v18450_v43 = vld [vmem:[#allocation11 + $0x1ac] ss:$16 sps:$4 sm:$0xff]  }
 0xf78   :  { %14771 = vmatpush2.bf16.msra.mxu0 %v18368_v4  ;;  %v18453_v4 = vld [vmem:[#allocation11 + $0x3ac] ss:$16 sps:$4 sm:$0xff]  }
 0xf79   :  { %14812 = vmatpush2.bf16.msra.mxu1 %v18369_v33  ;;  %14772 = vmatprep.subr.bf16.mxu0 %v18370_v28  ;;  %v18448_v33 = vld [vmem:[#allocation11 + $0x1a8] ss:$16 sps:$4 sm:$0xff]  }
 0xf7a   :  { %14813 = vmatprep.subr.bf16.mxu1 %v18372_v46  ;;  %v18451_v28 = vld [vmem:[#allocation11 + $0x3a8] ss:$16 sps:$4 sm:$0xff]   ;;  %v18456_v46 = vld [vmem:[#allocation11 + $0x18c] ss:$16 sps:$4 sm:$0xff]  }
 0xf7c   :  { %14773 = vmatpush2.bf16.msra.mxu0 %v18374_v47  ;;  %v18459_v47 = vld [vmem:[#allocation11 + $0x38c] ss:$16 sps:$4 sm:$0xff]  }
 0xf7d   :  { %14814 = vmatpush2.bf16.msra.mxu1 %v18375_v24  ;;  %14774 = vmatprep.subr.bf16.mxu0 %v18376_v36  ;;  %v18454_v24 = vld [vmem:[#allocation11 + $0x188] ss:$16 sps:$4 sm:$0xff]  }
 0xf7e   :  { %14815 = vmatprep.subr.bf16.mxu1 %v18378_v17  ;;  %v18457_v36 = vld [vmem:[#allocation11 + $0x388] ss:$16 sps:$4 sm:$0xff]   ;;  %v18462_v17 = vld [vmem:[#allocation11 + $0x16c] ss:$16 sps:$4 sm:$0xff]  }
 0xf80   :  { %14775 = vmatpush2.bf16.msra.mxu0 %v18380_v11  ;;  %v18465_v11 = vld [vmem:[#allocation11 + $0x36c] ss:$16 sps:$4 sm:$0xff]  }
 0xf81   :  { %14816 = vmatpush2.bf16.msra.mxu1 %v18381_v49  ;;  %14776 = vmatprep.subr.bf16.mxu0 %v18382_v15  ;;  %v18460_v49 = vld [vmem:[#allocation11 + $0x168] ss:$16 sps:$4 sm:$0xff]  }
 0xf82   :  { %14817 = vmatprep.subr.bf16.mxu1 %v18384_v61  ;;  %v18463_v15 = vld [vmem:[#allocation11 + $0x368] ss:$16 sps:$4 sm:$0xff]   ;;  %v18468_v61 = vld [vmem:[#allocation11 + $0x14c] ss:$16 sps:$4 sm:$0xff]  }
 0xf84   :  { %14777 = vmatpush2.bf16.msra.mxu0 %v18386_v5  ;;  %v18471_v5 = vld [vmem:[#allocation11 + $0x34c] ss:$16 sps:$4 sm:$0xff]  }
 0xf85   :  { %14818 = vmatpush2.bf16.msra.mxu1 %v18387_v60  ;;  %14828 = vmatprep.subr.bf16.mxu0 %v18390_v50  ;;  %v18466_v60 = vld [vmem:[#allocation11 + $0x148] ss:$16 sps:$4 sm:$0xff]  }
 0xf86   :  { %14869 = vmatprep.subr.bf16.mxu1 %v18393_v53  ;;  %v18469_v50 = vld [vmem:[#allocation11 + $0x348] ss:$16 sps:$4 sm:$0xff]   ;;  %v18474_v53 = vld [vmem:[#allocation11 + $0x12c] ss:$16 sps:$4 sm:$0xff]  }
 0xf87   :  { %14779 = vmatmul.mubr.bf16.vlgmr.msra.gmra.mxu0 %v19338_v26 }
 0xf88   :  { %14820 = vmatmul.mubr.bf16.vlgmr.msra.gmra.mxu1 %v19342_v35  ;;  %14829 = vmatpush1.bf16.msra.mxu0 %v18388_v54  ;;  %v18477_v54 = vld [vmem:[#allocation11 + $0x32c] ss:$16 sps:$4 sm:$0xff]  }
 0xf89   :  { %14870 = vmatpush1.bf16.msra.mxu1 %v18391_v20  ;;  %14830 = vmatprep.subr.bf16.mxu0 %v18396_v55  ;;  %v18472_v20 = vld [vmem:[#allocation11 + $0x128] ss:$16 sps:$4 sm:$0xff]  }
 0xf8a   :  { %14871 = vmatprep.subr.bf16.mxu1 %v18399_v44  ;;  %14860 = vmatprep.mubr.bf16.mxu0 %v19330_v30  ;;  %v18415_v30 = vld [vmem:[#allocation11 + $0x268] ss:$16 sps:$4 sm:$0xff]   ;;  %v18480_v44 = vld [vmem:[#allocation11 + $0x10c] ss:$16 sps:$4 sm:$0xff]  }
 0xf8b   :  { %14901 = vmatprep.mubr.bf16.mxu1 %v19332_v0  ;;  %v18420_v0 = vld [vmem:[#allocation11 + $0x4c] ss:$16 sps:$4 sm:$0xff]   ;;  %v18475_v55 = vld [vmem:[#allocation11 + $0x328] ss:$16 sps:$4 sm:$0xff]  }
 0xf8c   :  { %14831 = vmatpush1.bf16.msra.mxu0 %v18394_v16  ;;  %v18483_v16 = vld [vmem:[#allocation11 + $0x30c] ss:$16 sps:$4 sm:$0xff]  }
 0xf8d   :  { %14872 = vmatpush1.bf16.msra.mxu1 %v18397_v59  ;;  %14832 = vmatprep.subr.bf16.mxu0 %v18402_v37  ;;  %v18478_v59 = vld [vmem:[#allocation11 + $0x108] ss:$16 sps:$4 sm:$0xff]  }
 0xf8e   :  { %14873 = vmatprep.subr.bf16.mxu1 %v18405_v48  ;;  %v18481_v37 = vld [vmem:[#allocation11 + $0x308] ss:$16 sps:$4 sm:$0xff]   ;;  %v14084_v48 = vld [vmem:[#allocation18 + $0x41] ss:$8 sm:$0xf] }
 0xf90   :  { %14833 = vmatpush1.bf16.msra.mxu0 %v18400_v23  ;;  %v14089_v23 = vrot.slane %v14084_v48, %v18983_v32 }
 0xf91   :  { %14874 = vmatpush1.bf16.msra.mxu1 %v18403_v57  ;;  %14834 = vmatprep.subr.bf16.mxu0 %v18408_v56  ;;  %v14093_v57 = vrot.slane %v14084_v48, %v18986_v34  ;;  %v14097_v34 = vrot.slane %v14084_v48, %v18995_v7 }
 0xf92   :  { %14875 = vmatprep.subr.bf16.mxu1 %v18411_v62 }
 0xf94   :  { %14835 = vmatpush1.bf16.msra.mxu0 %v18406_v63 }
 0xf95   :  { %14876 = vmatpush1.bf16.msra.mxu1 %v18409_v51  ;;  %14836 = vmatprep.subr.bf16.mxu0 %v18414_v18 }
 0xf96   :  { %14877 = vmatprep.subr.bf16.mxu1 %v18417_v25 }
 0xf98   :  { %14837 = vmatpush1.bf16.msra.mxu0 %v18412_v1 }
 0xf99   :  { %14878 = vmatpush1.bf16.msra.mxu1 %v18415_v30  ;;  %14838 = vmatprep.subr.bf16.mxu0 %v18420_v0 }
 0xf9a   :  { %14879 = vmatprep.subr.bf16.mxu1 %v18423_v45 }
 0xf9c   :  { %14839 = vmatpush1.bf16.msra.mxu0 %v18418_v9 }
 0xf9d   :  { %14880 = vmatpush1.bf16.msra.mxu1 %v18421_v2  ;;  %14840 = vmatprep.subr.bf16.mxu0 %v18426_v41 }
 0xf9e   :  { %14881 = vmatprep.subr.bf16.mxu1 %v18429_v31 }
 0xfa0   :  { %14841 = vmatpush1.bf16.msra.mxu0 %v18424_v58  ;;  %v14101_v58 = vrot.slane %v14084_v48, %v18998_v8 }
 0xfa1   :  { %14882 = vmatpush1.bf16.msra.mxu1 %v18427_v6  ;;  %14842 = vmatprep.subr.bf16.mxu0 %v18432_v40 }
 0xfa2   :  { %14883 = vmatprep.subr.bf16.mxu1 %v18435_v10 }
 0xfa4   :  { %14843 = vmatpush1.bf16.msra.mxu0 %v18430_v39 }
 0xfa5   :  { %14884 = vmatpush1.bf16.msra.mxu1 %v18433_v12  ;;  %14844 = vmatprep.subr.bf16.mxu0 %v18438_v27 }
 0xfa6   :  { %14885 = vmatprep.subr.bf16.mxu1 %v18441_v19 }
 0xfa8   :  { %14845 = vmatpush2.bf16.msra.mxu0 %v18436_v21 }
 0xfa9   :  { %14886 = vmatpush2.bf16.msra.mxu1 %v18439_v38  ;;  %14846 = vmatprep.subr.bf16.mxu0 %v18444_v13 }
 0xfaa   :  { %14887 = vmatprep.subr.bf16.mxu1 %v18447_v22 }
 0xfac   :  { %14847 = vmatpush2.bf16.msra.mxu0 %v18442_v42 }
 0xfad   :  { %14888 = vmatpush2.bf16.msra.mxu1 %v18445_v3  ;;  %14848 = vmatprep.subr.bf16.mxu0 %v18450_v43 }
 0xfae   :  { %14889 = vmatprep.subr.bf16.mxu1 %v18453_v4 }
 0xfb0   :  { %14849 = vmatpush2.bf16.msra.mxu0 %v18448_v33 }
 0xfb1   :  { %14890 = vmatpush2.bf16.msra.mxu1 %v18451_v28  ;;  %14850 = vmatprep.subr.bf16.mxu0 %v18456_v46 }
 0xfb2   :  { %14891 = vmatprep.subr.bf16.mxu1 %v18459_v47 }
 0xfb4   :  { %14851 = vmatpush2.bf16.msra.mxu0 %v18454_v24 }
 0xfb5   :  { %14892 = vmatpush2.bf16.msra.mxu1 %v18457_v36  ;;  %14852 = vmatprep.subr.bf16.mxu0 %v18462_v17 }
 0xfb6   :  { %14893 = vmatprep.subr.bf16.mxu1 %v18465_v11 }
 0xfb8   :  { %14853 = vmatpush2.bf16.msra.mxu0 %v18460_v49 }
 0xfb9   :  { %14894 = vmatpush2.bf16.msra.mxu1 %v18463_v15  ;;  %14854 = vmatprep.subr.bf16.mxu0 %v18468_v61 }
 0xfba   :  { %14895 = vmatprep.subr.bf16.mxu1 %v18471_v5 }
 0xfbc   :  { %14855 = vmatpush2.bf16.msra.mxu0 %v18466_v60 }
 0xfbd   :  { %14896 = vmatpush2.bf16.msra.mxu1 %v18469_v50  ;;  %14856 = vmatprep.subr.bf16.mxu0 %v18474_v53 }
 0xfbe   :  { %14897 = vmatprep.subr.bf16.mxu1 %v18477_v54 }
 0xfc0   :  { %14857 = vmatpush2.bf16.msra.mxu0 %v18472_v20 }
 0xfc1   :  { %14898 = vmatpush2.bf16.msra.mxu1 %v18475_v55  ;;  %14858 = vmatprep.subr.bf16.mxu0 %v18480_v44 }
 0xfc2   :  { %14899 = vmatprep.subr.bf16.mxu1 %v18483_v16 }
 0xfc4   :  { %14859 = vmatpush2.bf16.msra.mxu0 %v18478_v59 }
 0xfc5   :  { %14900 = vmatpush2.bf16.msra.mxu1 %v18481_v37 }
 0xfc7   :  { %14861 = vmatmul.mubr.bf16.vlgmr.msra.gmra.mxu0 %v19338_v26 }
 0xfc8   :  { %14902 = vmatmul.mubr.bf16.vlgmr.msra.gmra.mxu1 %v19342_v35 }
0x1047   :  { %v14780_v56 = vpop.f32.mrf.mxu0 }
0x1048   :  { %v14821_v62 = vpop.f32.mrf.mxu1  ;;  %v14781_v63 = vadd.f32 %v14780_v56, %v14089_v23 }
0x1049   :  { %v14782_v51 = vpop.f32.mrf.mxu0 }
0x104a   :  { %v14823_v18 = vpop.f32.mrf.mxu1  ;;  %v14822_v25 = vadd.f32 %v14821_v62, %v14781_v63  ;;  %v14783_v1 = vadd.f32 %v14782_v51, %v14093_v57 }
0x104b   :  { %v14784_v30 = vpop.f32.mrf.mxu0 }
0x104c   :  { %v14825_v0 = vpop.f32.mrf.mxu1  ;;  %vm14910_vm13 = vcmp.ge.f32.partialorder %v14822_v25, 0.0  ;;  %v14914_v45 = vmul.f32 0.2, %v14822_v25  ;;  %v14824_v9 = vadd.f32 %v14823_v18, %v14783_v1 }
0x104d   :  { %v14785_v26 = vpop.f32.mrf.mxu0 }
0x104e   :  { %v14826_v2 = vpop.f32.mrf.mxu1  ;;  %v14918_v35 = vsel %vm14910_vm13, %v14822_v25, %v14914_v45  ;;  %vm14911_vm14 = vcmp.ge.f32.partialorder %v14824_v9, 0.0  ;;  %v14915_v41 = vmul.f32 0.2, %v14824_v9 }
0x1050   :  { %v14919_v31 = vsel %vm14911_vm14, %v14824_v9, %v14915_v41 }
0x1087   :  { %v14862_v6 = vpop.f32.mrf.mxu0 }
0x1088   :  { %v14903_v40 = vpop.f32.mrf.mxu1  ;;  %v14863_v10 = vadd.f32 %v14862_v6, %v14097_v34 }
0x1089   :  { %v14864_v39 = vpop.f32.mrf.mxu0 }
0x108a   :  { %v14905_v12 = vpop.f32.mrf.mxu1  ;;  %v14904_v27 = vadd.f32 %v14903_v40, %v14863_v10  ;;  %v14865_v19 = vadd.f32 %v14864_v39, %v14101_v58 }
0x108b   :  { %v14866_v21 = vpop.f32.mrf.mxu0 }
0x108c   :  { %v14907_v38 = vpop.f32.mrf.mxu1  ;;  %vm14912_vm15 = vcmp.ge.f32.partialorder %v14904_v27, 0.0  ;;  %v14916_v13 = vmul.f32 0.2, %v14904_v27  ;;  %v14906_v22 = vadd.f32 %v14905_v12, %v14865_v19 }
0x108d   :  { %v14867_v42 = vpop.f32.mrf.mxu0 }
0x108e   :  { %v14908_v3 = vpop.f32.mrf.mxu1  ;;  %v14920_v43 = vsel %vm14912_vm15, %v14904_v27, %v14916_v13  ;;  %vm14913_vm0 = vcmp.ge.f32.partialorder %v14906_v22, 0.0  ;;  %v14917_v4 = vmul.f32 0.2, %v14906_v22 }
0x1090   :  { %v14921_v33 = vsel %vm14913_vm0, %v14906_v22, %v14917_v4 }
0x1091   :  { %18788 = dma.done.wait [#allocation13 + $0xa], 64 }
0x1092   :  { %18789 = vsyncadd [#allocation13 + $0xa], 4294967232  ;;  %v14926_v8 = vpack.c.bf16 %v14918_v35, %v14918_v35  ;;  %v14927_v28 = vpack.c.bf16 %v14919_v31, %v14919_v31  ;;  %v14928_v46 = vpack.c.bf16 %v14920_v43, %v14920_v43  ;;  %v14925_v47 = vld [vmem:[#allocation12] sm:$0xf]  ;;  %v14929_v24 = vpack.c.bf16 %v14921_v33, %v14921_v33 }
0x1093   :  { %v14934_v36 = vunpack.c.l.bf16 %v14925_v47  ;;  %vm14983_vm1 = vcmask 7168  }
0x1094   :  { %v14930_v17 = vunpack.c.l.bf16 %v14926_v8  ;;  %v14931_v11 = vunpack.c.l.bf16 %v14927_v28  ;;  %v14932_v49 = vunpack.c.l.bf16 %v14928_v46  ;;  %v14933_v50 = vunpack.c.l.bf16 %v14929_v24 }
0x1095   :  { %v14939_v15 = vrot.slane %v14934_v36, %v18983_v32  ;;  %v14943_v61 = vrot.slane %v14934_v36, %v18995_v7  ;;  %v14947_v5 = vrot.slane %v14934_v36, %v3971_v52  ;;  %v14951_v60 = vrot.slane %v14934_v36, %v3979_v14  ;;  %v14981_v52 = vld [vmem:[#allocation18 + $0x42] ss:$0 sm:$0xff] }
0x1097   :  { %v14959_v53 = vrot.slane %v14939_v15, %v18983_v32  ;;  %v14963_v54 = vrot.slane %v14943_v61, %v18983_v32  ;;  %v14967_v20 = vrot.slane %v14947_v5, %v18983_v32  ;;  %v14971_v55 = vrot.slane %v14951_v60, %v18983_v32 }
0x1099   :  { %v14972_v44 = vmul.f32 %v14959_v53, %v14930_v17  ;;  %v14973_v16 = vmul.f32 %v14963_v54, %v14931_v11  ;;  %v14974_v59 = vmul.f32 %v14967_v20, %v14932_v49  ;;  %v14975_v37 = vmul.f32 %v14971_v55, %v14933_v50 }
0x109b   :  { %v14976_v7 = vadd.f32 %v14973_v16, %v14972_v44 }
0x109d   :  { %v14977_v48 = vadd.f32 %v14976_v7, %v14974_v59 }
0x109f   :  { %v14978_v23 = vadd.f32 %v14977_v48, %v14975_v37 }
0x10a1   :  { %14979 = vadd.xlane.f32.xlu0 %v14978_v23 }
0x112a   :  { %v14980_v29 = vpop.xlane.xlu0 %14979 }
0x112b   :  { %v14982_v14 = vadd.f32 %v14981_v52, %v14980_v29 }
0x112d   :  { %14984 = vst.msk [vmem:[%s19381_s14] sm:$0xff] %vm14983_vm1, %v14982_v14 }
0x112e   :  { %14989 = vsyncpa [#allocation15], 1 }
0x112f   :  { %14990 = vsyncpa [#allocation17], 1 }
0x1130   :  { %14991 = vsyncmov [#allocation13] }
0x1133   :  { %s14992_s17 = vpop.sfrf %14991 }
0x1134   :  { %p17035_p0 = scmp.ne.s32.totalorder %s14992_s17, 0 }
0x1136   :  { %14996 = shalt.err (%p17035_p0)  }
0x1137   :  { %14998 = vsyncmov [#allocation13 + $0x1] }
0x113a   :  { %s14999_s6 = vpop.sfrf %14998 }
0x113b   :  { %p17036_p1 = scmp.ne.s32.totalorder %s14999_s6, 0 }
0x113d   :  { %15003 = shalt.err (%p17036_p1)  }
0x113e   :  { %15005 = vsyncmov [#allocation13 + $0x2] }
0x1141   :  { %s15006_s18 = vpop.sfrf %15005 }
0x1142   :  { %p17037_p2 = scmp.ne.s32.totalorder %s15006_s18, 0 }
0x1144   :  { %15010 = shalt.err (%p17037_p2)  }
0x1145   :  { %15012 = vsyncmov [#allocation13 + $0x3] }
0x1148   :  { %s15013_s2 = vpop.sfrf %15012 }
0x1149   :  { %p17038_p3 = scmp.ne.s32.totalorder %s15013_s2, 0 }
0x114b   :  { %15017 = shalt.err (%p17038_p3)  }
0x114c   :  { %15019 = vsyncmov [#allocation13 + $0x4] }
0x114f   :  { %s15020_s14 = vpop.sfrf %15019 }
0x1150   :  { %p17039_p4 = scmp.ne.s32.totalorder %s15020_s14, 0 }
0x1152   :  { %15024 = shalt.err (%p17039_p4)  }
0x1153   :  { %15026 = vsyncmov [#allocation13 + $0x5] }
0x1156   :  { %s15027_s19 = vpop.sfrf %15026 }
0x1157   :  { %p17040_p5 = scmp.ne.s32.totalorder %s15027_s19, 0 }
0x1159   :  { %15031 = shalt.err (%p17040_p5)  }
0x115a   :  { %15033 = vsyncmov [#allocation13 + $0x6] }
0x115d   :  { %s15034_s20 = vpop.sfrf %15033 }
0x115e   :  { %p17041_p6 = scmp.ne.s32.totalorder %s15034_s20, 0 }
0x1160   :  { %15038 = shalt.err (%p17041_p6)  }
0x1161   :  { %15040 = vsyncmov [#allocation13 + $0x7] }
0x1164   :  { %s15041_s21 = vpop.sfrf %15040 }
0x1165   :  { %p17042_p7 = scmp.ne.s32.totalorder %s15041_s21, 0 }
0x1167   :  { %15045 = shalt.err (%p17042_p7)  }
0x1168   :  { %15047 = vsyncmov [#allocation13 + $0x8] }
0x116b   :  { %s15048_s22 = vpop.sfrf %15047 }
0x116c   :  { %p17043_p8 = scmp.ne.s32.totalorder %s15048_s22, 0 }
0x116e   :  { %15052 = shalt.err (%p17043_p8)  }
0x116f   :  { %15054 = vsyncmov [#allocation13 + $0x9] }
0x1172   :  { %s15055_s7 = vpop.sfrf %15054 }
0x1173   :  { %p17044_p9 = scmp.ne.s32.totalorder %s15055_s7, 0 }
0x1175   :  { %15059 = shalt.err (%p17044_p9)  }
0x1176   :  { %15061 = vsyncmov [#allocation13 + $0xa] }
0x1179   :  { %s15062_s23 = vpop.sfrf %15061 }
0x117a   :  { %p17045_p10 = scmp.ne.s32.totalorder %s15062_s23, 0 }
0x117c   :  { %15066 = shalt.err (%p17045_p10)  }

</bundles_post_ra>
